<compile_context>
chip_gen: v5e
topology: v5e:2x2
jax: 0.10.0
libtpu: 0.0.40
codegen_flags: <defaults>
</compile_context>

<pallas_src>
import jax
import jax.numpy as jnp
from jax import lax
from jax.experimental import pallas as pl
from jax.experimental.pallas import tpu as pltpu


def _attention_residual_kernel(
    x_ref, w1_ref, b1_ref, w2_ref, b2_ref, wfc1_ref, wfc2_ref,
    wband_ref,                    # (7, 2*(W+6), W) banded 7x7 spatial weights
    o_ref,
    pad_buf, patches, spad):
  _, H, W, C = o_ref.shape
  HW = H * W
  Wp = W + 6                      # per-map padded width inside spad

  # ---- zero ONLY the halos; the interiors are fully overwritten below. ----
  zrow = jnp.zeros((1, W + 2, C), jnp.float32)
  pad_buf[0:1, :, :] = zrow
  pad_buf[H + 1:H + 2, :, :] = zrow
  zcol = jnp.zeros((H + 2, 1, C), jnp.float32)
  pad_buf[:, 0:1, :] = zcol
  pad_buf[:, W + 1:W + 2, :] = zcol

  # spad halos: top/bottom 3 rows, left/right 3 cols of each half (the
  # right-pad of the avg half and the left-pad of the max half are adjacent,
  # so they collapse into a single 6-wide write).
  zs_row = jnp.zeros((3, 2 * Wp), jnp.float32)
  spad[0:3, :] = zs_row
  spad[H + 3:H + 6, :] = zs_row
  zs_col3 = jnp.zeros((H + 6, 3), jnp.float32)
  spad[:, 0:3] = zs_col3
  spad[:, 2 * Wp - 3:2 * Wp] = zs_col3
  spad[:, W + 3:W + 9] = jnp.zeros((H + 6, 6), jnp.float32)

  x3 = x_ref[0].astype(jnp.float32)                       # (H, W, C)

  def conv3x3(w_ref, b_ref):
    # im2col: one (HW, 9C) x (9C, C) MXU matmul instead of 9 K=C dots.
    for ky in range(3):
      for kx in range(3):
        t = ky * 3 + kx
        patches[:, t * C:(t + 1) * C] = (
            pad_buf[ky:ky + H, kx:kx + W, :].reshape(HW, C))
    return jnp.dot(patches[...], w_ref[...],
                   preferred_element_type=jnp.float32) + b_ref[...]

  # conv1 (BN scale pre-folded into weights) -> bias -> relu
  pad_buf[1:H + 1, 1:W + 1, :] = x3
  h1 = jnp.maximum(conv3x3(w1_ref, b1_ref), 0.0)          # (HW, C)

  # conv2 -> bias   (reuse the same padded buffer: halo is still zero)
  pad_buf[1:H + 1, 1:W + 1, :] = h1.reshape(H, W, C)
  out2 = conv3x3(w2_ref, b2_ref)                          # (HW, C)

  # ---------------- channel attention ----------------
  avg_c = jnp.mean(out2, axis=0, keepdims=True)           # (1, C)
  max_c = jnp.max(out2, axis=0, keepdims=True)            # (1, C)
  pooled = jnp.concatenate([avg_c, max_c], axis=0)        # (2, C)
  hid = jnp.maximum(jnp.dot(pooled, wfc1_ref[...],
                            preferred_element_type=jnp.float32), 0.0)
  z = jnp.dot(hid, wfc2_ref[...], preferred_element_type=jnp.float32)  # (2, C)
  ca = jax.nn.sigmoid(z[0:1, :] + z[1:2, :])              # (1, C)
  out_ca = out2 * ca                                      # (HW, C)
  out_ca3 = out_ca.reshape(H, W, C)

  # ---------------- spatial attention ----------------
  # Avg/max channel-pooled maps are packed side-by-side: columns [0, Wp) hold
  # the padded avg map, columns [Wp, 2*Wp) the padded max map.
  spad[3:3 + H, 3:3 + W] = jnp.mean(out_ca3, axis=2)      # (H, W)
  spad[3:3 + H, Wp + 3:Wp + 3 + W] = jnp.max(out_ca3, axis=2)

  # 7x7 conv (2 -> 1 channel) as 7 MXU dots against a banded weight matrix:
  #   out[y, x] = sum_ky  spad[y+ky, :] @ wband[ky]   with
  #   wband[ky, c*Wp + u, x] = w[c, ky, u - x]  (0 <= u - x < 7, else 0).
  terms = [jnp.dot(spad[ky:ky + H, :], wband_ref[ky],
                   preferred_element_type=jnp.float32) for ky in range(7)]
  sa_pre = (((terms[0] + terms[1]) + (terms[2] + terms[3]))
            + ((terms[4] + terms[5]) + terms[6]))          # (H, W)
  sa = jax.nn.sigmoid(sa_pre)

  out_sa = out_ca3 * sa[:, :, None]                        # (H, W, C)

  # identity shortcut (stride=1, Cin == Cout) + final relu
  o_ref[0] = jnp.maximum(out_sa + x3, 0.0).astype(o_ref.dtype)


def _build_spatial_band(wsa, W):
  """Banded weight matrix for the 7x7 (2->1 channel) conv along the W axis.

  wsa: (2, 7, 7)  ->  returns (7, 2*(W+6), W) f32 with
  band[ky, c*(W+6) + u, x] = wsa[c, ky, u - x] if 0 <= u - x < 7 else 0.
  """
  Wp = W + 6
  u = jnp.arange(Wp)[:, None]                 # (Wp, 1)
  xi = jnp.arange(W)[None, :]                 # (1, W)
  kx = u - xi                                 # (Wp, W)
  valid = (kx >= 0) & (kx < 7)
  kx_c = jnp.clip(kx, 0, 6)
  band = jnp.where(valid[None, None], wsa[:, :, kx_c], 0.0)   # (2, 7, Wp, W)
  return jnp.transpose(band, (1, 0, 2, 3)).reshape(7, 2 * Wp, W)


def attention_residual_block(x, w1, scale1, bias1, w2, scale2, bias2,
                             wfc1, wfc2, wsa):
  """x: (N, H, W, C) f32.  w1/w2: (3,3,Cin,Cout) HWIO.  wsa: (2,7,7)."""
  N, H, W, C = x.shape
  Cr = wfc1.shape[1]
  Wp = W + 6

  # Fold the BN scale into the conv weights (per output channel) and reshape
  # to the im2col weight layout (row index = (ky*3+kx)*C + ci).
  w1cat = (w1 * scale1[None, None, None, :]).reshape(9 * C, C)
  w2cat = (w2 * scale2[None, None, None, :]).reshape(9 * C, C)
  b1 = bias1.reshape(1, C)
  b2 = bias2.reshape(1, C)
  wband = _build_spatial_band(wsa, W)                       # (7, 2*Wp, W)

  grid_spec = pltpu.PrefetchScalarGridSpec(
      num_scalar_prefetch=0,
      grid=(N,),
      in_specs=[
          pl.BlockSpec((1, H, W, C), lambda n: (n, 0, 0, 0)),   # x
          pl.BlockSpec((9 * C, C), lambda n: (0, 0)),           # conv1 weights
          pl.BlockSpec((1, C), lambda n: (0, 0)),               # bn1 bias
          pl.BlockSpec((9 * C, C), lambda n: (0, 0)),           # conv2 weights
          pl.BlockSpec((1, C), lambda n: (0, 0)),               # bn2 bias
          pl.BlockSpec((C, Cr), lambda n: (0, 0)),              # fc1 weight
          pl.BlockSpec((Cr, C), lambda n: (0, 0)),              # fc2 weight
          pl.BlockSpec((7, 2 * Wp, W), lambda n: (0, 0, 0)),    # banded 7x7 w
      ],
      out_specs=pl.BlockSpec((1, H, W, C), lambda n: (n, 0, 0, 0)),
      scratch_shapes=[
          pltpu.VMEM((H + 2, W + 2, C), jnp.float32),   # shared padded buffer
          pltpu.VMEM((H * W, 9 * C), jnp.float32),      # im2col patches
          pltpu.VMEM((H + 6, 2 * Wp), jnp.float32),     # packed padded avg|max
      ],
  )
  return pl.pallas_call(
      _attention_residual_kernel,
      out_shape=jax.ShapeDtypeStruct((N, H, W, C), x.dtype),
      grid_spec=grid_spec,
      compiler_params=pltpu.CompilerParams(
          dimension_semantics=("parallel",)),      # batch images independent
  )(x, w1cat, b1, w2cat, b2, wfc1, wfc2, wband)


def reference(x, w1, scale1, bias1, w2, scale2, bias2, wfc1, wfc2, wsa):
  dn = ('NHWC', 'HWIO', 'NHWC')
  h = lax.conv_general_dilated(x, w1, (1, 1), 'SAME', dimension_numbers=dn)
  h = jnp.maximum(h * scale1 + bias1, 0.0)
  o = lax.conv_general_dilated(h, w2, (1, 1), 'SAME', dimension_numbers=dn)
  o = o * scale2 + bias2
  avg = jnp.mean(o, axis=(1, 2))
  mx = jnp.max(o, axis=(1, 2))
  fc = lambda v: jnp.maximum(v @ wfc1, 0.0) @ wfc2
  ca = jax.nn.sigmoid(fc(avg) + fc(mx))
  o = o * ca[:, None, None, :]
  avg_s = jnp.mean(o, axis=3, keepdims=True)
  max_s = jnp.max(o, axis=3, keepdims=True)
  s = jnp.concatenate([avg_s, max_s], axis=3)
  wsa_hwio = jnp.transpose(wsa, (1, 2, 0))[:, :, :, None]     # (7,7,2,1)
  sc = lax.conv_general_dilated(s, wsa_hwio, (1, 1), 'SAME', dimension_numbers=dn)
  o = o * jax.nn.sigmoid(sc)
  return jnp.maximum(o + x, 0.0)


if __name__ == "__main__":
  key = jax.random.PRNGKey(0)
  N, H, W, C, R = 2, 16, 16, 32, 16      # out_channels must be >= reduction_ratio
  Cr = C // R
  ks = jax.random.split(key, 16)

  x = jax.random.normal(ks[0], (N, H, W, C), jnp.float32)
  w1 = jax.random.normal(ks[1], (3, 3, C, C), jnp.float32) * 0.1
  w2 = jax.random.normal(ks[2], (3, 3, C, C), jnp.float32) * 0.1

  # BatchNorm (inference mode) parameters, folded into scale/bias.
  g1 = 1.0 + 0.1 * jax.random.normal(ks[3], (C,), jnp.float32)
  be1 = 0.1 * jax.random.normal(ks[4], (C,), jnp.float32)
  m1 = 0.1 * jax.random.normal(ks[5], (C,), jnp.float32)
  v1 = jax.random.uniform(ks[6], (C,), jnp.float32, 0.5, 1.5)
  g2 = 1.0 + 0.1 * jax.random.normal(ks[7], (C,), jnp.float32)
  be2 = 0.1 * jax.random.normal(ks[8], (C,), jnp.float32)
  m2 = 0.1 * jax.random.normal(ks[9], (C,), jnp.float32)
  v2 = jax.random.uniform(ks[10], (C,), jnp.float32, 0.5, 1.5)
  eps = 1e-5
  scale1 = g1 / jnp.sqrt(v1 + eps)
  bias1 = be1 - m1 * scale1
  scale2 = g2 / jnp.sqrt(v2 + eps)
  bias2 = be2 - m2 * scale2

  wfc1 = jax.random.normal(ks[11], (C, Cr), jnp.float32) * 0.3
  wfc2 = jax.random.normal(ks[12], (Cr, C), jnp.float32) * 0.3
  wsa = jax.random.normal(ks[13], (2, 7, 7), jnp.float32) * 0.2

  out = attention_residual_block(x, w1, scale1, bias1, w2, scale2, bias2,
                                 wfc1, wfc2, wsa)
  out = jax.block_until_ready(out)

  ref = reference(x, w1, scale1, bias1, w2, scale2, bias2, wfc1, wfc2, wsa)
  err = float(jnp.max(jnp.abs(out - ref)))
  assert err < 1e-3, f"max abs error {err}"
  print("KERNEL_OK")
</pallas_src>

<mosaic_0001>
module attributes {stable_mosaic.version = 11 : i64} {
  func.func @_attention_residual_kernel(%arg0: i32, %arg1: memref<1x16x16x32xf32, #tpu.memory_space<vmem>>, %arg2: memref<288x32xf32, #tpu.memory_space<vmem>>, %arg3: memref<1x32xf32, #tpu.memory_space<vmem>>, %arg4: memref<288x32xf32, #tpu.memory_space<vmem>>, %arg5: memref<1x32xf32, #tpu.memory_space<vmem>>, %arg6: memref<32x2xf32, #tpu.memory_space<vmem>>, %arg7: memref<2x32xf32, #tpu.memory_space<vmem>>, %arg8: memref<7x44x16xf32, #tpu.memory_space<vmem>>, %arg9: memref<1x16x16x32xf32, #tpu.memory_space<vmem>>, %arg10: memref<18x18x32xf32, #tpu.memory_space<vmem>>, %arg11: memref<256x288xf32, #tpu.memory_space<vmem>>, %arg12: memref<22x44xf32, #tpu.memory_space<vmem>>) attributes {dimension_semantics = [#tpu.dimension_semantics<parallel>], iteration_bounds = array<i64: 2>, scalar_prefetch = 0 : i64, scratch_operands = 3 : i64, tpu.core_type = #tpu.core_type<tc>, window_params = [{transform_indices = @transform_0, window_bounds = array<i64: 1, 16, 16, 32>}, {pipeline_mode = #tpu.pipeline_mode<synchronous>, transform_indices = @transform_1, window_bounds = array<i64: 288, 32>}, {pipeline_mode = #tpu.pipeline_mode<synchronous>, transform_indices = @transform_2, window_bounds = array<i64: 1, 32>}, {pipeline_mode = #tpu.pipeline_mode<synchronous>, transform_indices = @transform_3, window_bounds = array<i64: 288, 32>}, {pipeline_mode = #tpu.pipeline_mode<synchronous>, transform_indices = @transform_4, window_bounds = array<i64: 1, 32>}, {pipeline_mode = #tpu.pipeline_mode<synchronous>, transform_indices = @transform_5, window_bounds = array<i64: 32, 2>}, {pipeline_mode = #tpu.pipeline_mode<synchronous>, transform_indices = @transform_6, window_bounds = array<i64: 2, 32>}, {pipeline_mode = #tpu.pipeline_mode<synchronous>, transform_indices = @transform_7, window_bounds = array<i64: 7, 44, 16>}, {transform_indices = @transform_8, window_bounds = array<i64: 1, 16, 16, 32>}]} {
    %cst = arith.constant 0.000000e+00 : f32
    %0 = vector.broadcast %cst : f32 to vector<1x18x32xf32>
    %c0 = arith.constant 0 : index
    %c0_0 = arith.constant 0 : index
    %c0_1 = arith.constant 0 : index
    %1 = vector.load %arg10[%c0, %c0_0, %c0_1] : memref<18x18x32xf32, #tpu.memory_space<vmem>>, vector<1x18x32xf32>
    tpu.vector_store %arg10[%c0, %c0_0, %c0_1], %0 {strides = array<i32>} : memref<18x18x32xf32, #tpu.memory_space<vmem>>, vector<1x18x32xf32>,
    %c17 = arith.constant 17 : index
    %c0_2 = arith.constant 0 : index
    %c0_3 = arith.constant 0 : index
    %2 = vector.load %arg10[%c17, %c0_2, %c0_3] : memref<18x18x32xf32, #tpu.memory_space<vmem>>, vector<1x18x32xf32>
    tpu.vector_store %arg10[%c17, %c0_2, %c0_3], %0 {strides = array<i32>} : memref<18x18x32xf32, #tpu.memory_space<vmem>>, vector<1x18x32xf32>,
    %cst_4 = arith.constant 0.000000e+00 : f32
    %3 = vector.broadcast %cst_4 : f32 to vector<18x1x32xf32>
    %c0_5 = arith.constant 0 : index
    %c0_6 = arith.constant 0 : index
    %c0_7 = arith.constant 0 : index
    %4 = vector.load %arg10[%c0_5, %c0_6, %c0_7] : memref<18x18x32xf32, #tpu.memory_space<vmem>>, vector<18x1x32xf32>
    tpu.vector_store %arg10[%c0_5, %c0_6, %c0_7], %3 {strides = array<i32>} : memref<18x18x32xf32, #tpu.memory_space<vmem>>, vector<18x1x32xf32>,
    %c0_8 = arith.constant 0 : index
    %c17_9 = arith.constant 17 : index
    %c0_10 = arith.constant 0 : index
    %5 = vector.load %arg10[%c0_8, %c17_9, %c0_10] : memref<18x18x32xf32, #tpu.memory_space<vmem>>, vector<18x1x32xf32>
    tpu.vector_store %arg10[%c0_8, %c17_9, %c0_10], %3 {strides = array<i32>} : memref<18x18x32xf32, #tpu.memory_space<vmem>>, vector<18x1x32xf32>,
    %cst_11 = arith.constant 0.000000e+00 : f32
    %6 = vector.broadcast %cst_11 : f32 to vector<3x44xf32>
    %c0_12 = arith.constant 0 : index
    %c0_13 = arith.constant 0 : index
    %7 = vector.load %arg12[%c0_12, %c0_13] : memref<22x44xf32, #tpu.memory_space<vmem>>, vector<3x44xf32>
    tpu.vector_store %arg12[%c0_12, %c0_13], %6 {strides = array<i32>} : memref<22x44xf32, #tpu.memory_space<vmem>>, vector<3x44xf32>,
    %c19 = arith.constant 19 : index
    %c0_14 = arith.constant 0 : index
    %8 = vector.load %arg12[%c19, %c0_14] : memref<22x44xf32, #tpu.memory_space<vmem>>, vector<3x44xf32>
    tpu.vector_store %arg12[%c19, %c0_14], %6 {strides = array<i32>} : memref<22x44xf32, #tpu.memory_space<vmem>>, vector<3x44xf32>,
    %cst_15 = arith.constant 0.000000e+00 : f32
    %9 = vector.broadcast %cst_15 : f32 to vector<22x3xf32>
    %c0_16 = arith.constant 0 : index
    %c0_17 = arith.constant 0 : index
    %10 = vector.load %arg12[%c0_16, %c0_17] : memref<22x44xf32, #tpu.memory_space<vmem>>, vector<22x3xf32>
    tpu.vector_store %arg12[%c0_16, %c0_17], %9 {strides = array<i32>} : memref<22x44xf32, #tpu.memory_space<vmem>>, vector<22x3xf32>,
    %c0_18 = arith.constant 0 : index
    %c41 = arith.constant 41 : index
    %11 = vector.load %arg12[%c0_18, %c41] : memref<22x44xf32, #tpu.memory_space<vmem>>, vector<22x3xf32>
    tpu.vector_store %arg12[%c0_18, %c41], %9 {strides = array<i32>} : memref<22x44xf32, #tpu.memory_space<vmem>>, vector<22x3xf32>,
    %cst_19 = arith.constant 0.000000e+00 : f32
    %12 = vector.broadcast %cst_19 : f32 to vector<22x6xf32>
    %c0_20 = arith.constant 0 : index
    %c19_21 = arith.constant 19 : index
    %13 = vector.load %arg12[%c0_20, %c19_21] : memref<22x44xf32, #tpu.memory_space<vmem>>, vector<22x6xf32>
    tpu.vector_store %arg12[%c0_20, %c19_21], %12 {strides = array<i32>} : memref<22x44xf32, #tpu.memory_space<vmem>>, vector<22x6xf32>,
    %c0_22 = arith.constant 0 : index
    %c0_23 = arith.constant 0 : index
    %c0_24 = arith.constant 0 : index
    %c0_25 = arith.constant 0 : index
    %14 = vector.load %arg1[%c0_22, %c0_23, %c0_24, %c0_25] : memref<1x16x16x32xf32, #tpu.memory_space<vmem>>, vector<1x16x16x32xf32>
    %15 = vector.shape_cast %14 : vector<1x16x16x32xf32> to vector<16x16x32xf32>
    %c1 = arith.constant 1 : index
    %c1_26 = arith.constant 1 : index
    %c0_27 = arith.constant 0 : index
    %16 = vector.load %arg10[%c1, %c1_26, %c0_27] : memref<18x18x32xf32, #tpu.memory_space<vmem>>, vector<16x16x32xf32>
    tpu.vector_store %arg10[%c1, %c1_26, %c0_27], %15 {strides = array<i32>} : memref<18x18x32xf32, #tpu.memory_space<vmem>>, vector<16x16x32xf32>,
    %c0_28 = arith.constant 0 : index
    %c0_29 = arith.constant 0 : index
    %c0_30 = arith.constant 0 : index
    %17 = vector.load %arg10[%c0_28, %c0_29, %c0_30] : memref<18x18x32xf32, #tpu.memory_space<vmem>>, vector<16x16x32xf32>
    %18 = vector.shape_cast %17 : vector<16x16x32xf32> to vector<256x32xf32>
    %c0_31 = arith.constant 0 : index
    %c0_32 = arith.constant 0 : index
    %19 = vector.load %arg11[%c0_31, %c0_32] : memref<256x288xf32, #tpu.memory_space<vmem>>, vector<256x32xf32>
    tpu.vector_store %arg11[%c0_31, %c0_32], %18 {strides = array<i32>} : memref<256x288xf32, #tpu.memory_space<vmem>>, vector<256x32xf32>,
    %c0_33 = arith.constant 0 : index
    %c1_34 = arith.constant 1 : index
    %c0_35 = arith.constant 0 : index
    %20 = vector.load %arg10[%c0_33, %c1_34, %c0_35] : memref<18x18x32xf32, #tpu.memory_space<vmem>>, vector<16x16x32xf32>
    %21 = vector.shape_cast %20 : vector<16x16x32xf32> to vector<256x32xf32>
    %c0_36 = arith.constant 0 : index
    %c32 = arith.constant 32 : index
    %22 = vector.load %arg11[%c0_36, %c32] : memref<256x288xf32, #tpu.memory_space<vmem>>, vector<256x32xf32>
    tpu.vector_store %arg11[%c0_36, %c32], %21 {strides = array<i32>} : memref<256x288xf32, #tpu.memory_space<vmem>>, vector<256x32xf32>,
    %c0_37 = arith.constant 0 : index
    %c2 = arith.constant 2 : index
    %c0_38 = arith.constant 0 : index
    %23 = vector.load %arg10[%c0_37, %c2, %c0_38] : memref<18x18x32xf32, #tpu.memory_space<vmem>>, vector<16x16x32xf32>
    %24 = vector.shape_cast %23 : vector<16x16x32xf32> to vector<256x32xf32>
    %c0_39 = arith.constant 0 : index
    %c64 = arith.constant 64 : index
    %25 = vector.load %arg11[%c0_39, %c64] : memref<256x288xf32, #tpu.memory_space<vmem>>, vector<256x32xf32>
    tpu.vector_store %arg11[%c0_39, %c64], %24 {strides = array<i32>} : memref<256x288xf32, #tpu.memory_space<vmem>>, vector<256x32xf32>,
    %c1_40 = arith.constant 1 : index
    %c0_41 = arith.constant 0 : index
    %c0_42 = arith.constant 0 : index
    %26 = vector.load %arg10[%c1_40, %c0_41, %c0_42] : memref<18x18x32xf32, #tpu.memory_space<vmem>>, vector<16x16x32xf32>
    %27 = vector.shape_cast %26 : vector<16x16x32xf32> to vector<256x32xf32>
    %c0_43 = arith.constant 0 : index
    %c96 = arith.constant 96 : index
    %28 = vector.load %arg11[%c0_43, %c96] : memref<256x288xf32, #tpu.memory_space<vmem>>, vector<256x32xf32>
    tpu.vector_store %arg11[%c0_43, %c96], %27 {strides = array<i32>} : memref<256x288xf32, #tpu.memory_space<vmem>>, vector<256x32xf32>,
    %c1_44 = arith.constant 1 : index
    %c1_45 = arith.constant 1 : index
    %c0_46 = arith.constant 0 : index
    %29 = vector.load %arg10[%c1_44, %c1_45, %c0_46] : memref<18x18x32xf32, #tpu.memory_space<vmem>>, vector<16x16x32xf32>
    %30 = vector.shape_cast %29 : vector<16x16x32xf32> to vector<256x32xf32>
    %c0_47 = arith.constant 0 : index
    %c128 = arith.constant 128 : index
    %31 = vector.load %arg11[%c0_47, %c128] : memref<256x288xf32, #tpu.memory_space<vmem>>, vector<256x32xf32>
    tpu.vector_store %arg11[%c0_47, %c128], %30 {strides = array<i32>} : memref<256x288xf32, #tpu.memory_space<vmem>>, vector<256x32xf32>,
    %c1_48 = arith.constant 1 : index
    %c2_49 = arith.constant 2 : index
    %c0_50 = arith.constant 0 : index
    %32 = vector.load %arg10[%c1_48, %c2_49, %c0_50] : memref<18x18x32xf32, #tpu.memory_space<vmem>>, vector<16x16x32xf32>
    %33 = vector.shape_cast %32 : vector<16x16x32xf32> to vector<256x32xf32>
    %c0_51 = arith.constant 0 : index
    %c160 = arith.constant 160 : index
    %34 = vector.load %arg11[%c0_51, %c160] : memref<256x288xf32, #tpu.memory_space<vmem>>, vector<256x32xf32>
    tpu.vector_store %arg11[%c0_51, %c160], %33 {strides = array<i32>} : memref<256x288xf32, #tpu.memory_space<vmem>>, vector<256x32xf32>,
    %c2_52 = arith.constant 2 : index
    %c0_53 = arith.constant 0 : index
    %c0_54 = arith.constant 0 : index
    %35 = vector.load %arg10[%c2_52, %c0_53, %c0_54] : memref<18x18x32xf32, #tpu.memory_space<vmem>>, vector<16x16x32xf32>
    %36 = vector.shape_cast %35 : vector<16x16x32xf32> to vector<256x32xf32>
    %c0_55 = arith.constant 0 : index
    %c192 = arith.constant 192 : index
    %37 = vector.load %arg11[%c0_55, %c192] : memref<256x288xf32, #tpu.memory_space<vmem>>, vector<256x32xf32>
    tpu.vector_store %arg11[%c0_55, %c192], %36 {strides = array<i32>} : memref<256x288xf32, #tpu.memory_space<vmem>>, vector<256x32xf32>,
    %c2_56 = arith.constant 2 : index
    %c1_57 = arith.constant 1 : index
    %c0_58 = arith.constant 0 : index
    %38 = vector.load %arg10[%c2_56, %c1_57, %c0_58] : memref<18x18x32xf32, #tpu.memory_space<vmem>>, vector<16x16x32xf32>
    %39 = vector.shape_cast %38 : vector<16x16x32xf32> to vector<256x32xf32>
    %c0_59 = arith.constant 0 : index
    %c224 = arith.constant 224 : index
    %40 = vector.load %arg11[%c0_59, %c224] : memref<256x288xf32, #tpu.memory_space<vmem>>, vector<256x32xf32>
    tpu.vector_store %arg11[%c0_59, %c224], %39 {strides = array<i32>} : memref<256x288xf32, #tpu.memory_space<vmem>>, vector<256x32xf32>,
    %c2_60 = arith.constant 2 : index
    %c2_61 = arith.constant 2 : index
    %c0_62 = arith.constant 0 : index
    %41 = vector.load %arg10[%c2_60, %c2_61, %c0_62] : memref<18x18x32xf32, #tpu.memory_space<vmem>>, vector<16x16x32xf32>
    %42 = vector.shape_cast %41 : vector<16x16x32xf32> to vector<256x32xf32>
    %c0_63 = arith.constant 0 : index
    %c256 = arith.constant 256 : index
    %43 = vector.load %arg11[%c0_63, %c256] : memref<256x288xf32, #tpu.memory_space<vmem>>, vector<256x32xf32>
    tpu.vector_store %arg11[%c0_63, %c256], %42 {strides = array<i32>} : memref<256x288xf32, #tpu.memory_space<vmem>>, vector<256x32xf32>,
    %c0_64 = arith.constant 0 : index
    %c0_65 = arith.constant 0 : index
    %44 = vector.load %arg11[%c0_64, %c0_65] : memref<256x288xf32, #tpu.memory_space<vmem>>, vector<256x288xf32>
    %c0_66 = arith.constant 0 : index
    %c0_67 = arith.constant 0 : index
    %45 = vector.load %arg2[%c0_66, %c0_67] : memref<288x32xf32, #tpu.memory_space<vmem>>, vector<288x32xf32>
    %cst_68 = arith.constant dense<0.000000e+00> : vector<256x32xf32>
    %46 = tpu.matmul %44, %45, %cst_68 {dimension_numbers = #tpu.dot_dimension_numbers<[1], [0], [0], [1], [0, 0, 1, 1], [], []>} : vector<256x288xf32>, vector<288x32xf32>, vector<256x32xf32> -> vector<256x32xf32>
    %c0_69 = arith.constant 0 : index
    %c0_70 = arith.constant 0 : index
    %47 = vector.load %arg3[%c0_69, %c0_70] : memref<1x32xf32, #tpu.memory_space<vmem>>, vector<1x32xf32>
    %48 = vector.broadcast %47 : vector<1x32xf32> to vector<256x32xf32>
    %49 = arith.addf %46, %48 : vector<256x32xf32>
    %cst_71 = arith.constant 0.000000e+00 : f32
    %50 = vector.broadcast %cst_71 : f32 to vector<256x32xf32>
    %51 = arith.maximumf %49, %50 : vector<256x32xf32>
    %52 = vector.shape_cast %51 : vector<256x32xf32> to vector<16x16x32xf32>
    %c1_72 = arith.constant 1 : index
    %c1_73 = arith.constant 1 : index
    %c0_74 = arith.constant 0 : index
    %53 = vector.load %arg10[%c1_72, %c1_73, %c0_74] : memref<18x18x32xf32, #tpu.memory_space<vmem>>, vector<16x16x32xf32>
    tpu.vector_store %arg10[%c1_72, %c1_73, %c0_74], %52 {strides = array<i32>} : memref<18x18x32xf32, #tpu.memory_space<vmem>>, vector<16x16x32xf32>,
    %c0_75 = arith.constant 0 : index
    %c0_76 = arith.constant 0 : index
    %c0_77 = arith.constant 0 : index
    %54 = vector.load %arg10[%c0_75, %c0_76, %c0_77] : memref<18x18x32xf32, #tpu.memory_space<vmem>>, vector<16x16x32xf32>
    %55 = vector.shape_cast %54 : vector<16x16x32xf32> to vector<256x32xf32>
    %c0_78 = arith.constant 0 : index
    %c0_79 = arith.constant 0 : index
    %56 = vector.load %arg11[%c0_78, %c0_79] : memref<256x288xf32, #tpu.memory_space<vmem>>, vector<256x32xf32>
    tpu.vector_store %arg11[%c0_78, %c0_79], %55 {strides = array<i32>} : memref<256x288xf32, #tpu.memory_space<vmem>>, vector<256x32xf32>,
    %c0_80 = arith.constant 0 : index
    %c1_81 = arith.constant 1 : index
    %c0_82 = arith.constant 0 : index
    %57 = vector.load %arg10[%c0_80, %c1_81, %c0_82] : memref<18x18x32xf32, #tpu.memory_space<vmem>>, vector<16x16x32xf32>
    %58 = vector.shape_cast %57 : vector<16x16x32xf32> to vector<256x32xf32>
    %c0_83 = arith.constant 0 : index
    %c32_84 = arith.constant 32 : index
    %59 = vector.load %arg11[%c0_83, %c32_84] : memref<256x288xf32, #tpu.memory_space<vmem>>, vector<256x32xf32>
    tpu.vector_store %arg11[%c0_83, %c32_84], %58 {strides = array<i32>} : memref<256x288xf32, #tpu.memory_space<vmem>>, vector<256x32xf32>,
    %c0_85 = arith.constant 0 : index
    %c2_86 = arith.constant 2 : index
    %c0_87 = arith.constant 0 : index
    %60 = vector.load %arg10[%c0_85, %c2_86, %c0_87] : memref<18x18x32xf32, #tpu.memory_space<vmem>>, vector<16x16x32xf32>
    %61 = vector.shape_cast %60 : vector<16x16x32xf32> to vector<256x32xf32>
    %c0_88 = arith.constant 0 : index
    %c64_89 = arith.constant 64 : index
    %62 = vector.load %arg11[%c0_88, %c64_89] : memref<256x288xf32, #tpu.memory_space<vmem>>, vector<256x32xf32>
    tpu.vector_store %arg11[%c0_88, %c64_89], %61 {strides = array<i32>} : memref<256x288xf32, #tpu.memory_space<vmem>>, vector<256x32xf32>,
    %c1_90 = arith.constant 1 : index
    %c0_91 = arith.constant 0 : index
    %c0_92 = arith.constant 0 : index
    %63 = vector.load %arg10[%c1_90, %c0_91, %c0_92] : memref<18x18x32xf32, #tpu.memory_space<vmem>>, vector<16x16x32xf32>
    %64 = vector.shape_cast %63 : vector<16x16x32xf32> to vector<256x32xf32>
    %c0_93 = arith.constant 0 : index
    %c96_94 = arith.constant 96 : index
    %65 = vector.load %arg11[%c0_93, %c96_94] : memref<256x288xf32, #tpu.memory_space<vmem>>, vector<256x32xf32>
    tpu.vector_store %arg11[%c0_93, %c96_94], %64 {strides = array<i32>} : memref<256x288xf32, #tpu.memory_space<vmem>>, vector<256x32xf32>,
    %c1_95 = arith.constant 1 : index
    %c1_96 = arith.constant 1 : index
    %c0_97 = arith.constant 0 : index
    %66 = vector.load %arg10[%c1_95, %c1_96, %c0_97] : memref<18x18x32xf32, #tpu.memory_space<vmem>>, vector<16x16x32xf32>
    %67 = vector.shape_cast %66 : vector<16x16x32xf32> to vector<256x32xf32>
    %c0_98 = arith.constant 0 : index
    %c128_99 = arith.constant 128 : index
    %68 = vector.load %arg11[%c0_98, %c128_99] : memref<256x288xf32, #tpu.memory_space<vmem>>, vector<256x32xf32>
    tpu.vector_store %arg11[%c0_98, %c128_99], %67 {strides = array<i32>} : memref<256x288xf32, #tpu.memory_space<vmem>>, vector<256x32xf32>,
    %c1_100 = arith.constant 1 : index
    %c2_101 = arith.constant 2 : index
    %c0_102 = arith.constant 0 : index
    %69 = vector.load %arg10[%c1_100, %c2_101, %c0_102] : memref<18x18x32xf32, #tpu.memory_space<vmem>>, vector<16x16x32xf32>
    %70 = vector.shape_cast %69 : vector<16x16x32xf32> to vector<256x32xf32>
    %c0_103 = arith.constant 0 : index
    %c160_104 = arith.constant 160 : index
    %71 = vector.load %arg11[%c0_103, %c160_104] : memref<256x288xf32, #tpu.memory_space<vmem>>, vector<256x32xf32>
    tpu.vector_store %arg11[%c0_103, %c160_104], %70 {strides = array<i32>} : memref<256x288xf32, #tpu.memory_space<vmem>>, vector<256x32xf32>,
    %c2_105 = arith.constant 2 : index
    %c0_106 = arith.constant 0 : index
    %c0_107 = arith.constant 0 : index
    %72 = vector.load %arg10[%c2_105, %c0_106, %c0_107] : memref<18x18x32xf32, #tpu.memory_space<vmem>>, vector<16x16x32xf32>
    %73 = vector.shape_cast %72 : vector<16x16x32xf32> to vector<256x32xf32>
    %c0_108 = arith.constant 0 : index
    %c192_109 = arith.constant 192 : index
    %74 = vector.load %arg11[%c0_108, %c192_109] : memref<256x288xf32, #tpu.memory_space<vmem>>, vector<256x32xf32>
    tpu.vector_store %arg11[%c0_108, %c192_109], %73 {strides = array<i32>} : memref<256x288xf32, #tpu.memory_space<vmem>>, vector<256x32xf32>,
    %c2_110 = arith.constant 2 : index
    %c1_111 = arith.constant 1 : index
    %c0_112 = arith.constant 0 : index
    %75 = vector.load %arg10[%c2_110, %c1_111, %c0_112] : memref<18x18x32xf32, #tpu.memory_space<vmem>>, vector<16x16x32xf32>
    %76 = vector.shape_cast %75 : vector<16x16x32xf32> to vector<256x32xf32>
    %c0_113 = arith.constant 0 : index
    %c224_114 = arith.constant 224 : index
    %77 = vector.load %arg11[%c0_113, %c224_114] : memref<256x288xf32, #tpu.memory_space<vmem>>, vector<256x32xf32>
    tpu.vector_store %arg11[%c0_113, %c224_114], %76 {strides = array<i32>} : memref<256x288xf32, #tpu.memory_space<vmem>>, vector<256x32xf32>,
    %c2_115 = arith.constant 2 : index
    %c2_116 = arith.constant 2 : index
    %c0_117 = arith.constant 0 : index
    %78 = vector.load %arg10[%c2_115, %c2_116, %c0_117] : memref<18x18x32xf32, #tpu.memory_space<vmem>>, vector<16x16x32xf32>
    %79 = vector.shape_cast %78 : vector<16x16x32xf32> to vector<256x32xf32>
    %c0_118 = arith.constant 0 : index
    %c256_119 = arith.constant 256 : index
    %80 = vector.load %arg11[%c0_118, %c256_119] : memref<256x288xf32, #tpu.memory_space<vmem>>, vector<256x32xf32>
    tpu.vector_store %arg11[%c0_118, %c256_119], %79 {strides = array<i32>} : memref<256x288xf32, #tpu.memory_space<vmem>>, vector<256x32xf32>,
    %c0_120 = arith.constant 0 : index
    %c0_121 = arith.constant 0 : index
    %81 = vector.load %arg11[%c0_120, %c0_121] : memref<256x288xf32, #tpu.memory_space<vmem>>, vector<256x288xf32>
    %c0_122 = arith.constant 0 : index
    %c0_123 = arith.constant 0 : index
    %82 = vector.load %arg4[%c0_122, %c0_123] : memref<288x32xf32, #tpu.memory_space<vmem>>, vector<288x32xf32>
    %cst_124 = arith.constant dense<0.000000e+00> : vector<256x32xf32>
    %83 = tpu.matmul %81, %82, %cst_124 {dimension_numbers = #tpu.dot_dimension_numbers<[1], [0], [0], [1], [0, 0, 1, 1], [], []>} : vector<256x288xf32>, vector<288x32xf32>, vector<256x32xf32> -> vector<256x32xf32>
    %c0_125 = arith.constant 0 : index
    %c0_126 = arith.constant 0 : index
    %84 = vector.load %arg5[%c0_125, %c0_126] : memref<1x32xf32, #tpu.memory_space<vmem>>, vector<1x32xf32>
    %85 = vector.broadcast %84 : vector<1x32xf32> to vector<256x32xf32>
    %86 = arith.addf %83, %85 : vector<256x32xf32>
    %cst_127 = arith.constant dense<0.000000e+00> : vector<32xf32>
    %87 = vector.multi_reduction <add>, %86, %cst_127 [0] : vector<256x32xf32> to vector<32xf32>
    %88 = vector.shape_cast %87 : vector<32xf32> to vector<1x32xf32>
    %cst_128 = arith.constant 2.560000e+02 : f32
    %89 = vector.broadcast %cst_128 : f32 to vector<1x32xf32>
    %90 = arith.divf %88, %89 : vector<1x32xf32>
    %cst_129 = arith.constant dense<0xFF800000> : vector<32xf32>
    %91 = vector.multi_reduction <maximumf>, %86, %cst_129 [0] : vector<256x32xf32> to vector<32xf32>
    %92 = vector.shape_cast %91 : vector<32xf32> to vector<1x32xf32>
    %93 = tpu.concatenate %90, %92 in 0 : vector<1x32xf32>, vector<1x32xf32> -> vector<2x32xf32>
    %c0_130 = arith.constant 0 : index
    %c0_131 = arith.constant 0 : index
    %94 = vector.load %arg6[%c0_130, %c0_131] : memref<32x2xf32, #tpu.memory_space<vmem>>, vector<32x2xf32>
    %cst_132 = arith.constant dense<0.000000e+00> : vector<2x2xf32>
    %95 = tpu.matmul %93, %94, %cst_132 {dimension_numbers = #tpu.dot_dimension_numbers<[1], [0], [0], [1], [0, 0, 1, 1], [], []>} : vector<2x32xf32>, vector<32x2xf32>, vector<2x2xf32> -> vector<2x2xf32>
    %cst_133 = arith.constant 0.000000e+00 : f32
    %96 = vector.broadcast %cst_133 : f32 to vector<2x2xf32>
    %97 = arith.maximumf %95, %96 : vector<2x2xf32>
    %c0_134 = arith.constant 0 : index
    %c0_135 = arith.constant 0 : index
    %98 = vector.load %arg7[%c0_134, %c0_135] : memref<2x32xf32, #tpu.memory_space<vmem>>, vector<2x32xf32>
    %cst_136 = arith.constant dense<0.000000e+00> : vector<2x32xf32>
    %99 = tpu.matmul %97, %98, %cst_136 {dimension_numbers = #tpu.dot_dimension_numbers<[1], [0], [0], [1], [0, 0, 1, 1], [], []>} : vector<2x2xf32>, vector<2x32xf32>, vector<2x32xf32> -> vector<2x32xf32>
    %100 = vector.extract_strided_slice %99 {offsets = [0, 0], sizes = [1, 32], strides = [1, 1]} : vector<2x32xf32> to vector<1x32xf32>
    %101 = vector.extract_strided_slice %99 {offsets = [1, 0], sizes = [1, 32], strides = [1, 1]} : vector<2x32xf32> to vector<1x32xf32>
    %102 = arith.addf %100, %101 : vector<1x32xf32>
    %103 = arith.negf %102 : vector<1x32xf32>
    %104 = math.exp %103 : vector<1x32xf32>
    %cst_137 = arith.constant 1.000000e+00 : f32
    %105 = vector.broadcast %cst_137 : f32 to vector<1x32xf32>
    %106 = arith.addf %105, %104 : vector<1x32xf32>
    %107 = arith.divf %105, %106 : vector<1x32xf32>
    %108 = vector.broadcast %107 : vector<1x32xf32> to vector<256x32xf32>
    %109 = arith.mulf %86, %108 : vector<256x32xf32>
    %110 = vector.shape_cast %109 : vector<256x32xf32> to vector<16x16x32xf32>
    %cst_138 = arith.constant dense<0.000000e+00> : vector<16x16xf32>
    %111 = vector.multi_reduction <add>, %110, %cst_138 [2] : vector<16x16x32xf32> to vector<16x16xf32>
    %cst_139 = arith.constant 3.200000e+01 : f32
    %112 = vector.broadcast %cst_139 : f32 to vector<16x16xf32>
    %113 = arith.divf %111, %112 : vector<16x16xf32>
    %c3 = arith.constant 3 : index
    %c3_140 = arith.constant 3 : index
    %114 = vector.load %arg12[%c3, %c3_140] : memref<22x44xf32, #tpu.memory_space<vmem>>, vector<16x16xf32>
    tpu.vector_store %arg12[%c3, %c3_140], %113 {strides = array<i32>} : memref<22x44xf32, #tpu.memory_space<vmem>>, vector<16x16xf32>,
    %cst_141 = arith.constant dense<0xFF800000> : vector<16x16xf32>
    %115 = vector.multi_reduction <maximumf>, %110, %cst_141 [2] : vector<16x16x32xf32> to vector<16x16xf32>
    %c3_142 = arith.constant 3 : index
    %c25 = arith.constant 25 : index
    %116 = vector.load %arg12[%c3_142, %c25] : memref<22x44xf32, #tpu.memory_space<vmem>>, vector<16x16xf32>
    tpu.vector_store %arg12[%c3_142, %c25], %115 {strides = array<i32>} : memref<22x44xf32, #tpu.memory_space<vmem>>, vector<16x16xf32>,
    %c0_143 = arith.constant 0 : index
    %c0_144 = arith.constant 0 : index
    %117 = vector.load %arg12[%c0_143, %c0_144] : memref<22x44xf32, #tpu.memory_space<vmem>>, vector<16x44xf32>
    %c0_145 = arith.constant 0 : index
    %c0_146 = arith.constant 0 : index
    %c0_147 = arith.constant 0 : index
    %118 = vector.load %arg8[%c0_145, %c0_146, %c0_147] : memref<7x44x16xf32, #tpu.memory_space<vmem>>, vector<1x44x16xf32>
    %119 = vector.shape_cast %118 : vector<1x44x16xf32> to vector<44x16xf32>
    %cst_148 = arith.constant dense<0.000000e+00> : vector<16x16xf32>
    %120 = tpu.matmul %117, %119, %cst_148 {dimension_numbers = #tpu.dot_dimension_numbers<[1], [0], [0], [1], [0, 0, 1, 1], [], []>} : vector<16x44xf32>, vector<44x16xf32>, vector<16x16xf32> -> vector<16x16xf32>
    %c1_149 = arith.constant 1 : index
    %c0_150 = arith.constant 0 : index
    %121 = vector.load %arg12[%c1_149, %c0_150] : memref<22x44xf32, #tpu.memory_space<vmem>>, vector<16x44xf32>
    %c1_151 = arith.constant 1 : index
    %c0_152 = arith.constant 0 : index
    %c0_153 = arith.constant 0 : index
    %122 = vector.load %arg8[%c1_151, %c0_152, %c0_153] : memref<7x44x16xf32, #tpu.memory_space<vmem>>, vector<1x44x16xf32>
    %123 = vector.shape_cast %122 : vector<1x44x16xf32> to vector<44x16xf32>
    %cst_154 = arith.constant dense<0.000000e+00> : vector<16x16xf32>
    %124 = tpu.matmul %121, %123, %cst_154 {dimension_numbers = #tpu.dot_dimension_numbers<[1], [0], [0], [1], [0, 0, 1, 1], [], []>} : vector<16x44xf32>, vector<44x16xf32>, vector<16x16xf32> -> vector<16x16xf32>
    %c2_155 = arith.constant 2 : index
    %c0_156 = arith.constant 0 : index
    %125 = vector.load %arg12[%c2_155, %c0_156] : memref<22x44xf32, #tpu.memory_space<vmem>>, vector<16x44xf32>
    %c2_157 = arith.constant 2 : index
    %c0_158 = arith.constant 0 : index
    %c0_159 = arith.constant 0 : index
    %126 = vector.load %arg8[%c2_157, %c0_158, %c0_159] : memref<7x44x16xf32, #tpu.memory_space<vmem>>, vector<1x44x16xf32>
    %127 = vector.shape_cast %126 : vector<1x44x16xf32> to vector<44x16xf32>
    %cst_160 = arith.constant dense<0.000000e+00> : vector<16x16xf32>
    %128 = tpu.matmul %125, %127, %cst_160 {dimension_numbers = #tpu.dot_dimension_numbers<[1], [0], [0], [1], [0, 0, 1, 1], [], []>} : vector<16x44xf32>, vector<44x16xf32>, vector<16x16xf32> -> vector<16x16xf32>
    %c3_161 = arith.constant 3 : index
    %c0_162 = arith.constant 0 : index
    %129 = vector.load %arg12[%c3_161, %c0_162] : memref<22x44xf32, #tpu.memory_space<vmem>>, vector<16x44xf32>
    %c3_163 = arith.constant 3 : index
    %c0_164 = arith.constant 0 : index
    %c0_165 = arith.constant 0 : index
    %130 = vector.load %arg8[%c3_163, %c0_164, %c0_165] : memref<7x44x16xf32, #tpu.memory_space<vmem>>, vector<1x44x16xf32>
    %131 = vector.shape_cast %130 : vector<1x44x16xf32> to vector<44x16xf32>
    %cst_166 = arith.constant dense<0.000000e+00> : vector<16x16xf32>
    %132 = tpu.matmul %129, %131, %cst_166 {dimension_numbers = #tpu.dot_dimension_numbers<[1], [0], [0], [1], [0, 0, 1, 1], [], []>} : vector<16x44xf32>, vector<44x16xf32>, vector<16x16xf32> -> vector<16x16xf32>
    %c4 = arith.constant 4 : index
    %c0_167 = arith.constant 0 : index
    %133 = vector.load %arg12[%c4, %c0_167] : memref<22x44xf32, #tpu.memory_space<vmem>>, vector<16x44xf32>
    %c4_168 = arith.constant 4 : index
    %c0_169 = arith.constant 0 : index
    %c0_170 = arith.constant 0 : index
    %134 = vector.load %arg8[%c4_168, %c0_169, %c0_170] : memref<7x44x16xf32, #tpu.memory_space<vmem>>, vector<1x44x16xf32>
    %135 = vector.shape_cast %134 : vector<1x44x16xf32> to vector<44x16xf32>
    %cst_171 = arith.constant dense<0.000000e+00> : vector<16x16xf32>
    %136 = tpu.matmul %133, %135, %cst_171 {dimension_numbers = #tpu.dot_dimension_numbers<[1], [0], [0], [1], [0, 0, 1, 1], [], []>} : vector<16x44xf32>, vector<44x16xf32>, vector<16x16xf32> -> vector<16x16xf32>
    %c5 = arith.constant 5 : index
    %c0_172 = arith.constant 0 : index
    %137 = vector.load %arg12[%c5, %c0_172] : memref<22x44xf32, #tpu.memory_space<vmem>>, vector<16x44xf32>
    %c5_173 = arith.constant 5 : index
    %c0_174 = arith.constant 0 : index
    %c0_175 = arith.constant 0 : index
    %138 = vector.load %arg8[%c5_173, %c0_174, %c0_175] : memref<7x44x16xf32, #tpu.memory_space<vmem>>, vector<1x44x16xf32>
    %139 = vector.shape_cast %138 : vector<1x44x16xf32> to vector<44x16xf32>
    %cst_176 = arith.constant dense<0.000000e+00> : vector<16x16xf32>
    %140 = tpu.matmul %137, %139, %cst_176 {dimension_numbers = #tpu.dot_dimension_numbers<[1], [0], [0], [1], [0, 0, 1, 1], [], []>} : vector<16x44xf32>, vector<44x16xf32>, vector<16x16xf32> -> vector<16x16xf32>
    %c6 = arith.constant 6 : index
    %c0_177 = arith.constant 0 : index
    %141 = vector.load %arg12[%c6, %c0_177] : memref<22x44xf32, #tpu.memory_space<vmem>>, vector<16x44xf32>
    %c6_178 = arith.constant 6 : index
    %c0_179 = arith.constant 0 : index
    %c0_180 = arith.constant 0 : index
    %142 = vector.load %arg8[%c6_178, %c0_179, %c0_180] : memref<7x44x16xf32, #tpu.memory_space<vmem>>, vector<1x44x16xf32>
    %143 = vector.shape_cast %142 : vector<1x44x16xf32> to vector<44x16xf32>
    %cst_181 = arith.constant dense<0.000000e+00> : vector<16x16xf32>
    %144 = tpu.matmul %141, %143, %cst_181 {dimension_numbers = #tpu.dot_dimension_numbers<[1], [0], [0], [1], [0, 0, 1, 1], [], []>} : vector<16x44xf32>, vector<44x16xf32>, vector<16x16xf32> -> vector<16x16xf32>
    %145 = arith.addf %120, %124 : vector<16x16xf32>
    %146 = arith.addf %128, %132 : vector<16x16xf32>
    %147 = arith.addf %145, %146 : vector<16x16xf32>
    %148 = arith.addf %136, %140 : vector<16x16xf32>
    %149 = arith.addf %148, %144 : vector<16x16xf32>
    %150 = arith.addf %147, %149 : vector<16x16xf32>
    %151 = arith.negf %150 : vector<16x16xf32>
    %152 = math.exp %151 : vector<16x16xf32>
    %cst_182 = arith.constant 1.000000e+00 : f32
    %153 = vector.broadcast %cst_182 : f32 to vector<16x16xf32>
    %154 = arith.addf %153, %152 : vector<16x16xf32>
    %155 = arith.divf %153, %154 : vector<16x16xf32>
    %156 = vector.shape_cast %155 : vector<16x16xf32> to vector<16x16x1xf32>
    %157 = vector.broadcast %156 : vector<16x16x1xf32> to vector<16x16x32xf32>
    %158 = arith.mulf %110, %157 : vector<16x16x32xf32>
    %159 = arith.addf %158, %15 : vector<16x16x32xf32>
    %cst_183 = arith.constant 0.000000e+00 : f32
    %160 = vector.broadcast %cst_183 : f32 to vector<16x16x32xf32>
    %161 = arith.maximumf %159, %160 : vector<16x16x32xf32>
    %c0_184 = arith.constant 0 : index
    %c0_185 = arith.constant 0 : index
    %c0_186 = arith.constant 0 : index
    %c0_187 = arith.constant 0 : index
    %162 = vector.load %arg9[%c0_184, %c0_185, %c0_186, %c0_187] : memref<1x16x16x32xf32, #tpu.memory_space<vmem>>, vector<1x16x16x32xf32>
    %163 = vector.shape_cast %162 : vector<1x16x16x32xf32> to vector<16x16x32xf32>
    %164 = vector.shape_cast %161 : vector<16x16x32xf32> to vector<1x16x16x32xf32>
    tpu.vector_store %arg9[%c0_184, %c0_185, %c0_186, %c0_187], %164 {strides = array<i32>} : memref<1x16x16x32xf32, #tpu.memory_space<vmem>>, vector<1x16x16x32xf32>,
    return
  }
  func.func @transform_0(%arg0: i32) -> (i32, i32, i32, i32) {
    %c0_i32 = arith.constant 0 : i32
    %c0_i32_0 = arith.constant 0 : i32
    %c0_i32_1 = arith.constant 0 : i32
    %c0_i32_2 = arith.constant 0 : i32
    return %arg0, %c0_i32, %c0_i32_0, %c0_i32_1 : i32, i32, i32, i32
  }
  func.func @transform_1(%arg0: i32) -> (i32, i32) {
    %c0_i32 = arith.constant 0 : i32
    %c0_i32_0 = arith.constant 0 : i32
    %c0_i32_1 = arith.constant 0 : i32
    return %c0_i32, %c0_i32_0 : i32, i32
  }
  func.func @transform_2(%arg0: i32) -> (i32, i32) {
    %c0_i32 = arith.constant 0 : i32
    %c0_i32_0 = arith.constant 0 : i32
    %c0_i32_1 = arith.constant 0 : i32
    return %c0_i32, %c0_i32_0 : i32, i32
  }
  func.func @transform_3(%arg0: i32) -> (i32, i32) {
    %c0_i32 = arith.constant 0 : i32
    %c0_i32_0 = arith.constant 0 : i32
    %c0_i32_1 = arith.constant 0 : i32
    return %c0_i32, %c0_i32_0 : i32, i32
  }
  func.func @transform_4(%arg0: i32) -> (i32, i32) {
    %c0_i32 = arith.constant 0 : i32
    %c0_i32_0 = arith.constant 0 : i32
    %c0_i32_1 = arith.constant 0 : i32
    return %c0_i32, %c0_i32_0 : i32, i32
  }
  func.func @transform_5(%arg0: i32) -> (i32, i32) {
    %c0_i32 = arith.constant 0 : i32
    %c0_i32_0 = arith.constant 0 : i32
    %c0_i32_1 = arith.constant 0 : i32
    return %c0_i32, %c0_i32_0 : i32, i32
  }
  func.func @transform_6(%arg0: i32) -> (i32, i32) {
    %c0_i32 = arith.constant 0 : i32
    %c0_i32_0 = arith.constant 0 : i32
    %c0_i32_1 = arith.constant 0 : i32
    return %c0_i32, %c0_i32_0 : i32, i32
  }
  func.func @transform_7(%arg0: i32) -> (i32, i32, i32) {
    %c0_i32 = arith.constant 0 : i32
    %c0_i32_0 = arith.constant 0 : i32
    %c0_i32_1 = arith.constant 0 : i32
    %c0_i32_2 = arith.constant 0 : i32
    return %c0_i32, %c0_i32_0, %c0_i32_1 : i32, i32, i32
  }
  func.func @transform_8(%arg0: i32) -> (i32, i32, i32, i32) {
    %c0_i32 = arith.constant 0 : i32
    %c0_i32_0 = arith.constant 0 : i32
    %c0_i32_1 = arith.constant 0 : i32
    %c0_i32_2 = arith.constant 0 : i32
    return %arg0, %c0_i32, %c0_i32_0, %c0_i32_1 : i32, i32, i32, i32
  }
}

</mosaic_0001>

<bundles_post_ra>
// kernel: tpu_custom_call.1
= control target key start
LH: loop header
LB: loop body
LE: loop exit
PB: predicated region body
PF: predicated region fallthrough
CT: control target
= control target key end

     0   :  { %13 = vsyncpa [#allocation6], 0  ;;  %s9813_s0 = inlined_call_operand.vmem [shape: f32[2,16,16,32], index: 0, kind: input, shape index: {}]   ;;  %s9814_s1 = inlined_call_operand.vmem [shape: f32[288,32], index: 1, kind: input, shape index: {}]   ;;  %s9815_s2 = inlined_call_operand.vmem [shape: f32[1,32], index: 2, kind: input, shape index: {}]   ;;  %s9816_s3 = inlined_call_operand.vmem [shape: f32[288,32], index: 3, kind: input, shape index: {}]   ;;  %s9817_s4 = inlined_call_operand.vmem [shape: f32[1,32], index: 4, kind: input, shape index: {}]   ;;  %s9818_s5 = inlined_call_operand.vmem [shape: f32[32,2], index: 5, kind: input, shape index: {}]   ;;  %s9819_s6 = inlined_call_operand.vmem [shape: f32[2,32], index: 6, kind: input, shape index: {}]   ;;  %s9820_s7 = inlined_call_operand.vmem [shape: f32[7,44,16], index: 7, kind: input, shape index: {}]   ;;  %s9821_s8 = inlined_call_operand.hbm [shape: f32[2,16,16,32], index: 8, kind: output, shape index: {}]  }
   0x1   :  { %15 = vsyncpa [#allocation6 + $0x1], 0  ;;  %s6144_s27 = smov 0   ;;  %s6146_s28 = smov 0  }
   0x2   :  { %s6148_s29 = smov 0   ;;  %s6150_s30 = smov 0  }
   0x3 LB: > { %s6165_s9 = sadd.s32 4294967295, %s6089_s30   ;;  %s5782_s10 = sadd.s32 4294967294, %s6089_s30   ;;  %s6089_s30 = sphi %s6150_s30, %s9991_s30   ;;  %s6085_s29 = sphi %s6148_s29, %s9990_s29   ;;  %s6081_s28 = sphi %s6146_s28, %s9989_s28   ;;  %s6077_s27 = sphi %s6144_s27, %s9988_s27  }
   0x4   : > { %s6169_s11 = sadd.s32 1, %s6089_s30   ;;  %s201_s12 = sadd.s32 1, %s6085_s29 }
   0x5   : > { %s198_s13 = ssub.s32 %s6089_s30, %s6169_s11  ;;  %p211_p0 = scmp.ne.s32.totalorder %s6085_s29, %s6081_s28 }
   0x6   : > { %p199_p1 = scmp.eq.s32.totalorder %s198_s13, 0  ;;  %p212_p2 = scmp.eq.s32.totalorder %s6165_s9, 1 }
   0x7   : > { %p217_p3 = scmp.ne.s32.totalorder %s6081_s28, %s6077_s27  ;;  %p218_p4 = scmp.eq.s32.totalorder %s5782_s10, 1 }
   0x8   : > { %s6180_s14 = scalar_select %p199_p1, %s6085_s29, %s201_s12  }
   0x9   : > { %p6182_p5 = por %p212_p2, %p211_p0  ;;  %p6186_p6 = por %p218_p4, %p217_p3 }
   0xa   : > { %p5785_p7 = scmp.ge.s32.totalorder %s6089_s30, 1  ;;  %p265_p8 = scmp.lt.s32.totalorder %s6089_s30, 3 }
   0xc   : > { %p266_p9 = pnand %p5785_p7, %p265_p8 }
   0xe   : > { %269 = sbr.rel (%p266_p9) target bundleno = 2427 (0x97b), region = 52 }
  0x13   : > { %vm9860_vm0 = vcmask 261120   ;;  %p299_p10 = scmp.lt.s32.totalorder %s6165_s9, 1  ;;  %v9822_v0 = vmov 0.0   ;;  %vm307_vm1 = vcmask 254976   ;;  %vm313_vm2 = vcmask 253952   ;;  %s6092_s22 = smov 32  }
  0x14   : > { %305 = vst.msk [vmem:[#allocation2] sm:$0xff] %vm9860_vm0, %v9822_v0  ;;  %s6093_s23 = smov 64   ;;  %s6094_s24 = smov 96   ;;  %vm657_vm3 = vcmask 523520   ;;  %v1908_v52 = vld [vmem:[%s9814_s1 + $0xf8] sm:$0xff]  ;;  %v1907_v54 = vld [vmem:[%s9814_s1 + $0xf0] sm:$0xff] }
  0x15   : > { %306 = vst.msk [vmem:[#allocation2 + $0x8] sm:$0xff] %vm9860_vm0, %v9822_v0  ;;  %s300_s17 = scalar_select %p299_p10, %s6165_s9, 1  ;;  %2126 = vmatpush.msra.mxu1 %v1908_v52  ;;  %v1906_v55 = vld [vmem:[%s9814_s1 + $0xe8] sm:$0xff]  ;;  %v1905_v57 = vld [vmem:[%s9814_s1 + $0xe0] sm:$0xff]  ;;  %v1904_v62 = vld [vmem:[%s9814_s1 + $0xd8] sm:$0xff]  ;;  %vm850_vm4 = vcmask 785920  }
  0x16   : > { %310 = vst.msk [vmem:[#allocation2 + $0x198] sm:$0xff] %vm9860_vm0, %v9822_v0  ;;  %v1903_v63 = vld [vmem:[%s9814_s1 + $0xd0] sm:$0xff]  ;;  %vm1043_vm5 = vcmask 1048320   ;;  %vm4512_vm6 = vcmask 1041408   ;;  %vm4477_vm8 = vcmask 1040384   ;;  %vm4508_vm9 = vcmask 15360  }
  0x17   : > { %311 = vst.msk [vmem:[#allocation2 + $0x1a0] sm:$0xff] %vm9860_vm0, %v9822_v0  ;;  %s5921_s18 = sshll.u32 %s300_s17, 8  ;;  %2127 = vmatpush.msra.mxu1 %v1907_v54  ;;  %vm4765_vm15 = vcmask 154712   ;;  %s296_s12 = sand.u32 1, %s6081_s28  }
  0x18   : > { %s6205_s21 = scalar_lea.vmem %s9813_s0, %s5921_s18  ;;  %308 = vst.msk [vmem:[#allocation2 + $0x10] sm:$0x3] %vm307_vm1, %v9822_v0  ;;  %s5786_s13 = sshll.u32 %s296_s12, 8 }
  0x19   : > { %v6209_v1 = vld [vmem:[%s6205_s21] sm:$0xff]  ;;  %312 = vst.msk [vmem:[#allocation2 + $0x1a8] sm:$0x3] %vm307_vm1, %v9822_v0  ;;  %v6213_v2 = vld [vmem:[%s6205_s21 + $0x8] sm:$0xff]  ;;  %v6228_v6 = vld [vmem:[%s6205_s21 + $0x10] sm:$0xff]  ;;  %2128 = vmatpush.msra.mxu1 %v1906_v55  ;;  %vm4812_vm1 = vcmask 1041409  }
  0x1a   : > { %9865 = vst [vmem:[#allocation8_spill] sm:$0xff] %v6209_v1  ;;  %v6216_v3 = vld [vmem:[%s6205_s21 + $0x20] sm:$0xff]  ;;  %v6221_v4 = vld [vmem:[%s6205_s21 + $0x28] sm:$0xff]  ;;  %v6318_v14 = vld [vmem:[%s6205_s21 + $0x18] sm:$0xff]  ;;  %s9646_s17 = scalar_lea.vmem [#allocation5], %s5786_s13  ;;  %s5922_s18 = sshll.u32 %s6165_s9, 8 }
  0x1b   : > { %9866 = vst [vmem:[#allocation9_spill] sm:$0xff] %v6213_v2  ;;  %v6323_v15 = vld [vmem:[%s6205_s21 + $0x30] sm:$0xff]  ;;  %v6328_v16 = vld [vmem:[%s6205_s21 + $0x38] sm:$0xff]  ;;  %v6346_v21 = vld [vmem:[%s6205_s21 + $0x40] sm:$0xff]  ;;  %2129 = vmatpush.msra.mxu1 %v1905_v57  ;;  %s5717_s25 = sshll.u32 %s9646_s17, 4  ;;  %s5705_s9 = scalar_lea.sflag [#allocation6], %s296_s12  ;;  %s5718_s25 = int_to_ptr.vmem [resolvable:$true] %s5717_s25 }
  0x1c   : > { %9867 = vst [vmem:[#allocation10_spill] sm:$0xff] %v6216_v3  ;;  %v497_v5 = vld [vmem:[#allocation2 + $0x1] sm:$0xff]  ;;  %v6372_v28 = vld [vmem:[%s6205_s21 + $0x50] sm:$0xff]  ;;  %v6384_v32 = vld [vmem:[%s6205_s21 + $0x58] sm:$0xff]  ;;  %s6047_s13 = scalar_lea.hbm %s9821_s8, 512 }
  0x1d   : > { %401 = vst.msk [vmem:[#allocation2 + $0x19] sm:$0xff] %vm9860_vm0, %v6209_v1  ;;  %561 = vrot.lane.b32.xlu0 %v497_v5, %s6092_s22  ;;  %v6360_v25 = vld [vmem:[%s6205_s21 + $0x48] sm:$0xff]  ;;  %v6394_v36 = vld [vmem:[%s6205_s21 + $0x60] sm:$0xff]  ;;  %v6415_v44 = vld [vmem:[%s6205_s21 + $0x70] sm:$0xff]  ;;  %2130 = vmatpush.msra.mxu1 %v1904_v62 }
  0x1e   : > { %9868 = vst [vmem:[#allocation11_spill] sm:$0xff] %v6221_v4  ;;  %v6403_v40 = vld [vmem:[%s6205_s21 + $0x68] sm:$0xff]  ;;  %v6430_v50 = vld [vmem:[%s6205_s21 + $0x78] sm:$0xff]  ;;  %v6460_v61 = vld [vmem:[%s6205_s21 + $0x80] sm:$0xff] }
  0x1f   : > { %402 = vst.msk [vmem:[#allocation2 + $0x21] sm:$0xff] %vm9860_vm0, %v6213_v2  ;;  %v498_v8 = vld [vmem:[#allocation2 + $0x9] sm:$0xff]  ;;  %2131 = vmatpush.msra.mxu1 %v1903_v63 }
  0x20   : > { %405 = vst.msk [vmem:[#allocation2 + $0x49] sm:$0xff] %vm9860_vm0, %v6216_v3  ;;  %v434_v53 = vld [vmem:[#allocation2 + $0x8] sm:$0xff] }
  0x21   : > { %9869 = vst [vmem:[#allocation12_spill] sm:$0xff] %v6228_v6  ;;  %v1902_v5 = vld [vmem:[%s9814_s1 + $0xc8] sm:$0xff] }
  0x22   : > { %406 = vst.msk [vmem:[#allocation2 + $0x51] sm:$0xff] %vm9860_vm0, %v6221_v4  ;;  %2132 = vmatpush.msra.mxu1 %v1902_v5  ;;  %v6570_v62 = vld [vmem:[%s6205_s21 + $0xa8] sm:$0xff] }
  0x23   : > { %316 = vst.msk [vmem:[#allocation2 + $0x30] sm:$0x1] %vm313_vm2, %v9822_v0 }
  0x24   : > { %403 = vst.msk [vmem:[#allocation2 + $0x31] sm:$0xff] %vm9860_vm0, %v6228_v6  ;;  %v499_v7 = vld [vmem:[#allocation2 + $0x19] sm:$0xff] }
  0x25   : > { %314 = vst.msk [vmem:[#allocation2] sm:$0x1] %vm313_vm2, %v9822_v0  ;;  %565 = vrot.lane.b32.xlu1 %v499_v7, %s6092_s22  ;;  %563 = vrot.lane.b32.xlu0 %v498_v8, %s6092_s22 }
  0x26   : > { %315 = vst.msk [vmem:[#allocation2 + $0x18] sm:$0x1] %vm313_vm2, %v9822_v0  ;;  %v500_v10 = vld [vmem:[#allocation2 + $0x21] sm:$0xff] }
  0x27   : > { %317 = vst.msk [vmem:[#allocation2 + $0x48] sm:$0x1] %vm313_vm2, %v9822_v0  ;;  %v6261_v11 = vld [vmem:[#allocation2 + $0x49] sm:$0xff]  ;;  %v6356_v23 = vld [vmem:[#allocation2 + $0x1a] sm:$0xff] }
  0x28   : > { %318 = vst.msk [vmem:[#allocation2 + $0x60] sm:$0x1] %vm313_vm2, %v9822_v0  ;;  %v6457_v60 = vld [vmem:[#allocation2 + $0x20] sm:$0xff] }
  0x29   : > { %319 = vst.msk [vmem:[#allocation2 + $0x78] sm:$0x1] %vm313_vm2, %v9822_v0  ;;  %v6275_v12 = vld [vmem:[#allocation2 + $0x51] sm:$0xff] }
  0x2a   : > { %320 = vst.msk [vmem:[#allocation2 + $0x90] sm:$0x1] %vm313_vm2, %v9822_v0  ;;  %v1336_v18 = vld [vmem:[#allocation2 + $0x50] sm:$0xff] }
  0x2b   : > { %321 = vst.msk [vmem:[#allocation2 + $0xa8] sm:$0x1] %vm313_vm2, %v9822_v0  ;;  %v1525_v9 = vld [vmem:[#allocation2 + $0x31] sm:$0xff] }
  0x2c   : > { %322 = vst.msk [vmem:[#allocation2 + $0xc0] sm:$0x1] %vm313_vm2, %v9822_v0  ;;  %569 = vrot.lane.b32.xlu2 %v1525_v9, %s6092_s22  ;;  %v1333_v13 = vld [vmem:[#allocation2 + $0x30] sm:$0xff]  ;;  %v433_v45 = vld [vmem:[#allocation2] sm:$0xff] }
  0x2d   : > { %323 = vst.msk [vmem:[#allocation2 + $0xd8] sm:$0x1] %vm313_vm2, %v9822_v0  ;;  %567 = vrot.lane.b32.xlu1 %v500_v10, %s6092_s22  ;;  %573 = vrot.lane.b32.xlu0 %v6261_v11, %s6092_s22  ;;  %v1144_v39 = vld [vmem:[#allocation2 + $0x4a] sm:$0xff]  ;;  %v6427_v49 = vld [vmem:[#allocation2 + $0x18] sm:$0xff] }
  0x2e   : > { %324 = vst.msk [vmem:[#allocation2 + $0xf0] sm:$0x1] %vm313_vm2, %v9822_v0  ;;  %v1335_v17 = vld [vmem:[#allocation2 + $0x48] sm:$0xff] }
  0x2f   : > { %325 = vst.msk [vmem:[#allocation2 + $0x108] sm:$0x1] %vm313_vm2, %v9822_v0 }
  0x30   : > { %326 = vst.msk [vmem:[#allocation2 + $0x120] sm:$0x1] %vm313_vm2, %v9822_v0 }
  0x31   : > { %327 = vst.msk [vmem:[#allocation2 + $0x138] sm:$0x1] %vm313_vm2, %v9822_v0 }
  0x32   : > { %328 = vst.msk [vmem:[#allocation2 + $0x150] sm:$0x1] %vm313_vm2, %v9822_v0 }
  0x33   : > { %329 = vst.msk [vmem:[#allocation2 + $0x168] sm:$0x1] %vm313_vm2, %v9822_v0 }
  0x34   : > { %330 = vst.msk [vmem:[#allocation2 + $0x180] sm:$0x1] %vm313_vm2, %v9822_v0 }
  0x35   : > { %331 = vst.msk [vmem:[#allocation2 + $0x198] sm:$0x1] %vm313_vm2, %v9822_v0  ;;  %575 = vrot.lane.b32.xlu1 %v6275_v12, %s6092_s22  ;;  %1397 = vrot.lane.b32.xlu0 %v1333_v13, %s6093_s23 }
  0x36   : > { %332 = vst.msk [vmem:[#allocation2 + $0x11] sm:$0x1] %vm313_vm2, %v9822_v0 }
  0x37   : > { %333 = vst.msk [vmem:[#allocation2 + $0x29] sm:$0x1] %vm313_vm2, %v9822_v0 }
  0x38   : > { %334 = vst.msk [vmem:[#allocation2 + $0x41] sm:$0x1] %vm313_vm2, %v9822_v0 }
  0x39   : > { %335 = vst.msk [vmem:[#allocation2 + $0x59] sm:$0x1] %vm313_vm2, %v9822_v0 }
  0x3a   : > { %336 = vst.msk [vmem:[#allocation2 + $0x71] sm:$0x1] %vm313_vm2, %v9822_v0 }
  0x3b   : > { %337 = vst.msk [vmem:[#allocation2 + $0x89] sm:$0x1] %vm313_vm2, %v9822_v0 }
  0x3c   : > { %338 = vst.msk [vmem:[#allocation2 + $0xa1] sm:$0x1] %vm313_vm2, %v9822_v0 }
  0x3d   : > { %339 = vst.msk [vmem:[#allocation2 + $0xb9] sm:$0x1] %vm313_vm2, %v9822_v0  ;;  %1589 = vrot.lane.b32.xlu1 %v1525_v9, %s6094_s24 }
  0x3e   : > { %340 = vst.msk [vmem:[#allocation2 + $0xd1] sm:$0x1] %vm313_vm2, %v9822_v0  ;;  %v1141_v27 = vld [vmem:[#allocation2 + $0x22] sm:$0xff] }
  0x3f   : > { %341 = vst.msk [vmem:[#allocation2 + $0xe9] sm:$0x1] %vm313_vm2, %v9822_v0 }
  0x40   : > { %342 = vst.msk [vmem:[#allocation2 + $0x101] sm:$0x1] %vm313_vm2, %v9822_v0  ;;  %v1145_v43 = vld [vmem:[#allocation2 + $0x52] sm:$0xff] }
  0x41   : > { %343 = vst.msk [vmem:[#allocation2 + $0x119] sm:$0x1] %vm313_vm2, %v9822_v0 }
  0x42   : > { %344 = vst.msk [vmem:[#allocation2 + $0x131] sm:$0x1] %vm313_vm2, %v9822_v0 }
  0x43   : > { %345 = vst.msk [vmem:[#allocation2 + $0x149] sm:$0x1] %vm313_vm2, %v9822_v0 }
  0x44   : > { %346 = vst.msk [vmem:[#allocation2 + $0x161] sm:$0x1] %vm313_vm2, %v9822_v0 }
  0x45   : > { %347 = vst.msk [vmem:[#allocation2 + $0x179] sm:$0x1] %vm313_vm2, %v9822_v0 }
  0x46   : > { %9870 = vst [vmem:[#allocation13_spill] sm:$0xff] %v6318_v14 }
  0x47   : > { %348 = vst.msk [vmem:[#allocation2 + $0x191] sm:$0x1] %vm313_vm2, %v9822_v0 }
  0x48   : > { %9871 = vst [vmem:[#allocation14_spill] sm:$0xff] %v6323_v15 }
  0x49   : > { %349 = vst.msk [vmem:[#allocation2 + $0x1a9] sm:$0x1] %vm313_vm2, %v9822_v0  ;;  %v1882_v0 = vld [vmem:[%s9814_s1 + $0x28] sm:$0xff]  ;;  %vm350_vm2 = vcmask 354304  }
  0x4a   : > { %9872 = vst [vmem:[#allocation15_spill] sm:$0xff] %v6328_v16 }
  0x4b   : > { %404 = vst.msk [vmem:[#allocation2 + $0x39] sm:$0xff] %vm9860_vm0, %v6318_v14 }
  0x4c   : > { %407 = vst.msk [vmem:[#allocation2 + $0x61] sm:$0xff] %vm9860_vm0, %v6323_v15 }
  0x4d   : > { %408 = vst.msk [vmem:[#allocation2 + $0x69] sm:$0xff] %vm9860_vm0, %v6328_v16 }
  0x4e   : > { %469 = vst.msk [vmem:[#allocation3 + $0x60] sm:$0xff] %vm9860_vm0, %v1333_v13  ;;  %v1900_v13 = vld [vmem:[%s9814_s1 + $0xb8] sm:$0xff] }
  0x4f   : > { %471 = vst.msk [vmem:[#allocation3 + $0x90] sm:$0xff] %vm9860_vm0, %v1335_v17 }
  0x50   : > { %472 = vst.msk [vmem:[#allocation3 + $0xa8] sm:$0xff] %vm9860_vm0, %v1336_v18 }
  0x51   : > { %1108 = vst.msk [vmem:[#allocation3 + $0x8] sm:$0xff] %vm9860_vm0, %v499_v7 }
  0x52   : > { %v1334_v19 = vld [vmem:[#allocation2 + $0x38] sm:$0xff]  ;;  %1109 = vst.msk [vmem:[#allocation3 + $0x20] sm:$0xff] %vm9860_vm0, %v500_v10 }
  0x53   : > { %v1526_v20 = vld [vmem:[#allocation2 + $0x39] sm:$0xff]  ;;  %1399 = vrot.lane.b32.xlu0 %v1334_v19, %s6093_s23  ;;  %470 = vst.msk [vmem:[#allocation3 + $0x78] sm:$0xff] %vm9860_vm0, %v1334_v19  ;;  %v1529_v22 = vld [vmem:[#allocation2 + $0x61] sm:$0xff] }
  0x54   : > { %1591 = vrot.lane.b32.xlu1 %v1526_v20, %s6094_s24  ;;  %571 = vrot.lane.b32.xlu2 %v1526_v20, %s6092_s22  ;;  %9873 = vst [vmem:[#allocation16_spill] sm:$0xff] %v6346_v21  ;;  %v1530_v24 = vld [vmem:[#allocation2 + $0x69] sm:$0xff]  ;;  %v1337_v30 = vld [vmem:[#allocation2 + $0x60] sm:$0xff]  ;;  %v6381_v31 = vld [vmem:[#allocation2 + $0x32] sm:$0xff] }
  0x55   : > { %1110 = vst.msk [vmem:[#allocation3 + $0x38] sm:$0xff] %vm9860_vm0, %v1525_v9  ;;  %v1338_v34 = vld [vmem:[#allocation2 + $0x68] sm:$0xff]  ;;  %v1143_v35 = vld [vmem:[#allocation2 + $0x3a] sm:$0xff] }
  0x56   : > { %409 = vst.msk [vmem:[#allocation2 + $0x79] sm:$0xff] %vm9860_vm0, %v6346_v21  ;;  %v1146_v48 = vld [vmem:[#allocation2 + $0x62] sm:$0xff]  ;;  %v1147_v59 = vld [vmem:[#allocation2 + $0x6a] sm:$0xff] }
  0x57   : > { %1111 = vst.msk [vmem:[#allocation3 + $0x50] sm:$0xff] %vm9860_vm0, %v1526_v20  ;;  %v1901_v9 = vld [vmem:[%s9814_s1 + $0xc0] sm:$0xff]  ;;  %v1898_v19 = vld [vmem:[%s9814_s1 + $0xa8] sm:$0xff] }
  0x58   : > { %1112 = vst.msk [vmem:[#allocation3 + $0x68] sm:$0xff] %vm9860_vm0, %v6261_v11  ;;  %2133 = vmatpush.msra.mxu1 %v1901_v9 }
  0x59   : > { %1113 = vst.msk [vmem:[#allocation3 + $0x80] sm:$0xff] %vm9860_vm0, %v6275_v12 }
  0x5a   : > { %1114 = vst.msk [vmem:[#allocation3 + $0x98] sm:$0xff] %vm9860_vm0, %v1529_v22  ;;  %2134 = vmatpush.msra.mxu1 %v1900_v13 }
  0x5b   : > { %9874 = vst [vmem:[#allocation17_spill] sm:$0xff] %v6360_v25  ;;  %1401 = vrot.lane.b32.xlu0 %v1335_v17, %s6093_s23  ;;  %v1899_v17 = vld [vmem:[%s9814_s1 + $0xb0] sm:$0xff] }
  0x5c   : > { %1115 = vst.msk [vmem:[#allocation3 + $0xb0] sm:$0xff] %vm9860_vm0, %v1530_v24  ;;  %1593 = vrot.lane.b32.xlu1 %v6261_v11, %s6094_s24  ;;  %1204 = vrot.lane.b32.xlu2 %v6356_v23, %s6092_s22 }
  0x5d   : > { %410 = vst.msk [vmem:[#allocation2 + $0x81] sm:$0xff] %vm9860_vm0, %v6360_v25  ;;  %v1531_v26 = vld [vmem:[#allocation2 + $0x79] sm:$0xff]  ;;  %2135 = vmatpush.msra.mxu1 %v1899_v17 }
  0x5e   : > { %1116 = vst.msk [vmem:[#allocation3 + $0xc8] sm:$0xff] %vm9860_vm0, %v1531_v26  ;;  %v1339_v38 = vld [vmem:[#allocation2 + $0x78] sm:$0xff] }
  0x5f   : > { %9875 = vst [vmem:[#allocation18_spill] sm:$0xff] %v6372_v28  ;;  %2136 = vmatpush.msra.mxu1 %v1898_v19 }
  0x60   : > { %411 = vst.msk [vmem:[#allocation2 + $0x91] sm:$0xff] %vm9860_vm0, %v6372_v28 }
  0x61   : > { %9876 = vst [vmem:[#allocation19_spill] sm:$0xff] %v6384_v32 }
  0x62   : > { %412 = vst.msk [vmem:[#allocation2 + $0x99] sm:$0xff] %vm9860_vm0, %v6384_v32 }
  0x63   : > { %1403 = vrot.lane.b32.xlu0 %v1336_v18, %s6093_s23  ;;  %9877 = vst [vmem:[#allocation20_spill] sm:$0xff] %v6394_v36 }
  0x64   : > { %1595 = vrot.lane.b32.xlu1 %v6275_v12, %s6094_s24  ;;  %v1532_v29 = vld [vmem:[#allocation2 + $0x81] sm:$0xff]  ;;  %1206 = vrot.lane.b32.xlu2 %v1141_v27, %s6092_s22  ;;  %413 = vst.msk [vmem:[#allocation2 + $0xa9] sm:$0xff] %vm9860_vm0, %v6394_v36 }
  0x65   : > { %1117 = vst.msk [vmem:[#allocation3 + $0xe0] sm:$0xff] %vm9860_vm0, %v1532_v29  ;;  %v1340_v42 = vld [vmem:[#allocation2 + $0x80] sm:$0xff]  ;;  %v6487_v12 = vld [vmem:[%s6205_s21 + $0x88] sm:$0xff] }
  0x66   : > { %9878 = vst [vmem:[#allocation21_spill] sm:$0xff] %v6403_v40  ;;  %v1148_v11 = vld [vmem:[#allocation2 + $0x7a] sm:$0xff]  ;;  %v1149_v27 = vld [vmem:[#allocation2 + $0x82] sm:$0xff] }
  0x67   : > { %v1533_v33 = vld [vmem:[#allocation2 + $0x91] sm:$0xff]  ;;  %414 = vst.msk [vmem:[#allocation2 + $0xb1] sm:$0xff] %vm9860_vm0, %v6403_v40 }
  0x68   : > { %1118 = vst.msk [vmem:[#allocation3 + $0xf8] sm:$0xff] %vm9860_vm0, %v1533_v33  ;;  %v1341_v47 = vld [vmem:[#allocation2 + $0x90] sm:$0xff] }
  0x69   : > { %v1534_v37 = vld [vmem:[#allocation2 + $0x99] sm:$0xff]  ;;  %9879 = vst [vmem:[#allocation22_spill] sm:$0xff] %v6415_v44 }
  0x6a   : > { %1119 = vst.msk [vmem:[#allocation3 + $0x110] sm:$0xff] %vm9860_vm0, %v1534_v37  ;;  %v1342_v58 = vld [vmem:[#allocation2 + $0x98] sm:$0xff] }
  0x6b   : > { %1405 = vrot.lane.b32.xlu0 %v1337_v30, %s6093_s23  ;;  %v6407_v41 = vld [vmem:[#allocation2 + $0xa9] sm:$0xff]  ;;  %415 = vst.msk [vmem:[#allocation2 + $0xc1] sm:$0xff] %vm9860_vm0, %v6415_v44  ;;  %v1896_v30 = vld [vmem:[%s9814_s1 + $0x98] sm:$0xff] }
  0x6c   : > { %1597 = vrot.lane.b32.xlu1 %v1529_v22, %s6094_s24  ;;  %1208 = vrot.lane.b32.xlu2 %v6381_v31, %s6092_s22  ;;  %1120 = vst.msk [vmem:[#allocation3 + $0x128] sm:$0xff] %vm9860_vm0, %v6407_v41  ;;  %v1343_v10 = vld [vmem:[#allocation2 + $0xa8] sm:$0xff]  ;;  %v1151_v52 = vld [vmem:[#allocation2 + $0x9a] sm:$0xff] }
  0x6d   : > { %465 = vst.msk [vmem:[#allocation3] sm:$0xff] %vm9860_vm0, %v433_v45  ;;  %v1912_v45 = vld [vmem:[%s9814_s1 + $0x118] sm:$0xff] }
  0x6e   : > { %v6423_v46 = vld [vmem:[#allocation2 + $0xb1] sm:$0xff]  ;;  %9880 = vst [vmem:[#allocation23_spill] sm:$0xff] %v6430_v50  ;;  %5939 = vmatpush.msra.mxu2 %v1912_v45 }
  0x6f   : > { %1121 = vst.msk [vmem:[#allocation3 + $0x140] sm:$0xff] %vm9860_vm0, %v6423_v46  ;;  %v1153_v9 = vld [vmem:[#allocation2 + $0xb2] sm:$0xff] }
  0x70   : > { %467 = vst.msk [vmem:[#allocation3 + $0x30] sm:$0xff] %vm9860_vm0, %v6427_v49 }
  0x71   : > { %466 = vst.msk [vmem:[#allocation3 + $0x18] sm:$0xff] %vm9860_vm0, %v434_v53  ;;  %v6556_v53 = vld [vmem:[%s6205_s21 + $0xa0] sm:$0xff] }
  0x72   : > { %v6448_v56 = vld [vmem:[#allocation2 + $0xc1] sm:$0xff]  ;;  %416 = vst.msk [vmem:[#allocation2 + $0xc9] sm:$0xff] %vm9860_vm0, %v6430_v50 }
  0x73   : > { %1407 = vrot.lane.b32.xlu0 %v1338_v34, %s6093_s23  ;;  %1122 = vst.msk [vmem:[#allocation3 + $0x158] sm:$0xff] %vm9860_vm0, %v6448_v56  ;;  %v1895_v34 = vld [vmem:[%s9814_s1 + $0x90] sm:$0xff] }
  0x74   : > { %1599 = vrot.lane.b32.xlu1 %v1530_v24, %s6094_s24  ;;  %1210 = vrot.lane.b32.xlu2 %v1143_v35, %s6092_s22  ;;  %9881 = vst [vmem:[#allocation24_spill] sm:$0xff] %v6460_v61  ;;  %v1897_v24 = vld [vmem:[%s9814_s1 + $0xa0] sm:$0xff]  ;;  %v1894_v35 = vld [vmem:[%s9814_s1 + $0x88] sm:$0xff] }
  0x75   : > { %468 = vst.msk [vmem:[#allocation3 + $0x48] sm:$0xff] %vm9860_vm0, %v6457_v60  ;;  %2137 = vmatpush.msra.mxu1 %v1897_v24 }
  0x76   : > { %417 = vst.msk [vmem:[#allocation2 + $0xd9] sm:$0xff] %vm9860_vm0, %v6460_v61 }
  0x77   : > { %9882 = vst [vmem:[#allocation25_spill] sm:$0xff] %v6487_v12  ;;  %2138 = vmatpush.msra.mxu1 %v1896_v30 }
  0x78   : > { %418 = vst.msk [vmem:[#allocation2 + $0xe1] sm:$0xff] %vm9860_vm0, %v6487_v12 }
  0x79   : > { %v6478_v7 = vld [vmem:[#allocation2 + $0xc9] sm:$0xff]  ;;  %2139 = vmatpush.msra.mxu1 %v1895_v34  ;;  %9885 = vst [vmem:[#allocation28_spill] sm:$0xff] %v6556_v53 }
  0x7a   : > { %1123 = vst.msk [vmem:[#allocation3 + $0x170] sm:$0xff] %vm9860_vm0, %v6478_v7 }
  0x7b   : > { %1409 = vrot.lane.b32.xlu0 %v1339_v38, %s6093_s23  ;;  %2140 = vmatpush.msra.mxu1 %v1894_v35  ;;  %421 = vst.msk [vmem:[#allocation2 + $0x109] sm:$0xff] %vm9860_vm0, %v6556_v53  ;;  %v1155_v35 = vld [vmem:[#allocation2 + $0xca] sm:$0xff] }
  0x7c   : > { %1601 = vrot.lane.b32.xlu1 %v1531_v26, %s6094_s24  ;;  %1212 = vrot.lane.b32.xlu2 %v1144_v39, %s6092_s22  ;;  %v1344_v26 = vld [vmem:[#allocation2 + $0xb0] sm:$0xff]  ;;  %v1345_v39 = vld [vmem:[#allocation2 + $0xc0] sm:$0xff]  ;;  %9886 = vst [vmem:[#allocation29_spill] sm:$0xff] %v6570_v62 }
  0x7d   : > { %v6505_v20 = vld [vmem:[#allocation2 + $0xd9] sm:$0xff]  ;;  %422 = vst.msk [vmem:[#allocation2 + $0x111] sm:$0xff] %vm9860_vm0, %v6570_v62 }
  0x7e   : > { %1124 = vst.msk [vmem:[#allocation3 + $0x188] sm:$0xff] %vm9860_vm0, %v6505_v20  ;;  %v1347_v57 = vld [vmem:[#allocation2 + $0xd8] sm:$0xff] }
  0x82   : > { %v1543_v5 = vld [vmem:[#allocation2 + $0x109] sm:$0xff] }
  0x83   : > { %1411 = vrot.lane.b32.xlu0 %v1340_v42, %s6093_s23  ;;  %v1893_v42 = vld [vmem:[%s9814_s1 + $0x80] sm:$0xff]  ;;  %1128 = vst.msk [vmem:[#allocation3 + $0x1e8] sm:$0xff] %vm9860_vm0, %v1543_v5 }
  0x84   : > { %1603 = vrot.lane.b32.xlu1 %v1532_v29, %s6094_s24  ;;  %1214 = vrot.lane.b32.xlu2 %v1145_v43, %s6092_s22  ;;  %v6514_v29 = vld [vmem:[%s6205_s21 + $0x90] sm:$0xff]  ;;  %v6538_v43 = vld [vmem:[%s6205_s21 + $0x98] sm:$0xff] }
  0x85   : > { %9883 = vst [vmem:[#allocation26_spill] sm:$0xff] %v6514_v29  ;;  %2141 = vmatpush.msra.mxu1 %v1893_v42  ;;  %v1544_v19 = vld [vmem:[#allocation2 + $0x111] sm:$0xff] }
  0x86   : > { %v570_v51 = vpop.permute.xlu2 %569  ;;  %419 = vst.msk [vmem:[#allocation2 + $0xf1] sm:$0xff] %vm9860_vm0, %v6514_v29 }
  0x87   : > { %662 = vst.msk [vmem:[#allocation3 + $0x60] sm:$0xff] %vm657_vm3, %v570_v51  ;;  %2251 = vmatpush.msrb.mxu1 %v1912_v45  ;;  %v1346_v51 = vld [vmem:[#allocation2 + $0xc8] sm:$0xff] }
  0x88   : > { %9884 = vst [vmem:[#allocation27_spill] sm:$0xff] %v6538_v43  ;;  %v1351_v45 = vld [vmem:[#allocation2 + $0x108] sm:$0xff] }
  0x89   : > { %420 = vst.msk [vmem:[#allocation2 + $0xf9] sm:$0xff] %vm9860_vm0, %v6538_v43 }
  0x8a   : > { %1129 = vst.msk [vmem:[#allocation3 + $0x200] sm:$0xff] %vm9860_vm0, %v1544_v19 }
  0x8b   : > { %1413 = vrot.lane.b32.xlu0 %v1341_v47, %s6093_s23 }
  0x8c   : > { %1605 = vrot.lane.b32.xlu1 %v1533_v33, %s6094_s24  ;;  %1216 = vrot.lane.b32.xlu2 %v1146_v48, %s6092_s22 }
  0x8d   : > { %v6551_v48 = vld [vmem:[#allocation2 + $0xf1] sm:$0xff] }
  0x8e   : > { %1126 = vst.msk [vmem:[#allocation3 + $0x1b8] sm:$0xff] %vm9860_vm0, %v6551_v48 }
  0x8f   : > { %v562_v8 = vpop.permute.xlu0 %561 }
  0x90   : > { %658 = vst.msk [vmem:[#allocation3] sm:$0xff] %vm657_vm3, %v562_v8 }
  0x93   : > { %1415 = vrot.lane.b32.xlu0 %v1342_v58, %s6093_s23  ;;  %v1152_v58 = vld [vmem:[#allocation2 + $0xaa] sm:$0xff] }
  0x94   : > { %1607 = vrot.lane.b32.xlu1 %v1534_v37, %s6094_s24  ;;  %1218 = vrot.lane.b32.xlu2 %v1147_v59, %s6092_s22  ;;  %v1540_v37 = vld [vmem:[#allocation2 + $0xe1] sm:$0xff]  ;;  %v6567_v59 = vld [vmem:[#allocation2 + $0xf9] sm:$0xff] }
  0x95   : > { %1125 = vst.msk [vmem:[#allocation3 + $0x1a0] sm:$0xff] %vm9860_vm0, %v1540_v37 }
  0x96   : > { %1127 = vst.msk [vmem:[#allocation3 + $0x1d0] sm:$0xff] %vm9860_vm0, %v6567_v59 }
  0x97   : > { %v566_v18 = vpop.permute.xlu1 %565  ;;  %v564_v22 = vpop.permute.xlu0 %563 }
  0x98   : > { %660 = vst.msk [vmem:[#allocation3 + $0x30] sm:$0xff] %vm657_vm3, %v566_v18  ;;  %v1349_v18 = vld [vmem:[#allocation2 + $0xf0] sm:$0xff] }
  0x99   : > { %659 = vst.msk [vmem:[#allocation3 + $0x18] sm:$0xff] %vm657_vm3, %v564_v22  ;;  %v6595_v22 = vld [vmem:[%s6205_s21 + $0xb8] sm:$0xff] }
  0x9a   : > { %9888 = vst [vmem:[#allocation31_spill] sm:$0xff] %v6595_v22 }
  0x9b   : > { %1417 = vrot.lane.b32.xlu0 %v1343_v10, %s6093_s23  ;;  %v6583_v10 = vld [vmem:[%s6205_s21 + $0xb0] sm:$0xff]  ;;  %424 = vst.msk [vmem:[#allocation2 + $0x129] sm:$0xff] %vm9860_vm0, %v6595_v22 }
  0x9c   : > { %1609 = vrot.lane.b32.xlu1 %v6407_v41, %s6094_s24  ;;  %1220 = vrot.lane.b32.xlu2 %v1148_v11, %s6092_s22  ;;  %v1150_v41 = vld [vmem:[#allocation2 + $0x92] sm:$0xff]  ;;  %9887 = vst [vmem:[#allocation30_spill] sm:$0xff] %v6583_v10 }
  0x9d   : > { %423 = vst.msk [vmem:[#allocation2 + $0x121] sm:$0xff] %vm9860_vm0, %v6583_v10 }
  0x9f   : > { %v568_v33 = vpop.permute.xlu1 %567  ;;  %v574_v38 = vpop.permute.xlu0 %573 }
  0xa0   : > { %661 = vst.msk [vmem:[#allocation3 + $0x48] sm:$0xff] %vm657_vm3, %v568_v33  ;;  %v1350_v33 = vld [vmem:[#allocation2 + $0xf8] sm:$0xff] }
  0xa1   : > { %664 = vst.msk [vmem:[#allocation3 + $0x90] sm:$0xff] %vm657_vm3, %v574_v38 }
  0xa3   : > { %1419 = vrot.lane.b32.xlu0 %v1344_v26, %s6093_s23 }
  0xa4   : > { %1611 = vrot.lane.b32.xlu1 %v6423_v46, %s6094_s24  ;;  %1222 = vrot.lane.b32.xlu2 %v1149_v27, %s6092_s22  ;;  %v1545_v34 = vld [vmem:[#allocation2 + $0x121] sm:$0xff] }
  0xa5   : > { %1130 = vst.msk [vmem:[#allocation3 + $0x218] sm:$0xff] %vm9860_vm0, %v1545_v34 }
  0xa7   : > { %v576_v46 = vpop.permute.xlu1 %575 }
  0xa8   : > { %665 = vst.msk [vmem:[#allocation3 + $0xa8] sm:$0xff] %vm657_vm3, %v576_v46  ;;  %v1546_v46 = vld [vmem:[#allocation2 + $0x129] sm:$0xff] }
  0xa9   : > { %1131 = vst.msk [vmem:[#allocation3 + $0x230] sm:$0xff] %vm9860_vm0, %v1546_v46 }
  0xab   : > { %1421 = vrot.lane.b32.xlu0 %v1345_v39, %s6093_s23 }
  0xac   : > { %1613 = vrot.lane.b32.xlu1 %v6448_v56, %s6094_s24  ;;  %1224 = vrot.lane.b32.xlu2 %v1150_v41, %s6092_s22  ;;  %v1398_v56 = vpop.permute.xlu0 %1397 }
  0xae   : > { %v572_v47 = vpop.permute.xlu2 %571 }
  0xaf   : > { %663 = vst.msk [vmem:[#allocation3 + $0x78] sm:$0xff] %vm657_vm3, %v572_v47  ;;  %v1590_v55 = vpop.permute.xlu1 %1589  ;;  %v1156_v47 = vld [vmem:[#allocation2 + $0xda] sm:$0xff] }
  0xb3   : > { %1423 = vrot.lane.b32.xlu0 %v1346_v51, %s6093_s23  ;;  %v6621_v51 = vld [vmem:[%s6205_s21 + $0xc8] sm:$0xff] }
  0xb4   : > { %1615 = vrot.lane.b32.xlu1 %v6478_v7, %s6094_s24  ;;  %1226 = vrot.lane.b32.xlu2 %v1151_v52, %s6092_s22  ;;  %v1348_v7 = vld [vmem:[#allocation2 + $0xe0] sm:$0xff]  ;;  %9890 = vst [vmem:[#allocation33_spill] sm:$0xff] %v6621_v51 }
  0xb5   : > { %426 = vst.msk [vmem:[#allocation2 + $0x141] sm:$0xff] %vm9860_vm0, %v6621_v51  ;;  %v1733_v51 = vld [vmem:[#allocation2 + $0xf2] sm:$0xff] }
  0xb6   : > { %v1205_v54 = vpop.permute.xlu2 %1204  ;;  %1765 = vst.msk [vmem:[#allocation3 + $0x190] sm:$0xff] %vm9860_vm0, %v1733_v51 }
  0xb7   : > { %1300 = vst.msk [vmem:[#allocation3 + $0x8] sm:$0xff] %vm657_vm3, %v1205_v54 }
  0xb8   : > { %1493 = vst.msk [vmem:[#allocation3 + $0x8] sm:$0xff] %vm850_vm4, %v1398_v56 }
  0xb9   : > { %1685 = vst.msk [vmem:[#allocation3 + $0x8] sm:$0xff] %vm1043_vm5, %v1590_v55 }
  0xbb   : > { %1425 = vrot.lane.b32.xlu0 %v1347_v57, %s6093_s23  ;;  %v1352_v57 = vld [vmem:[#allocation2 + $0x110] sm:$0xff] }
  0xbc   : > { %1617 = vrot.lane.b32.xlu1 %v6505_v20, %s6094_s24  ;;  %1228 = vrot.lane.b32.xlu2 %v1152_v58, %s6092_s22  ;;  %v1154_v20 = vld [vmem:[#allocation2 + $0xc2] sm:$0xff] }
  0xbd   : > { %v7144_v22 = vld [vmem:[#allocation2 + $0x142] sm:$0xff] }
  0xbe   : > { %v1207_v63 = vpop.permute.xlu2 %1206  ;;  %1772 = vst.msk [vmem:[#allocation3 + $0x238] sm:$0xff] %vm9860_vm0, %v7144_v22 }
  0xbf   : > { %1301 = vst.msk [vmem:[#allocation3 + $0x20] sm:$0xff] %vm657_vm3, %v1207_v63  ;;  %v1157_v63 = vld [vmem:[#allocation2 + $0xe2] sm:$0xff] }
  0xc0   : > { %v1782_v8 = vld [vmem:[#allocation3 + $0x8] sm:$0xff] }
  0xc1   : > { %2142 = vmatmul.f32.vlgmr.msra.gmra.mxu1 %v1782_v8 }
  0xc3   : > { %1427 = vrot.lane.b32.xlu0 %v1348_v7, %s6093_s23 }
  0xc4   : > { %1619 = vrot.lane.b32.xlu1 %v1540_v37, %s6094_s24  ;;  %1230 = vrot.lane.b32.xlu2 %v1153_v9, %s6092_s22  ;;  %v6608_v37 = vld [vmem:[%s6205_s21 + $0xc0] sm:$0xff] }
  0xc5   : > { %v1400_v11 = vpop.permute.xlu0 %1399  ;;  %9889 = vst [vmem:[#allocation32_spill] sm:$0xff] %v6608_v37 }
  0xc6   : > { %v1592_v13 = vpop.permute.xlu1 %1591  ;;  %1494 = vst.msk [vmem:[#allocation3 + $0x20] sm:$0xff] %vm850_vm4, %v1400_v11  ;;  %v1209_v17 = vpop.permute.xlu2 %1208 }
  0xc7   : > { %1686 = vst.msk [vmem:[#allocation3 + $0x20] sm:$0xff] %vm1043_vm5, %v1592_v13  ;;  %v1353_v13 = vld [vmem:[#allocation2 + $0x120] sm:$0xff] }
  0xc8   : > { %1302 = vst.msk [vmem:[#allocation3 + $0x38] sm:$0xff] %vm657_vm3, %v1209_v17  ;;  %v1548_v17 = vld [vmem:[#allocation2 + $0x141] sm:$0xff] }
  0xc9   : > { %425 = vst.msk [vmem:[#allocation2 + $0x139] sm:$0xff] %vm9860_vm0, %v6608_v37 }
  0xca   : > { %1133 = vst.msk [vmem:[#allocation3 + $0x260] sm:$0xff] %vm9860_vm0, %v1548_v17 }
  0xcb   : > { %1429 = vrot.lane.b32.xlu0 %v1349_v18, %s6093_s23  ;;  %v6643_v18 = vld [vmem:[#allocation2 + $0xf2] sm:$0xff] }
  0xcc   : > { %1621 = vrot.lane.b32.xlu1 %v6551_v48, %s6094_s24  ;;  %1232 = vrot.lane.b32.xlu2 %v1154_v20, %s6092_s22  ;;  %v1911_v20 = vld [vmem:[%s9814_s1 + $0x110] sm:$0xff] }
  0xcd   : > { %v1402_v24 = vpop.permute.xlu0 %1401  ;;  %2252 = vmatpush.msrb.mxu1 %v1911_v20  ;;  %5940 = vmatpush.msra.mxu2 %v1911_v20 }
  0xce   : > { %v1594_v26 = vpop.permute.xlu1 %1593  ;;  %1495 = vst.msk [vmem:[#allocation3 + $0x38] sm:$0xff] %vm850_vm4, %v1402_v24  ;;  %v1211_v27 = vpop.permute.xlu2 %1210  ;;  %v1785_v30 = vld [vmem:[#allocation3 + $0x20] sm:$0xff] }
  0xcf   : > { %1687 = vst.msk [vmem:[#allocation3 + $0x38] sm:$0xff] %vm1043_vm5, %v1594_v26  ;;  %2145 = vmatmul.f32.gmra.mxu1 %v1785_v30 }
  0xd0   : > { %1303 = vst.msk [vmem:[#allocation3 + $0x50] sm:$0xff] %vm657_vm3, %v1211_v27  ;;  %v1547_v58 = vld [vmem:[#allocation2 + $0x139] sm:$0xff] }
  0xd1   : > { %1132 = vst.msk [vmem:[#allocation3 + $0x248] sm:$0xff] %vm9860_vm0, %v1547_v58 }
  0xd3   : > { %1431 = vrot.lane.b32.xlu0 %v1350_v33, %s6093_s23  ;;  %v1354_v33 = vld [vmem:[#allocation2 + $0x128] sm:$0xff] }
  0xd4   : > { %1623 = vrot.lane.b32.xlu1 %v6567_v59, %s6094_s24  ;;  %1234 = vrot.lane.b32.xlu2 %v1155_v35, %s6092_s22  ;;  %v6661_v35 = vld [vmem:[#allocation2 + $0xfa] sm:$0xff] }
  0xd5   : > { %v1404_v38 = vpop.permute.xlu0 %1403 }
  0xd6   : > { %v1596_v39 = vpop.permute.xlu1 %1595  ;;  %1496 = vst.msk [vmem:[#allocation3 + $0x50] sm:$0xff] %vm850_vm4, %v1404_v38  ;;  %v1213_v41 = vpop.permute.xlu2 %1212  ;;  %v1788_v42 = vld [vmem:[#allocation3 + $0x38] sm:$0xff]  ;;  %v6665_v38 = vld [vmem:[%s6205_s21 + $0xe0] sm:$0xff] }
  0xd7   : > { %1688 = vst.msk [vmem:[#allocation3 + $0x50] sm:$0xff] %vm1043_vm5, %v1596_v39  ;;  %2148 = vmatmul.f32.gmra.mxu1 %v1788_v42 }
  0xd8   : > { %1304 = vst.msk [vmem:[#allocation3 + $0x68] sm:$0xff] %vm657_vm3, %v1213_v41 }
  0xd9   : > { %9893 = vst [vmem:[#allocation36_spill] sm:$0xff] %v6665_v38 }
  0xda   : > { %429 = vst.msk [vmem:[#allocation2 + $0x169] sm:$0xff] %vm9860_vm0, %v6665_v38  ;;  %v511_v38 = vld [vmem:[#allocation2 + $0xa9] sm:$0xff] }
  0xdb   : > { %1433 = vrot.lane.b32.xlu0 %v1351_v45, %s6093_s23 }
  0xdc   : > { %1625 = vrot.lane.b32.xlu1 %v1543_v5, %s6094_s24  ;;  %1236 = vrot.lane.b32.xlu2 %v1156_v47, %s6092_s22  ;;  %v6633_v5 = vld [vmem:[%s6205_s21 + $0xd0] sm:$0xff]  ;;  %v1355_v47 = vld [vmem:[#allocation2 + $0x138] sm:$0xff] }
  0xdd   : > { %v1406_v52 = vpop.permute.xlu0 %1405  ;;  %9891 = vst [vmem:[#allocation34_spill] sm:$0xff] %v6633_v5 }
  0xde   : > { %v1598_v54 = vpop.permute.xlu1 %1597  ;;  %1497 = vst.msk [vmem:[#allocation3 + $0x68] sm:$0xff] %vm850_vm4, %v1406_v52  ;;  %v1215_v55 = vpop.permute.xlu2 %1214  ;;  %v1791_v56 = vld [vmem:[#allocation3 + $0x50] sm:$0xff] }
  0xdf   : > { %1689 = vst.msk [vmem:[#allocation3 + $0x68] sm:$0xff] %vm1043_vm5, %v1598_v54  ;;  %2151 = vmatmul.f32.gmra.mxu1 %v1791_v56  ;;  %v6680_v54 = vld [vmem:[%s6205_s21 + $0xe8] sm:$0xff] }
  0xe0   : > { %1305 = vst.msk [vmem:[#allocation3 + $0x80] sm:$0xff] %vm657_vm3, %v1215_v55 }
  0xe1   : > { %427 = vst.msk [vmem:[#allocation2 + $0x151] sm:$0xff] %vm9860_vm0, %v6633_v5  ;;  %v7165_v5 = vld [vmem:[#allocation2 + $0xf8] sm:$0xff] }
  0xe2   : > { %9894 = vst [vmem:[#allocation37_spill] sm:$0xff] %v6680_v54 }
  0xe3   : > { %1435 = vrot.lane.b32.xlu0 %v1352_v57, %s6093_s23  ;;  %430 = vst.msk [vmem:[#allocation2 + $0x171] sm:$0xff] %vm9860_vm0, %v6680_v54  ;;  %v7106_v54 = vld [vmem:[#allocation2 + $0x138] sm:$0xff] }
  0xe4   : > { %1627 = vrot.lane.b32.xlu1 %v1544_v19, %s6094_s24  ;;  %1238 = vrot.lane.b32.xlu2 %v1157_v63, %s6092_s22  ;;  %v6647_v19 = vld [vmem:[%s6205_s21 + $0xd8] sm:$0xff]  ;;  %491 = vst.msk [vmem:[#allocation3 + $0x270] sm:$0xff] %vm9860_vm0, %v7106_v54 }
  0xe5   : > { %v1408_v7 = vpop.permute.xlu0 %1407  ;;  %9892 = vst [vmem:[#allocation35_spill] sm:$0xff] %v6647_v19 }
  0xe6   : > { %v1600_v8 = vpop.permute.xlu1 %1599  ;;  %1498 = vst.msk [vmem:[#allocation3 + $0x80] sm:$0xff] %vm850_vm4, %v1408_v7  ;;  %v1217_v9 = vpop.permute.xlu2 %1216  ;;  %v1794_v11 = vld [vmem:[#allocation3 + $0x68] sm:$0xff]  ;;  %v1356_v7 = vld [vmem:[#allocation2 + $0x140] sm:$0xff] }
  0xe7   : > { %1690 = vst.msk [vmem:[#allocation3 + $0x80] sm:$0xff] %vm1043_vm5, %v1600_v8  ;;  %2154 = vmatmul.f32.gmra.mxu1 %v1794_v11  ;;  %v1551_v8 = vld [vmem:[#allocation2 + $0x169] sm:$0xff] }
  0xe8   : > { %1306 = vst.msk [vmem:[#allocation3 + $0x98] sm:$0xff] %vm657_vm3, %v1217_v9  ;;  %v6695_v9 = vld [vmem:[%s6205_s21 + $0xf0] sm:$0xff] }
  0xe9   : > { %428 = vst.msk [vmem:[#allocation2 + $0x159] sm:$0xff] %vm9860_vm0, %v6647_v19  ;;  %v909_v53 = vld [vmem:[#allocation2 + $0x150] sm:$0xff] }
  0xea   : > { %1136 = vst.msk [vmem:[#allocation3 + $0x2a8] sm:$0xff] %vm9860_vm0, %v1551_v8 }
  0xeb   : > { %1437 = vrot.lane.b32.xlu0 %v1353_v13, %s6093_s23  ;;  %9895 = vst [vmem:[#allocation38_spill] sm:$0xff] %v6695_v9 }
  0xec   : > { %1629 = vrot.lane.b32.xlu1 %v1545_v34, %s6094_s24  ;;  %1240 = vrot.lane.b32.xlu2 %v6643_v18, %s6092_s22  ;;  %v1549_v34 = vld [vmem:[#allocation2 + $0x151] sm:$0xff]  ;;  %431 = vst.msk [vmem:[#allocation2 + $0x181] sm:$0xff] %vm9860_vm0, %v6695_v9  ;;  %v1878_v9 = vld [vmem:[%s9814_s1 + $0x8] sm:$0xff] }
  0xed   : > { %v1410_v24 = vpop.permute.xlu0 %1409  ;;  %1134 = vst.msk [vmem:[#allocation3 + $0x278] sm:$0xff] %vm9860_vm0, %v1549_v34 }
  0xee   : > { %v1602_v26 = vpop.permute.xlu1 %1601  ;;  %1499 = vst.msk [vmem:[#allocation3 + $0x98] sm:$0xff] %vm850_vm4, %v1410_v24  ;;  %v1219_v27 = vpop.permute.xlu2 %1218  ;;  %v1797_v30 = vld [vmem:[#allocation3 + $0x80] sm:$0xff] }
  0xef   : > { %1691 = vst.msk [vmem:[#allocation3 + $0x98] sm:$0xff] %vm1043_vm5, %v1602_v26  ;;  %2157 = vmatmul.f32.gmra.mxu1 %v1797_v30  ;;  %v1357_v26 = vld [vmem:[#allocation2 + $0x150] sm:$0xff]  ;;  %v6708_v30 = vld [vmem:[%s6205_s21 + $0xf8] sm:$0xff]  ;;  %s5716_s21 = scalar_lea.hbm %s9821_s8, %s5922_s18 }
  0xf0   : > { %1307 = vst.msk [vmem:[#allocation3 + $0xb0] sm:$0xff] %vm657_vm3, %v1219_v27  ;;  %v1550_v52 = vld [vmem:[#allocation2 + $0x159] sm:$0xff]  ;;  %v1552_v27 = vld [vmem:[#allocation2 + $0x171] sm:$0xff]  ;;  %s5719_s26 = sshll.u32 %s5716_s21, 4  ;;  %s5720_s26 = int_to_ptr.hbm [resolvable:$true] %s5719_s26 }
  0xf1   : > { %1135 = vst.msk [vmem:[#allocation3 + $0x290] sm:$0xff] %vm9860_vm0, %v1550_v52  ;;  %v910_v19 = vld [vmem:[#allocation2 + $0x158] sm:$0xff]  ;;  %s6041_s10 = sshra.s32 %s5720_s26, 4  ;;  %s6042_s10 = int_to_ptr.hbm [resolvable:$true] %s6041_s10 }
  0xf2   : > { %1137 = vst.msk [vmem:[#allocation3 + $0x2c0] sm:$0xff] %vm9860_vm0, %v1552_v27  ;;  %p6048_p0 = scmp.lt.s32.totalorder %s6042_s10, %s9821_s8 }
  0xf3   : > { %1439 = vrot.lane.b32.xlu0 %v1354_v33, %s6093_s23  ;;  %9896 = vst [vmem:[#allocation39_spill] sm:$0xff] %v6708_v30 }
  0xf4   : > { %1631 = vrot.lane.b32.xlu1 %v1546_v46, %s6094_s24  ;;  %1242 = vrot.lane.b32.xlu2 %v6661_v35, %s6092_s22  ;;  %v6676_v46 = vld [vmem:[#allocation2 + $0x10a] sm:$0xff]  ;;  %432 = vst.msk [vmem:[#allocation2 + $0x189] sm:$0xff] %vm9860_vm0, %v6708_v30  ;;  %v897_v30 = vld [vmem:[#allocation2 + $0xc0] sm:$0xff] }
  0xf5   : > { %v1412_v39 = vpop.permute.xlu0 %1411  ;;  %481 = vst.msk [vmem:[#allocation3 + $0x180] sm:$0xff] %vm9860_vm0, %v897_v30 }
  0xf6   : > { %v1604_v41 = vpop.permute.xlu1 %1603  ;;  %1500 = vst.msk [vmem:[#allocation3 + $0xb0] sm:$0xff] %vm850_vm4, %v1412_v39  ;;  %v1221_v42 = vpop.permute.xlu2 %1220  ;;  %v1800_v45 = vld [vmem:[#allocation3 + $0x98] sm:$0xff] }
  0xf7   : > { %1692 = vst.msk [vmem:[#allocation3 + $0xb0] sm:$0xff] %vm1043_vm5, %v1604_v41  ;;  %2160 = vmatmul.f32.gmra.mxu1 %v1800_v45  ;;  %v1358_v45 = vld [vmem:[#allocation2 + $0x158] sm:$0xff] }
  0xf8   : > { %1308 = vst.msk [vmem:[#allocation3 + $0xc8] sm:$0xff] %vm657_vm3, %v1221_v42 }
  0xf9   : > { %486 = vst.msk [vmem:[#allocation3 + $0x1f8] sm:$0xff] %vm9860_vm0, %v7165_v5 }
  0xfa   : > { %493 = vst.msk [vmem:[#allocation3 + $0x2a0] sm:$0xff] %vm9860_vm0, %v909_v53 }
  0xfb   : > { %1441 = vrot.lane.b32.xlu0 %v1355_v47, %s6093_s23  ;;  %v1553_v47 = vld [vmem:[#allocation2 + $0x181] sm:$0xff]  ;;  %494 = vst.msk [vmem:[#allocation3 + $0x2b8] sm:$0xff] %vm9860_vm0, %v910_v19  ;;  %v1746_v44 = vld [vmem:[#allocation2 + $0x18a] sm:$0xff] }
  0xfc   : > { %1633 = vrot.lane.b32.xlu1 %v1547_v58, %s6094_s24  ;;  %1244 = vrot.lane.b32.xlu2 %v6676_v46, %s6092_s22  ;;  %v6691_v58 = vld [vmem:[#allocation2 + $0x112] sm:$0xff]  ;;  %1138 = vst.msk [vmem:[#allocation3 + $0x2d8] sm:$0xff] %vm9860_vm0, %v1553_v47 }
  0xfd   : > { %v1414_v55 = vpop.permute.xlu0 %1413  ;;  %1778 = vst.msk [vmem:[#allocation3 + $0x2c8] sm:$0xff] %vm9860_vm0, %v1746_v44  ;;  %v3867_v44 = vld [vmem:[%s9816_s3 + $0x58] sm:$0xff] }
  0xfe   : > { %v1606_v56 = vpop.permute.xlu1 %1605  ;;  %1501 = vst.msk [vmem:[#allocation3 + $0xc8] sm:$0xff] %vm850_vm4, %v1414_v55  ;;  %v1223_v57 = vpop.permute.xlu2 %1222  ;;  %v1803_v63 = vld [vmem:[#allocation3 + $0xb0] sm:$0xff]  ;;  %v1163_v55 = vld [vmem:[#allocation2 + $0x12a] sm:$0xff] }
  0xff   : > { %1693 = vst.msk [vmem:[#allocation3 + $0xc8] sm:$0xff] %vm1043_vm5, %v1606_v56  ;;  %2163 = vmatmul.f32.gmra.mxu1 %v1803_v63 }
 0x100   : > { %1309 = vst.msk [vmem:[#allocation3 + $0xe0] sm:$0xff] %vm657_vm3, %v1223_v57 }
 0x103   : > { %1443 = vrot.lane.b32.xlu0 %v1356_v7, %s6093_s23  ;;  %v1359_v7 = vld [vmem:[#allocation2 + $0x168] sm:$0xff] }
 0x104   : > { %1635 = vrot.lane.b32.xlu1 %v1548_v17, %s6094_s24  ;;  %1246 = vrot.lane.b32.xlu2 %v6691_v58, %s6092_s22  ;;  %v1162_v17 = vld [vmem:[#allocation2 + $0x122] sm:$0xff] }
 0x105   : > { %v1416_v11 = vpop.permute.xlu0 %1415 }
 0x106   : > { %v1608_v13 = vpop.permute.xlu1 %1607  ;;  %1502 = vst.msk [vmem:[#allocation3 + $0xe0] sm:$0xff] %vm850_vm4, %v1416_v11  ;;  %v1225_v20 = vpop.permute.xlu2 %1224  ;;  %v1806_v24 = vld [vmem:[#allocation3 + $0xc8] sm:$0xff]  ;;  %v1554_v11 = vld [vmem:[#allocation2 + $0x189] sm:$0xff] }
 0x107   : > { %1694 = vst.msk [vmem:[#allocation3 + $0xe0] sm:$0xff] %vm1043_vm5, %v1608_v13  ;;  %2166 = vmatmul.f32.gmra.mxu1 %v1806_v24  ;;  %v1164_v13 = vld [vmem:[#allocation2 + $0x13a] sm:$0xff] }
 0x108   : > { %1310 = vst.msk [vmem:[#allocation3 + $0xf8] sm:$0xff] %vm657_vm3, %v1225_v20 }
 0x109   : > { %1139 = vst.msk [vmem:[#allocation3 + $0x2f0] sm:$0xff] %vm9860_vm0, %v1554_v11 }
 0x10b   : > { %1445 = vrot.lane.b32.xlu0 %v1357_v26, %s6093_s23 }
 0x10c   : > { %1637 = vrot.lane.b32.xlu1 %v1549_v34, %s6094_s24  ;;  %1248 = vrot.lane.b32.xlu2 %v1162_v17, %s6092_s22  ;;  %v1360_v17 = vld [vmem:[#allocation2 + $0x170] sm:$0xff] }
 0x10d   : > { %v1418_v33 = vpop.permute.xlu0 %1417 }
 0x10e   : > { %v1610_v39 = vpop.permute.xlu1 %1609  ;;  %1503 = vst.msk [vmem:[#allocation3 + $0xf8] sm:$0xff] %vm850_vm4, %v1418_v33  ;;  %v1227_v41 = vpop.permute.xlu2 %1226  ;;  %v1809_v42 = vld [vmem:[#allocation3 + $0xe0] sm:$0xff]  ;;  %v1165_v33 = vld [vmem:[#allocation2 + $0x142] sm:$0xff] }
 0x10f   : > { %1695 = vst.msk [vmem:[#allocation3 + $0xf8] sm:$0xff] %vm1043_vm5, %v1610_v39  ;;  %2169 = vmatmul.f32.gmra.mxu1 %v1809_v42 }
 0x110   : > { %1311 = vst.msk [vmem:[#allocation3 + $0x110] sm:$0xff] %vm657_vm3, %v1227_v41 }
 0x113   : > { %1447 = vrot.lane.b32.xlu0 %v1358_v45, %s6093_s23  ;;  %v1361_v45 = vld [vmem:[#allocation2 + $0x180] sm:$0xff] }
 0x114   : > { %1639 = vrot.lane.b32.xlu1 %v1550_v52, %s6094_s24  ;;  %1250 = vrot.lane.b32.xlu2 %v1163_v55, %s6092_s22  ;;  %v1166_v55 = vld [vmem:[#allocation2 + $0x152] sm:$0xff] }
 0x115   : > { %v1420_v34 = vpop.permute.xlu0 %1419 }
 0x116   : > { %v1612_v56 = vpop.permute.xlu1 %1611  ;;  %1504 = vst.msk [vmem:[#allocation3 + $0x110] sm:$0xff] %vm850_vm4, %v1420_v34  ;;  %v1229_v57 = vpop.permute.xlu2 %1228  ;;  %v1812_v63 = vld [vmem:[#allocation3 + $0xf8] sm:$0xff] }
 0x117   : > { %1696 = vst.msk [vmem:[#allocation3 + $0x110] sm:$0xff] %vm1043_vm5, %v1612_v56  ;;  %2172 = vmatmul.f32.gmra.mxu1 %v1812_v63 }
 0x118   : > { %1312 = vst.msk [vmem:[#allocation3 + $0x128] sm:$0xff] %vm657_vm3, %v1229_v57 }
 0x11b   : > { %1449 = vrot.lane.b32.xlu0 %v1359_v7, %s6093_s23  ;;  %v1362_v7 = vld [vmem:[#allocation2 + $0x188] sm:$0xff] }
 0x11c   : > { %1641 = vrot.lane.b32.xlu1 %v1551_v8, %s6094_s24  ;;  %1252 = vrot.lane.b32.xlu2 %v1164_v13, %s6092_s22 }
 0x11d   : > { %v1422_v52 = vpop.permute.xlu0 %1421 }
 0x11e   : > { %v1614_v20 = vpop.permute.xlu1 %1613  ;;  %1505 = vst.msk [vmem:[#allocation3 + $0x128] sm:$0xff] %vm850_vm4, %v1422_v52  ;;  %v1231_v24 = vpop.permute.xlu2 %1230  ;;  %v1815_v26 = vld [vmem:[#allocation3 + $0x110] sm:$0xff] }
 0x11f   : > { %1697 = vst.msk [vmem:[#allocation3 + $0x128] sm:$0xff] %vm1043_vm5, %v1614_v20  ;;  %2175 = vmatmul.f32.gmra.mxu1 %v1815_v26  ;;  %v1363_v26 = vld [vmem:[#allocation2 + $0x198] sm:$0xff] }
 0x120   : > { %1313 = vst.msk [vmem:[#allocation3 + $0x140] sm:$0xff] %vm657_vm3, %v1231_v24 }
 0x123   : > { %1451 = vrot.lane.b32.xlu0 %v1360_v17, %s6093_s23  ;;  %v1555_v17 = vld [vmem:[#allocation2 + $0x199] sm:$0xff] }
 0x124   : > { %1643 = vrot.lane.b32.xlu1 %v1552_v27, %s6094_s24  ;;  %1254 = vrot.lane.b32.xlu2 %v1165_v33, %s6092_s22  ;;  %v1910_v27 = vld [vmem:[%s9814_s1 + $0x108] sm:$0xff] }
 0x125   : > { %v1424_v8 = vpop.permute.xlu0 %1423  ;;  %2253 = vmatpush.msrb.mxu1 %v1910_v27  ;;  %5941 = vmatpush.msra.mxu2 %v1910_v27  ;;  %v1168_v33 = vld [vmem:[#allocation2 + $0x16a] sm:$0xff] }
 0x126   : > { %v1616_v39 = vpop.permute.xlu1 %1615  ;;  %1506 = vst.msk [vmem:[#allocation3 + $0x140] sm:$0xff] %vm850_vm4, %v1424_v8  ;;  %v1233_v41 = vpop.permute.xlu2 %1232  ;;  %v1818_v42 = vld [vmem:[#allocation3 + $0x128] sm:$0xff] }
 0x127   : > { %1698 = vst.msk [vmem:[#allocation3 + $0x140] sm:$0xff] %vm1043_vm5, %v1616_v39  ;;  %2178 = vmatmul.f32.gmra.mxu1 %v1818_v42  ;;  %v1364_v42 = vld [vmem:[#allocation2 + $0x1a0] sm:$0xff] }
 0x128   : > { %1314 = vst.msk [vmem:[#allocation3 + $0x158] sm:$0xff] %vm657_vm3, %v1233_v41 }
 0x12b   : > { %1453 = vrot.lane.b32.xlu0 %v1361_v45, %s6093_s23  ;;  %v1556_v45 = vld [vmem:[#allocation2 + $0x1a1] sm:$0xff] }
 0x12c   : > { %1645 = vrot.lane.b32.xlu1 %v1553_v47, %s6094_s24  ;;  %1256 = vrot.lane.b32.xlu2 %v1166_v55, %s6092_s22  ;;  %v1167_v47 = vld [vmem:[#allocation2 + $0x15a] sm:$0xff]  ;;  %v1169_v55 = vld [vmem:[#allocation2 + $0x172] sm:$0xff] }
 0x12d   : > { %v1426_v34 = vpop.permute.xlu0 %1425 }
 0x12e   : > { %v1618_v56 = vpop.permute.xlu1 %1617  ;;  %1507 = vst.msk [vmem:[#allocation3 + $0x158] sm:$0xff] %vm850_vm4, %v1426_v34  ;;  %v1235_v57 = vpop.permute.xlu2 %1234  ;;  %v1821_v63 = vld [vmem:[#allocation3 + $0x140] sm:$0xff] }
 0x12f   : > { %1699 = vst.msk [vmem:[#allocation3 + $0x158] sm:$0xff] %vm1043_vm5, %v1618_v56  ;;  %2181 = vmatmul.f32.gmra.mxu1 %v1821_v63 }
 0x130   : > { %1315 = vst.msk [vmem:[#allocation3 + $0x170] sm:$0xff] %vm657_vm3, %v1235_v57 }
 0x133   : > { %1455 = vrot.lane.b32.xlu0 %v1362_v7, %s6093_s23  ;;  %v691_v7 = vld [vmem:[#allocation2 + $0xa] sm:$0xff] }
 0x134   : > { %1647 = vrot.lane.b32.xlu1 %v1554_v11, %s6094_s24  ;;  %1258 = vrot.lane.b32.xlu2 %v1167_v47, %s6092_s22  ;;  %v695_v47 = vld [vmem:[#allocation2 + $0x3a] sm:$0xff] }
 0x135   : > { %v1428_v13 = vpop.permute.xlu0 %1427  ;;  %1750 = vst.msk [vmem:[#allocation3 + $0x28] sm:$0xff] %vm9860_vm0, %v695_v47 }
 0x136   : > { %v1620_v52 = vpop.permute.xlu1 %1619  ;;  %1508 = vst.msk [vmem:[#allocation3 + $0x170] sm:$0xff] %vm850_vm4, %v1428_v13  ;;  %v1237_v20 = vpop.permute.xlu2 %1236  ;;  %v1824_v24 = vld [vmem:[#allocation3 + $0x158] sm:$0xff] }
 0x137   : > { %1700 = vst.msk [vmem:[#allocation3 + $0x170] sm:$0xff] %vm1043_vm5, %v1620_v52  ;;  %2184 = vmatmul.f32.gmra.mxu1 %v1824_v24  ;;  %v1170_v13 = vld [vmem:[#allocation2 + $0x182] sm:$0xff] }
 0x138   : > { %1316 = vst.msk [vmem:[#allocation3 + $0x188] sm:$0xff] %vm657_vm3, %v1237_v20 }
 0x13b   : > { %1457 = vrot.lane.b32.xlu0 %v1363_v26, %s6093_s23 }
 0x13c   : > { %1649 = vrot.lane.b32.xlu1 %v1555_v17, %s6094_s24  ;;  %1260 = vrot.lane.b32.xlu2 %v1168_v33, %s6092_s22  ;;  %v885_v33 = vld [vmem:[#allocation2 + $0x30] sm:$0xff] }
 0x13d   : > { %v1430_v11 = vpop.permute.xlu0 %1429 }
 0x13e   : > { %v1622_v8 = vpop.permute.xlu1 %1621  ;;  %1509 = vst.msk [vmem:[#allocation3 + $0x188] sm:$0xff] %vm850_vm4, %v1430_v11  ;;  %v1239_v39 = vpop.permute.xlu2 %1238  ;;  %v1827_v41 = vld [vmem:[#allocation3 + $0x170] sm:$0xff]  ;;  %v697_v11 = vld [vmem:[#allocation2 + $0x52] sm:$0xff] }
 0x13f   : > { %1701 = vst.msk [vmem:[#allocation3 + $0x188] sm:$0xff] %vm1043_vm5, %v1622_v8  ;;  %2187 = vmatmul.f32.gmra.mxu1 %v1827_v41  ;;  %v6759_v27 = vpop.f32.mrf.mxu1  ;;  %v889_v8 = vld [vmem:[#allocation2 + $0x60] sm:$0xff] }
 0x140   : > { %1317 = vst.msk [vmem:[#allocation3 + $0x1a0] sm:$0xff] %vm657_vm3, %v1239_v39 }
 0x141   : > { %1752 = vst.msk [vmem:[#allocation3 + $0x58] sm:$0xff] %vm9860_vm0, %v697_v11 }
 0x142   : > { %473 = vst.msk [vmem:[#allocation3 + $0xc0] sm:$0xff] %vm9860_vm0, %v889_v8 }
 0x143   : > { %1459 = vrot.lane.b32.xlu0 %v1364_v42, %s6093_s23 }
 0x144   : > { %1651 = vrot.lane.b32.xlu1 %v1556_v45, %s6094_s24  ;;  %1262 = vrot.lane.b32.xlu2 %v1169_v55, %s6092_s22 }
 0x145   : > { %v1432_v34 = vpop.permute.xlu0 %1431 }
 0x146   : > { %v1624_v56 = vpop.permute.xlu1 %1623  ;;  %1510 = vst.msk [vmem:[#allocation3 + $0x1a0] sm:$0xff] %vm850_vm4, %v1432_v34  ;;  %v1241_v57 = vpop.permute.xlu2 %1240  ;;  %v1830_v63 = vld [vmem:[#allocation3 + $0x188] sm:$0xff] }
 0x147   : > { %1702 = vst.msk [vmem:[#allocation3 + $0x1a0] sm:$0xff] %vm1043_vm5, %v1624_v56  ;;  %2190 = vmatmul.f32.gmra.mxu1 %v1830_v63  ;;  %v886_v34 = vld [vmem:[#allocation2 + $0x38] sm:$0xff]  ;;  %v698_v56 = vld [vmem:[#allocation2 + $0x62] sm:$0xff] }
 0x148   : > { %1318 = vst.msk [vmem:[#allocation3 + $0x1b8] sm:$0xff] %vm657_vm3, %v1241_v57 }
 0x149   : > { %1753 = vst.msk [vmem:[#allocation3 + $0x70] sm:$0xff] %vm9860_vm0, %v698_v56 }
 0x14b   : > { %947 = vrot.lane.b32.xlu0 %v6427_v49, %s6094_s24  ;;  %v1171_v49 = vld [vmem:[#allocation2 + $0x18a] sm:$0xff] }
 0x14c   : > { %756 = vrot.lane.b32.xlu1 %v691_v7, %s6093_s23  ;;  %v6771_v52 = vpop.f32.mrf.mxu1  ;;  %1264 = vrot.lane.b32.xlu2 %v1170_v13, %s6092_s22 }
 0x14d   : > { %v1434_v20 = vpop.permute.xlu0 %1433 }
 0x14e   : > { %v1626_v24 = vpop.permute.xlu1 %1625  ;;  %1511 = vst.msk [vmem:[#allocation3 + $0x1b8] sm:$0xff] %vm850_vm4, %v1434_v20  ;;  %v1243_v26 = vpop.permute.xlu2 %1242  ;;  %v1833_v17 = vld [vmem:[#allocation3 + $0x1a0] sm:$0xff] }
 0x14f   : > { %1703 = vst.msk [vmem:[#allocation3 + $0x1b8] sm:$0xff] %vm1043_vm5, %v1626_v24  ;;  %2193 = vmatmul.f32.gmra.mxu1 %v1833_v17  ;;  %v888_v24 = vld [vmem:[#allocation2 + $0x50] sm:$0xff] }
 0x150   : > { %1319 = vst.msk [vmem:[#allocation3 + $0x1d0] sm:$0xff] %vm657_vm3, %v1243_v26  ;;  %v696_v26 = vld [vmem:[#allocation2 + $0x4a] sm:$0xff] }
 0x151   : > { %v699_v17 = vld [vmem:[#allocation2 + $0x6a] sm:$0xff]  ;;  %1751 = vst.msk [vmem:[#allocation3 + $0x40] sm:$0xff] %vm9860_vm0, %v696_v26 }
 0x152   : > { %1754 = vst.msk [vmem:[#allocation3 + $0x88] sm:$0xff] %vm9860_vm0, %v699_v17 }
 0x153   : > { %758 = vrot.lane.b32.xlu0 %v6356_v23, %s6093_s23  ;;  %v690_v23 = vld [vmem:[#allocation2 + $0x2] sm:$0xff] }
 0x154   : > { %951 = vrot.lane.b32.xlu1 %v885_v33, %s6094_s24  ;;  %v6782_v39 = vpop.f32.mrf.mxu1  ;;  %1266 = vrot.lane.b32.xlu2 %v1171_v49, %s6092_s22 }
 0x155   : > { %v1436_v41 = vpop.permute.xlu0 %1435 }
 0x156   : > { %v1628_v42 = vpop.permute.xlu1 %1627  ;;  %1512 = vst.msk [vmem:[#allocation3 + $0x1d0] sm:$0xff] %vm850_vm4, %v1436_v41  ;;  %v1245_v45 = vpop.permute.xlu2 %1244  ;;  %v1836_v55 = vld [vmem:[#allocation3 + $0x1b8] sm:$0xff] }
 0x157   : > { %1704 = vst.msk [vmem:[#allocation3 + $0x1d0] sm:$0xff] %vm1043_vm5, %v1628_v42  ;;  %2196 = vmatmul.f32.gmra.mxu1 %v1836_v55  ;;  %v693_v55 = vld [vmem:[#allocation2 + $0x22] sm:$0xff] }
 0x158   : > { %1320 = vst.msk [vmem:[#allocation3 + $0x1e8] sm:$0xff] %vm657_vm3, %v1245_v45  ;;  %v890_v45 = vld [vmem:[#allocation2 + $0x68] sm:$0xff] }
 0x159   : > { %474 = vst.msk [vmem:[#allocation3 + $0xd8] sm:$0xff] %vm9860_vm0, %v890_v45 }
 0x15b   : > { %953 = vrot.lane.b32.xlu0 %v886_v34, %s6094_s24 }
 0x15c   : > { %762 = vrot.lane.b32.xlu1 %v6381_v31, %s6093_s23  ;;  %v6792_v57 = vpop.f32.mrf.mxu1  ;;  %754 = vrot.lane.b32.xlu2 %v690_v23, %s6093_s23 }
 0x15d   : > { %v1438_v63 = vpop.permute.xlu0 %1437 }
 0x15e   : > { %v1630_v7 = vpop.permute.xlu1 %1629  ;;  %1513 = vst.msk [vmem:[#allocation3 + $0x1e8] sm:$0xff] %vm850_vm4, %v1438_v63  ;;  %v1247_v13 = vpop.permute.xlu2 %1246  ;;  %v1839_v20 = vld [vmem:[#allocation3 + $0x1d0] sm:$0xff] }
 0x15f   : > { %1705 = vst.msk [vmem:[#allocation3 + $0x1e8] sm:$0xff] %vm1043_vm5, %v1630_v7  ;;  %2199 = vmatmul.f32.gmra.mxu1 %v1839_v20  ;;  %v505_v20 = vld [vmem:[#allocation2 + $0x61] sm:$0xff] }
 0x160   : > { %1321 = vst.msk [vmem:[#allocation3 + $0x200] sm:$0xff] %vm657_vm3, %v1247_v13 }
 0x163   : > { %764 = vrot.lane.b32.xlu0 %v695_v47, %s6093_s23  ;;  %v1909_v47 = vld [vmem:[%s9814_s1 + $0x100] sm:$0xff] }
 0x164   : > { %957 = vrot.lane.b32.xlu1 %v888_v24, %s6094_s24  ;;  %v6802_v31 = vpop.f32.mrf.mxu1  ;;  %949 = vrot.lane.b32.xlu2 %v6457_v60, %s6094_s24  ;;  %v700_v60 = vld [vmem:[#allocation2 + $0x7a] sm:$0xff] }
 0x165   : > { %v1440_v33 = vpop.permute.xlu0 %1439  ;;  %2254 = vmatpush.msrb.mxu1 %v1909_v47  ;;  %5942 = vmatpush.msra.mxu2 %v1909_v47  ;;  %1755 = vst.msk [vmem:[#allocation3 + $0xa0] sm:$0xff] %vm9860_vm0, %v700_v60  ;;  %v6822_v24 = vld [vmem:[#allocation2 + $0x78] sm:$0xff] }
 0x166   : > { %v1632_v49 = vpop.permute.xlu1 %1631  ;;  %1514 = vst.msk [vmem:[#allocation3 + $0x200] sm:$0xff] %vm850_vm4, %v1440_v33  ;;  %v1249_v41 = vpop.permute.xlu2 %1248  ;;  %v1842_v42 = vld [vmem:[#allocation3 + $0x1e8] sm:$0xff] }
 0x167   : > { %1706 = vst.msk [vmem:[#allocation3 + $0x200] sm:$0xff] %vm1043_vm5, %v1632_v49  ;;  %2202 = vmatmul.f32.gmra.mxu1 %v1842_v42 }
 0x168   : > { %1322 = vst.msk [vmem:[#allocation3 + $0x218] sm:$0xff] %vm657_vm3, %v1249_v41 }
 0x169   : > { %475 = vst.msk [vmem:[#allocation3 + $0xf0] sm:$0xff] %vm9860_vm0, %v6822_v24 }
 0x16b   : > { %959 = vrot.lane.b32.xlu0 %v889_v8, %s6094_s24  ;;  %v887_v8 = vld [vmem:[#allocation2 + $0x48] sm:$0xff] }
 0x16c   : > { %768 = vrot.lane.b32.xlu1 %v697_v11, %s6093_s23  ;;  %v6816_v34 = vpop.f32.mrf.mxu1  ;;  %760 = vrot.lane.b32.xlu2 %v693_v55, %s6093_s23  ;;  %v701_v11 = vld [vmem:[#allocation2 + $0x82] sm:$0xff] }
 0x16d   : > { %v1442_v23 = vpop.permute.xlu0 %1441  ;;  %1756 = vst.msk [vmem:[#allocation3 + $0xb8] sm:$0xff] %vm9860_vm0, %v701_v11  ;;  %v506_v55 = vld [vmem:[#allocation2 + $0x69] sm:$0xff] }
 0x16e   : > { %v1634_v63 = vpop.permute.xlu1 %1633  ;;  %1515 = vst.msk [vmem:[#allocation3 + $0x218] sm:$0xff] %vm850_vm4, %v1442_v23  ;;  %v1251_v7 = vpop.permute.xlu2 %1250  ;;  %v1845_v13 = vld [vmem:[#allocation3 + $0x200] sm:$0xff]  ;;  %v6835_v23 = vld [vmem:[#allocation2 + $0x80] sm:$0xff] }
 0x16f   : > { %1707 = vst.msk [vmem:[#allocation3 + $0x218] sm:$0xff] %vm1043_vm5, %v1634_v63  ;;  %2205 = vmatmul.f32.gmra.mxu1 %v1845_v13  ;;  %v6837_v63 = vld [vmem:[#allocation2 + $0x92] sm:$0xff] }
 0x170   : > { %1323 = vst.msk [vmem:[#allocation3 + $0x230] sm:$0xff] %vm657_vm3, %v1251_v7 }
 0x171   : > { %476 = vst.msk [vmem:[#allocation3 + $0x108] sm:$0xff] %vm9860_vm0, %v6835_v23 }
 0x172   : > { %1757 = vst.msk [vmem:[#allocation3 + $0xd0] sm:$0xff] %vm9860_vm0, %v6837_v63 }
 0x173   : > { %577 = vrot.lane.b32.xlu0 %v505_v20, %s6092_s22 }
 0x174   : > { %770 = vrot.lane.b32.xlu1 %v698_v56, %s6093_s23  ;;  %v6829_v33 = vpop.f32.mrf.mxu1  ;;  %955 = vrot.lane.b32.xlu2 %v887_v8, %s6094_s24 }
 0x175   : > { %v1444_v49 = vpop.permute.xlu0 %1443 }
 0x176   : > { %v1636_v41 = vpop.permute.xlu1 %1635  ;;  %1516 = vst.msk [vmem:[#allocation3 + $0x230] sm:$0xff] %vm850_vm4, %v1444_v49  ;;  %v1253_v42 = vpop.permute.xlu2 %1252  ;;  %v1848_v47 = vld [vmem:[#allocation3 + $0x218] sm:$0xff]  ;;  %v507_v49 = vld [vmem:[#allocation2 + $0x79] sm:$0xff] }
 0x177   : > { %1708 = vst.msk [vmem:[#allocation3 + $0x230] sm:$0xff] %vm1043_vm5, %v1636_v41  ;;  %2208 = vmatmul.f32.gmra.mxu1 %v1848_v47  ;;  %v6851_v41 = vld [vmem:[#allocation2 + $0x9a] sm:$0xff] }
 0x178   : > { %1324 = vst.msk [vmem:[#allocation3 + $0x248] sm:$0xff] %vm657_vm3, %v1253_v42  ;;  %v6853_v42 = vld [vmem:[#allocation2 + $0x90] sm:$0xff] }
 0x179   : > { %1758 = vst.msk [vmem:[#allocation3 + $0xe8] sm:$0xff] %vm9860_vm0, %v6851_v41 }
 0x17a   : > { %477 = vst.msk [vmem:[#allocation3 + $0x120] sm:$0xff] %vm9860_vm0, %v6853_v42 }
 0x17b   : > { %579 = vrot.lane.b32.xlu0 %v506_v55, %s6092_s22 }
 0x17c   : > { %772 = vrot.lane.b32.xlu1 %v699_v17, %s6093_s23  ;;  %v6845_v56 = vpop.f32.mrf.mxu1  ;;  %766 = vrot.lane.b32.xlu2 %v696_v26, %s6093_s23 }
 0x17d   : > { %v1446_v7 = vpop.permute.xlu0 %1445 }
 0x17e   : > { %v1638_v13 = vpop.permute.xlu1 %1637  ;;  %1517 = vst.msk [vmem:[#allocation3 + $0x248] sm:$0xff] %vm850_vm4, %v1446_v7  ;;  %v1255_v20 = vpop.permute.xlu2 %1254  ;;  %v1851_v8 = vld [vmem:[#allocation3 + $0x230] sm:$0xff] }
 0x17f   : > { %1709 = vst.msk [vmem:[#allocation3 + $0x248] sm:$0xff] %vm1043_vm5, %v1638_v13  ;;  %2211 = vmatmul.f32.gmra.mxu1 %v1851_v8  ;;  %v1892_v13 = vld [vmem:[%s9814_s1 + $0x78] sm:$0xff]  ;;  %v1890_v8 = vld [vmem:[%s9814_s1 + $0x68] sm:$0xff] }
 0x180   : > { %1325 = vst.msk [vmem:[#allocation3 + $0x260] sm:$0xff] %vm657_vm3, %v1255_v20  ;;  %v1891_v20 = vld [vmem:[%s9814_s1 + $0x70] sm:$0xff]  ;;  %2013 = vmatpush.msra.mxu0 %v1892_v13  ;;  %5923 = vmatpush.msra.mxu3 %v1892_v13 }
 0x182   : > { %2014 = vmatpush.msra.mxu0 %v1891_v20  ;;  %5924 = vmatpush.msra.mxu3 %v1891_v20  ;;  %v509_v20 = vld [vmem:[#allocation2 + $0x91] sm:$0xff] }
 0x183   : > { %581 = vrot.lane.b32.xlu0 %v507_v49, %s6092_s22  ;;  %v1889_v49 = vld [vmem:[%s9814_s1 + $0x60] sm:$0xff] }
 0x184   : > { %774 = vrot.lane.b32.xlu1 %v700_v60, %s6093_s23  ;;  %v6861_v26 = vpop.f32.mrf.mxu1  ;;  %961 = vrot.lane.b32.xlu2 %v890_v45, %s6094_s24  ;;  %v508_v45 = vld [vmem:[#allocation2 + $0x81] sm:$0xff]  ;;  %v6873_v60 = vld [vmem:[#allocation2 + $0x98] sm:$0xff] }
 0x185   : > { %v1448_v17 = vpop.permute.xlu0 %1447  ;;  %478 = vst.msk [vmem:[#allocation3 + $0x138] sm:$0xff] %vm9860_vm0, %v6873_v60  ;;  %2015 = vmatpush.msra.mxu0 %v1890_v8  ;;  %5925 = vmatpush.msra.mxu3 %v1890_v8  ;;  %v6900_v8 = vld [vmem:[#allocation2 + $0xa8] sm:$0xff] }
 0x186   : > { %v1640_v47 = vpop.permute.xlu1 %1639  ;;  %1518 = vst.msk [vmem:[#allocation3 + $0x260] sm:$0xff] %vm850_vm4, %v1448_v17  ;;  %v1257_v55 = vpop.permute.xlu2 %1256  ;;  %v1854_v7 = vld [vmem:[#allocation3 + $0x248] sm:$0xff] }
 0x187   : > { %1710 = vst.msk [vmem:[#allocation3 + $0x260] sm:$0xff] %vm1043_vm5, %v1640_v47  ;;  %2214 = vmatmul.f32.gmra.mxu1 %v1854_v7  ;;  %2016 = vmatpush.msra.mxu0 %v1889_v49 }
 0x188   : > { %1326 = vst.msk [vmem:[#allocation3 + $0x278] sm:$0xff] %vm657_vm3, %v1257_v55  ;;  %5926 = vmatpush.msra.mxu3 %v1889_v49  ;;  %v1885_v49 = vld [vmem:[%s9814_s1 + $0x40] sm:$0xff] }
 0x189   : > { %479 = vst.msk [vmem:[#allocation3 + $0x150] sm:$0xff] %vm9860_vm0, %v6900_v8 }
 0x18b   : > { %583 = vrot.lane.b32.xlu0 %v508_v45, %s6092_s22  ;;  %v6898_v45 = vld [vmem:[#allocation2 + $0xaa] sm:$0xff] }
 0x18c   : > { %776 = vrot.lane.b32.xlu1 %v701_v11, %s6093_s23  ;;  %v6885_v17 = vpop.f32.mrf.mxu1  ;;  %963 = vrot.lane.b32.xlu2 %v6822_v24, %s6094_s24  ;;  %v1888_v11 = vld [vmem:[%s9814_s1 + $0x58] sm:$0xff]  ;;  %v1887_v24 = vld [vmem:[%s9814_s1 + $0x50] sm:$0xff]  ;;  %1759 = vst.msk [vmem:[#allocation3 + $0x100] sm:$0xff] %vm9860_vm0, %v6898_v45 }
 0x18d   : > { %v1450_v47 = vpop.permute.xlu0 %1449  ;;  %2017 = vmatpush.msra.mxu0 %v1888_v11  ;;  %5927 = vmatpush.msra.mxu3 %v1888_v11 }
 0x18e   : > { %v1642_v55 = vpop.permute.xlu1 %1641  ;;  %1519 = vst.msk [vmem:[#allocation3 + $0x278] sm:$0xff] %vm850_vm4, %v1450_v47  ;;  %v1259_v7 = vpop.permute.xlu2 %1258  ;;  %v1857_v13 = vld [vmem:[#allocation3 + $0x260] sm:$0xff]  ;;  %v1886_v47 = vld [vmem:[%s9814_s1 + $0x48] sm:$0xff] }
 0x18f   : > { %1711 = vst.msk [vmem:[#allocation3 + $0x278] sm:$0xff] %vm1043_vm5, %v1642_v55  ;;  %2217 = vmatmul.f32.gmra.mxu1 %v1857_v13  ;;  %2018 = vmatpush.msra.mxu0 %v1887_v24 }
 0x190   : > { %1327 = vst.msk [vmem:[#allocation3 + $0x290] sm:$0xff] %vm657_vm3, %v1259_v7  ;;  %5928 = vmatpush.msra.mxu3 %v1887_v24  ;;  %v510_v24 = vld [vmem:[#allocation2 + $0x99] sm:$0xff] }
 0x191   : > { %2019 = vmatpush.msra.mxu0 %v1886_v47 }
 0x192   : > { %5929 = vmatpush.msra.mxu3 %v1886_v47  ;;  %v1881_v47 = vld [vmem:[%s9814_s1 + $0x20] sm:$0xff] }
 0x193   : > { %585 = vrot.lane.b32.xlu0 %v509_v20, %s6092_s22  ;;  %2020 = vmatpush.msra.mxu0 %v1885_v49 }
 0x194   : > { %778 = vrot.lane.b32.xlu1 %v6837_v63, %s6093_s23  ;;  %v6915_v55 = vpop.f32.mrf.mxu1  ;;  %965 = vrot.lane.b32.xlu2 %v6835_v23, %s6094_s24  ;;  %v1884_v63 = vld [vmem:[%s9814_s1 + $0x38] sm:$0xff]  ;;  %v1883_v23 = vld [vmem:[%s9814_s1 + $0x30] sm:$0xff] }
 0x195   : > { %v1452_v7 = vpop.permute.xlu0 %1451  ;;  %2021 = vmatpush.msra.mxu0 %v1884_v63  ;;  %5930 = vmatpush.msra.mxu3 %v1885_v49 }
 0x196   : > { %v1644_v13 = vpop.permute.xlu1 %1643  ;;  %1520 = vst.msk [vmem:[#allocation3 + $0x290] sm:$0xff] %vm850_vm4, %v1452_v7  ;;  %v1261_v11 = vpop.permute.xlu2 %1260  ;;  %v1860_v20 = vld [vmem:[#allocation3 + $0x278] sm:$0xff]  ;;  %v6928_v7 = vld [vmem:[#allocation2 + $0xb0] sm:$0xff] }
 0x197   : > { %1712 = vst.msk [vmem:[#allocation3 + $0x290] sm:$0xff] %vm1043_vm5, %v1644_v13  ;;  %2220 = vmatmul.f32.gmra.mxu1 %v1860_v20  ;;  %2022 = vmatpush.msra.mxu0 %v1883_v23 }
 0x198   : > { %1328 = vst.msk [vmem:[#allocation3 + $0x2a8] sm:$0xff] %vm657_vm3, %v1261_v11  ;;  %5931 = vmatpush.msra.mxu3 %v1884_v63  ;;  %v6954_v63 = vld [vmem:[#allocation2 + $0xb2] sm:$0xff] }
 0x199   : > { %480 = vst.msk [vmem:[#allocation3 + $0x168] sm:$0xff] %vm9860_vm0, %v6928_v7  ;;  %2023 = vmatpush.msra.mxu0 %v1882_v0 }
 0x19a   : > { %5932 = vmatpush.msra.mxu3 %v1883_v23  ;;  %1760 = vst.msk [vmem:[#allocation3 + $0x118] sm:$0xff] %vm9860_vm0, %v6954_v63  ;;  %v1877_v23 = vld [vmem:[%s9814_s1] sm:$0xff] }
 0x19b   : > { %587 = vrot.lane.b32.xlu0 %v510_v24, %s6092_s22  ;;  %2024 = vmatpush.msra.mxu0 %v1881_v47 }
 0x19c   : > { %780 = vrot.lane.b32.xlu1 %v6851_v41, %s6093_s23  ;;  %v6941_v13 = vpop.f32.mrf.mxu1  ;;  %967 = vrot.lane.b32.xlu2 %v6853_v42, %s6094_s24  ;;  %v1880_v41 = vld [vmem:[%s9814_s1 + $0x18] sm:$0xff]  ;;  %v1879_v42 = vld [vmem:[%s9814_s1 + $0x10] sm:$0xff] }
 0x19d   : > { %v1454_v49 = vpop.permute.xlu0 %1453  ;;  %2025 = vmatpush.msra.mxu0 %v1880_v41  ;;  %5933 = vmatpush.msra.mxu3 %v1882_v0 }
 0x19e   : > { %v1646_v11 = vpop.permute.xlu1 %1645  ;;  %1521 = vst.msk [vmem:[#allocation3 + $0x2a8] sm:$0xff] %vm850_vm4, %v1454_v49  ;;  %v1263_v20 = vpop.permute.xlu2 %1262  ;;  %v1863_v24 = vld [vmem:[#allocation3 + $0x290] sm:$0xff]  ;;  %v6956_v49 = vld [vmem:[#allocation2 + $0x108] sm:$0xff] }
 0x19f   : > { %1713 = vst.msk [vmem:[#allocation3 + $0x2a8] sm:$0xff] %vm1043_vm5, %v1646_v11  ;;  %2223 = vmatmul.f32.gmra.mxu1 %v1863_v24  ;;  %2026 = vmatpush.msra.mxu0 %v1879_v42  ;;  %v1717_v11 = vld [vmem:[#allocation2 + $0x32] sm:$0xff] }
 0x1a0   : > { %1329 = vst.msk [vmem:[#allocation3 + $0x2c0] sm:$0xff] %vm657_vm3, %v1263_v20  ;;  %5934 = vmatpush.msra.mxu3 %v1881_v47 }
 0x1a1   : > { %487 = vst.msk [vmem:[#allocation3 + $0x210] sm:$0xff] %vm9860_vm0, %v6956_v49  ;;  %2027 = vmatpush.msra.mxu0 %v1878_v9 }
 0x1a2   : > { %1749 = vst.msk [vmem:[#allocation3 + $0x10] sm:$0xff] %vm9860_vm0, %v1717_v11  ;;  %5935 = vmatpush.msra.mxu3 %v1880_v41 }
 0x1a3   : > { %601 = vrot.lane.b32.xlu0 %v6551_v48, %s6092_s22  ;;  %2028 = vmatpush.msra.mxu0 %v1877_v23 }
 0x1a4   : > { %794 = vrot.lane.b32.xlu1 %v6643_v18, %s6093_s23  ;;  %v6972_v20 = vpop.f32.mrf.mxu1  ;;  %969 = vrot.lane.b32.xlu2 %v6873_v60, %s6094_s24 }
 0x1a5   : > { %v1456_v0 = vpop.permute.xlu0 %1455  ;;  %5936 = vmatpush.msra.mxu3 %v1879_v42  ;;  %v1810_v42 = vld [vmem:[#allocation3 + $0xe8] sm:$0xff] }
 0x1a6   : > { %v1648_v24 = vpop.permute.xlu1 %1647  ;;  %1522 = vst.msk [vmem:[#allocation3 + $0x2c0] sm:$0xff] %vm850_vm4, %v1456_v0  ;;  %v1265_v48 = vpop.permute.xlu2 %1264  ;;  %v1866_v18 = vld [vmem:[#allocation3 + $0x2a8] sm:$0xff]  ;;  %5798 = vmatmul.msk.f32.vlgmr.msra.gmra.mxu2 %vm9860_vm0, %v1810_v42  ;;  %v1816_v42 = vld [vmem:[#allocation3 + $0x118] sm:$0xff] }
 0x1a7   : > { %1714 = vst.msk [vmem:[#allocation3 + $0x2c0] sm:$0xff] %vm1043_vm5, %v1648_v24  ;;  %2226 = vmatmul.f32.gmra.mxu1 %v1866_v18  ;;  %5937 = vmatpush.msra.mxu3 %v1878_v9  ;;  %v1813_v18 = vld [vmem:[#allocation3 + $0x100] sm:$0xff] }
 0x1a8   : > { %1330 = vst.msk [vmem:[#allocation3 + $0x2d8] sm:$0xff] %vm657_vm3, %v1265_v48 }
 0x1a9   : > { %5938 = vmatpush.msra.mxu3 %v1877_v23 }
 0x1ab   : > { %589 = vrot.lane.b32.xlu0 %v511_v38, %s6092_s22  ;;  %v706_v38 = vld [vmem:[#allocation2 + $0xc2] sm:$0xff] }
 0x1ac   : > { %782 = vrot.lane.b32.xlu1 %v6898_v45, %s6093_s23  ;;  %v6984_v60 = vpop.f32.mrf.mxu1  ;;  %971 = vrot.lane.b32.xlu2 %v6900_v8, %s6094_s24  ;;  %v6992_v45 = vld [vmem:[#allocation2 + $0x110] sm:$0xff]  ;;  %1761 = vst.msk [vmem:[#allocation3 + $0x130] sm:$0xff] %vm9860_vm0, %v706_v38 }
 0x1ad   : > { %v1458_v47 = vpop.permute.xlu0 %1457  ;;  %488 = vst.msk [vmem:[#allocation3 + $0x228] sm:$0xff] %vm9860_vm0, %v6992_v45 }
 0x1ae   : > { %v1650_v41 = vpop.permute.xlu1 %1649  ;;  %1523 = vst.msk [vmem:[#allocation3 + $0x2d8] sm:$0xff] %vm850_vm4, %v1458_v47  ;;  %v1267_v11 = vpop.permute.xlu2 %1266  ;;  %v1869_v0 = vld [vmem:[#allocation3 + $0x2c0] sm:$0xff]  ;;  %5799 = vmatmul.msk.f32.gmra.mxu2 %vm9860_vm0, %v1813_v18 }
 0x1af   : > { %1715 = vst.msk [vmem:[#allocation3 + $0x2d8] sm:$0xff] %vm1043_vm5, %v1650_v41  ;;  %2229 = vmatmul.f32.gmra.mxu1 %v1869_v0 }
 0x1b0   : > { %1331 = vst.msk [vmem:[#allocation3 + $0x2f0] sm:$0xff] %vm657_vm3, %v1267_v11 }
 0x1b3   : > { %603 = vrot.lane.b32.xlu0 %v6567_v59, %s6092_s22  ;;  %v512_v59 = vld [vmem:[#allocation2 + $0xb1] sm:$0xff] }
 0x1b4   : > { %796 = vrot.lane.b32.xlu1 %v6661_v35, %s6093_s23  ;;  %v7001_v9 = vpop.f32.mrf.mxu1  ;;  %973 = vrot.lane.b32.xlu2 %v6928_v7, %s6094_s24  ;;  %v7009_v35 = vld [vmem:[#allocation2 + $0xc8] sm:$0xff] }
 0x1b5   : > { %v1460_v8 = vpop.permute.xlu0 %1459  ;;  %482 = vst.msk [vmem:[#allocation3 + $0x198] sm:$0xff] %vm9860_vm0, %v7009_v35 }
 0x1b6   : > { %v1652_v23 = vpop.permute.xlu1 %1651  ;;  %1524 = vst.msk [vmem:[#allocation3 + $0x2f0] sm:$0xff] %vm850_vm4, %v1460_v8  ;;  %v755_v24 = vpop.permute.xlu2 %754  ;;  %v1872_v48 = vld [vmem:[#allocation3 + $0x2d8] sm:$0xff]  ;;  %5800 = vmatmul.msk.f32.gmra.mxu2 %vm9860_vm0, %v1816_v42 }
 0x1b7   : > { %1716 = vst.msk [vmem:[#allocation3 + $0x2f0] sm:$0xff] %vm1043_vm5, %v1652_v23  ;;  %2232 = vmatmul.f32.gmra.mxu1 %v1872_v48  ;;  %v7024_v8 = vld [vmem:[#allocation2 + $0xca] sm:$0xff]  ;;  %v7026_v23 = vld [vmem:[#allocation2 + $0x120] sm:$0xff] }
 0x1b8   : > { %851 = vst.msk [vmem:[#allocation3] sm:$0xff] %vm850_vm4, %v755_v24  ;;  %v1783_v24 = vld [vmem:[#allocation3 + $0x10] sm:$0xff] }
 0x1b9   : > { %1762 = vst.msk [vmem:[#allocation3 + $0x148] sm:$0xff] %vm9860_vm0, %v7024_v8 }
 0x1ba   : > { %489 = vst.msk [vmem:[#allocation3 + $0x240] sm:$0xff] %vm9860_vm0, %v7026_v23 }
 0x1bb   : > { %591 = vrot.lane.b32.xlu0 %v512_v59, %s6092_s22 }
 0x1bc   : > { %784 = vrot.lane.b32.xlu1 %v6954_v63, %s6093_s23  ;;  %v7016_v7 = vpop.f32.mrf.mxu1  ;;  %987 = vrot.lane.b32.xlu2 %v6956_v49, %s6094_s24  ;;  %v519_v63 = vld [vmem:[#allocation2 + $0x109] sm:$0xff] }
 0x1bd   : > { %v948_v47 = vpop.permute.xlu0 %947 }
 0x1be   : > { %v757_v41 = vpop.permute.xlu1 %756  ;;  %1044 = vst.msk [vmem:[#allocation3] sm:$0xff] %vm1043_vm5, %v948_v47  ;;  %v950_v11 = vpop.permute.xlu2 %949  ;;  %v1875_v0 = vld [vmem:[#allocation3 + $0x2f0] sm:$0xff] }
 0x1bf   : > { %852 = vst.msk [vmem:[#allocation3 + $0x18] sm:$0xff] %vm850_vm4, %v757_v41  ;;  %2235 = vmatmul.f32.gmra.mxu1 %v1875_v0  ;;  %v1819_v41 = vld [vmem:[#allocation3 + $0x130] sm:$0xff] }
 0x1c0   : > { %1045 = vst.msk [vmem:[#allocation3 + $0x18] sm:$0xff] %vm1043_vm5, %v950_v11  ;;  %5801 = vmatmul.msk.f32.gmra.mxu2 %vm9860_vm0, %v1819_v41  ;;  %v7043_v11 = vld [vmem:[#allocation2 + $0x122] sm:$0xff] }
 0x1c1   : > { %1769 = vst.msk [vmem:[#allocation3 + $0x1f0] sm:$0xff] %vm9860_vm0, %v7043_v11 }
 0x1c3   : > { %605 = vrot.lane.b32.xlu0 %v519_v63, %s6092_s22  ;;  %v1786_v63 = vld [vmem:[#allocation3 + $0x28] sm:$0xff] }
 0x1c4   : > { %798 = vrot.lane.b32.xlu1 %v6676_v46, %s6093_s23  ;;  %v7035_v49 = vpop.f32.mrf.mxu1  ;;  %975 = vrot.lane.b32.xlu2 %v897_v30, %s6094_s24  ;;  %v513_v46 = vld [vmem:[#allocation2 + $0xc1] sm:$0xff]  ;;  %v7045_v30 = vld [vmem:[#allocation2 + $0xd8] sm:$0xff] }
 0x1c5   : > { %v1781_v48 = vld [vmem:[#allocation3] sm:$0xff]  ;;  %v759_v18 = vpop.permute.xlu0 %758  ;;  %483 = vst.msk [vmem:[#allocation3 + $0x1b0] sm:$0xff] %vm9860_vm0, %v7045_v30 }
 0x1c6   : > { %v952_v59 = vpop.permute.xlu1 %951  ;;  %2029 = vmatmul.f32.vlgmr.msra.gmra.mxu0 %v1781_v48  ;;  %853 = vst.msk [vmem:[#allocation3 + $0x30] sm:$0xff] %vm850_vm4, %v759_v18  ;;  %v761_v47 = vpop.permute.xlu2 %760 }
 0x1c7   : > { %1046 = vst.msk [vmem:[#allocation3 + $0x30] sm:$0xff] %vm1043_vm5, %v952_v59  ;;  %5789 = vmatmul.msk.f32.vlgmr.msrb.gmra.mxu1 %vm9860_vm0, %v1783_v24  ;;  %v1784_v0 = vld [vmem:[#allocation3 + $0x18] sm:$0xff]  ;;  %v1822_v59 = vld [vmem:[#allocation3 + $0x148] sm:$0xff] }
 0x1c8   : > { %854 = vst.msk [vmem:[#allocation3 + $0x48] sm:$0xff] %vm850_vm4, %v761_v47  ;;  %5802 = vmatmul.msk.f32.gmra.mxu2 %vm9860_vm0, %v1822_v59  ;;  %v520_v47 = vld [vmem:[#allocation2 + $0x111] sm:$0xff]  ;;  %v7081_v59 = vld [vmem:[#allocation2 + $0xe2] sm:$0xff] }
 0x1c9   : > { %1764 = vst.msk [vmem:[#allocation3 + $0x178] sm:$0xff] %vm9860_vm0, %v7081_v59 }
 0x1cb   : > { %593 = vrot.lane.b32.xlu0 %v513_v46, %s6092_s22 }
 0x1cc   : > { %786 = vrot.lane.b32.xlu1 %v706_v38, %s6093_s23  ;;  %v7053_v42 = vpop.f32.mrf.mxu1  ;;  %989 = vrot.lane.b32.xlu2 %v6992_v45, %s6094_s24  ;;  %v7061_v38 = vld [vmem:[#allocation2 + $0xda] sm:$0xff]  ;;  %v7064_v45 = vld [vmem:[#allocation2 + $0x128] sm:$0xff] }
 0x1cd   : > { %v954_v24 = vpop.permute.xlu0 %953  ;;  %1763 = vst.msk [vmem:[#allocation3 + $0x160] sm:$0xff] %vm9860_vm0, %v7061_v38 }
 0x1ce   : > { %v763_v48 = vpop.permute.xlu1 %762  ;;  %2032 = vmatmul.f32.gmra.mxu0 %v1784_v0  ;;  %1047 = vst.msk [vmem:[#allocation3 + $0x48] sm:$0xff] %vm1043_vm5, %v954_v24  ;;  %v956_v18 = vpop.permute.xlu2 %955  ;;  %v1787_v41 = vld [vmem:[#allocation3 + $0x30] sm:$0xff]  ;;  %v1789_v0 = vld [vmem:[#allocation3 + $0x40] sm:$0xff] }
 0x1cf   : > { %855 = vst.msk [vmem:[#allocation3 + $0x60] sm:$0xff] %vm850_vm4, %v763_v48  ;;  %5790 = vmatmul.msk.f32.gmra.mxu1 %vm9860_vm0, %v1786_v63 }
 0x1d0   : > { %1048 = vst.msk [vmem:[#allocation3 + $0x60] sm:$0xff] %vm1043_vm5, %v956_v18  ;;  %v514_v18 = vld [vmem:[#allocation2 + $0xc9] sm:$0xff] }
 0x1d1   : > { %490 = vst.msk [vmem:[#allocation3 + $0x258] sm:$0xff] %vm9860_vm0, %v7064_v45 }
 0x1d3   : > { %607 = vrot.lane.b32.xlu0 %v520_v47, %s6092_s22  ;;  %v7088_v47 = vld [vmem:[#allocation2 + $0xe0] sm:$0xff] }
 0x1d4   : > { %800 = vrot.lane.b32.xlu1 %v6691_v58, %s6093_s23  ;;  %v7073_v46 = vpop.f32.mrf.mxu1  ;;  %977 = vrot.lane.b32.xlu2 %v7009_v35, %s6094_s24  ;;  %v1825_v58 = vld [vmem:[#allocation3 + $0x160] sm:$0xff]  ;;  %484 = vst.msk [vmem:[#allocation3 + $0x1c8] sm:$0xff] %vm9860_vm0, %v7088_v47 }
 0x1d5   : > { %v765_v63 = vpop.permute.xlu0 %764  ;;  %5803 = vmatmul.msk.f32.gmra.mxu2 %vm9860_vm0, %v1825_v58  ;;  %v7084_v35 = vld [vmem:[#allocation2 + $0x12a] sm:$0xff] }
 0x1d6   : > { %v958_v24 = vpop.permute.xlu1 %957  ;;  %2035 = vmatmul.f32.gmra.mxu0 %v1787_v41  ;;  %856 = vst.msk [vmem:[#allocation3 + $0x78] sm:$0xff] %vm850_vm4, %v765_v63  ;;  %v767_v48 = vpop.permute.xlu2 %766  ;;  %v1790_v41 = vld [vmem:[#allocation3 + $0x48] sm:$0xff]  ;;  %v1792_v63 = vld [vmem:[#allocation3 + $0x58] sm:$0xff] }
 0x1d7   : > { %1049 = vst.msk [vmem:[#allocation3 + $0x78] sm:$0xff] %vm1043_vm5, %v958_v24  ;;  %5791 = vmatmul.msk.f32.gmra.mxu1 %vm9860_vm0, %v1789_v0 }
 0x1d8   : > { %857 = vst.msk [vmem:[#allocation3 + $0x90] sm:$0xff] %vm850_vm4, %v767_v48 }
 0x1d9   : > { %1770 = vst.msk [vmem:[#allocation3 + $0x208] sm:$0xff] %vm9860_vm0, %v7084_v35 }
 0x1db   : > { %595 = vrot.lane.b32.xlu0 %v514_v18, %s6092_s22  ;;  %v1828_v18 = vld [vmem:[#allocation3 + $0x178] sm:$0xff] }
 0x1dc   : > { %788 = vrot.lane.b32.xlu1 %v7024_v8, %s6093_s23  ;;  %v7097_v0 = vpop.f32.mrf.mxu1  ;;  %991 = vrot.lane.b32.xlu2 %v7026_v23, %s6094_s24  ;;  %v521_v8 = vld [vmem:[#allocation2 + $0x121] sm:$0xff]  ;;  %v1793_v23 = vld [vmem:[#allocation3 + $0x60] sm:$0xff] }
 0x1dd   : > { %v960_v24 = vpop.permute.xlu0 %959  ;;  %5804 = vmatmul.msk.f32.gmra.mxu2 %vm9860_vm0, %v1828_v18  ;;  %v7123_v18 = vld [vmem:[#allocation2 + $0xf0] sm:$0xff] }
 0x1de   : > { %v769_v48 = vpop.permute.xlu1 %768  ;;  %2038 = vmatmul.f32.gmra.mxu0 %v1790_v41  ;;  %1050 = vst.msk [vmem:[#allocation3 + $0x90] sm:$0xff] %vm1043_vm5, %v960_v24  ;;  %v962_v58 = vpop.permute.xlu2 %961 }
 0x1df   : > { %858 = vst.msk [vmem:[#allocation3 + $0xa8] sm:$0xff] %vm850_vm4, %v769_v48  ;;  %5792 = vmatmul.msk.f32.gmra.mxu1 %vm9860_vm0, %v1792_v63  ;;  %v1795_v63 = vld [vmem:[#allocation3 + $0x70] sm:$0xff] }
 0x1e0   : > { %1051 = vst.msk [vmem:[#allocation3 + $0xa8] sm:$0xff] %vm1043_vm5, %v962_v58  ;;  %v515_v58 = vld [vmem:[#allocation2 + $0xd9] sm:$0xff] }
 0x1e1   : > { %485 = vst.msk [vmem:[#allocation3 + $0x1e0] sm:$0xff] %vm9860_vm0, %v7123_v18 }
 0x1e3   : > { %609 = vrot.lane.b32.xlu0 %v521_v8, %s6092_s22  ;;  %v1734_v8 = vld [vmem:[#allocation2 + $0xfa] sm:$0xff] }
 0x1e4   : > { %802 = vrot.lane.b32.xlu1 %v7043_v11, %s6093_s23  ;;  %v7114_v41 = vpop.f32.mrf.mxu1  ;;  %979 = vrot.lane.b32.xlu2 %v7045_v30, %s6094_s24  ;;  %v1831_v11 = vld [vmem:[#allocation3 + $0x190] sm:$0xff]  ;;  %1766 = vst.msk [vmem:[#allocation3 + $0x1a8] sm:$0xff] %vm9860_vm0, %v1734_v8  ;;  %v1735_v8 = vld [vmem:[#allocation2 + $0x10a] sm:$0xff] }
 0x1e5   : > { %v578_v24 = vpop.permute.xlu0 %577  ;;  %5805 = vmatmul.msk.f32.gmra.mxu2 %vm9860_vm0, %v1831_v11  ;;  %v7126_v30 = vld [vmem:[#allocation2 + $0x13a] sm:$0xff]  ;;  %1767 = vst.msk [vmem:[#allocation3 + $0x1c0] sm:$0xff] %vm9860_vm0, %v1735_v8  ;;  %v1736_v8 = vld [vmem:[#allocation2 + $0x112] sm:$0xff] }
 0x1e6   : > { %v771_v48 = vpop.permute.xlu1 %770  ;;  %2041 = vmatmul.f32.gmra.mxu0 %v1793_v23  ;;  %666 = vst.msk [vmem:[#allocation3 + $0xc0] sm:$0xff] %vm657_vm3, %v578_v24  ;;  %v964_v51 = vpop.permute.xlu2 %963  ;;  %v1796_v23 = vld [vmem:[#allocation3 + $0x78] sm:$0xff]  ;;  %v1798_v24 = vld [vmem:[#allocation3 + $0x88] sm:$0xff] }
 0x1e7   : > { %859 = vst.msk [vmem:[#allocation3 + $0xc0] sm:$0xff] %vm850_vm4, %v771_v48  ;;  %5793 = vmatmul.msk.f32.gmra.mxu1 %vm9860_vm0, %v1795_v63 }
 0x1e8   : > { %1052 = vst.msk [vmem:[#allocation3 + $0xc0] sm:$0xff] %vm1043_vm5, %v964_v51 }
 0x1e9   : > { %1771 = vst.msk [vmem:[#allocation3 + $0x220] sm:$0xff] %vm9860_vm0, %v7126_v30 }
 0x1ea   : > { %1768 = vst.msk [vmem:[#allocation3 + $0x1d8] sm:$0xff] %vm9860_vm0, %v1736_v8  ;;  %v719_v8 = vld [vmem:[#allocation2 + $0x15a] sm:$0xff] }
 0x1eb   : > { %597 = vrot.lane.b32.xlu0 %v515_v58, %s6092_s22  ;;  %v1834_v58 = vld [vmem:[#allocation3 + $0x1a8] sm:$0xff]  ;;  %1774 = vst.msk [vmem:[#allocation3 + $0x268] sm:$0xff] %vm9860_vm0, %v719_v8 }
 0x1ec   : > { %790 = vrot.lane.b32.xlu1 %v7061_v38, %s6093_s23  ;;  %v7135_v63 = vpop.f32.mrf.mxu1  ;;  %993 = vrot.lane.b32.xlu2 %v7064_v45, %s6094_s24  ;;  %v522_v38 = vld [vmem:[#allocation2 + $0x129] sm:$0xff]  ;;  %v7147_v45 = vld [vmem:[#allocation2 + $0x140] sm:$0xff] }
 0x1ed   : > { %v580_v48 = vpop.permute.xlu0 %579  ;;  %5806 = vmatmul.msk.f32.gmra.mxu2 %vm9860_vm0, %v1834_v58  ;;  %492 = vst.msk [vmem:[#allocation3 + $0x288] sm:$0xff] %vm9860_vm0, %v7147_v45 }
 0x1ee   : > { %v773_v51 = vpop.permute.xlu1 %772  ;;  %2044 = vmatmul.f32.gmra.mxu0 %v1796_v23  ;;  %667 = vst.msk [vmem:[#allocation3 + $0xd8] sm:$0xff] %vm657_vm3, %v580_v48  ;;  %v966_v11 = vpop.permute.xlu2 %965  ;;  %v1799_v23 = vld [vmem:[#allocation3 + $0x90] sm:$0xff]  ;;  %v1801_v48 = vld [vmem:[#allocation3 + $0xa0] sm:$0xff] }
 0x1ef   : > { %860 = vst.msk [vmem:[#allocation3 + $0xd8] sm:$0xff] %vm850_vm4, %v773_v51  ;;  %5794 = vmatmul.msk.f32.gmra.mxu1 %vm9860_vm0, %v1798_v24 }
 0x1f0   : > { %1053 = vst.msk [vmem:[#allocation3 + $0xd8] sm:$0xff] %vm1043_vm5, %v966_v11 }
 0x1f3   : > { %611 = vrot.lane.b32.xlu0 %v522_v38, %s6092_s22  ;;  %v1837_v38 = vld [vmem:[#allocation3 + $0x1c0] sm:$0xff] }
 0x1f4   : > { %804 = vrot.lane.b32.xlu1 %v7084_v35, %s6093_s23  ;;  %v7156_v24 = vpop.f32.mrf.mxu1  ;;  %981 = vrot.lane.b32.xlu2 %v7088_v47, %s6094_s24  ;;  %v516_v35 = vld [vmem:[#allocation2 + $0xe1] sm:$0xff]  ;;  %v7168_v47 = vld [vmem:[#allocation2 + $0x152] sm:$0xff] }
 0x1f5   : > { %v582_v51 = vpop.permute.xlu0 %581  ;;  %5807 = vmatmul.msk.f32.gmra.mxu2 %vm9860_vm0, %v1837_v38  ;;  %1773 = vst.msk [vmem:[#allocation3 + $0x250] sm:$0xff] %vm9860_vm0, %v7168_v47 }
 0x1f6   : > { %v775_v11 = vpop.permute.xlu1 %774  ;;  %2047 = vmatmul.f32.gmra.mxu0 %v1799_v23  ;;  %668 = vst.msk [vmem:[#allocation3 + $0xf0] sm:$0xff] %vm657_vm3, %v582_v51  ;;  %v968_v58 = vpop.permute.xlu2 %967  ;;  %v1802_v23 = vld [vmem:[#allocation3 + $0xa8] sm:$0xff]  ;;  %v1804_v51 = vld [vmem:[#allocation3 + $0xb8] sm:$0xff] }
 0x1f7   : > { %861 = vst.msk [vmem:[#allocation3 + $0xf0] sm:$0xff] %vm850_vm4, %v775_v11  ;;  %5795 = vmatmul.msk.f32.gmra.mxu1 %vm9860_vm0, %v1801_v48 }
 0x1f8   : > { %1054 = vst.msk [vmem:[#allocation3 + $0xf0] sm:$0xff] %vm1043_vm5, %v968_v58 }
 0x1fb   : > { %599 = vrot.lane.b32.xlu0 %v516_v35, %s6092_s22  ;;  %v1840_v35 = vld [vmem:[#allocation3 + $0x1d8] sm:$0xff] }
 0x1fc   : > { %792 = vrot.lane.b32.xlu1 %v7081_v59, %s6093_s23  ;;  %v7177_v48 = vpop.f32.mrf.mxu1  ;;  %995 = vrot.lane.b32.xlu2 %v7106_v54, %s6094_s24  ;;  %v523_v59 = vld [vmem:[#allocation2 + $0x139] sm:$0xff]  ;;  %v1805_v54 = vld [vmem:[#allocation3 + $0xc0] sm:$0xff] }
 0x1fd   : > { %v584_v11 = vpop.permute.xlu0 %583  ;;  %5808 = vmatmul.msk.f32.gmra.mxu2 %vm9860_vm0, %v1840_v35  ;;  %v1843_v35 = vld [vmem:[#allocation3 + $0x1f0] sm:$0xff] }
 0x1fe   : > { %v777_v58 = vpop.permute.xlu1 %776  ;;  %2050 = vmatmul.f32.gmra.mxu0 %v1802_v23  ;;  %669 = vst.msk [vmem:[#allocation3 + $0x108] sm:$0xff] %vm657_vm3, %v584_v11  ;;  %v970_v38 = vpop.permute.xlu2 %969  ;;  %v1855_v50 = vld [vmem:[#allocation3 + $0x250] sm:$0xff] }
 0x1ff   : > { %862 = vst.msk [vmem:[#allocation3 + $0x108] sm:$0xff] %vm850_vm4, %v777_v58  ;;  %5796 = vmatmul.msk.f32.gmra.mxu1 %vm9860_vm0, %v1804_v51  ;;  %v1807_v51 = vld [vmem:[#allocation3 + $0xd0] sm:$0xff] }
 0x200   : > { %1055 = vst.msk [vmem:[#allocation3 + $0x108] sm:$0xff] %vm1043_vm5, %v970_v38 }
 0x203   : > { %613 = vrot.lane.b32.xlu0 %v523_v59, %s6092_s22  ;;  %v720_v59 = vld [vmem:[#allocation2 + $0x16a] sm:$0xff] }
 0x204   : > { %806 = vrot.lane.b32.xlu1 %v7126_v30, %s6093_s23  ;;  %v7191_v23 = vpop.f32.mrf.mxu1  ;;  %983 = vrot.lane.b32.xlu2 %v7123_v18, %s6094_s24  ;;  %v524_v30 = vld [vmem:[#allocation2 + $0x141] sm:$0xff]  ;;  %1775 = vst.msk [vmem:[#allocation3 + $0x280] sm:$0xff] %vm9860_vm0, %v720_v59 }
 0x205   : > { %v586_v11 = vpop.permute.xlu0 %585  ;;  %5809 = vmatmul.msk.f32.gmra.mxu2 %vm9860_vm0, %v1843_v35  ;;  %v1808_v18 = vld [vmem:[#allocation3 + $0xd8] sm:$0xff]  ;;  %v721_v35 = vld [vmem:[#allocation2 + $0x172] sm:$0xff] }
 0x206   : > { %v779_v58 = vpop.permute.xlu1 %778  ;;  %2053 = vmatmul.f32.gmra.mxu0 %v1805_v54  ;;  %670 = vst.msk [vmem:[#allocation3 + $0x120] sm:$0xff] %vm657_vm3, %v586_v11  ;;  %v972_v38 = vpop.permute.xlu2 %971 }
 0x207   : > { %863 = vst.msk [vmem:[#allocation3 + $0x120] sm:$0xff] %vm850_vm4, %v779_v58  ;;  %5797 = vmatmul.msk.f32.gmra.mxu1 %vm9860_vm0, %v1807_v51  ;;  %v1814_v37 = vld [vmem:[#allocation3 + $0x108] sm:$0xff] }
 0x208   : > { %1056 = vst.msk [vmem:[#allocation3 + $0x120] sm:$0xff] %vm1043_vm5, %v972_v38  ;;  %v525_v38 = vld [vmem:[#allocation2 + $0x151] sm:$0xff] }
 0x209   : > { %1776 = vst.msk [vmem:[#allocation3 + $0x298] sm:$0xff] %vm9860_vm0, %v721_v35 }
 0x20b   : > { %615 = vrot.lane.b32.xlu0 %v524_v30, %s6092_s22  ;;  %v911_v30 = vld [vmem:[#allocation2 + $0x168] sm:$0xff]  ;;  %v1861_v36 = vld [vmem:[#allocation3 + $0x280] sm:$0xff] }
 0x20c   : > { %808 = vrot.lane.b32.xlu1 %v7144_v22, %s6093_s23  ;;  %v7205_v54 = vpop.f32.mrf.mxu1  ;;  %997 = vrot.lane.b32.xlu2 %v7147_v45, %s6094_s24  ;;  %495 = vst.msk [vmem:[#allocation3 + $0x2d0] sm:$0xff] %vm9860_vm0, %v911_v30  ;;  %v1811_v22 = vld [vmem:[#allocation3 + $0xf0] sm:$0xff] }
 0x20d   : > { %v588_v51 = vpop.permute.xlu0 %587 }
 0x20e   : > { %v781_v11 = vpop.permute.xlu1 %780  ;;  %2056 = vmatmul.f32.gmra.mxu0 %v1808_v18  ;;  %671 = vst.msk [vmem:[#allocation3 + $0x138] sm:$0xff] %vm657_vm3, %v588_v51  ;;  %v974_v58 = vpop.permute.xlu2 %973 }
 0x20f   : > { %864 = vst.msk [vmem:[#allocation3 + $0x138] sm:$0xff] %vm850_vm4, %v781_v11 }
 0x210   : > { %1057 = vst.msk [vmem:[#allocation3 + $0x138] sm:$0xff] %vm1043_vm5, %v974_v58  ;;  %v1846_v58 = vld [vmem:[#allocation3 + $0x208] sm:$0xff] }
 0x211   : > { %5810 = vmatmul.msk.f32.gmra.mxu2 %vm9860_vm0, %v1846_v58  ;;  %v527_v58 = vld [vmem:[#allocation2 + $0x169] sm:$0xff] }
 0x213   : > { %617 = vrot.lane.b32.xlu0 %v525_v38, %s6092_s22  ;;  %v526_v38 = vld [vmem:[#allocation2 + $0x159] sm:$0xff] }
 0x214   : > { %810 = vrot.lane.b32.xlu1 %v7168_v47, %s6093_s23  ;;  %v7217_v45 = vpop.f32.mrf.mxu1  ;;  %985 = vrot.lane.b32.xlu2 %v7165_v5, %s6094_s24  ;;  %v912_v47 = vld [vmem:[#allocation2 + $0x170] sm:$0xff] }
 0x215   : > { %v602_v18 = vpop.permute.xlu0 %601  ;;  %496 = vst.msk [vmem:[#allocation3 + $0x2e8] sm:$0xff] %vm9860_vm0, %v912_v47 }
 0x216   : > { %v795_v51 = vpop.permute.xlu1 %794  ;;  %2059 = vmatmul.f32.gmra.mxu0 %v1811_v22  ;;  %678 = vst.msk [vmem:[#allocation3 + $0x1e0] sm:$0xff] %vm657_vm3, %v602_v18  ;;  %v988_v11 = vpop.permute.xlu2 %987 }
 0x217   : > { %871 = vst.msk [vmem:[#allocation3 + $0x1e0] sm:$0xff] %vm850_vm4, %v795_v51 }
 0x218   : > { %1064 = vst.msk [vmem:[#allocation3 + $0x1e0] sm:$0xff] %vm1043_vm5, %v988_v11 }
 0x21b   : > { %619 = vrot.lane.b32.xlu0 %v526_v38, %s6092_s22  ;;  %v1817_v38 = vld [vmem:[#allocation3 + $0x120] sm:$0xff] }
 0x21c   : > { %812 = vrot.lane.b32.xlu1 %v719_v8, %s6093_s23  ;;  %v7228_v5 = vpop.f32.mrf.mxu1  ;;  %999 = vrot.lane.b32.xlu2 %v909_v53, %s6094_s24 }
 0x21d   : > { %v590_v22 = vpop.permute.xlu0 %589 }
 0x21e   : > { %v783_v18 = vpop.permute.xlu1 %782  ;;  %2062 = vmatmul.f32.gmra.mxu0 %v1814_v37  ;;  %672 = vst.msk [vmem:[#allocation3 + $0x150] sm:$0xff] %vm657_vm3, %v590_v22  ;;  %v976_v51 = vpop.permute.xlu2 %975 }
 0x21f   : > { %865 = vst.msk [vmem:[#allocation3 + $0x150] sm:$0xff] %vm850_vm4, %v783_v18  ;;  %v1841_v11 = vld [vmem:[#allocation3 + $0x1e0] sm:$0xff] }
 0x220   : > { %1058 = vst.msk [vmem:[#allocation3 + $0x150] sm:$0xff] %vm1043_vm5, %v976_v51  ;;  %2089 = vmatmul.f32.vlgmr.msra.gmra.mxu3 %v1841_v11  ;;  %v528_v18 = vld [vmem:[#allocation2 + $0x171] sm:$0xff]  ;;  %v1820_v11 = vld [vmem:[#allocation3 + $0x138] sm:$0xff] }
 0x221   : > { %v1849_v51 = vld [vmem:[#allocation3 + $0x220] sm:$0xff] }
 0x222   : > { %5811 = vmatmul.msk.f32.gmra.mxu2 %vm9860_vm0, %v1849_v51 }
 0x223   : > { %621 = vrot.lane.b32.xlu0 %v527_v58, %s6092_s22 }
 0x224   : > { %814 = vrot.lane.b32.xlu1 %v720_v59, %s6093_s23  ;;  %v7236_v8 = vpop.f32.mrf.mxu1  ;;  %1001 = vrot.lane.b32.xlu2 %v910_v19, %s6094_s24 }
 0x225   : > { %v604_v53 = vpop.permute.xlu0 %603 }
 0x226   : > { %v797_v37 = vpop.permute.xlu1 %796  ;;  %2065 = vmatmul.f32.gmra.mxu0 %v1817_v38  ;;  %679 = vst.msk [vmem:[#allocation3 + $0x1f8] sm:$0xff] %vm657_vm3, %v604_v53  ;;  %v990_v22 = vpop.permute.xlu2 %989 }
 0x227   : > { %872 = vst.msk [vmem:[#allocation3 + $0x1f8] sm:$0xff] %vm850_vm4, %v797_v37  ;;  %v2480_v37 = vld [vmem:[#allocation2 + $0x1] sm:$0xff] }
 0x228   : > { %1065 = vst.msk [vmem:[#allocation3 + $0x1f8] sm:$0xff] %vm1043_vm5, %v990_v22  ;;  %v2672_v22 = vld [vmem:[#allocation2 + $0x2] sm:$0xff] }
 0x22b   : > { %623 = vrot.lane.b32.xlu0 %v528_v18, %s6092_s22  ;;  %v1823_v18 = vld [vmem:[#allocation3 + $0x150] sm:$0xff] }
 0x22c   : > { %816 = vrot.lane.b32.xlu1 %v721_v35, %s6093_s23  ;;  %v7245_v19 = vpop.f32.mrf.mxu1  ;;  %1003 = vrot.lane.b32.xlu2 %v911_v30, %s6094_s24 }
 0x22d   : > { %v592_v59 = vpop.permute.xlu0 %591 }
 0x22e   : > { %v785_v58 = vpop.permute.xlu1 %784  ;;  %2068 = vmatmul.f32.gmra.mxu0 %v1820_v11  ;;  %673 = vst.msk [vmem:[#allocation3 + $0x168] sm:$0xff] %vm657_vm3, %v592_v59  ;;  %v978_v38 = vpop.permute.xlu2 %977 }
 0x22f   : > { %866 = vst.msk [vmem:[#allocation3 + $0x168] sm:$0xff] %vm850_vm4, %v785_v58  ;;  %v1844_v53 = vld [vmem:[#allocation3 + $0x1f8] sm:$0xff]  ;;  %v7257_v59 = vpop.f32.mrf.mxu2 }
 0x230   : > { %1059 = vst.msk [vmem:[#allocation3 + $0x168] sm:$0xff] %vm1043_vm5, %v978_v38  ;;  %2092 = vmatmul.f32.gmra.mxu3 %v1844_v53  ;;  %v2481_v58 = vld [vmem:[#allocation2 + $0x9] sm:$0xff] }
 0x231   : > { %v2673_v38 = vld [vmem:[#allocation2 + $0xa] sm:$0xff] }
 0x232   : > { %v1852_v53 = vld [vmem:[#allocation3 + $0x238] sm:$0xff] }
 0x233   : > { %2544 = vrot.lane.b32.xlu0 %v2480_v37, %s6092_s22  ;;  %v913_v37 = vld [vmem:[#allocation2 + $0x180] sm:$0xff]  ;;  %5812 = vmatmul.msk.f32.gmra.mxu2 %vm9860_vm0, %v1852_v53 }
 0x234   : > { %2736 = vrot.lane.b32.xlu1 %v2672_v22, %s6093_s23  ;;  %v7253_v35 = vpop.f32.mrf.mxu1  ;;  %1005 = vrot.lane.b32.xlu2 %v912_v47, %s6094_s24  ;;  %v7272_v53 = vld [vmem:[%s9815_s2] ss:$0 sm:$0xff] }
 0x235   : > { %v606_v30 = vpop.permute.xlu0 %605 }
 0x236   : > { %v799_v51 = vpop.permute.xlu1 %798  ;;  %2071 = vmatmul.f32.gmra.mxu0 %v1823_v18  ;;  %680 = vst.msk [vmem:[#allocation3 + $0x210] sm:$0xff] %vm657_vm3, %v606_v30  ;;  %v992_v11 = vpop.permute.xlu2 %991 }
 0x237   : > { %873 = vst.msk [vmem:[#allocation3 + $0x210] sm:$0xff] %vm850_vm4, %v799_v51  ;;  %v1826_v22 = vld [vmem:[#allocation3 + $0x168] sm:$0xff] }
 0x238   : > { %1066 = vst.msk [vmem:[#allocation3 + $0x210] sm:$0xff] %vm1043_vm5, %v992_v11 }
 0x23b   : > { %2546 = vrot.lane.b32.xlu0 %v2481_v58, %s6092_s22  ;;  %v7275_v58 = vpop.f32.mrf.mxu2  ;;  %5813 = vmatmul.msk.f32.gmra.mxu2 %vm9860_vm0, %v1855_v50 }
 0x23c   : > { %2738 = vrot.lane.b32.xlu1 %v2673_v38, %s6093_s23  ;;  %v7264_v47 = vpop.f32.mrf.mxu1  ;;  %1007 = vrot.lane.b32.xlu2 %v913_v37, %s6094_s24  ;;  %v914_v38 = vld [vmem:[#allocation2 + $0x188] sm:$0xff] }
 0x23d   : > { %v594_v18 = vpop.permute.xlu0 %593 }
 0x23e   : > { %v787_v30 = vpop.permute.xlu1 %786  ;;  %2074 = vmatmul.f32.gmra.mxu0 %v1826_v22  ;;  %674 = vst.msk [vmem:[#allocation3 + $0x180] sm:$0xff] %vm657_vm3, %v594_v18  ;;  %v980_v51 = vpop.permute.xlu2 %979 }
 0x23f   : > { %867 = vst.msk [vmem:[#allocation3 + $0x180] sm:$0xff] %vm850_vm4, %v787_v30  ;;  %v1847_v11 = vld [vmem:[#allocation3 + $0x210] sm:$0xff] }
 0x240   : > { %1060 = vst.msk [vmem:[#allocation3 + $0x180] sm:$0xff] %vm1043_vm5, %v980_v51  ;;  %2095 = vmatmul.f32.gmra.mxu3 %v1847_v11 }
 0x243   : > { %v2030_v37 = vpop.f32.mrf.mxu0  ;;  %v7284_v43 = vpop.f32.mrf.mxu2 }
 0x244   : > { %v2031_v22 = vadd.f32 %v7272_v53, %v2030_v37  ;;  %v2256_v29 = vpop.f32.mrf.mxu1  ;;  %1009 = vrot.lane.b32.xlu2 %v914_v38, %s6094_s24 }
 0x245   : > { %v608_v18 = vpop.permute.xlu0 %607 }
 0x246   : > { %v801_v30 = vpop.permute.xlu1 %800  ;;  %v2144_v10 = vadd.f32 %v6759_v27, %v2031_v22  ;;  %681 = vst.msk [vmem:[#allocation3 + $0x228] sm:$0xff] %vm657_vm3, %v608_v18  ;;  %v994_v62 = vpop.permute.xlu2 %993 }
 0x247   : > { %874 = vst.msk [vmem:[#allocation3 + $0x228] sm:$0xff] %vm850_vm4, %v801_v30  ;;  %v1829_v51 = vld [vmem:[#allocation3 + $0x180] sm:$0xff] }
 0x248   : > { %v2257_v11 = vadd.f32 %v2256_v29, %v2144_v10  ;;  %1067 = vst.msk [vmem:[#allocation3 + $0x228] sm:$0xff] %vm1043_vm5, %v994_v62  ;;  %2077 = vmatmul.f32.gmra.mxu0 %v1829_v51 }
 0x24a   : > { %v2352_v37 = vmax.f32 %v2257_v11, 0.0 }
 0x24b   : > { %v2033_v38 = vpop.f32.mrf.mxu0 }
 0x24c   : > { %2384 = vst.msk [vmem:[#allocation2 + $0x19] sm:$0xff] %vm9860_vm0, %v2352_v37  ;;  %v2034_v27 = vadd.f32 %v7272_v53, %v2033_v38  ;;  %v2259_v22 = vpop.f32.mrf.mxu1 }
 0x24d   : > { %v596_v18 = vpop.permute.xlu0 %595 }
 0x24e   : > { %v789_v40 = vpop.permute.xlu1 %788  ;;  %v2147_v30 = vadd.f32 %v6771_v52, %v2034_v27  ;;  %675 = vst.msk [vmem:[#allocation3 + $0x198] sm:$0xff] %vm657_vm3, %v596_v18  ;;  %v982_v29 = vpop.permute.xlu2 %981 }
 0x24f   : > { %868 = vst.msk [vmem:[#allocation3 + $0x198] sm:$0xff] %vm850_vm4, %v789_v40  ;;  %v1850_v62 = vld [vmem:[#allocation3 + $0x228] sm:$0xff]  ;;  %v7297_v27 = vpop.f32.mrf.mxu2 }
 0x250   : > { %v2260_v50 = vadd.f32 %v2259_v22, %v2147_v30  ;;  %1061 = vst.msk [vmem:[#allocation3 + $0x198] sm:$0xff] %vm1043_vm5, %v982_v29  ;;  %2098 = vmatmul.f32.gmra.mxu3 %v1850_v62 }
 0x252   : > { %v2353_v10 = vmax.f32 %v2260_v50, 0.0 }
 0x253   : > { %v2036_v51 = vpop.f32.mrf.mxu0  ;;  %v2864_v11 = vld [vmem:[#allocation2 + $0x18] sm:$0xff] }
 0x254   : > { %v7292_v37 = vld [vmem:[#allocation2 + $0x19] sm:$0xff]  ;;  %2385 = vst.msk [vmem:[#allocation2 + $0x21] sm:$0xff] %vm9860_vm0, %v2353_v10  ;;  %v2037_v38 = vadd.f32 %v7272_v53, %v2036_v51  ;;  %2928 = vrot.lane.b32.xlu2 %v2864_v11, %s6094_s24  ;;  %v2262_v52 = vpop.f32.mrf.mxu1 }
 0x255   : > { %v610_v40 = vpop.permute.xlu0 %609  ;;  %3088 = vst.msk [vmem:[#allocation3 + $0x8] sm:$0xff] %vm9860_vm0, %v7292_v37  ;;  %v2418_v29 = vld [vmem:[#allocation2 + $0x18] sm:$0xff] }
 0x256   : > { %v803_v18 = vpop.permute.xlu1 %802  ;;  %v2150_v22 = vadd.f32 %v6782_v39, %v2037_v38  ;;  %682 = vst.msk [vmem:[#allocation3 + $0x240] sm:$0xff] %vm657_vm3, %v610_v40  ;;  %v996_v30 = vpop.permute.xlu2 %995  ;;  %v1858_v10 = vld [vmem:[#allocation3 + $0x268] sm:$0xff] }
 0x257   : > { %875 = vst.msk [vmem:[#allocation3 + $0x240] sm:$0xff] %vm850_vm4, %v803_v18  ;;  %v1832_v62 = vld [vmem:[#allocation3 + $0x198] sm:$0xff]  ;;  %5814 = vmatmul.msk.f32.gmra.mxu2 %vm9860_vm0, %v1858_v10  ;;  %v3891_v40 = vld [vmem:[%s9816_s3 + $0x118] sm:$0xff]  ;;  %v7324_v10 = vpop.f32.mrf.mxu2 }
 0x258   : > { %v2263_v50 = vadd.f32 %v2262_v52, %v2150_v22  ;;  %1068 = vst.msk [vmem:[#allocation3 + $0x240] sm:$0xff] %vm1043_vm5, %v996_v30  ;;  %2080 = vmatmul.f32.gmra.mxu0 %v1832_v62 }
 0x259   : > { %2450 = vst.msk [vmem:[#allocation3 + $0x30] sm:$0xff] %vm9860_vm0, %v2418_v29  ;;  %4230 = vmatpush.msrb.mxu0 %v3891_v40  ;;  %v3890_v29 = vld [vmem:[%s9816_s3 + $0x110] sm:$0xff] }
 0x25a   : > { %v2354_v51 = vmax.f32 %v2263_v50, 0.0 }
 0x25b   : > { %v2039_v11 = vpop.f32.mrf.mxu0  ;;  %v3120_v12 = vld [vmem:[#allocation2 + $0x1a] sm:$0xff]  ;;  %4231 = vmatpush.msrb.mxu0 %v3890_v29 }
 0x25c   : > { %v2865_v39 = vld [vmem:[#allocation2 + $0x20] sm:$0xff]  ;;  %2386 = vst.msk [vmem:[#allocation2 + $0x31] sm:$0xff] %vm9860_vm0, %v2354_v51  ;;  %v2040_v38 = vadd.f32 %v7272_v53, %v2039_v11  ;;  %3184 = vrot.lane.b32.xlu0 %v3120_v12, %s6092_s22  ;;  %v2265_v52 = vpop.f32.mrf.mxu1  ;;  %2740 = vrot.lane.b32.xlu1 %v3120_v12, %s6093_s23 }
 0x25d   : > { %2930 = vrot.lane.b32.xlu2 %v2865_v39, %s6094_s24  ;;  %v7314_v18 = vld [vmem:[#allocation2 + $0x21] sm:$0xff]  ;;  %v598_v22 = vpop.permute.xlu0 %597 }
 0x25e   : > { %v791_v30 = vpop.permute.xlu1 %790  ;;  %3089 = vst.msk [vmem:[#allocation3 + $0x20] sm:$0xff] %vm9860_vm0, %v7314_v18  ;;  %v2153_v62 = vadd.f32 %v6792_v57, %v2040_v38  ;;  %v984_v50 = vpop.permute.xlu2 %983  ;;  %v2419_v51 = vld [vmem:[#allocation2 + $0x20] sm:$0xff]  ;;  %v3889_v39 = vld [vmem:[%s9816_s3 + $0x108] sm:$0xff] }
 0x25f   : > { %676 = vst.msk [vmem:[#allocation3 + $0x1b0] sm:$0xff] %vm657_vm3, %v598_v22  ;;  %v1853_v12 = vld [vmem:[#allocation3 + $0x240] sm:$0xff]  ;;  %v7332_v38 = vld [vmem:[#allocation2 + $0x22] sm:$0xff]  ;;  %4232 = vmatpush.msrb.mxu0 %v3889_v39  ;;  %v7351_v28 = vpop.f32.mrf.mxu2  ;;  %5815 = vmatmul.msk.f32.gmra.mxu2 %vm9860_vm0, %v1861_v36 }
 0x260   : > { %869 = vst.msk [vmem:[#allocation3 + $0x1b0] sm:$0xff] %vm850_vm4, %v791_v30  ;;  %v2266_v11 = vadd.f32 %v2265_v52, %v2153_v62  ;;  %2101 = vmatmul.f32.gmra.mxu3 %v1853_v12  ;;  %v3888_v52 = vld [vmem:[%s9816_s3 + $0x100] sm:$0xff] }
 0x261   : > { %1062 = vst.msk [vmem:[#allocation3 + $0x1b0] sm:$0xff] %vm1043_vm5, %v984_v50  ;;  %4233 = vmatpush.msrb.mxu0 %v3888_v52 }
 0x262   : > { %2451 = vst.msk [vmem:[#allocation3 + $0x48] sm:$0xff] %vm9860_vm0, %v2419_v51  ;;  %v2355_v57 = vmax.f32 %v2266_v11, 0.0 }
 0x263   : > { %v2042_v40 = vpop.f32.mrf.mxu0  ;;  %v7334_v22 = vld [vmem:[#allocation2 + $0x31] sm:$0xff] }
 0x264   : > { %v3312_v30 = vld [vmem:[#allocation2 + $0x30] sm:$0xff]  ;;  %2387 = vst.msk [vmem:[#allocation2 + $0x39] sm:$0xff] %vm9860_vm0, %v2355_v57  ;;  %v2043_v29 = vadd.f32 %v7272_v53, %v2042_v40  ;;  %3186 = vrot.lane.b32.xlu0 %v7332_v38, %s6092_s22  ;;  %v2268_v62 = vpop.f32.mrf.mxu1 }
 0x265   : > { %3568 = vrot.lane.b32.xlu2 %v7334_v22, %s6094_s24  ;;  %v3058_v50 = vld [vmem:[#allocation2 + $0x31] sm:$0xff]  ;;  %3376 = vrot.lane.b32.xlu1 %v3312_v30, %s6093_s23  ;;  %v612_v51 = vpop.permute.xlu0 %611 }
 0x266   : > { %v805_v12 = vpop.permute.xlu1 %804  ;;  %3090 = vst.msk [vmem:[#allocation3 + $0x38] sm:$0xff] %vm9860_vm0, %v3058_v50  ;;  %v2156_v11 = vadd.f32 %v6802_v31, %v2043_v29  ;;  %v998_v39 = vpop.permute.xlu2 %997  ;;  %v2420_v57 = vld [vmem:[#allocation2 + $0x30] sm:$0xff] }
 0x267   : > { %683 = vst.msk [vmem:[#allocation3 + $0x258] sm:$0xff] %vm657_vm3, %v612_v51 }
 0x268   : > { %876 = vst.msk [vmem:[#allocation3 + $0x258] sm:$0xff] %vm850_vm4, %v805_v12  ;;  %v1835_v40 = vld [vmem:[#allocation3 + $0x1b0] sm:$0xff]  ;;  %v2269_v61 = vadd.f32 %v2268_v62, %v2156_v11 }
 0x269   : > { %1069 = vst.msk [vmem:[#allocation3 + $0x258] sm:$0xff] %vm1043_vm5, %v998_v39  ;;  %2083 = vmatmul.f32.gmra.mxu0 %v1835_v40 }
 0x26a   : > { %2452 = vst.msk [vmem:[#allocation3 + $0x60] sm:$0xff] %vm9860_vm0, %v2420_v57  ;;  %v2356_v52 = vmax.f32 %v2269_v61, 0.0 }
 0x26b   : > { %v2045_v31 = vpop.f32.mrf.mxu0  ;;  %v3313_v29 = vld [vmem:[#allocation2 + $0x38] sm:$0xff] }
 0x26c   : > { %v7355_v50 = vld [vmem:[#allocation2 + $0x32] sm:$0xff]  ;;  %2388 = vst.msk [vmem:[#allocation2 + $0x49] sm:$0xff] %vm9860_vm0, %v2356_v52  ;;  %v2046_v51 = vadd.f32 %v7272_v53, %v2045_v31  ;;  %2548 = vrot.lane.b32.xlu0 %v7292_v37, %s6092_s22  ;;  %v2271_v62 = vpop.f32.mrf.mxu1  ;;  %v7367_v39 = vld [vmem:[#allocation2 + $0x3a] sm:$0xff]  ;;  %v7373_v31 = vpop.f32.mrf.mxu2 }
 0x26d   : > { %2932 = vrot.lane.b32.xlu2 %v3312_v30, %s6094_s24  ;;  %3378 = vrot.lane.b32.xlu1 %v3313_v29, %s6093_s23  ;;  %v600_v36 = vpop.permute.xlu0 %599  ;;  %3728 = vst.msk [vmem:[#allocation3 + $0x10] sm:$0xff] %vm9860_vm0, %v7355_v50  ;;  %v3059_v57 = vld [vmem:[#allocation2 + $0x39] sm:$0xff] }
 0x26e   : > { %v793_v12 = vpop.permute.xlu1 %792  ;;  %v2159_v61 = vadd.f32 %v6816_v34, %v2046_v51  ;;  %677 = vst.msk [vmem:[#allocation3 + $0x1c8] sm:$0xff] %vm657_vm3, %v600_v36  ;;  %v986_v11 = vpop.permute.xlu2 %985  ;;  %v2421_v40 = vld [vmem:[#allocation2 + $0x38] sm:$0xff]  ;;  %v1864_v36 = vld [vmem:[#allocation3 + $0x298] sm:$0xff] }
 0x26f   : > { %870 = vst.msk [vmem:[#allocation3 + $0x1c8] sm:$0xff] %vm850_vm4, %v793_v12  ;;  %v7376_v51 = vld [vmem:[#allocation2 + $0x39] sm:$0xff]  ;;  %5816 = vmatmul.msk.f32.gmra.mxu2 %vm9860_vm0, %v1864_v36 }
 0x270   : > { %v1856_v37 = vld [vmem:[#allocation3 + $0x258] sm:$0xff]  ;;  %v2272_v30 = vadd.f32 %v2271_v62, %v2159_v61  ;;  %1063 = vst.msk [vmem:[#allocation3 + $0x1c8] sm:$0xff] %vm1043_vm5, %v986_v11 }
 0x271   : > { %2104 = vmatmul.f32.gmra.mxu3 %v1856_v37  ;;  %3729 = vst.msk [vmem:[#allocation3 + $0x28] sm:$0xff] %vm9860_vm0, %v7367_v39  ;;  %v1745_v61 = vld [vmem:[#allocation2 + $0x182] sm:$0xff] }
 0x272   : > { %v2357_v52 = vmax.f32 %v2272_v30, 0.0  ;;  %3091 = vst.msk [vmem:[#allocation3 + $0x50] sm:$0xff] %vm9860_vm0, %v3059_v57 }
 0x273   : > { %v2048_v34 = vpop.f32.mrf.mxu0  ;;  %2453 = vst.msk [vmem:[#allocation3 + $0x78] sm:$0xff] %vm9860_vm0, %v2421_v40  ;;  %v7391_v40 = vld [vmem:[#allocation2 + $0x49] sm:$0xff] }
 0x274   : > { %2389 = vst.msk [vmem:[#allocation2 + $0x51] sm:$0xff] %vm9860_vm0, %v2357_v52  ;;  %v2049_v62 = vadd.f32 %v7272_v53, %v2048_v34  ;;  %3188 = vrot.lane.b32.xlu0 %v7355_v50, %s6092_s22  ;;  %v2274_v12 = vpop.f32.mrf.mxu1  ;;  %v2422_v34 = vld [vmem:[#allocation2 + $0x48] sm:$0xff] }
 0x275   : > { %3570 = vrot.lane.b32.xlu2 %v7376_v51, %s6094_s24  ;;  %2742 = vrot.lane.b32.xlu1 %v7332_v38, %s6093_s23  ;;  %v614_v11 = vpop.permute.xlu0 %613  ;;  %1777 = vst.msk [vmem:[#allocation3 + $0x2b0] sm:$0xff] %vm9860_vm0, %v1745_v61  ;;  %v7402_v61 = vld [vmem:[#allocation2 + $0x48] sm:$0xff] }
 0x276   : > { %v807_v37 = vpop.permute.xlu1 %806  ;;  %v2162_v57 = vadd.f32 %v6829_v33, %v2049_v62  ;;  %684 = vst.msk [vmem:[#allocation3 + $0x270] sm:$0xff] %vm657_vm3, %v614_v11  ;;  %v1000_v30 = vpop.permute.xlu2 %999 }
 0x277   : > { %877 = vst.msk [vmem:[#allocation3 + $0x270] sm:$0xff] %vm850_vm4, %v807_v37  ;;  %v1838_v52 = vld [vmem:[#allocation3 + $0x1c8] sm:$0xff]  ;;  %v7407_v11 = vpop.f32.mrf.mxu2 }
 0x278   : > { %v2275_v21 = vadd.f32 %v2274_v12, %v2162_v57  ;;  %1070 = vst.msk [vmem:[#allocation3 + $0x270] sm:$0xff] %vm1043_vm5, %v1000_v30  ;;  %2086 = vmatmul.f32.gmra.mxu0 %v1838_v52  ;;  %v3871_v37 = vld [vmem:[%s9816_s3 + $0x78] sm:$0xff]  ;;  %v3870_v52 = vld [vmem:[%s9816_s3 + $0x70] sm:$0xff] }
 0x279   : > { %3092 = vst.msk [vmem:[#allocation3 + $0x68] sm:$0xff] %vm9860_vm0, %v7391_v40  ;;  %3992 = vmatpush.msrb.mxu3 %v3871_v37  ;;  %v3868_v37 = vld [vmem:[%s9816_s3 + $0x60] sm:$0xff] }
 0x27a   : > { %v2358_v38 = vmax.f32 %v2275_v21, 0.0  ;;  %2454 = vst.msk [vmem:[#allocation3 + $0x90] sm:$0xff] %vm9860_vm0, %v2422_v34 }
 0x27b   : > { %v2051_v33 = vpop.f32.mrf.mxu0  ;;  %v7398_v36 = vld [vmem:[#allocation2 + $0x4a] sm:$0xff]  ;;  %v7422_v34 = vld [vmem:[#allocation2 + $0x52] sm:$0xff]  ;;  %3993 = vmatpush.msrb.mxu3 %v3870_v52 }
 0x27c   : > { %2390 = vst.msk [vmem:[#allocation2 + $0x61] sm:$0xff] %vm9860_vm0, %v2358_v38  ;;  %v2052_v62 = vadd.f32 %v7272_v53, %v2051_v33  ;;  %2550 = vrot.lane.b32.xlu0 %v7314_v18, %s6092_s22  ;;  %v2277_v12 = vpop.f32.mrf.mxu1  ;;  %v1867_v21 = vld [vmem:[#allocation3 + $0x2b0] sm:$0xff]  ;;  %v2423_v4 = vld [vmem:[#allocation2 + $0x50] sm:$0xff] }
 0x27d   : > { %2934 = vrot.lane.b32.xlu2 %v3313_v29, %s6094_s24  ;;  %3380 = vrot.lane.b32.xlu1 %v7402_v61, %s6093_s23  ;;  %v616_v57 = vpop.permute.xlu0 %615  ;;  %3730 = vst.msk [vmem:[#allocation3 + $0x40] sm:$0xff] %vm9860_vm0, %v7398_v36  ;;  %v3762_v33 = vld [vmem:[#allocation3 + $0x10] sm:$0xff] }
 0x27e   : > { %v809_v30 = vpop.permute.xlu1 %808  ;;  %5817 = vmatmul.msk.f32.gmra.mxu2 %vm9860_vm0, %v1867_v21  ;;  %v2165_v18 = vadd.f32 %v6845_v56, %v2052_v62  ;;  %685 = vst.msk [vmem:[#allocation3 + $0x288] sm:$0xff] %vm657_vm3, %v616_v57  ;;  %v1002_v29 = vpop.permute.xlu2 %1001  ;;  %v3869_v56 = vld [vmem:[%s9816_s3 + $0x68] sm:$0xff]  ;;  %v3061_v62 = vld [vmem:[#allocation2 + $0x51] sm:$0xff]  ;;  %v7436_v57 = vld [vmem:[#allocation2 + $0x19a] sm:$0xff] }
 0x27f   : > { %878 = vst.msk [vmem:[#allocation3 + $0x288] sm:$0xff] %vm850_vm4, %v809_v30  ;;  %v1859_v38 = vld [vmem:[#allocation3 + $0x270] sm:$0xff]  ;;  %3994 = vmatpush.msrb.mxu3 %v3869_v56  ;;  %v7456_v56 = vpop.f32.mrf.mxu2 }
 0x280   : > { %v2278_v16 = vadd.f32 %v2277_v12, %v2165_v18  ;;  %1071 = vst.msk [vmem:[#allocation3 + $0x288] sm:$0xff] %vm1043_vm5, %v1002_v29  ;;  %2107 = vmatmul.f32.gmra.mxu3 %v1859_v38  ;;  %5821 = vmatmul.msk.f32.vlgmr.msrb.gmra.mxu0 %vm9860_vm0, %v3762_v33  ;;  %v7441_v18 = vld [vmem:[#allocation2 + $0x50] sm:$0xff] }
 0x281   : > { %3731 = vst.msk [vmem:[#allocation3 + $0x58] sm:$0xff] %vm9860_vm0, %v7422_v34  ;;  %3995 = vmatpush.msrb.mxu3 %v3868_v37  ;;  %v3765_v37 = vld [vmem:[#allocation3 + $0x28] sm:$0xff] }
 0x282   : > { %v2359_v21 = vmax.f32 %v2278_v16, 0.0  ;;  %3093 = vst.msk [vmem:[#allocation3 + $0x80] sm:$0xff] %vm9860_vm0, %v3061_v62 }
 0x283   : > { %v2054_v12 = vpop.f32.mrf.mxu0  ;;  %1779 = vst.msk [vmem:[#allocation3 + $0x2e0] sm:$0xff] %vm9860_vm0, %v7436_v57  ;;  %v7458_v62 = vld [vmem:[#allocation2 + $0x61] sm:$0xff]  ;;  %3996 = vmatpush.msrb.mxu3 %v3867_v44 }
 0x284   : > { %2391 = vst.msk [vmem:[#allocation2 + $0x69] sm:$0xff] %vm9860_vm0, %v2359_v21  ;;  %v2055_v30 = vadd.f32 %v7272_v53, %v2054_v12  ;;  %3190 = vrot.lane.b32.xlu0 %v7367_v39, %s6092_s22  ;;  %v2280_v16 = vpop.f32.mrf.mxu1  ;;  %v3866_v21 = vld [vmem:[%s9816_s3 + $0x50] sm:$0xff] }
 0x285   : > { %3572 = vrot.lane.b32.xlu2 %v7391_v40, %s6094_s24  ;;  %3382 = vrot.lane.b32.xlu1 %v7441_v18, %s6093_s23  ;;  %v618_v29 = vpop.permute.xlu0 %617  ;;  %3094 = vst.msk [vmem:[#allocation3 + $0x98] sm:$0xff] %vm9860_vm0, %v7458_v62 }
 0x286   : > { %v811_v52 = vpop.permute.xlu1 %810  ;;  %v2168_v38 = vadd.f32 %v6861_v26, %v2055_v30  ;;  %686 = vst.msk [vmem:[#allocation3 + $0x2a0] sm:$0xff] %vm657_vm3, %v618_v29  ;;  %v1004_v33 = vpop.permute.xlu2 %1003  ;;  %v3865_v26 = vld [vmem:[%s9816_s3 + $0x48] sm:$0xff]  ;;  %v2424_v30 = vld [vmem:[#allocation2 + $0x60] sm:$0xff]  ;;  %v1870_v29 = vld [vmem:[#allocation3 + $0x2c8] sm:$0xff]  ;;  %3997 = vmatpush.msrb.mxu3 %v3866_v21 }
 0x287   : > { %879 = vst.msk [vmem:[#allocation3 + $0x2a0] sm:$0xff] %vm850_vm4, %v811_v52  ;;  %v1862_v12 = vld [vmem:[#allocation3 + $0x288] sm:$0xff]  ;;  %5818 = vmatmul.msk.f32.gmra.mxu2 %vm9860_vm0, %v1870_v29 }
 0x288   : > { %v2281_v32 = vadd.f32 %v2280_v16, %v2168_v38  ;;  %1072 = vst.msk [vmem:[#allocation3 + $0x2a0] sm:$0xff] %vm1043_vm5, %v1004_v33  ;;  %2110 = vmatmul.f32.gmra.mxu3 %v1862_v12  ;;  %5822 = vmatmul.msk.f32.gmra.mxu0 %vm9860_vm0, %v3765_v37  ;;  %v3864_v16 = vld [vmem:[%s9816_s3 + $0x40] sm:$0xff]  ;;  %v7476_v38 = vld [vmem:[#allocation2 + $0x51] sm:$0xff] }
 0x289   : > { %2455 = vst.msk [vmem:[#allocation3 + $0xa8] sm:$0xff] %vm9860_vm0, %v2423_v4  ;;  %3998 = vmatpush.msrb.mxu3 %v3865_v26  ;;  %v3863_v4 = vld [vmem:[%s9816_s3 + $0x38] sm:$0xff] }
 0x28a   : > { %v2360_v52 = vmax.f32 %v2281_v32, 0.0  ;;  %2456 = vst.msk [vmem:[#allocation3 + $0xc0] sm:$0xff] %vm9860_vm0, %v2424_v30  ;;  %v3768_v30 = vld [vmem:[#allocation3 + $0x40] sm:$0xff] }
 0x28b   : > { %v2057_v44 = vpop.f32.mrf.mxu0  ;;  %v7478_v33 = vld [vmem:[#allocation2 + $0x62] sm:$0xff]  ;;  %3999 = vmatpush.msrb.mxu3 %v3864_v16 }
 0x28c   : > { %2392 = vst.msk [vmem:[#allocation2 + $0x79] sm:$0xff] %vm9860_vm0, %v2360_v52  ;;  %v2058_v32 = vadd.f32 %v7272_v53, %v2057_v44  ;;  %2552 = vrot.lane.b32.xlu0 %v7334_v22, %s6092_s22  ;;  %v3862_v22 = vld [vmem:[%s9816_s3 + $0x30] sm:$0xff]  ;;  %v3861_v16 = vld [vmem:[%s9816_s3 + $0x28] sm:$0xff] }
 0x28d   : > { %3574 = vrot.lane.b32.xlu2 %v7476_v38, %s6094_s24  ;;  %2744 = vrot.lane.b32.xlu1 %v7355_v50, %s6093_s23  ;;  %v620_v21 = vpop.permute.xlu0 %619  ;;  %3732 = vst.msk [vmem:[#allocation3 + $0x70] sm:$0xff] %vm9860_vm0, %v7478_v33  ;;  %v1873_v50 = vld [vmem:[#allocation3 + $0x2e0] sm:$0xff] }
 0x28e   : > { %v813_v12 = vpop.permute.xlu1 %812  ;;  %v2171_v37 = vadd.f32 %v6885_v17, %v2058_v32  ;;  %687 = vst.msk [vmem:[#allocation3 + $0x2b8] sm:$0xff] %vm657_vm3, %v620_v21  ;;  %v1006_v26 = vpop.permute.xlu2 %1005  ;;  %4000 = vmatpush.msrb.mxu3 %v3863_v4  ;;  %v7500_v52 = vld [vmem:[#allocation2 + $0x6a] sm:$0xff]  ;;  %v2416_v32 = vld [vmem:[#allocation2] sm:$0xff] }
 0x28f   : > { %880 = vst.msk [vmem:[#allocation3 + $0x2b8] sm:$0xff] %vm850_vm4, %v813_v12  ;;  %v1865_v29 = vld [vmem:[#allocation3 + $0x2a0] sm:$0xff]  ;;  %v7505_v17 = vpop.f32.mrf.mxu2  ;;  %5819 = vmatmul.msk.f32.gmra.mxu2 %vm9860_vm0, %v1873_v50  ;;  %v3771_v50 = vld [vmem:[#allocation3 + $0x58] sm:$0xff] }
 0x290   : > { %v2284_v44 = vadd.f32 %v7257_v59, %v2171_v37  ;;  %1073 = vst.msk [vmem:[#allocation3 + $0x2b8] sm:$0xff] %vm1043_vm5, %v1006_v26  ;;  %2113 = vmatmul.f32.gmra.mxu3 %v1865_v29  ;;  %5823 = vmatmul.msk.f32.gmra.mxu0 %vm9860_vm0, %v3768_v30  ;;  %v1748_v59 = vld [vmem:[#allocation2 + $0x1a2] sm:$0xff]  ;;  %v3859_v26 = vld [vmem:[%s9816_s3 + $0x18] sm:$0xff] }
 0x291   : > { %3758 = vst.msk [vmem:[#allocation3 + $0x2e0] sm:$0xff] %vm9860_vm0, %v7436_v57  ;;  %4001 = vmatpush.msrb.mxu3 %v3862_v22  ;;  %v3860_v57 = vld [vmem:[%s9816_s3 + $0x20] sm:$0xff] }
 0x292   : > { %v2361_v4 = vmax.f32 %v2284_v44, 0.0  ;;  %3733 = vst.msk [vmem:[#allocation3 + $0x88] sm:$0xff] %vm9860_vm0, %v7500_v52  ;;  %v7523_v37 = vld [vmem:[#allocation2 + $0x60] sm:$0xff]  ;;  %v7535_v44 = vld [vmem:[#allocation2 + $0x69] sm:$0xff] }
 0x293   : > { %v2060_v21 = vpop.f32.mrf.mxu0  ;;  %4002 = vmatpush.msrb.mxu3 %v3861_v16  ;;  %2448 = vst.msk [vmem:[#allocation3] sm:$0xff] %vm9860_vm0, %v2416_v32  ;;  %v3858_v32 = vld [vmem:[%s9816_s3 + $0x10] sm:$0xff] }
 0x294   : > { %2393 = vst.msk [vmem:[#allocation2 + $0x81] sm:$0xff] %vm9860_vm0, %v2361_v4  ;;  %v2061_v12 = vadd.f32 %v7272_v53, %v2060_v21  ;;  %3192 = vrot.lane.b32.xlu0 %v7398_v36, %s6092_s22  ;;  %v7541_v4 = vld [vmem:[#allocation2 + $0x79] sm:$0xff] }
 0x295   : > { %2936 = vrot.lane.b32.xlu2 %v7402_v61, %s6094_s24  ;;  %3384 = vrot.lane.b32.xlu1 %v7523_v37, %s6093_s23  ;;  %v622_v30 = vpop.permute.xlu0 %621  ;;  %1780 = vst.msk [vmem:[#allocation3 + $0x2f8] sm:$0xff] %vm9860_vm0, %v1748_v59 }
 0x296   : > { %v815_v22 = vpop.permute.xlu1 %814  ;;  %4003 = vmatpush.msrb.mxu3 %v3860_v57  ;;  %v2174_v29 = vadd.f32 %v6915_v55, %v2061_v12  ;;  %688 = vst.msk [vmem:[#allocation3 + $0x2d0] sm:$0xff] %vm657_vm3, %v622_v30  ;;  %v1008_v61 = vpop.permute.xlu2 %1007  ;;  %v3857_v12 = vld [vmem:[%s9816_s3 + $0x8] sm:$0xff] }
 0x297   : > { %881 = vst.msk [vmem:[#allocation3 + $0x2d0] sm:$0xff] %vm850_vm4, %v815_v22  ;;  %v1868_v16 = vld [vmem:[#allocation3 + $0x2b8] sm:$0xff]  ;;  %v7548_v57 = vpop.f32.mrf.mxu2 }
 0x298   : > { %4004 = vmatpush.msrb.mxu3 %v3859_v26  ;;  %v2287_v21 = vadd.f32 %v7275_v58, %v2174_v29  ;;  %1074 = vst.msk [vmem:[#allocation3 + $0x2d0] sm:$0xff] %vm1043_vm5, %v1008_v61  ;;  %5824 = vmatmul.msk.f32.gmra.mxu0 %vm9860_vm0, %v3771_v50  ;;  %v2417_v26 = vld [vmem:[#allocation2 + $0x8] sm:$0xff]  ;;  %v3856_v29 = vld [vmem:[%s9816_s3] sm:$0xff] }
 0x299   : > { %2116 = vmatmul.f32.gmra.mxu3 %v1868_v16  ;;  %3095 = vst.msk [vmem:[#allocation3 + $0xb0] sm:$0xff] %vm9860_vm0, %v7535_v44 }
 0x29a   : > { %4005 = vmatpush.msrb.mxu3 %v3858_v32  ;;  %v2362_v55 = vmax.f32 %v2287_v21, 0.0  ;;  %3096 = vst.msk [vmem:[#allocation3 + $0xc8] sm:$0xff] %vm9860_vm0, %v7541_v4 }
 0x29b   : > { %v2063_v58 = vpop.f32.mrf.mxu0  ;;  %2449 = vst.msk [vmem:[#allocation3 + $0x18] sm:$0xff] %vm9860_vm0, %v2417_v26  ;;  %v7583_v26 = vld [vmem:[#allocation2 + $0x81] sm:$0xff] }
 0x29c   : > { %4006 = vmatpush.msrb.mxu3 %v3857_v12  ;;  %2394 = vst.msk [vmem:[#allocation2 + $0x91] sm:$0xff] %vm9860_vm0, %v2362_v55  ;;  %v2064_v30 = vadd.f32 %v7272_v53, %v2063_v58  ;;  %2554 = vrot.lane.b32.xlu0 %v7376_v51, %s6092_s22  ;;  %v1876_v22 = vld [vmem:[#allocation3 + $0x2f8] sm:$0xff]  ;;  %v7571_v51 = vld [vmem:[#allocation2 + $0x7a] sm:$0xff] }
 0x29d   : > { %3576 = vrot.lane.b32.xlu2 %v7458_v62, %s6094_s24  ;;  %2746 = vrot.lane.b32.xlu1 %v7367_v39, %s6093_s23  ;;  %v624_v61 = vpop.permute.xlu0 %623  ;;  %3759 = vst.msk [vmem:[#allocation3 + $0x2f8] sm:$0xff] %vm9860_vm0, %v1748_v59  ;;  %v3774_v55 = vld [vmem:[#allocation3 + $0x70] sm:$0xff] }
 0x29e   : > { %v817_v50 = vpop.permute.xlu1 %816  ;;  %5820 = vmatmul.msk.f32.gmra.mxu2 %vm9860_vm0, %v1876_v22  ;;  %v2177_v16 = vadd.f32 %v6941_v13, %v2064_v30  ;;  %689 = vst.msk [vmem:[#allocation3 + $0x2e8] sm:$0xff] %vm657_vm3, %v624_v61  ;;  %v1010_v32 = vpop.permute.xlu2 %1009  ;;  %4007 = vmatpush.msrb.mxu3 %v3856_v29  ;;  %v7574_v12 = vld [vmem:[#allocation2 + $0x82] sm:$0xff] }
 0x29f   : > { %882 = vst.msk [vmem:[#allocation3 + $0x2e8] sm:$0xff] %vm850_vm4, %v817_v50  ;;  %v1871_v21 = vld [vmem:[#allocation3 + $0x2d0] sm:$0xff]  ;;  %v2425_v13 = vld [vmem:[#allocation2 + $0x68] sm:$0xff]  ;;  %v2316_v61 = vpop.f32.mrf.mxu2  ;;  %v3887_v50 = vld [vmem:[%s9816_s3 + $0xf8] sm:$0xff] }
 0x2a0   : > { %v2290_v39 = vadd.f32 %v7284_v43, %v2177_v16  ;;  %1075 = vst.msk [vmem:[#allocation3 + $0x2e8] sm:$0xff] %vm1043_vm5, %v1010_v32  ;;  %5825 = vmatmul.msk.f32.gmra.mxu0 %vm9860_vm0, %v3774_v55  ;;  %v7590_v22 = vld [vmem:[#allocation2 + $0x68] sm:$0xff]  ;;  %v3886_v16 = vld [vmem:[%s9816_s3 + $0xf0] sm:$0xff]  ;;  %4105 = vmatpush.msrb.mxu2 %v3887_v50  ;;  %v2427_v50 = vld [vmem:[#allocation2 + $0x80] sm:$0xff] }
 0x2a1   : > { %2119 = vmatmul.f32.gmra.mxu3 %v1871_v21  ;;  %3734 = vst.msk [vmem:[#allocation3 + $0xa0] sm:$0xff] %vm9860_vm0, %v7571_v51  ;;  %v2426_v21 = vld [vmem:[#allocation2 + $0x78] sm:$0xff] }
 0x2a2   : > { %v2363_v59 = vmax.f32 %v2290_v39, 0.0  ;;  %3735 = vst.msk [vmem:[#allocation3 + $0xb8] sm:$0xff] %vm9860_vm0, %v7574_v12  ;;  %4106 = vmatpush.msrb.mxu2 %v3886_v16 }
 0x2a3   : > { %v2066_v58 = vpop.f32.mrf.mxu0  ;;  %v2090_v30 = vpop.f32.mrf.mxu3  ;;  %2457 = vst.msk [vmem:[#allocation3 + $0xd8] sm:$0xff] %vm9860_vm0, %v2425_v13  ;;  %v3885_v13 = vld [vmem:[%s9816_s3 + $0xe8] sm:$0xff] }
 0x2a4   : > { %2395 = vst.msk [vmem:[#allocation2 + $0x99] sm:$0xff] %vm9860_vm0, %v2363_v59  ;;  %v2067_v43 = vadd.f32 %v7272_v53, %v2066_v58  ;;  %3194 = vrot.lane.b32.xlu0 %v7422_v34, %s6092_s22  ;;  %v2091_v29 = vadd.f32 %v7272_v53, %v2090_v30  ;;  %v7611_v59 = vld [vmem:[#allocation2 + $0x91] sm:$0xff]  ;;  %4107 = vmatpush.msrb.mxu2 %v3885_v13 }
 0x2a5   : > { %2938 = vrot.lane.b32.xlu2 %v7441_v18, %s6094_s24  ;;  %3386 = vrot.lane.b32.xlu1 %v7590_v22, %s6093_s23  ;;  %v2545_v18 = vpop.permute.xlu0 %2544  ;;  %3097 = vst.msk [vmem:[#allocation3 + $0xe0] sm:$0xff] %vm9860_vm0, %v7583_v26  ;;  %v3777_v30 = vld [vmem:[#allocation3 + $0x88] sm:$0xff] }
 0x2a6   : > { %v2737_v32 = vpop.permute.xlu1 %2736  ;;  %v2180_v55 = vadd.f32 %v6972_v20, %v2067_v43  ;;  %v2204_v39 = vadd.f32 %v7114_v41, %v2091_v29  ;;  %2640 = vst.msk [vmem:[#allocation3] sm:$0xff] %vm657_vm3, %v2545_v18  ;;  %v3884_v20 = vld [vmem:[%s9816_s3 + $0xe0] sm:$0xff]  ;;  %v2428_v41 = vld [vmem:[#allocation2 + $0x90] sm:$0xff] }
 0x2a7   : > { %v1874_v58 = vld [vmem:[#allocation3 + $0x2e8] sm:$0xff]  ;;  %2832 = vst.msk [vmem:[#allocation3] sm:$0xff] %vm850_vm4, %v2737_v32  ;;  %4108 = vmatpush.msrb.mxu2 %v3884_v20 }
 0x2a8   : > { %v2293_v14 = vadd.f32 %v7297_v27, %v2180_v55  ;;  %v2317_v25 = vadd.f32 %v2316_v61, %v2204_v39  ;;  %5826 = vmatmul.msk.f32.gmra.mxu0 %vm9860_vm0, %v3777_v30  ;;  %2458 = vst.msk [vmem:[#allocation3 + $0xf0] sm:$0xff] %vm9860_vm0, %v2426_v21  ;;  %v3883_v21 = vld [vmem:[%s9816_s3 + $0xd8] sm:$0xff]  ;;  %v3881_v39 = vld [vmem:[%s9816_s3 + $0xc8] sm:$0xff] }
 0x2a9   : > { %2122 = vmatmul.f32.gmra.mxu3 %v1874_v58  ;;  %3098 = vst.msk [vmem:[#allocation3 + $0xf8] sm:$0xff] %vm9860_vm0, %v7611_v59  ;;  %4109 = vmatpush.msrb.mxu2 %v3883_v21 }
 0x2aa   : > { %v2364_v43 = vmax.f32 %v2293_v14, 0.0  ;;  %v2372_v29 = vmax.f32 %v2317_v25, 0.0  ;;  %2459 = vst.msk [vmem:[#allocation3 + $0x108] sm:$0xff] %vm9860_vm0, %v2427_v50 }
 0x2ab   : > { %v2069_v27 = vpop.f32.mrf.mxu0  ;;  %2460 = vst.msk [vmem:[#allocation3 + $0x120] sm:$0xff] %vm9860_vm0, %v2428_v41  ;;  %v7635_v32 = vld [vmem:[#allocation2 + $0x92] sm:$0xff]  ;;  %v7644_v55 = vld [vmem:[#allocation2 + $0x9a] sm:$0xff] }
 0x2ac   : > { %2396 = vst.msk [vmem:[#allocation2 + $0xa9] sm:$0xff] %vm9860_vm0, %v2364_v43  ;;  %v2070_v61 = vadd.f32 %v7272_v53, %v2069_v27  ;;  %2556 = vrot.lane.b32.xlu0 %v7391_v40, %s6092_s22  ;;  %v3882_v40 = vld [vmem:[%s9816_s3 + $0xd0] sm:$0xff]  ;;  %v7652_v13 = vld [vmem:[#allocation2 + $0x99] sm:$0xff] }
 0x2ad   : > { %3578 = vrot.lane.b32.xlu2 %v7535_v44, %s6094_s24  ;;  %2404 = vst.msk [vmem:[#allocation2 + $0x109] sm:$0xff] %vm9860_vm0, %v2372_v29  ;;  %2748 = vrot.lane.b32.xlu1 %v7398_v36, %s6093_s23  ;;  %v2547_v14 = vpop.permute.xlu0 %2546  ;;  %v3780_v36 = vld [vmem:[#allocation3 + $0xa0] sm:$0xff]  ;;  %v2429_v41 = vld [vmem:[#allocation2 + $0x98] sm:$0xff] }
 0x2ae   : > { %v2739_v25 = vpop.permute.xlu1 %2738  ;;  %v2183_v16 = vadd.f32 %v6984_v60, %v2070_v61  ;;  %v2929_v18 = vpop.permute.xlu2 %2928  ;;  %2641 = vst.msk [vmem:[#allocation3 + $0x18] sm:$0xff] %vm657_vm3, %v2547_v14  ;;  %4110 = vmatpush.msrb.mxu2 %v3882_v40  ;;  %v7669_v29 = vld [vmem:[#allocation2 + $0x78] sm:$0xff]  ;;  %v3878_v40 = vld [vmem:[%s9816_s3 + $0xb0] sm:$0xff] }
 0x2af   : > { %3024 = vst.msk [vmem:[#allocation3] sm:$0xff] %vm1043_vm5, %v2929_v18  ;;  %v3879_v61 = vld [vmem:[%s9816_s3 + $0xb8] sm:$0xff]  ;;  %v2319_v14 = vpop.f32.mrf.mxu2 }
 0x2b0   : > { %v2296_v60 = vadd.f32 %v7324_v10, %v2183_v16  ;;  %5827 = vmatmul.msk.f32.gmra.mxu0 %vm9860_vm0, %v3780_v36  ;;  %2833 = vst.msk [vmem:[#allocation3 + $0x18] sm:$0xff] %vm850_vm4, %v2739_v25  ;;  %v3880_v10 = vld [vmem:[%s9816_s3 + $0xc0] sm:$0xff]  ;;  %4111 = vmatpush.msrb.mxu2 %v3881_v39 }
 0x2b1   : > { %3736 = vst.msk [vmem:[#allocation3 + $0xd0] sm:$0xff] %vm9860_vm0, %v7635_v32 }
 0x2b2   : > { %v2365_v58 = vmax.f32 %v2296_v60, 0.0  ;;  %3737 = vst.msk [vmem:[#allocation3 + $0xe8] sm:$0xff] %vm9860_vm0, %v7644_v55  ;;  %4112 = vmatpush.msrb.mxu2 %v3880_v10  ;;  %v3783_v60 = vld [vmem:[#allocation3 + $0xb8] sm:$0xff] }
 0x2b3   : > { %v2072_v30 = vpop.f32.mrf.mxu0  ;;  %v2093_v50 = vpop.f32.mrf.mxu3  ;;  %v7661_v20 = vld [vmem:[#allocation2 + $0xa9] sm:$0xff]  ;;  %3099 = vst.msk [vmem:[#allocation3 + $0x110] sm:$0xff] %vm9860_vm0, %v7652_v13 }
 0x2b4   : > { %2397 = vst.msk [vmem:[#allocation2 + $0xb1] sm:$0xff] %vm9860_vm0, %v2365_v58  ;;  %v2073_v43 = vadd.f32 %v7272_v53, %v2072_v30  ;;  %3196 = vrot.lane.b32.xlu0 %v7478_v33, %s6092_s22  ;;  %v2094_v27 = vadd.f32 %v7272_v53, %v2093_v50  ;;  %v7686_v36 = vld [vmem:[#allocation2 + $0x109] sm:$0xff]  ;;  %4113 = vmatpush.msrb.mxu2 %v3879_v61  ;;  %v3876_v50 = vld [vmem:[%s9816_s3 + $0xa0] sm:$0xff] }
 0x2b5   : > { %2940 = vrot.lane.b32.xlu2 %v7523_v37, %s6094_s24  ;;  %3388 = vrot.lane.b32.xlu1 %v7669_v29, %s6093_s23  ;;  %3100 = vst.msk [vmem:[#allocation3 + $0x128] sm:$0xff] %vm9860_vm0, %v7661_v20  ;;  %v2430_v37 = vld [vmem:[#allocation2 + $0xa8] sm:$0xff] }
 0x2b6   : > { %v2186_v25 = vadd.f32 %v7001_v9, %v2073_v43  ;;  %v3760_v18 = vld [vmem:[#allocation3] sm:$0xff]  ;;  %v2207_v21 = vadd.f32 %v7135_v63, %v2094_v27  ;;  %2461 = vst.msk [vmem:[#allocation3 + $0x138] sm:$0xff] %vm9860_vm0, %v2429_v41  ;;  %v7690_v39 = vld [vmem:[#allocation2 + $0x108] sm:$0xff]  ;;  %4114 = vmatpush.msrb.mxu2 %v3878_v40 }
 0x2b7   : > { %v2931_v16 = vpop.permute.xlu2 %2930  ;;  %4008 = vmatmul.f32.vlgmr.msrb.gmra.mxu3 %v3760_v18  ;;  %v3877_v63 = vld [vmem:[%s9816_s3 + $0xa8] sm:$0xff]  ;;  %2462 = vst.msk [vmem:[#allocation3 + $0x150] sm:$0xff] %vm9860_vm0, %v2430_v37 }
 0x2b8   : > { %3025 = vst.msk [vmem:[#allocation3 + $0x18] sm:$0xff] %vm1043_vm5, %v2931_v16  ;;  %v2299_v9 = vadd.f32 %v7351_v28, %v2186_v25  ;;  %v2320_v58 = vadd.f32 %v2319_v14, %v2207_v21  ;;  %5828 = vmatmul.msk.f32.gmra.mxu0 %vm9860_vm0, %v3783_v60  ;;  %4115 = vmatpush.msrb.mxu2 %v3877_v63  ;;  %v3786_v18 = vld [vmem:[#allocation3 + $0xd0] sm:$0xff]  ;;  %v3873_v21 = vld [vmem:[%s9816_s3 + $0x88] sm:$0xff] }
 0x2b9   : > { %3108 = vst.msk [vmem:[#allocation3 + $0x1e8] sm:$0xff] %vm9860_vm0, %v7686_v36  ;;  %v7741_v60 = vld [vmem:[#allocation2 + $0x80] sm:$0xff] }
 0x2ba   : > { %v2366_v10 = vmax.f32 %v2299_v9, 0.0  ;;  %v2373_v30 = vmax.f32 %v2320_v58, 0.0  ;;  %2470 = vst.msk [vmem:[#allocation3 + $0x210] sm:$0xff] %vm9860_vm0, %v7690_v39  ;;  %4116 = vmatpush.msrb.mxu2 %v3876_v50 }
 0x2bb   : > { %v2075_v28 = vpop.f32.mrf.mxu0  ;;  %v7705_v41 = vld [vmem:[#allocation2 + $0xaa] sm:$0xff]  ;;  %v7713_v27 = vld [vmem:[#allocation2 + $0xb2] sm:$0xff] }
 0x2bc   : > { %2398 = vst.msk [vmem:[#allocation2 + $0xc1] sm:$0xff] %vm9860_vm0, %v2366_v10  ;;  %v2076_v43 = vadd.f32 %v7272_v53, %v2075_v28  ;;  %2558 = vrot.lane.b32.xlu0 %v7476_v38, %s6092_s22  ;;  %v7718_v61 = vld [vmem:[#allocation2 + $0xb1] sm:$0xff]  ;;  %v2322_v28 = vpop.f32.mrf.mxu2 }
 0x2bd   : > { %3580 = vrot.lane.b32.xlu2 %v7541_v4, %s6094_s24  ;;  %2405 = vst.msk [vmem:[#allocation2 + $0x111] sm:$0xff] %vm9860_vm0, %v2373_v30  ;;  %2750 = vrot.lane.b32.xlu1 %v7422_v34, %s6093_s23  ;;  %v2431_v14 = vld [vmem:[#allocation2 + $0xb0] sm:$0xff]  ;;  %v3875_v38 = vld [vmem:[%s9816_s3 + $0x98] sm:$0xff] }
 0x2be   : > { %v2189_v37 = vadd.f32 %v7016_v7, %v2076_v43  ;;  %3738 = vst.msk [vmem:[#allocation3 + $0x100] sm:$0xff] %vm9860_vm0, %v7705_v41  ;;  %v3874_v34 = vld [vmem:[%s9816_s3 + $0x90] sm:$0xff]  ;;  %4117 = vmatpush.msrb.mxu2 %v3875_v38  ;;  %v3789_v38 = vld [vmem:[#allocation3 + $0xe8] sm:$0xff] }
 0x2bf   : > { %v7721_v25 = vpop.permute.xlu2 %3568  ;;  %v3763_v16 = vld [vmem:[#allocation3 + $0x18] sm:$0xff]  ;;  %3739 = vst.msk [vmem:[#allocation3 + $0x118] sm:$0xff] %vm9860_vm0, %v7713_v27 }
 0x2c0   : > { %4011 = vmatmul.f32.gmra.mxu3 %v3763_v16  ;;  %v2302_v7 = vadd.f32 %v7373_v31, %v2189_v37  ;;  %5829 = vmatmul.msk.f32.gmra.mxu0 %vm9860_vm0, %v3786_v18  ;;  %3101 = vst.msk [vmem:[#allocation3 + $0x140] sm:$0xff] %vm9860_vm0, %v7718_v61  ;;  %v3872_v31 = vld [vmem:[%s9816_s3 + $0x80] sm:$0xff] }
 0x2c1   : > { %4118 = vmatpush.msrb.mxu2 %v3874_v34  ;;  %2463 = vst.msk [vmem:[#allocation3 + $0x168] sm:$0xff] %vm9860_vm0, %v2431_v14 }
 0x2c2   : > { %v2367_v40 = vmax.f32 %v2302_v7, 0.0 }
 0x2c3   : > { %v2096_v9 = vpop.f32.mrf.mxu3  ;;  %4119 = vmatpush.msrb.mxu2 %v3873_v21  ;;  %v7752_v63 = vld [vmem:[#allocation2 + $0xc1] sm:$0xff] }
 0x2c4   : > { %2399 = vst.msk [vmem:[#allocation2 + $0xc9] sm:$0xff] %vm9860_vm0, %v2367_v40  ;;  %3198 = vrot.lane.b32.xlu0 %v7500_v52, %s6092_s22  ;;  %v2097_v58 = vadd.f32 %v7272_v53, %v2096_v9  ;;  %v7754_v10 = vld [vmem:[#allocation2 + $0x10a] sm:$0xff]  ;;  %v7756_v30 = vld [vmem:[#allocation2 + $0x112] sm:$0xff]  ;;  %v7760_v43 = vld [vmem:[#allocation2 + $0xc0] sm:$0xff] }
 0x2c5   : > { %2942 = vrot.lane.b32.xlu2 %v7590_v22, %s6094_s24  ;;  %3390 = vrot.lane.b32.xlu1 %v7741_v60, %s6093_s23  ;;  %v2078_v50 = vpop.f32.mrf.mxu0  ;;  %3746 = vst.msk [vmem:[#allocation3 + $0x1c0] sm:$0xff] %vm9860_vm0, %v7754_v10  ;;  %v7769_v53 = vld [vmem:[%s9815_s2] ss:$0 sm:$0xff]  ;;  %v7775_v16 = vld [vmem:[#allocation2 + $0x111] sm:$0xff] }
 0x2c6   : > { %4120 = vmatpush.msrb.mxu2 %v3872_v31  ;;  %v2079_v14 = vadd.f32 %v7769_v53, %v2078_v50  ;;  %v2210_v37 = vadd.f32 %v7156_v24, %v2097_v58  ;;  %3747 = vst.msk [vmem:[#allocation3 + $0x1d8] sm:$0xff] %vm9860_vm0, %v7756_v30  ;;  %v7777_v34 = vld [vmem:[#allocation2 + $0x110] sm:$0xff]  ;;  %v3795_v1 = vld [vmem:[#allocation3 + $0x118] sm:$0xff] }
 0x2c7   : > { %v7764_v22 = vpop.permute.xlu2 %2932  ;;  %3102 = vst.msk [vmem:[#allocation3 + $0x158] sm:$0xff] %vm9860_vm0, %v7752_v63 }
 0x2c8   : > { %v2192_v18 = vadd.f32 %v7035_v49, %v2079_v14  ;;  %v2323_v7 = vadd.f32 %v2322_v28, %v2210_v37  ;;  %5830 = vmatmul.msk.f32.gmra.mxu0 %vm9860_vm0, %v3789_v38  ;;  %2464 = vst.msk [vmem:[#allocation3 + $0x180] sm:$0xff] %vm9860_vm0, %v7760_v43  ;;  %v3792_v28 = vld [vmem:[#allocation3 + $0x100] sm:$0xff] }
 0x2c9   : > { %3109 = vst.msk [vmem:[#allocation3 + $0x200] sm:$0xff] %vm9860_vm0, %v7775_v16  ;;  %v7822_v38 = vld [vmem:[#allocation2 + $0x90] sm:$0xff] }
 0x2ca   : > { %v2305_v24 = vadd.f32 %v7407_v11, %v2192_v18  ;;  %v2374_v21 = vmax.f32 %v2323_v7, 0.0  ;;  %2471 = vst.msk [vmem:[#allocation3 + $0x228] sm:$0xff] %vm9860_vm0, %v7777_v34 }
 0x2cb   : > { %v7790_v40 = vld [vmem:[#allocation2 + $0xc2] sm:$0xff]  ;;  %v7801_v49 = vld [vmem:[#allocation2 + $0xca] sm:$0xff] }
 0x2cc   : > { %v2368_v9 = vmax.f32 %v2305_v24, 0.0  ;;  %2406 = vst.msk [vmem:[#allocation2 + $0x121] sm:$0xff] %vm9860_vm0, %v2374_v21  ;;  %2560 = vrot.lane.b32.xlu0 %v7458_v62, %s6092_s22  ;;  %v7804_v58 = vld [vmem:[#allocation2 + $0xc9] sm:$0xff]  ;;  %v2325_v24 = vpop.f32.mrf.mxu2 }
 0x2cd   : > { %3582 = vrot.lane.b32.xlu2 %v7583_v26, %s6094_s24  ;;  %2752 = vrot.lane.b32.xlu1 %v7478_v33, %s6093_s23  ;;  %3740 = vst.msk [vmem:[#allocation3 + $0x130] sm:$0xff] %vm9860_vm0, %v7790_v40  ;;  %v7807_v14 = vld [vmem:[#allocation2 + $0xc8] sm:$0xff] }
 0x2ce   : > { %2400 = vst.msk [vmem:[#allocation2 + $0xd9] sm:$0xff] %vm9860_vm0, %v2368_v9  ;;  %v3185_v11 = vpop.permute.xlu0 %3184  ;;  %v2741_v50 = vpop.permute.xlu1 %2740 }
 0x2cf   : > { %v3571_v31 = vpop.permute.xlu2 %3570  ;;  %3280 = vst.msk [vmem:[#allocation3 + $0x8] sm:$0xff] %vm657_vm3, %v3185_v11 }
 0x2d0   : > { %5831 = vmatmul.msk.f32.gmra.mxu0 %vm9860_vm0, %v3792_v28  ;;  %3741 = vst.msk [vmem:[#allocation3 + $0x148] sm:$0xff] %vm9860_vm0, %v7801_v49 }
 0x2d1   : > { %3103 = vst.msk [vmem:[#allocation3 + $0x170] sm:$0xff] %vm9860_vm0, %v7804_v58 }
 0x2d2   : > { %2465 = vst.msk [vmem:[#allocation3 + $0x198] sm:$0xff] %vm9860_vm0, %v7807_v14 }
 0x2d3   : > { %v2099_v62 = vpop.f32.mrf.mxu3  ;;  %v7816_v33 = vld [vmem:[#allocation2 + $0x120] sm:$0xff] }
 0x2d4   : > { %v7818_v37 = vld [vmem:[#allocation2 + $0x121] sm:$0xff]  ;;  %3200 = vrot.lane.b32.xlu0 %v7571_v51, %s6092_s22  ;;  %v2100_v18 = vadd.f32 %v7769_v53, %v2099_v62  ;;  %2472 = vst.msk [vmem:[#allocation3 + $0x240] sm:$0xff] %vm9860_vm0, %v7816_v33 }
 0x2d5   : > { %2944 = vrot.lane.b32.xlu2 %v7669_v29, %s6094_s24  ;;  %3110 = vst.msk [vmem:[#allocation3 + $0x218] sm:$0xff] %vm9860_vm0, %v7818_v37  ;;  %3392 = vrot.lane.b32.xlu1 %v7822_v38, %s6093_s23  ;;  %v2081_v7 = vpop.f32.mrf.mxu0  ;;  %v7831_v21 = vld [vmem:[#allocation2 + $0xd9] sm:$0xff] }
 0x2d6   : > { %v3187_v29 = vpop.permute.xlu0 %3186  ;;  %v2082_v11 = vadd.f32 %v7769_v53, %v2081_v7  ;;  %v2213_v28 = vadd.f32 %v7177_v48, %v2100_v18  ;;  %3104 = vst.msk [vmem:[#allocation3 + $0x188] sm:$0xff] %vm9860_vm0, %v7831_v21  ;;  %v7842_v2 = vld [vmem:[#allocation2 + $0xd8] sm:$0xff] }
 0x2d7   : > { %v7835_v9 = vpop.permute.xlu2 %2934  ;;  %3281 = vst.msk [vmem:[#allocation3 + $0x20] sm:$0xff] %vm657_vm3, %v3187_v29  ;;  %v3377_v62 = vpop.permute.xlu1 %3376 }
 0x2d8   : > { %3472 = vst.msk [vmem:[#allocation3 + $0x8] sm:$0xff] %vm850_vm4, %v3377_v62  ;;  %v2195_v15 = vadd.f32 %v7053_v42, %v2082_v11  ;;  %v2326_v3 = vadd.f32 %v2325_v24, %v2213_v28  ;;  %5832 = vmatmul.msk.f32.gmra.mxu0 %vm9860_vm0, %v3795_v1  ;;  %v3798_v42 = vld [vmem:[#allocation3 + $0x130] sm:$0xff]  ;;  %v2328_v24 = vpop.f32.mrf.mxu2 }
 0x2d9   : > { %3664 = vst.msk [vmem:[#allocation3 + $0x8] sm:$0xff] %vm1043_vm5, %v7721_v25 }
 0x2da   : > { %v2308_v48 = vadd.f32 %v7456_v56, %v2195_v15  ;;  %v2375_v18 = vmax.f32 %v2326_v3, 0.0  ;;  %2466 = vst.msk [vmem:[#allocation3 + $0x1b0] sm:$0xff] %vm9860_vm0, %v7842_v2 }
 0x2dc   : > { %v2369_v7 = vmax.f32 %v2308_v48, 0.0  ;;  %2407 = vst.msk [vmem:[#allocation2 + $0x129] sm:$0xff] %vm9860_vm0, %v2375_v18  ;;  %2562 = vrot.lane.b32.xlu0 %v7535_v44, %s6092_s22 }
 0x2dd   : > { %3584 = vrot.lane.b32.xlu2 %v7611_v59, %s6094_s24  ;;  %2754 = vrot.lane.b32.xlu1 %v7500_v52, %s6093_s23 }
 0x2de   : > { %2401 = vst.msk [vmem:[#allocation2 + $0xe1] sm:$0xff] %vm9860_vm0, %v2369_v7  ;;  %v2549_v1 = vpop.permute.xlu0 %2548 }
 0x2df   : > { %v7860_v15 = vpop.permute.xlu2 %3572  ;;  %2642 = vst.msk [vmem:[#allocation3 + $0x30] sm:$0xff] %vm657_vm3, %v2549_v1  ;;  %v3379_v3 = vpop.permute.xlu1 %3378  ;;  %v3801_v1 = vld [vmem:[#allocation3 + $0x148] sm:$0xff] }
 0x2e0   : > { %2834 = vst.msk [vmem:[#allocation3 + $0x30] sm:$0xff] %vm850_vm4, %v2741_v50  ;;  %v3761_v56 = vld [vmem:[#allocation3 + $0x8] sm:$0xff]  ;;  %5833 = vmatmul.msk.f32.gmra.mxu0 %vm9860_vm0, %v3798_v42 }
 0x2e1   : > { %3026 = vst.msk [vmem:[#allocation3 + $0x30] sm:$0xff] %vm1043_vm5, %v7764_v22  ;;  %4121 = vmatmul.f32.vlgmr.msrb.gmra.mxu2 %v3761_v56  ;;  %v7875_v50 = vld [vmem:[#allocation2 + $0x98] sm:$0xff] }
 0x2e2   : > { %3473 = vst.msk [vmem:[#allocation3 + $0x20] sm:$0xff] %vm850_vm4, %v3379_v3 }
 0x2e3   : > { %3665 = vst.msk [vmem:[#allocation3 + $0x20] sm:$0xff] %vm1043_vm5, %v3571_v31  ;;  %v2102_v52 = vpop.f32.mrf.mxu3  ;;  %v7869_v44 = vld [vmem:[#allocation2 + $0x122] sm:$0xff]  ;;  %v7871_v25 = vld [vmem:[#allocation2 + $0x12a] sm:$0xff] }
 0x2e4   : > { %3202 = vrot.lane.b32.xlu0 %v7574_v12, %s6092_s22  ;;  %v2103_v22 = vadd.f32 %v7769_v53, %v2102_v52  ;;  %3748 = vst.msk [vmem:[#allocation3 + $0x1f0] sm:$0xff] %vm9860_vm0, %v7869_v44  ;;  %v7910_v6 = vld [vmem:[#allocation2 + $0x128] sm:$0xff] }
 0x2e5   : > { %2946 = vrot.lane.b32.xlu2 %v7741_v60, %s6094_s24  ;;  %3394 = vrot.lane.b32.xlu1 %v7875_v50, %s6093_s23  ;;  %v7884_v29 = vld [vmem:[#allocation2 + $0xda] sm:$0xff]  ;;  %v7886_v11 = vld [vmem:[#allocation2 + $0xe2] sm:$0xff]  ;;  %3749 = vst.msk [vmem:[#allocation3 + $0x208] sm:$0xff] %vm9860_vm0, %v7871_v25 }
 0x2e6   : > { %v2084_v31 = vpop.f32.mrf.mxu0  ;;  %v3189_v60 = vpop.permute.xlu0 %3188  ;;  %v2216_v48 = vadd.f32 %v7191_v23, %v2103_v22  ;;  %3742 = vst.msk [vmem:[#allocation3 + $0x160] sm:$0xff] %vm9860_vm0, %v7884_v29  ;;  %v7896_v18 = vld [vmem:[#allocation2 + $0xe1] sm:$0xff]  ;;  %v7905_v23 = vld [vmem:[#allocation2 + $0x129] sm:$0xff] }
 0x2e7   : > { %v7890_v28 = vpop.permute.xlu2 %3574  ;;  %v2085_v62 = vadd.f32 %v7769_v53, %v2084_v31  ;;  %v2743_v7 = vpop.permute.xlu1 %2742  ;;  %3282 = vst.msk [vmem:[#allocation3 + $0x38] sm:$0xff] %vm657_vm3, %v3189_v60  ;;  %v7899_v3 = vld [vmem:[#allocation2 + $0xe0] sm:$0xff] }
 0x2e8   : > { %v3766_v56 = vld [vmem:[#allocation3 + $0x30] sm:$0xff]  ;;  %v2329_v52 = vadd.f32 %v2328_v24, %v2216_v48  ;;  %5834 = vmatmul.msk.f32.gmra.mxu0 %vm9860_vm0, %v3801_v1  ;;  %3743 = vst.msk [vmem:[#allocation3 + $0x178] sm:$0xff] %vm9860_vm0, %v7886_v11 }
 0x2e9   : > { %v2198_v42 = vadd.f32 %v7073_v46, %v2085_v62  ;;  %4014 = vmatmul.f32.gmra.mxu3 %v3766_v56  ;;  %3105 = vst.msk [vmem:[#allocation3 + $0x1a0] sm:$0xff] %vm9860_vm0, %v7896_v18  ;;  %v7940_v56 = vld [vmem:[#allocation2 + $0xa8] sm:$0xff] }
 0x2ea   : > { %v3764_v31 = vld [vmem:[#allocation3 + $0x20] sm:$0xff]  ;;  %v2376_v60 = vmax.f32 %v2329_v52, 0.0  ;;  %2467 = vst.msk [vmem:[#allocation3 + $0x1c8] sm:$0xff] %vm9860_vm0, %v7899_v3 }
 0x2eb   : > { %v2311_v22 = vadd.f32 %v7505_v17, %v2198_v42  ;;  %4124 = vmatmul.f32.gmra.mxu2 %v3764_v31  ;;  %3111 = vst.msk [vmem:[#allocation3 + $0x230] sm:$0xff] %vm9860_vm0, %v7905_v23 }
 0x2ec   : > { %2408 = vst.msk [vmem:[#allocation2 + $0x139] sm:$0xff] %vm9860_vm0, %v2376_v60  ;;  %2564 = vrot.lane.b32.xlu0 %v7541_v4, %s6092_s22 }
 0x2ed   : > { %v2370_v46 = vmax.f32 %v2311_v22, 0.0  ;;  %3586 = vrot.lane.b32.xlu2 %v7652_v13, %s6094_s24  ;;  %2756 = vrot.lane.b32.xlu1 %v7571_v51, %s6093_s23  ;;  %2473 = vst.msk [vmem:[#allocation3 + $0x258] sm:$0xff] %vm9860_vm0, %v7910_v6  ;;  %v3804_v48 = vld [vmem:[#allocation3 + $0x160] sm:$0xff]  ;;  %v2331_v51 = vpop.f32.mrf.mxu2 }
 0x2ee   : > { %v2551_v17 = vpop.permute.xlu0 %2550 }
 0x2ef   : > { %2402 = vst.msk [vmem:[#allocation2 + $0xf1] sm:$0xff] %vm9860_vm0, %v2370_v46  ;;  %v2937_v24 = vpop.permute.xlu2 %2936  ;;  %v3381_v62 = vpop.permute.xlu1 %3380  ;;  %v3807_v46 = vld [vmem:[#allocation3 + $0x178] sm:$0xff] }
 0x2f0   : > { %2643 = vst.msk [vmem:[#allocation3 + $0x48] sm:$0xff] %vm657_vm3, %v2551_v17  ;;  %5835 = vmatmul.msk.f32.gmra.mxu0 %vm9860_vm0, %v3804_v48 }
 0x2f1   : > { %3474 = vst.msk [vmem:[#allocation3 + $0x38] sm:$0xff] %vm850_vm4, %v3381_v62 }
 0x2f2   : > { %3666 = vst.msk [vmem:[#allocation3 + $0x38] sm:$0xff] %vm1043_vm5, %v7860_v15 }
 0x2f3   : > { %2835 = vst.msk [vmem:[#allocation3 + $0x48] sm:$0xff] %vm850_vm4, %v2743_v7  ;;  %v7934_v1 = vld [vmem:[#allocation2 + $0x138] sm:$0xff] }
 0x2f4   : > { %3027 = vst.msk [vmem:[#allocation3 + $0x48] sm:$0xff] %vm1043_vm5, %v7835_v9  ;;  %v2105_v4 = vpop.f32.mrf.mxu3  ;;  %v7936_v42 = vld [vmem:[#allocation2 + $0x139] sm:$0xff]  ;;  %3204 = vrot.lane.b32.xlu0 %v7635_v32, %s6092_s22 }
 0x2f5   : > { %2948 = vrot.lane.b32.xlu2 %v7822_v38, %s6094_s24  ;;  %v2106_v15 = vadd.f32 %v7769_v53, %v2105_v4  ;;  %3112 = vst.msk [vmem:[#allocation3 + $0x248] sm:$0xff] %vm9860_vm0, %v7936_v42  ;;  %3396 = vrot.lane.b32.xlu1 %v7940_v56, %s6093_s23  ;;  %v2087_v9 = vpop.f32.mrf.mxu0 }
 0x2f6   : > { %v7949_v7 = vld [vmem:[#allocation2 + $0xf1] sm:$0xff]  ;;  %2474 = vst.msk [vmem:[#allocation3 + $0x270] sm:$0xff] %vm9860_vm0, %v7934_v1  ;;  %v3191_v38 = vpop.permute.xlu0 %3190  ;;  %v2088_v22 = vadd.f32 %v7769_v53, %v2087_v9 }
 0x2f7   : > { %v3577_v52 = vpop.permute.xlu2 %3576  ;;  %v2219_v31 = vadd.f32 %v7205_v54, %v2106_v15  ;;  %3106 = vst.msk [vmem:[#allocation3 + $0x1b8] sm:$0xff] %vm9860_vm0, %v7949_v7  ;;  %v3383_v60 = vpop.permute.xlu1 %3382  ;;  %v7958_v17 = vld [vmem:[#allocation2 + $0xf0] sm:$0xff] }
 0x2f8   : > { %3283 = vst.msk [vmem:[#allocation3 + $0x50] sm:$0xff] %vm657_vm3, %v3191_v38  ;;  %v2201_v62 = vadd.f32 %v7097_v0, %v2088_v22  ;;  %5836 = vmatmul.msk.f32.gmra.mxu0 %vm9860_vm0, %v3807_v46  ;;  %v2334_v38 = vpop.f32.mrf.mxu2 }
 0x2f9   : > { %3475 = vst.msk [vmem:[#allocation3 + $0x50] sm:$0xff] %vm850_vm4, %v3383_v60  ;;  %v3767_v48 = vld [vmem:[#allocation3 + $0x38] sm:$0xff]  ;;  %v2332_v4 = vadd.f32 %v2331_v51, %v2219_v31 }
 0x2fa   : > { %3667 = vst.msk [vmem:[#allocation3 + $0x50] sm:$0xff] %vm1043_vm5, %v7890_v28  ;;  %4127 = vmatmul.f32.gmra.mxu2 %v3767_v48  ;;  %v2314_v54 = vadd.f32 %v7548_v57, %v2201_v62 }
 0x2fb   : > { %v3769_v15 = vld [vmem:[#allocation3 + $0x48] sm:$0xff]  ;;  %v2377_v9 = vmax.f32 %v2332_v4, 0.0  ;;  %2468 = vst.msk [vmem:[#allocation3 + $0x1e0] sm:$0xff] %vm9860_vm0, %v7958_v17 }
 0x2fc   : > { %4017 = vmatmul.f32.gmra.mxu3 %v3769_v15  ;;  %v2371_v60 = vmax.f32 %v2314_v54, 0.0  ;;  %2566 = vrot.lane.b32.xlu0 %v7583_v26, %s6092_s22 }
 0x2fd   : > { %2409 = vst.msk [vmem:[#allocation2 + $0x141] sm:$0xff] %vm9860_vm0, %v2377_v9  ;;  %3588 = vrot.lane.b32.xlu2 %v7661_v20, %s6094_s24  ;;  %2758 = vrot.lane.b32.xlu1 %v7574_v12, %s6093_s23  ;;  %v7985_v12 = vld [vmem:[#allocation2 + $0xb0] sm:$0xff] }
 0x2fe   : > { %2403 = vst.msk [vmem:[#allocation2 + $0xf9] sm:$0xff] %vm9860_vm0, %v2371_v60  ;;  %v2553_v57 = vpop.permute.xlu0 %2552 }
 0x2ff   : > { %v2939_v0 = vpop.permute.xlu2 %2938  ;;  %v2745_v28 = vpop.permute.xlu1 %2744  ;;  %2644 = vst.msk [vmem:[#allocation3 + $0x60] sm:$0xff] %vm657_vm3, %v2553_v57 }
 0x300   : > { %2836 = vst.msk [vmem:[#allocation3 + $0x60] sm:$0xff] %vm850_vm4, %v2745_v28  ;;  %v2337_v62 = vpop.f32.mrf.mxu2 }
 0x301   : > { %v3770_v51 = vld [vmem:[#allocation3 + $0x50] sm:$0xff]  ;;  %3028 = vst.msk [vmem:[#allocation3 + $0x60] sm:$0xff] %vm1043_vm5, %v2937_v24 }
 0x302   : > { %4130 = vmatmul.f32.gmra.mxu2 %v3770_v51 }
 0x303   : > { %v2108_v22 = vpop.f32.mrf.mxu3 }
 0x304   : > { %v7979_v31 = vld [vmem:[#allocation2 + $0x13a] sm:$0xff]  ;;  %v7981_v26 = vld [vmem:[#allocation2 + $0x142] sm:$0xff]  ;;  %3206 = vrot.lane.b32.xlu0 %v7644_v55, %s6092_s22  ;;  %v2109_v46 = vadd.f32 %v7769_v53, %v2108_v22 }
 0x305   : > { %9897 = vst [vmem:[#allocation40_spill] sm:$0xff] %v7981_v26  ;;  %2950 = vrot.lane.b32.xlu2 %v7875_v50, %s6094_s24  ;;  %3398 = vrot.lane.b32.xlu1 %v7985_v12, %s6093_s23  ;;  %v7994_v24 = vld [vmem:[#allocation2 + $0xf2] sm:$0xff]  ;;  %v8002_v15 = vld [vmem:[#allocation2 + $0xfa] sm:$0xff] }
 0x306   : > { %3750 = vst.msk [vmem:[#allocation3 + $0x220] sm:$0xff] %vm9860_vm0, %v7979_v31  ;;  %v3193_v48 = vpop.permute.xlu0 %3192  ;;  %v2222_v4 = vadd.f32 %v7217_v45, %v2109_v46  ;;  %v8005_v57 = vld [vmem:[#allocation2 + $0xf9] sm:$0xff]  ;;  %v8012_v22 = vld [vmem:[#allocation2 + $0x141] sm:$0xff] }
 0x307   : > { %3751 = vst.msk [vmem:[#allocation3 + $0x238] sm:$0xff] %vm9860_vm0, %v7981_v26  ;;  %v3579_v50 = vpop.permute.xlu2 %3578  ;;  %v3385_v54 = vpop.permute.xlu1 %3384  ;;  %v8010_v45 = vld [vmem:[#allocation2 + $0xf8] sm:$0xff] }
 0x308   : > { %3744 = vst.msk [vmem:[#allocation3 + $0x190] sm:$0xff] %vm9860_vm0, %v7994_v24  ;;  %v3772_v9 = vld [vmem:[#allocation3 + $0x60] sm:$0xff]  ;;  %v2335_v60 = vadd.f32 %v2334_v38, %v2222_v4 }
 0x309   : > { %3284 = vst.msk [vmem:[#allocation3 + $0x68] sm:$0xff] %vm657_vm3, %v3193_v48  ;;  %4020 = vmatmul.f32.gmra.mxu3 %v3772_v9  ;;  %v8031_v9 = vld [vmem:[#allocation2 + $0x140] sm:$0xff] }
 0x30a   : > { %3476 = vst.msk [vmem:[#allocation3 + $0x68] sm:$0xff] %vm850_vm4, %v3385_v54  ;;  %v2378_v28 = vmax.f32 %v2335_v60, 0.0 }
 0x30b   : > { %3668 = vst.msk [vmem:[#allocation3 + $0x68] sm:$0xff] %vm1043_vm5, %v3577_v52  ;;  %v2111_v51 = vpop.f32.mrf.mxu3 }
 0x30c   : > { %3745 = vst.msk [vmem:[#allocation3 + $0x1a8] sm:$0xff] %vm9860_vm0, %v8002_v15  ;;  %2568 = vrot.lane.b32.xlu0 %v7611_v59, %s6092_s22  ;;  %v2112_v52 = vadd.f32 %v7769_v53, %v2111_v51  ;;  %v2340_v59 = vpop.f32.mrf.mxu2 }
 0x30d   : > { %3107 = vst.msk [vmem:[#allocation3 + $0x1d0] sm:$0xff] %vm9860_vm0, %v8005_v57  ;;  %3590 = vrot.lane.b32.xlu2 %v7718_v61, %s6094_s24  ;;  %2760 = vrot.lane.b32.xlu1 %v7635_v32, %s6093_s23 }
 0x30e   : > { %2410 = vst.msk [vmem:[#allocation2 + $0x151] sm:$0xff] %vm9860_vm0, %v2378_v28  ;;  %v2555_v48 = vpop.permute.xlu0 %2554  ;;  %v2225_v4 = vadd.f32 %v7228_v5, %v2112_v52 }
 0x30f   : > { %v3810_v38 = vld [vmem:[#allocation3 + $0x190] sm:$0xff]  ;;  %2469 = vst.msk [vmem:[#allocation3 + $0x1f8] sm:$0xff] %vm9860_vm0, %v8010_v45  ;;  %v2941_v46 = vpop.permute.xlu2 %2940  ;;  %v2747_v54 = vpop.permute.xlu1 %2746 }
 0x310   : > { %5837 = vmatmul.msk.f32.gmra.mxu0 %vm9860_vm0, %v3810_v38  ;;  %3113 = vst.msk [vmem:[#allocation3 + $0x260] sm:$0xff] %vm9860_vm0, %v8012_v22  ;;  %v2338_v60 = vadd.f32 %v2337_v62, %v2225_v4 }
 0x311   : > { %2645 = vst.msk [vmem:[#allocation3 + $0x78] sm:$0xff] %vm657_vm3, %v2555_v48 }
 0x312   : > { %2837 = vst.msk [vmem:[#allocation3 + $0x78] sm:$0xff] %vm850_vm4, %v2747_v54  ;;  %v3773_v32 = vld [vmem:[#allocation3 + $0x68] sm:$0xff]  ;;  %v2379_v28 = vmax.f32 %v2338_v60, 0.0 }
 0x313   : > { %3029 = vst.msk [vmem:[#allocation3 + $0x78] sm:$0xff] %vm1043_vm5, %v2939_v0  ;;  %4133 = vmatmul.f32.gmra.mxu2 %v3773_v32  ;;  %v2114_v5 = vpop.f32.mrf.mxu3  ;;  %v3813_v62 = vld [vmem:[#allocation3 + $0x1a8] sm:$0xff] }
 0x314   : > { %2475 = vst.msk [vmem:[#allocation3 + $0x288] sm:$0xff] %vm9860_vm0, %v8031_v9  ;;  %3208 = vrot.lane.b32.xlu0 %v7705_v41, %s6092_s22  ;;  %v2115_v0 = vadd.f32 %v7769_v53, %v2114_v5  ;;  %v2343_v60 = vpop.f32.mrf.mxu2 }
 0x315   : > { %v8037_v51 = vld [vmem:[#allocation2 + $0x150] sm:$0xff]  ;;  %2411 = vst.msk [vmem:[#allocation2 + $0x159] sm:$0xff] %vm9860_vm0, %v2379_v28  ;;  %2952 = vrot.lane.b32.xlu2 %v7940_v56, %s6094_s24  ;;  %3400 = vrot.lane.b32.xlu1 %v7760_v43, %s6093_s23 }
 0x316   : > { %v8039_v52 = vld [vmem:[#allocation2 + $0x151] sm:$0xff]  ;;  %v3195_v48 = vpop.permute.xlu0 %3194  ;;  %v2228_v4 = vadd.f32 %v7236_v8, %v2115_v0  ;;  %2476 = vst.msk [vmem:[#allocation3 + $0x2a0] sm:$0xff] %vm9860_vm0, %v8037_v51 }
 0x317   : > { %3114 = vst.msk [vmem:[#allocation3 + $0x278] sm:$0xff] %vm9860_vm0, %v8039_v52  ;;  %v3581_v38 = vpop.permute.xlu2 %3580  ;;  %v3387_v56 = vpop.permute.xlu1 %3386 }
 0x318   : > { %5838 = vmatmul.msk.f32.gmra.mxu0 %vm9860_vm0, %v3813_v62  ;;  %3285 = vst.msk [vmem:[#allocation3 + $0x80] sm:$0xff] %vm657_vm3, %v3195_v48  ;;  %v2341_v32 = vadd.f32 %v2340_v59, %v2228_v4 }
 0x319   : > { %3477 = vst.msk [vmem:[#allocation3 + $0x80] sm:$0xff] %vm850_vm4, %v3387_v56 }
 0x31a   : > { %v3775_v54 = vld [vmem:[#allocation3 + $0x78] sm:$0xff]  ;;  %3669 = vst.msk [vmem:[#allocation3 + $0x80] sm:$0xff] %vm1043_vm5, %v3579_v50  ;;  %v2380_v28 = vmax.f32 %v2341_v32, 0.0  ;;  %v3816_v50 = vld [vmem:[#allocation3 + $0x1c0] sm:$0xff] }
 0x31b   : > { %4023 = vmatmul.f32.gmra.mxu3 %v3775_v54 }
 0x31c   : > { %v2117_v5 = vpop.f32.mrf.mxu3  ;;  %v8058_v26 = vld [vmem:[#allocation2 + $0x152] sm:$0xff]  ;;  %v8060_v62 = vld [vmem:[#allocation2 + $0x15a] sm:$0xff]  ;;  %2412 = vst.msk [vmem:[#allocation2 + $0x169] sm:$0xff] %vm9860_vm0, %v2380_v28  ;;  %2570 = vrot.lane.b32.xlu0 %v7652_v13, %s6092_s22  ;;  %v2346_v28 = vpop.f32.mrf.mxu2 }
 0x31d   : > { %3592 = vrot.lane.b32.xlu2 %v7752_v63, %s6094_s24  ;;  %v2118_v8 = vadd.f32 %v7769_v53, %v2117_v5  ;;  %2762 = vrot.lane.b32.xlu1 %v7644_v55, %s6093_s23  ;;  %3752 = vst.msk [vmem:[#allocation3 + $0x250] sm:$0xff] %vm9860_vm0, %v8058_v26  ;;  %v8079_v4 = vld [vmem:[#allocation2 + $0x159] sm:$0xff] }
 0x31e   : > { %v2557_v0 = vpop.permute.xlu0 %2556  ;;  %3753 = vst.msk [vmem:[#allocation3 + $0x268] sm:$0xff] %vm9860_vm0, %v8060_v62  ;;  %v8082_v54 = vld [vmem:[#allocation2 + $0x158] sm:$0xff] }
 0x31f   : > { %v8072_v59 = vpop.permute.xlu2 %2942  ;;  %v2231_v48 = vadd.f32 %v7245_v19, %v2118_v8  ;;  %v2749_v13 = vpop.permute.xlu1 %2748  ;;  %2646 = vst.msk [vmem:[#allocation3 + $0x90] sm:$0xff] %vm657_vm3, %v2557_v0 }
 0x320   : > { %5839 = vmatmul.msk.f32.gmra.mxu0 %vm9860_vm0, %v3816_v50  ;;  %2838 = vst.msk [vmem:[#allocation3 + $0x90] sm:$0xff] %vm850_vm4, %v2749_v13 }
 0x321   : > { %v3776_v55 = vld [vmem:[#allocation3 + $0x80] sm:$0xff]  ;;  %v2344_v56 = vadd.f32 %v2343_v60, %v2231_v48  ;;  %3030 = vst.msk [vmem:[#allocation3 + $0x90] sm:$0xff] %vm1043_vm5, %v2941_v46  ;;  %v3819_v60 = vld [vmem:[#allocation3 + $0x1d8] sm:$0xff] }
 0x322   : > { %4136 = vmatmul.f32.gmra.mxu2 %v3776_v55  ;;  %3115 = vst.msk [vmem:[#allocation3 + $0x290] sm:$0xff] %vm9860_vm0, %v8079_v4 }
 0x323   : > { %v2381_v32 = vmax.f32 %v2344_v56, 0.0  ;;  %v8087_v5 = vld [vmem:[#allocation2 + $0x168] sm:$0xff]  ;;  %2477 = vst.msk [vmem:[#allocation3 + $0x2b8] sm:$0xff] %vm9860_vm0, %v8082_v54 }
 0x324   : > { %v2120_v19 = vpop.f32.mrf.mxu3  ;;  %v8089_v8 = vld [vmem:[#allocation2 + $0x169] sm:$0xff]  ;;  %3210 = vrot.lane.b32.xlu0 %v7713_v27, %s6092_s22  ;;  %2478 = vst.msk [vmem:[#allocation3 + $0x2d0] sm:$0xff] %vm9860_vm0, %v8087_v5 }
 0x325   : > { %2413 = vst.msk [vmem:[#allocation2 + $0x171] sm:$0xff] %vm9860_vm0, %v2381_v32  ;;  %2954 = vrot.lane.b32.xlu2 %v7985_v12, %s6094_s24  ;;  %v2121_v46 = vadd.f32 %v7769_v53, %v2120_v19  ;;  %3402 = vrot.lane.b32.xlu1 %v7807_v14, %s6093_s23 }
 0x326   : > { %3116 = vst.msk [vmem:[#allocation3 + $0x2a8] sm:$0xff] %vm9860_vm0, %v8089_v8  ;;  %v3197_v0 = vpop.permute.xlu0 %3196 }
 0x327   : > { %v3583_v50 = vpop.permute.xlu2 %3582  ;;  %v2234_v48 = vadd.f32 %v7253_v35, %v2121_v46  ;;  %v3389_v12 = vpop.permute.xlu1 %3388  ;;  %3286 = vst.msk [vmem:[#allocation3 + $0x98] sm:$0xff] %vm657_vm3, %v3197_v0 }
 0x328   : > { %5840 = vmatmul.msk.f32.gmra.mxu0 %vm9860_vm0, %v3819_v60  ;;  %3478 = vst.msk [vmem:[#allocation3 + $0x98] sm:$0xff] %vm850_vm4, %v3389_v12  ;;  %v3778_v13 = vld [vmem:[#allocation3 + $0x90] sm:$0xff] }
 0x329   : > { %v2347_v55 = vadd.f32 %v2346_v28, %v2234_v48  ;;  %3670 = vst.msk [vmem:[#allocation3 + $0x98] sm:$0xff] %vm1043_vm5, %v3581_v38  ;;  %4026 = vmatmul.f32.gmra.mxu3 %v3778_v13  ;;  %v3822_v38 = vld [vmem:[#allocation3 + $0x1f0] sm:$0xff]  ;;  %v2349_v28 = vpop.f32.mrf.mxu2 }
 0x32b   : > { %v2382_v56 = vmax.f32 %v2347_v55, 0.0 }
 0x32c   : > { %v2123_v32 = vpop.f32.mrf.mxu3  ;;  %v8110_v19 = vld [vmem:[#allocation2 + $0x16a] sm:$0xff]  ;;  %v8112_v60 = vld [vmem:[#allocation2 + $0x172] sm:$0xff]  ;;  %2572 = vrot.lane.b32.xlu0 %v7661_v20, %s6092_s22 }
 0x32d   : > { %2414 = vst.msk [vmem:[#allocation2 + $0x181] sm:$0xff] %vm9860_vm0, %v2382_v56  ;;  %3594 = vrot.lane.b32.xlu2 %v7804_v58, %s6094_s24  ;;  %v2124_v35 = vadd.f32 %v7769_v53, %v2123_v32  ;;  %2764 = vrot.lane.b32.xlu1 %v7705_v41, %s6093_s23  ;;  %v8129_v53 = vld [vmem:[#allocation2 + $0x171] sm:$0xff] }
 0x32e   : > { %3754 = vst.msk [vmem:[#allocation3 + $0x280] sm:$0xff] %vm9860_vm0, %v8110_v19  ;;  %v2559_v0 = vpop.permute.xlu0 %2558  ;;  %v8132_v13 = vld [vmem:[#allocation2 + $0x170] sm:$0xff] }
 0x32f   : > { %v2945_v46 = vpop.permute.xlu2 %2944  ;;  %v2237_v48 = vadd.f32 %v7264_v47, %v2124_v35  ;;  %3755 = vst.msk [vmem:[#allocation3 + $0x298] sm:$0xff] %vm9860_vm0, %v8112_v60  ;;  %v2751_v20 = vpop.permute.xlu1 %2750 }
 0x330   : > { %5841 = vmatmul.msk.f32.gmra.mxu0 %vm9860_vm0, %v3822_v38  ;;  %2647 = vst.msk [vmem:[#allocation3 + $0xa8] sm:$0xff] %vm657_vm3, %v2559_v0  ;;  %v3779_v41 = vld [vmem:[#allocation3 + $0x98] sm:$0xff] }
 0x331   : > { %2839 = vst.msk [vmem:[#allocation3 + $0xa8] sm:$0xff] %vm850_vm4, %v2751_v20  ;;  %v2350_v12 = vadd.f32 %v2349_v28, %v2237_v48  ;;  %4139 = vmatmul.f32.gmra.mxu2 %v3779_v41  ;;  %v3828_v48 = vld [vmem:[#allocation3 + $0x220] sm:$0xff] }
 0x332   : > { %3031 = vst.msk [vmem:[#allocation3 + $0xa8] sm:$0xff] %vm1043_vm5, %v8072_v59  ;;  %v3825_v59 = vld [vmem:[#allocation3 + $0x208] sm:$0xff] }
 0x333   : > { %v2383_v55 = vmax.f32 %v2350_v12, 0.0  ;;  %3117 = vst.msk [vmem:[#allocation3 + $0x2c0] sm:$0xff] %vm9860_vm0, %v8129_v53  ;;  %v3831_v12 = vld [vmem:[#allocation3 + $0x238] sm:$0xff] }
 0x334   : > { %v8138_v47 = vld [vmem:[#allocation2 + $0x181] sm:$0xff]  ;;  %2479 = vst.msk [vmem:[#allocation3 + $0x2e8] sm:$0xff] %vm9860_vm0, %v8132_v13  ;;  %3212 = vrot.lane.b32.xlu0 %v7790_v40, %s6092_s22 }
 0x335   : > { %2415 = vst.msk [vmem:[#allocation2 + $0x189] sm:$0xff] %vm9860_vm0, %v2383_v55  ;;  %2956 = vrot.lane.b32.xlu2 %v7760_v43, %s6094_s24  ;;  %3404 = vrot.lane.b32.xlu1 %v7842_v2, %s6093_s23 }
 0x336   : > { %3118 = vst.msk [vmem:[#allocation3 + $0x2d8] sm:$0xff] %vm9860_vm0, %v8138_v47  ;;  %v3199_v32 = vpop.permute.xlu0 %3198 }
 0x337   : > { %v3585_v56 = vpop.permute.xlu2 %3584  ;;  %v3391_v35 = vpop.permute.xlu1 %3390  ;;  %3287 = vst.msk [vmem:[#allocation3 + $0xb0] sm:$0xff] %vm657_vm3, %v3199_v32 }
 0x338   : > { %5842 = vmatmul.msk.f32.gmra.mxu0 %vm9860_vm0, %v3825_v59  ;;  %3479 = vst.msk [vmem:[#allocation3 + $0xb0] sm:$0xff] %vm850_vm4, %v3391_v35  ;;  %v3834_v35 = vld [vmem:[#allocation3 + $0x250] sm:$0xff] }
 0x339   : > { %v3781_v43 = vld [vmem:[#allocation3 + $0xa8] sm:$0xff]  ;;  %3671 = vst.msk [vmem:[#allocation3 + $0xb0] sm:$0xff] %vm1043_vm5, %v3583_v50 }
 0x33a   : > { %4029 = vmatmul.f32.gmra.mxu3 %v3781_v43 }
 0x33c   : > { %v3724_v38 = vld [vmem:[#allocation2 + $0x182] sm:$0xff]  ;;  %v3725_v28 = vld [vmem:[#allocation2 + $0x18a] sm:$0xff]  ;;  %2574 = vrot.lane.b32.xlu0 %v7718_v61, %s6092_s22 }
 0x33d   : > { %3596 = vrot.lane.b32.xlu2 %v7831_v21, %s6094_s24  ;;  %3756 = vst.msk [vmem:[#allocation3 + $0x2b0] sm:$0xff] %vm9860_vm0, %v3724_v38  ;;  %v8160_v0 = vld [vmem:[#allocation2 + $0x189] sm:$0xff]  ;;  %2766 = vrot.lane.b32.xlu1 %v7713_v27, %s6093_s23  ;;  %v8171_v27 = vpop.f32.mrf.mxu0 }
 0x33e   : > { %3757 = vst.msk [vmem:[#allocation3 + $0x2c8] sm:$0xff] %vm9860_vm0, %v3725_v28  ;;  %v2561_v20 = vpop.permute.xlu0 %2560 }
 0x33f   : > { %v2947_v50 = vpop.permute.xlu2 %2946  ;;  %3119 = vst.msk [vmem:[#allocation3 + $0x2f0] sm:$0xff] %vm9860_vm0, %v8160_v0  ;;  %v2753_v41 = vpop.permute.xlu1 %2752 }
 0x340   : > { %5843 = vmatmul.msk.f32.gmra.mxu0 %vm9860_vm0, %v3828_v48  ;;  %2648 = vst.msk [vmem:[#allocation3 + $0xc0] sm:$0xff] %vm657_vm3, %v2561_v20  ;;  %v3782_v61 = vld [vmem:[#allocation3 + $0xb0] sm:$0xff] }
 0x341   : > { %2840 = vst.msk [vmem:[#allocation3 + $0xc0] sm:$0xff] %vm850_vm4, %v2753_v41  ;;  %4142 = vmatmul.f32.gmra.mxu2 %v3782_v61 }
 0x342   : > { %3032 = vst.msk [vmem:[#allocation3 + $0xc0] sm:$0xff] %vm1043_vm5, %v2945_v46 }
 0x344   : > { %3214 = vrot.lane.b32.xlu0 %v7801_v49, %s6092_s22 }
 0x345   : > { %2958 = vrot.lane.b32.xlu2 %v7807_v14, %s6094_s24  ;;  %3406 = vrot.lane.b32.xlu1 %v7899_v3, %s6093_s23  ;;  %v8187_v14 = vpop.f32.mrf.mxu0 }
 0x346   : > { %v3201_v59 = vpop.permute.xlu0 %3200 }
 0x347   : > { %v3587_v55 = vpop.permute.xlu2 %3586  ;;  %v3393_v32 = vpop.permute.xlu1 %3392  ;;  %3288 = vst.msk [vmem:[#allocation3 + $0xc8] sm:$0xff] %vm657_vm3, %v3201_v59 }
 0x348   : > { %5844 = vmatmul.msk.f32.gmra.mxu0 %vm9860_vm0, %v3831_v12  ;;  %3480 = vst.msk [vmem:[#allocation3 + $0xc8] sm:$0xff] %vm850_vm4, %v3393_v32 }
 0x349   : > { %v3784_v46 = vld [vmem:[#allocation3 + $0xc0] sm:$0xff]  ;;  %3672 = vst.msk [vmem:[#allocation3 + $0xc8] sm:$0xff] %vm1043_vm5, %v3585_v56 }
 0x34a   : > { %4032 = vmatmul.f32.gmra.mxu3 %v3784_v46 }
 0x34c   : > { %2576 = vrot.lane.b32.xlu0 %v7752_v63, %s6092_s22  ;;  %v3837_v63 = vld [vmem:[#allocation3 + $0x268] sm:$0xff] }
 0x34d   : > { %3598 = vrot.lane.b32.xlu2 %v7896_v18, %s6094_s24  ;;  %2768 = vrot.lane.b32.xlu1 %v7790_v40, %s6093_s23  ;;  %v8203_v41 = vpop.f32.mrf.mxu0 }
 0x34e   : > { %v2563_v38 = vpop.permute.xlu0 %2562 }
 0x34f   : > { %v2949_v43 = vpop.permute.xlu2 %2948  ;;  %v2755_v28 = vpop.permute.xlu1 %2754  ;;  %2649 = vst.msk [vmem:[#allocation3 + $0xd8] sm:$0xff] %vm657_vm3, %v2563_v38  ;;  %v3846_v38 = vld [vmem:[#allocation3 + $0x2b0] sm:$0xff] }
 0x350   : > { %5845 = vmatmul.msk.f32.gmra.mxu0 %vm9860_vm0, %v3834_v35  ;;  %2841 = vst.msk [vmem:[#allocation3 + $0xd8] sm:$0xff] %vm850_vm4, %v2755_v28  ;;  %v3785_v56 = vld [vmem:[#allocation3 + $0xc8] sm:$0xff] }
 0x351   : > { %3033 = vst.msk [vmem:[#allocation3 + $0xd8] sm:$0xff] %vm1043_vm5, %v2947_v50  ;;  %4145 = vmatmul.f32.gmra.mxu2 %v3785_v56 }
 0x354   : > { %3216 = vrot.lane.b32.xlu0 %v7884_v29, %s6092_s22 }
 0x355   : > { %2960 = vrot.lane.b32.xlu2 %v7842_v2, %s6094_s24  ;;  %3408 = vrot.lane.b32.xlu1 %v7958_v17, %s6093_s23  ;;  %v3840_v2 = vld [vmem:[#allocation3 + $0x280] sm:$0xff]  ;;  %v8217_v32 = vpop.f32.mrf.mxu0 }
 0x356   : > { %v3203_v48 = vpop.permute.xlu0 %3202 }
 0x357   : > { %v3589_v40 = vpop.permute.xlu2 %3588  ;;  %v3395_v20 = vpop.permute.xlu1 %3394  ;;  %3289 = vst.msk [vmem:[#allocation3 + $0xe0] sm:$0xff] %vm657_vm3, %v3203_v48 }
 0x358   : > { %5846 = vmatmul.msk.f32.gmra.mxu0 %vm9860_vm0, %v3837_v63  ;;  %3481 = vst.msk [vmem:[#allocation3 + $0xe0] sm:$0xff] %vm850_vm4, %v3395_v20  ;;  %v3787_v50 = vld [vmem:[#allocation3 + $0xd8] sm:$0xff] }
 0x359   : > { %3673 = vst.msk [vmem:[#allocation3 + $0xe0] sm:$0xff] %vm1043_vm5, %v3587_v55  ;;  %4035 = vmatmul.f32.gmra.mxu3 %v3787_v50 }
 0x35c   : > { %2578 = vrot.lane.b32.xlu0 %v7804_v58, %s6092_s22 }
 0x35d   : > { %3600 = vrot.lane.b32.xlu2 %v7949_v7, %s6094_s24  ;;  %2770 = vrot.lane.b32.xlu1 %v7801_v49, %s6093_s23  ;;  %v3843_v49 = vld [vmem:[#allocation3 + $0x298] sm:$0xff] }
 0x35e   : > { %v2565_v12 = vpop.permute.xlu0 %2564 }
 0x35f   : > { %v2951_v61 = vpop.permute.xlu2 %2950  ;;  %v2757_v59 = vpop.permute.xlu1 %2756  ;;  %2650 = vst.msk [vmem:[#allocation3 + $0xf0] sm:$0xff] %vm657_vm3, %v2565_v12 }
 0x360   : > { %5847 = vmatmul.msk.f32.gmra.mxu0 %vm9860_vm0, %v3840_v2  ;;  %2842 = vst.msk [vmem:[#allocation3 + $0xf0] sm:$0xff] %vm850_vm4, %v2757_v59  ;;  %v3788_v55 = vld [vmem:[#allocation3 + $0xe0] sm:$0xff] }
 0x361   : > { %3034 = vst.msk [vmem:[#allocation3 + $0xf0] sm:$0xff] %vm1043_vm5, %v2949_v43  ;;  %4148 = vmatmul.f32.gmra.mxu2 %v3788_v55 }
 0x364   : > { %3218 = vrot.lane.b32.xlu0 %v7886_v11, %s6092_s22 }
 0x365   : > { %2962 = vrot.lane.b32.xlu2 %v7899_v3, %s6094_s24  ;;  %3410 = vrot.lane.b32.xlu1 %v8010_v45, %s6093_s23  ;;  %v8229_v3 = vpop.f32.mrf.mxu0 }
 0x366   : > { %v3205_v46 = vpop.permute.xlu0 %3204 }
 0x367   : > { %v3591_v58 = vpop.permute.xlu2 %3590  ;;  %v3397_v35 = vpop.permute.xlu1 %3396  ;;  %3290 = vst.msk [vmem:[#allocation3 + $0xf8] sm:$0xff] %vm657_vm3, %v3205_v46 }
 0x368   : > { %5848 = vmatmul.msk.f32.gmra.mxu0 %vm9860_vm0, %v3843_v49  ;;  %3482 = vst.msk [vmem:[#allocation3 + $0xf8] sm:$0xff] %vm850_vm4, %v3397_v35  ;;  %v3790_v43 = vld [vmem:[#allocation3 + $0xf0] sm:$0xff] }
 0x369   : > { %3674 = vst.msk [vmem:[#allocation3 + $0xf8] sm:$0xff] %vm1043_vm5, %v3589_v40  ;;  %4038 = vmatmul.f32.gmra.mxu3 %v3790_v43 }
 0x36c   : > { %2580 = vrot.lane.b32.xlu0 %v7831_v21, %s6092_s22  ;;  %v3849_v21 = vld [vmem:[#allocation3 + $0x2c8] sm:$0xff] }
 0x36d   : > { %3602 = vrot.lane.b32.xlu2 %v8005_v57, %s6094_s24  ;;  %2772 = vrot.lane.b32.xlu1 %v7884_v29, %s6093_s23  ;;  %v8247_v29 = vpop.f32.mrf.mxu0 }
 0x36e   : > { %v2567_v63 = vpop.permute.xlu0 %2566 }
 0x36f   : > { %v2953_v28 = vpop.permute.xlu2 %2952  ;;  %v2759_v56 = vpop.permute.xlu1 %2758  ;;  %2651 = vst.msk [vmem:[#allocation3 + $0x108] sm:$0xff] %vm657_vm3, %v2567_v63 }
 0x370   : > { %5849 = vmatmul.msk.f32.gmra.mxu0 %vm9860_vm0, %v3846_v38  ;;  %v3791_v40 = vld [vmem:[#allocation3 + $0xf8] sm:$0xff]  ;;  %2843 = vst.msk [vmem:[#allocation3 + $0x108] sm:$0xff] %vm850_vm4, %v2759_v56 }
 0x371   : > { %4151 = vmatmul.f32.gmra.mxu2 %v3791_v40  ;;  %3035 = vst.msk [vmem:[#allocation3 + $0x108] sm:$0xff] %vm1043_vm5, %v2951_v61 }
 0x374   : > { %3220 = vrot.lane.b32.xlu0 %v7994_v24, %s6092_s22 }
 0x375   : > { %2964 = vrot.lane.b32.xlu2 %v7958_v17, %s6094_s24  ;;  %3412 = vrot.lane.b32.xlu1 %v7690_v39, %s6093_s23 }
 0x376   : > { %v3207_v50 = vpop.permute.xlu0 %3206 }
 0x377   : > { %v3593_v48 = vpop.permute.xlu2 %3592  ;;  %v3399_v20 = vpop.permute.xlu1 %3398  ;;  %3291 = vst.msk [vmem:[#allocation3 + $0x110] sm:$0xff] %vm657_vm3, %v3207_v50 }
 0x378   : > { %5850 = vmatmul.msk.f32.gmra.mxu0 %vm9860_vm0, %v3849_v21  ;;  %3483 = vst.msk [vmem:[#allocation3 + $0x110] sm:$0xff] %vm850_vm4, %v3399_v20  ;;  %v3793_v2 = vld [vmem:[#allocation3 + $0x108] sm:$0xff] }
 0x379   : > { %3675 = vst.msk [vmem:[#allocation3 + $0x110] sm:$0xff] %vm1043_vm5, %v3591_v58  ;;  %4041 = vmatmul.f32.gmra.mxu3 %v3793_v2 }
 0x37c   : > { %2582 = vrot.lane.b32.xlu0 %v7896_v18, %s6092_s22 }
 0x37d   : > { %3604 = vrot.lane.b32.xlu2 %v7686_v36, %s6094_s24  ;;  %2774 = vrot.lane.b32.xlu1 %v7886_v11, %s6093_s23 }
 0x37e   : > { %v2569_v12 = vpop.permute.xlu0 %2568 }
 0x37f   : > { %v2955_v17 = vpop.permute.xlu2 %2954  ;;  %v2761_v61 = vpop.permute.xlu1 %2760  ;;  %2652 = vst.msk [vmem:[#allocation3 + $0x120] sm:$0xff] %vm657_vm3, %v2569_v12 }
 0x380   : > { %2844 = vst.msk [vmem:[#allocation3 + $0x120] sm:$0xff] %vm850_vm4, %v2761_v61  ;;  %v3794_v59 = vld [vmem:[#allocation3 + $0x110] sm:$0xff] }
 0x381   : > { %3036 = vst.msk [vmem:[#allocation3 + $0x120] sm:$0xff] %vm1043_vm5, %v2953_v28  ;;  %4154 = vmatmul.f32.gmra.mxu2 %v3794_v59 }
 0x384   : > { %3222 = vrot.lane.b32.xlu0 %v8002_v15, %s6092_s22 }
 0x385   : > { %2966 = vrot.lane.b32.xlu2 %v8010_v45, %s6094_s24  ;;  %3414 = vrot.lane.b32.xlu1 %v7777_v34, %s6093_s23 }
 0x386   : > { %v3209_v55 = vpop.permute.xlu0 %3208 }
 0x387   : > { %v3595_v11 = vpop.permute.xlu2 %3594  ;;  %v3401_v18 = vpop.permute.xlu1 %3400  ;;  %3292 = vst.msk [vmem:[#allocation3 + $0x128] sm:$0xff] %vm657_vm3, %v3209_v55 }
 0x388   : > { %3484 = vst.msk [vmem:[#allocation3 + $0x128] sm:$0xff] %vm850_vm4, %v3401_v18  ;;  %v3796_v49 = vld [vmem:[#allocation3 + $0x120] sm:$0xff]  ;;  %v8343_v55 = vpop.f32.mrf.mxu2 }
 0x389   : > { %3676 = vst.msk [vmem:[#allocation3 + $0x128] sm:$0xff] %vm1043_vm5, %v3593_v48  ;;  %4044 = vmatmul.f32.gmra.mxu3 %v3796_v49 }
 0x38c   : > { %2584 = vrot.lane.b32.xlu0 %v7949_v7, %s6092_s22 }
 0x38d   : > { %3606 = vrot.lane.b32.xlu2 %v7775_v16, %s6094_s24  ;;  %2776 = vrot.lane.b32.xlu1 %v7994_v24, %s6093_s23 }
 0x38e   : > { %v2571_v46 = vpop.permute.xlu0 %2570 }
 0x38f   : > { %v2957_v45 = vpop.permute.xlu2 %2956  ;;  %v2763_v58 = vpop.permute.xlu1 %2762  ;;  %2653 = vst.msk [vmem:[#allocation3 + $0x138] sm:$0xff] %vm657_vm3, %v2571_v46 }
 0x390   : > { %2845 = vst.msk [vmem:[#allocation3 + $0x138] sm:$0xff] %vm850_vm4, %v2763_v58  ;;  %v3797_v35 = vld [vmem:[#allocation3 + $0x128] sm:$0xff] }
 0x391   : > { %3037 = vst.msk [vmem:[#allocation3 + $0x138] sm:$0xff] %vm1043_vm5, %v2955_v17  ;;  %4157 = vmatmul.f32.gmra.mxu2 %v3797_v35 }
 0x394   : > { %3224 = vrot.lane.b32.xlu0 %v7754_v10, %s6092_s22 }
 0x395   : > { %2968 = vrot.lane.b32.xlu2 %v7690_v39, %s6094_s24  ;;  %3416 = vrot.lane.b32.xlu1 %v7816_v33, %s6093_s23 }
 0x396   : > { %v3211_v43 = vpop.permute.xlu0 %3210 }
 0x397   : > { %v3597_v7 = vpop.permute.xlu2 %3596  ;;  %v3403_v24 = vpop.permute.xlu1 %3402  ;;  %3293 = vst.msk [vmem:[#allocation3 + $0x140] sm:$0xff] %vm657_vm3, %v3211_v43 }
 0x398   : > { %3485 = vst.msk [vmem:[#allocation3 + $0x140] sm:$0xff] %vm850_vm4, %v3403_v24  ;;  %v3799_v38 = vld [vmem:[#allocation3 + $0x138] sm:$0xff] }
 0x399   : > { %3677 = vst.msk [vmem:[#allocation3 + $0x140] sm:$0xff] %vm1043_vm5, %v3595_v11  ;;  %4047 = vmatmul.f32.gmra.mxu3 %v3799_v38 }
 0x39c   : > { %2586 = vrot.lane.b32.xlu0 %v8005_v57, %s6092_s22 }
 0x39d   : > { %3608 = vrot.lane.b32.xlu2 %v7818_v37, %s6094_s24  ;;  %2778 = vrot.lane.b32.xlu1 %v8002_v15, %s6093_s23 }
 0x39e   : > { %v2573_v56 = vpop.permute.xlu0 %2572 }
 0x39f   : > { %v2959_v39 = vpop.permute.xlu2 %2958  ;;  %v2765_v28 = vpop.permute.xlu1 %2764  ;;  %2654 = vst.msk [vmem:[#allocation3 + $0x150] sm:$0xff] %vm657_vm3, %v2573_v56 }
 0x3a0   : > { %2846 = vst.msk [vmem:[#allocation3 + $0x150] sm:$0xff] %vm850_vm4, %v2765_v28  ;;  %v3800_v63 = vld [vmem:[#allocation3 + $0x140] sm:$0xff] }
 0x3a1   : > { %3038 = vst.msk [vmem:[#allocation3 + $0x150] sm:$0xff] %vm1043_vm5, %v2957_v45  ;;  %4160 = vmatmul.f32.gmra.mxu2 %v3800_v63 }
 0x3a4   : > { %3226 = vrot.lane.b32.xlu0 %v7756_v30, %s6092_s22 }
 0x3a5   : > { %2970 = vrot.lane.b32.xlu2 %v7777_v34, %s6094_s24  ;;  %3418 = vrot.lane.b32.xlu1 %v7910_v6, %s6093_s23 }
 0x3a6   : > { %v3213_v40 = vpop.permute.xlu0 %3212 }
 0x3a7   : > { %v3599_v15 = vpop.permute.xlu2 %3598  ;;  %v3405_v57 = vpop.permute.xlu1 %3404  ;;  %3294 = vst.msk [vmem:[#allocation3 + $0x158] sm:$0xff] %vm657_vm3, %v3213_v40 }
 0x3a8   : > { %3486 = vst.msk [vmem:[#allocation3 + $0x158] sm:$0xff] %vm850_vm4, %v3405_v57  ;;  %v3802_v21 = vld [vmem:[#allocation3 + $0x150] sm:$0xff] }
 0x3a9   : > { %3678 = vst.msk [vmem:[#allocation3 + $0x158] sm:$0xff] %vm1043_vm5, %v3597_v7  ;;  %4050 = vmatmul.f32.gmra.mxu3 %v3802_v21  ;;  %v8358_v7 = vpop.f32.mrf.mxu2 }
 0x3ac   : > { %2588 = vrot.lane.b32.xlu0 %v7686_v36, %s6092_s22 }
 0x3ad   : > { %3610 = vrot.lane.b32.xlu2 %v7905_v23, %s6094_s24  ;;  %2780 = vrot.lane.b32.xlu1 %v7754_v10, %s6093_s23 }
 0x3ae   : > { %v2575_v20 = vpop.permute.xlu0 %2574 }
 0x3af   : > { %v2961_v34 = vpop.permute.xlu2 %2960  ;;  %v2767_v48 = vpop.permute.xlu1 %2766  ;;  %2655 = vst.msk [vmem:[#allocation3 + $0x168] sm:$0xff] %vm657_vm3, %v2575_v20 }
 0x3b0   : > { %2847 = vst.msk [vmem:[#allocation3 + $0x168] sm:$0xff] %vm850_vm4, %v2767_v48  ;;  %v3803_v50 = vld [vmem:[#allocation3 + $0x158] sm:$0xff] }
 0x3b1   : > { %3039 = vst.msk [vmem:[#allocation3 + $0x168] sm:$0xff] %vm1043_vm5, %v2959_v39  ;;  %4163 = vmatmul.f32.gmra.mxu2 %v3803_v50 }
 0x3b4   : > { %3228 = vrot.lane.b32.xlu0 %v7869_v44, %s6092_s22 }
 0x3b5   : > { %2972 = vrot.lane.b32.xlu2 %v7816_v33, %s6094_s24  ;;  %3420 = vrot.lane.b32.xlu1 %v7934_v1, %s6093_s23 }
 0x3b6   : > { %v3215_v2 = vpop.permute.xlu0 %3214 }
 0x3b7   : > { %v3601_v36 = vpop.permute.xlu2 %3600  ;;  %v3407_v10 = vpop.permute.xlu1 %3406  ;;  %3295 = vst.msk [vmem:[#allocation3 + $0x170] sm:$0xff] %vm657_vm3, %v3215_v2 }
 0x3b8   : > { %3487 = vst.msk [vmem:[#allocation3 + $0x170] sm:$0xff] %vm850_vm4, %v3407_v10  ;;  %v3805_v17 = vld [vmem:[#allocation3 + $0x168] sm:$0xff] }
 0x3b9   : > { %3679 = vst.msk [vmem:[#allocation3 + $0x170] sm:$0xff] %vm1043_vm5, %v3599_v15  ;;  %4053 = vmatmul.f32.gmra.mxu3 %v3805_v17 }
 0x3bc   : > { %2590 = vrot.lane.b32.xlu0 %v7775_v16, %s6092_s22 }
 0x3bd   : > { %3612 = vrot.lane.b32.xlu2 %v7936_v42, %s6094_s24  ;;  %2782 = vrot.lane.b32.xlu1 %v7756_v30, %s6093_s23  ;;  %v8340_v30 = vpop.f32.mrf.mxu3 }
 0x3be   : > { %v2577_v12 = vpop.permute.xlu0 %2576 }
 0x3bf   : > { %v2963_v33 = vpop.permute.xlu2 %2962  ;;  %v2769_v61 = vpop.permute.xlu1 %2768  ;;  %2656 = vst.msk [vmem:[#allocation3 + $0x180] sm:$0xff] %vm657_vm3, %v2577_v12 }
 0x3c0   : > { %2848 = vst.msk [vmem:[#allocation3 + $0x180] sm:$0xff] %vm850_vm4, %v2769_v61  ;;  %v3806_v59 = vld [vmem:[#allocation3 + $0x170] sm:$0xff] }
 0x3c1   : > { %3040 = vst.msk [vmem:[#allocation3 + $0x180] sm:$0xff] %vm1043_vm5, %v2961_v34  ;;  %4166 = vmatmul.f32.gmra.mxu2 %v3806_v59 }
 0x3c4   : > { %3230 = vrot.lane.b32.xlu0 %v7871_v25, %s6092_s22 }
 0x3c5   : > { %2974 = vrot.lane.b32.xlu2 %v7910_v6, %s6094_s24  ;;  %3422 = vrot.lane.b32.xlu1 %v8031_v9, %s6093_s23  ;;  %v8354_v46 = vpop.f32.mrf.mxu3 }
 0x3c6   : > { %v3217_v18 = vpop.permute.xlu0 %3216 }
 0x3c7   : > { %v3603_v16 = vpop.permute.xlu2 %3602  ;;  %v3409_v11 = vpop.permute.xlu1 %3408  ;;  %3296 = vst.msk [vmem:[#allocation3 + $0x188] sm:$0xff] %vm657_vm3, %v3217_v18 }
 0x3c8   : > { %3488 = vst.msk [vmem:[#allocation3 + $0x188] sm:$0xff] %vm850_vm4, %v3409_v11  ;;  %v3808_v49 = vld [vmem:[#allocation3 + $0x180] sm:$0xff] }
 0x3c9   : > { %3680 = vst.msk [vmem:[#allocation3 + $0x188] sm:$0xff] %vm1043_vm5, %v3601_v36  ;;  %4056 = vmatmul.f32.gmra.mxu3 %v3808_v49 }
 0x3cc   : > { %2592 = vrot.lane.b32.xlu0 %v7818_v37, %s6092_s22 }
 0x3cd   : > { %3614 = vrot.lane.b32.xlu2 %v8012_v22, %s6094_s24  ;;  %2784 = vrot.lane.b32.xlu1 %v7869_v44, %s6093_s23  ;;  %v8367_v43 = vpop.f32.mrf.mxu3 }
 0x3ce   : > { %v2579_v58 = vpop.permute.xlu0 %2578 }
 0x3cf   : > { %v2965_v6 = vpop.permute.xlu2 %2964  ;;  %v2771_v45 = vpop.permute.xlu1 %2770  ;;  %2657 = vst.msk [vmem:[#allocation3 + $0x198] sm:$0xff] %vm657_vm3, %v2579_v58 }
 0x3d0   : > { %2849 = vst.msk [vmem:[#allocation3 + $0x198] sm:$0xff] %vm850_vm4, %v2771_v45  ;;  %v3809_v35 = vld [vmem:[#allocation3 + $0x188] sm:$0xff] }
 0x3d1   : > { %3041 = vst.msk [vmem:[#allocation3 + $0x198] sm:$0xff] %vm1043_vm5, %v2963_v33  ;;  %4169 = vmatmul.f32.gmra.mxu2 %v3809_v35 }
 0x3d4   : > { %3232 = vrot.lane.b32.xlu0 %v7979_v31, %s6092_s22 }
 0x3d5   : > { %2976 = vrot.lane.b32.xlu2 %v7934_v1, %s6094_s24  ;;  %3424 = vrot.lane.b32.xlu1 %v8037_v51, %s6093_s23  ;;  %v8371_v1 = vpop.f32.mrf.mxu2  ;;  %v8380_v63 = vpop.f32.mrf.mxu3 }
 0x3d6   : > { %v3219_v24 = vpop.permute.xlu0 %3218 }
 0x3d7   : > { %v3605_v37 = vpop.permute.xlu2 %3604  ;;  %v3411_v44 = vpop.permute.xlu1 %3410  ;;  %3297 = vst.msk [vmem:[#allocation3 + $0x1a0] sm:$0xff] %vm657_vm3, %v3219_v24 }
 0x3d8   : > { %3489 = vst.msk [vmem:[#allocation3 + $0x1a0] sm:$0xff] %vm850_vm4, %v3411_v44  ;;  %v3811_v38 = vld [vmem:[#allocation3 + $0x198] sm:$0xff] }
 0x3d9   : > { %3681 = vst.msk [vmem:[#allocation3 + $0x1a0] sm:$0xff] %vm1043_vm5, %v3603_v16  ;;  %4059 = vmatmul.f32.gmra.mxu3 %v3811_v38 }
 0x3dc   : > { %2594 = vrot.lane.b32.xlu0 %v7905_v23, %s6092_s22  ;;  %v9898_v23 = vld [vmem:[#allocation40_spill] sm:$0xff] }
 0x3dd   : > { %3616 = vrot.lane.b32.xlu2 %v8039_v52, %s6094_s24  ;;  %2786 = vrot.lane.b32.xlu1 %v7871_v25, %s6093_s23  ;;  %v8388_v25 = vpop.f32.mrf.mxu2  ;;  %v8393_v34 = vpop.f32.mrf.mxu3 }
 0x3de   : > { %v2581_v56 = vpop.permute.xlu0 %2580 }
 0x3df   : > { %v2967_v39 = vpop.permute.xlu2 %2966  ;;  %v2773_v28 = vpop.permute.xlu1 %2772  ;;  %2658 = vst.msk [vmem:[#allocation3 + $0x1b0] sm:$0xff] %vm657_vm3, %v2581_v56 }
 0x3e0   : > { %2850 = vst.msk [vmem:[#allocation3 + $0x1b0] sm:$0xff] %vm850_vm4, %v2773_v28  ;;  %v3812_v15 = vld [vmem:[#allocation3 + $0x1a0] sm:$0xff] }
 0x3e1   : > { %3042 = vst.msk [vmem:[#allocation3 + $0x1b0] sm:$0xff] %vm1043_vm5, %v2965_v6  ;;  %4172 = vmatmul.f32.gmra.mxu2 %v3812_v15 }
 0x3e4   : > { %3234 = vrot.lane.b32.xlu0 %v9898_v23, %s6092_s22 }
 0x3e5   : > { %2978 = vrot.lane.b32.xlu2 %v8031_v9, %s6094_s24  ;;  %3426 = vrot.lane.b32.xlu1 %v8082_v54, %s6093_s23  ;;  %v8401_v9 = vpop.f32.mrf.mxu2  ;;  %v8406_v10 = vpop.f32.mrf.mxu3 }
 0x3e6   : > { %v3221_v21 = vpop.permute.xlu0 %3220 }
 0x3e7   : > { %v3607_v57 = vpop.permute.xlu2 %3606  ;;  %v3413_v40 = vpop.permute.xlu1 %3412  ;;  %3298 = vst.msk [vmem:[#allocation3 + $0x1b8] sm:$0xff] %vm657_vm3, %v3221_v21 }
 0x3e8   : > { %3490 = vst.msk [vmem:[#allocation3 + $0x1b8] sm:$0xff] %vm850_vm4, %v3413_v40  ;;  %v3814_v48 = vld [vmem:[#allocation3 + $0x1b0] sm:$0xff] }
 0x3e9   : > { %3682 = vst.msk [vmem:[#allocation3 + $0x1b8] sm:$0xff] %vm1043_vm5, %v3605_v37  ;;  %4062 = vmatmul.f32.gmra.mxu3 %v3814_v48 }
 0x3ec   : > { %2596 = vrot.lane.b32.xlu0 %v7936_v42, %s6092_s22 }
 0x3ed   : > { %3618 = vrot.lane.b32.xlu2 %v8079_v4, %s6094_s24  ;;  %2788 = vrot.lane.b32.xlu1 %v7979_v31, %s6093_s23  ;;  %v8414_v42 = vpop.f32.mrf.mxu2  ;;  %v8419_v61 = vpop.f32.mrf.mxu3 }
 0x3ee   : > { %v2583_v36 = vpop.permute.xlu0 %2582 }
 0x3ef   : > { %v2969_v20 = vpop.permute.xlu2 %2968  ;;  %v2775_v50 = vpop.permute.xlu1 %2774  ;;  %2659 = vst.msk [vmem:[#allocation3 + $0x1c8] sm:$0xff] %vm657_vm3, %v2583_v36 }
 0x3f0   : > { %2851 = vst.msk [vmem:[#allocation3 + $0x1c8] sm:$0xff] %vm850_vm4, %v2775_v50  ;;  %v3815_v2 = vld [vmem:[#allocation3 + $0x1b8] sm:$0xff] }
 0x3f1   : > { %3043 = vst.msk [vmem:[#allocation3 + $0x1c8] sm:$0xff] %vm1043_vm5, %v2967_v39  ;;  %4175 = vmatmul.f32.gmra.mxu2 %v3815_v2 }
 0x3f4   : > { %3236 = vrot.lane.b32.xlu0 %v8058_v26, %s6092_s22 }
 0x3f5   : > { %2980 = vrot.lane.b32.xlu2 %v8037_v51, %s6094_s24  ;;  %3428 = vrot.lane.b32.xlu1 %v8087_v5, %s6093_s23  ;;  %v8427_v51 = vpop.f32.mrf.mxu2  ;;  %v8432_v18 = vpop.f32.mrf.mxu3 }
 0x3f6   : > { %v3223_v33 = vpop.permute.xlu0 %3222 }
 0x3f7   : > { %v3609_v31 = vpop.permute.xlu2 %3608  ;;  %v3415_v17 = vpop.permute.xlu1 %3414  ;;  %3299 = vst.msk [vmem:[#allocation3 + $0x1d0] sm:$0xff] %vm657_vm3, %v3223_v33 }
 0x3f8   : > { %3491 = vst.msk [vmem:[#allocation3 + $0x1d0] sm:$0xff] %vm850_vm4, %v3415_v17  ;;  %v3817_v12 = vld [vmem:[#allocation3 + $0x1c8] sm:$0xff] }
 0x3f9   : > { %3683 = vst.msk [vmem:[#allocation3 + $0x1d0] sm:$0xff] %vm1043_vm5, %v3607_v57  ;;  %4065 = vmatmul.f32.gmra.mxu3 %v3817_v12 }
 0x3fc   : > { %2598 = vrot.lane.b32.xlu0 %v8012_v22, %s6092_s22 }
 0x3fd   : > { %3620 = vrot.lane.b32.xlu2 %v8089_v8, %s6094_s24  ;;  %2790 = vrot.lane.b32.xlu1 %v9898_v23, %s6093_s23  ;;  %v8440_v22 = vpop.f32.mrf.mxu2  ;;  %v8445_v35 = vpop.f32.mrf.mxu3 }
 0x3fe   : > { %v2585_v11 = vpop.permute.xlu0 %2584 }
 0x3ff   : > { %v2971_v59 = vpop.permute.xlu2 %2970  ;;  %v2777_v16 = vpop.permute.xlu1 %2776  ;;  %2660 = vst.msk [vmem:[#allocation3 + $0x1e0] sm:$0xff] %vm657_vm3, %v2585_v11 }
 0x400   : > { %2852 = vst.msk [vmem:[#allocation3 + $0x1e0] sm:$0xff] %vm850_vm4, %v2777_v16  ;;  %v3818_v49 = vld [vmem:[#allocation3 + $0x1d0] sm:$0xff] }
 0x401   : > { %3044 = vst.msk [vmem:[#allocation3 + $0x1e0] sm:$0xff] %vm1043_vm5, %v2969_v20  ;;  %4178 = vmatmul.f32.gmra.mxu2 %v3818_v49 }
 0x404   : > { %3238 = vrot.lane.b32.xlu0 %v8060_v62, %s6092_s22 }
 0x405   : > { %2982 = vrot.lane.b32.xlu2 %v8082_v54, %s6094_s24  ;;  %3430 = vrot.lane.b32.xlu1 %v8132_v13, %s6093_s23  ;;  %v8449_v54 = vpop.f32.mrf.mxu0  ;;  %v8455_v62 = vpop.f32.mrf.mxu2 }
 0x406   : > { %v3225_v58 = vpop.permute.xlu0 %3224  ;;  %v8460_v39 = vpop.f32.mrf.mxu3 }
 0x407   : > { %v3611_v6 = vpop.permute.xlu2 %3610  ;;  %v3417_v45 = vpop.permute.xlu1 %3416  ;;  %3300 = vst.msk [vmem:[#allocation3 + $0x1e8] sm:$0xff] %vm657_vm3, %v3225_v58 }
 0x408   : > { %3492 = vst.msk [vmem:[#allocation3 + $0x1e8] sm:$0xff] %vm850_vm4, %v3417_v45  ;;  %v3820_v37 = vld [vmem:[#allocation3 + $0x1e0] sm:$0xff] }
 0x409   : > { %3684 = vst.msk [vmem:[#allocation3 + $0x1e8] sm:$0xff] %vm1043_vm5, %v3609_v31  ;;  %4068 = vmatmul.f32.gmra.mxu3 %v3820_v37 }
 0x40c   : > { %2600 = vrot.lane.b32.xlu0 %v8039_v52, %s6092_s22  ;;  %v3340_v52 = vld [vmem:[#allocation2 + $0x180] sm:$0xff] }
 0x40d   : > { %3622 = vrot.lane.b32.xlu2 %v8129_v53, %s6094_s24  ;;  %2792 = vrot.lane.b32.xlu1 %v8058_v26, %s6093_s23  ;;  %v8468_v26 = vpop.f32.mrf.mxu2  ;;  %v8471_v56 = vpop.f32.mrf.mxu0 }
 0x40e   : > { %v2587_v38 = vpop.permute.xlu0 %2586  ;;  %v8474_v40 = vpop.f32.mrf.mxu3 }
 0x40f   : > { %v2973_v44 = vpop.permute.xlu2 %2972  ;;  %v2779_v24 = vpop.permute.xlu1 %2778  ;;  %2661 = vst.msk [vmem:[#allocation3 + $0x1f8] sm:$0xff] %vm657_vm3, %v2587_v38 }
 0x410   : > { %2853 = vst.msk [vmem:[#allocation3 + $0x1f8] sm:$0xff] %vm850_vm4, %v2779_v24  ;;  %v3821_v28 = vld [vmem:[#allocation3 + $0x1e8] sm:$0xff] }
 0x411   : > { %3045 = vst.msk [vmem:[#allocation3 + $0x1f8] sm:$0xff] %vm1043_vm5, %v2971_v59  ;;  %4181 = vmatmul.f32.gmra.mxu2 %v3821_v28 }
 0x414   : > { %3240 = vrot.lane.b32.xlu0 %v8110_v19, %s6092_s22  ;;  %v2701_v19 = vld [vmem:[#allocation2 + $0x15a] sm:$0xff] }
 0x415   : > { %2984 = vrot.lane.b32.xlu2 %v8087_v5, %s6094_s24  ;;  %3432 = vrot.lane.b32.xlu1 %v3340_v52, %s6093_s23  ;;  %v8482_v21 = vpop.f32.mrf.mxu2  ;;  %v8485_v36 = vpop.f32.mrf.mxu0 }
 0x416   : > { %v3227_v57 = vpop.permute.xlu0 %3226  ;;  %v8488_v2 = vpop.f32.mrf.mxu3 }
 0x417   : > { %v3613_v15 = vpop.permute.xlu2 %3612  ;;  %v3419_v23 = vpop.permute.xlu1 %3418  ;;  %3301 = vst.msk [vmem:[#allocation3 + $0x200] sm:$0xff] %vm657_vm3, %v3227_v57 }
 0x418   : > { %3493 = vst.msk [vmem:[#allocation3 + $0x200] sm:$0xff] %vm850_vm4, %v3419_v23  ;;  %v3823_v5 = vld [vmem:[#allocation3 + $0x1f8] sm:$0xff] }
 0x419   : > { %3685 = vst.msk [vmem:[#allocation3 + $0x200] sm:$0xff] %vm1043_vm5, %v3611_v6  ;;  %4071 = vmatmul.f32.gmra.mxu3 %v3823_v5  ;;  %v3534_v5 = vld [vmem:[#allocation2 + $0x199] sm:$0xff] }
 0x41c   : > { %2602 = vrot.lane.b32.xlu0 %v8079_v4, %s6092_s22  ;;  %v8494_v4 = vld [vmem:[#allocation2 + $0x188] sm:$0xff] }
 0x41d   : > { %3624 = vrot.lane.b32.xlu2 %v8138_v47, %s6094_s24  ;;  %2794 = vrot.lane.b32.xlu1 %v2701_v19, %s6093_s23  ;;  %v8498_v31 = vpop.f32.mrf.mxu2  ;;  %v8506_v16 = vpop.f32.mrf.mxu0 }
 0x41e   : > { %v2589_v50 = vpop.permute.xlu0 %2588  ;;  %v8503_v59 = vpop.f32.mrf.mxu3 }
 0x41f   : > { %v2975_v48 = vpop.permute.xlu2 %2974  ;;  %v2781_v20 = vpop.permute.xlu1 %2780  ;;  %2662 = vst.msk [vmem:[#allocation3 + $0x210] sm:$0xff] %vm657_vm3, %v2589_v50 }
 0x420   : > { %2854 = vst.msk [vmem:[#allocation3 + $0x210] sm:$0xff] %vm850_vm4, %v2781_v20  ;;  %v3824_v47 = vld [vmem:[#allocation3 + $0x200] sm:$0xff] }
 0x421   : > { %3046 = vst.msk [vmem:[#allocation3 + $0x210] sm:$0xff] %vm1043_vm5, %v2973_v44  ;;  %4184 = vmatmul.f32.gmra.mxu2 %v3824_v47  ;;  %v3150_v44 = vld [vmem:[#allocation2 + $0x182] sm:$0xff] }
 0x424   : > { %3242 = vrot.lane.b32.xlu0 %v8112_v60, %s6092_s22  ;;  %v2702_v60 = vld [vmem:[#allocation2 + $0x16a] sm:$0xff] }
 0x425   : > { %2986 = vrot.lane.b32.xlu2 %v8132_v13, %s6094_s24  ;;  %3434 = vrot.lane.b32.xlu1 %v8494_v4, %s6093_s23  ;;  %v8513_v11 = vpop.f32.mrf.mxu2 }
 0x426   : > { %v3229_v12 = vpop.permute.xlu0 %3228  ;;  %v8517_v58 = vpop.f32.mrf.mxu3 }
 0x427   : > { %v3615_v17 = vpop.permute.xlu2 %3614  ;;  %v3421_v33 = vpop.permute.xlu1 %3420  ;;  %3302 = vst.msk [vmem:[#allocation3 + $0x218] sm:$0xff] %vm657_vm3, %v3229_v12  ;;  %v8546_v12 = vld [vmem:[%s9817_s4] ss:$0 sm:$0xff] }
 0x428   : > { %3494 = vst.msk [vmem:[#allocation3 + $0x218] sm:$0xff] %vm850_vm4, %v3421_v33  ;;  %v3826_v13 = vld [vmem:[#allocation3 + $0x210] sm:$0xff] }
 0x429   : > { %3686 = vst.msk [vmem:[#allocation3 + $0x218] sm:$0xff] %vm1043_vm5, %v3613_v15  ;;  %4074 = vmatmul.f32.gmra.mxu3 %v3826_v13  ;;  %v3151_v13 = vld [vmem:[#allocation2 + $0x18a] sm:$0xff] }
 0x42c   : > { %2604 = vrot.lane.b32.xlu0 %v8089_v8, %s6092_s22  ;;  %v8521_v8 = vpop.f32.mrf.mxu0 }
 0x42d   : > { %3626 = vrot.lane.b32.xlu2 %v8160_v0, %s6094_s24  ;;  %2796 = vrot.lane.b32.xlu1 %v2702_v60, %s6093_s23  ;;  %v3342_v0 = vld [vmem:[#allocation2 + $0x198] sm:$0xff]  ;;  %v8525_v24 = vpop.f32.mrf.mxu2 }
 0x42e   : > { %v2591_v45 = vpop.permute.xlu0 %2590  ;;  %v8529_v23 = vpop.f32.mrf.mxu3 }
 0x42f   : > { %v2977_v49 = vpop.permute.xlu2 %2976  ;;  %v2783_v6 = vpop.permute.xlu1 %2782  ;;  %2663 = vst.msk [vmem:[#allocation3 + $0x228] sm:$0xff] %vm657_vm3, %v2591_v45 }
 0x430   : > { %2855 = vst.msk [vmem:[#allocation3 + $0x228] sm:$0xff] %vm850_vm4, %v2783_v6  ;;  %v3827_v37 = vld [vmem:[#allocation3 + $0x218] sm:$0xff] }
 0x431   : > { %3047 = vst.msk [vmem:[#allocation3 + $0x228] sm:$0xff] %vm1043_vm5, %v2975_v48  ;;  %4187 = vmatmul.f32.gmra.mxu2 %v3827_v37 }
 0x434   : > { %3244 = vrot.lane.b32.xlu0 %v3150_v44, %s6092_s22  ;;  %v8539_v48 = vpop.f32.mrf.mxu0 }
 0x435   : > { %2988 = vrot.lane.b32.xlu2 %v3340_v52, %s6094_s24  ;;  %3436 = vrot.lane.b32.xlu1 %v3342_v0, %s6093_s23  ;;  %v2703_v52 = vld [vmem:[#allocation2 + $0x172] sm:$0xff]  ;;  %v8536_v19 = vpop.f32.mrf.mxu2 }
 0x436   : > { %v3231_v15 = vpop.permute.xlu0 %3230 }
 0x437   : > { %v3617_v38 = vpop.permute.xlu2 %3616  ;;  %v3423_v28 = vpop.permute.xlu1 %3422  ;;  %3303 = vst.msk [vmem:[#allocation3 + $0x230] sm:$0xff] %vm657_vm3, %v3231_v15  ;;  %v3535_v15 = vld [vmem:[#allocation2 + $0x1a1] sm:$0xff] }
 0x438   : > { %3495 = vst.msk [vmem:[#allocation3 + $0x230] sm:$0xff] %vm850_vm4, %v3423_v28  ;;  %v3829_v57 = vld [vmem:[#allocation3 + $0x228] sm:$0xff] }
 0x439   : > { %3687 = vst.msk [vmem:[#allocation3 + $0x230] sm:$0xff] %vm1043_vm5, %v3615_v17  ;;  %4077 = vmatmul.f32.gmra.mxu3 %v3829_v57 }
 0x43c   : > { %2606 = vrot.lane.b32.xlu0 %v8129_v53, %s6092_s22  ;;  %v4054_v33 = vpop.f32.mrf.mxu3  ;;  %v3343_v53 = vld [vmem:[#allocation2 + $0x1a0] sm:$0xff]  ;;  %v8556_v28 = vpop.f32.mrf.mxu0 }
 0x43d   : > { %3628 = vrot.lane.b32.xlu2 %v3534_v5, %s6094_s24  ;;  %2798 = vrot.lane.b32.xlu1 %v2703_v52, %s6093_s23  ;;  %v4055_v60 = vadd.f32 %v8546_v12, %v4054_v33 }
 0x43e   : > { %v2593_v47 = vpop.permute.xlu0 %2592 }
 0x43f   : > { %v2979_v20 = vpop.permute.xlu2 %2978  ;;  %v2785_v50 = vpop.permute.xlu1 %2784  ;;  %2664 = vst.msk [vmem:[#allocation3 + $0x240] sm:$0xff] %vm657_vm3, %v2593_v47 }
 0x440   : > { %2856 = vst.msk [vmem:[#allocation3 + $0x240] sm:$0xff] %vm850_vm4, %v2785_v50  ;;  %v3830_v17 = vld [vmem:[#allocation3 + $0x230] sm:$0xff] }
 0x441   : > { %3048 = vst.msk [vmem:[#allocation3 + $0x240] sm:$0xff] %vm1043_vm5, %v2977_v49  ;;  %4190 = vmatmul.f32.gmra.mxu2 %v3830_v17 }
 0x444   : > { %3246 = vrot.lane.b32.xlu0 %v3151_v13, %s6092_s22  ;;  %v4167_v6 = vpop.f32.mrf.mxu2  ;;  %v8564_v47 = vpop.f32.mrf.mxu0  ;;  %s6043_s22 = scalar_lea.hbm %s6042_s10, 256 }
 0x445   : > { %2990 = vrot.lane.b32.xlu2 %v8494_v4, %s6094_s24  ;;  %3438 = vrot.lane.b32.xlu1 %v3343_v53, %s6093_s23  ;;  %v8554_v45 = vadd.f32 %v4167_v6, %v4055_v60  ;;  %p6044_p11 = scmp.ne.s32.totalorder %s6042_s10, %s6043_s22  ;;  %p6049_p1 = scmp.lt.s32.totalorder %s6047_s13, %s6043_s22 }
 0x446   : > { %v3233_v44 = vpop.permute.xlu0 %3232 }
 0x447   : > { %v3619_v37 = vpop.permute.xlu2 %3618  ;;  %v3425_v0 = vpop.permute.xlu1 %3424  ;;  %3304 = vst.msk [vmem:[#allocation3 + $0x248] sm:$0xff] %vm657_vm3, %v3233_v44  ;;  %p6045_p12 = pnand %p6044_p11, %p6182_p5  ;;  %p6050_p2 = por %p6049_p1, %p6048_p0 }
 0x448   : > { %3496 = vst.msk [vmem:[#allocation3 + $0x248] sm:$0xff] %vm850_vm4, %v3425_v0  ;;  %v3832_v49 = vld [vmem:[#allocation3 + $0x240] sm:$0xff] }
 0x449   : > { %3688 = vst.msk [vmem:[#allocation3 + $0x248] sm:$0xff] %vm1043_vm5, %v3617_v38  ;;  %4080 = vmatmul.f32.gmra.mxu3 %v3832_v49  ;;  %p6046_p13 = pneg %p6045_p12 }
 0x44b   : > { %p6051_p3 = pnand %p6050_p2, %p6046_p13 }
 0x44c   : > { %v4057_v52 = vpop.f32.mrf.mxu3  ;;  %v8573_v0 = vpop.f32.mrf.mxu0 }
 0x44d   : > { %3630 = vrot.lane.b32.xlu2 %v3535_v15, %s6094_s24  ;;  %v4058_v33 = vadd.f32 %v8546_v12, %v4057_v52 }
 0x44e   : > { %v2595_v5 = vpop.permute.xlu0 %2594 }
 0x44f   : > { %v2981_v4 = vpop.permute.xlu2 %2980  ;;  %v2787_v57 = vpop.permute.xlu1 %2786  ;;  %2665 = vst.msk [vmem:[#allocation3 + $0x258] sm:$0xff] %vm657_vm3, %v2595_v5 }
 0x450   : > { %2857 = vst.msk [vmem:[#allocation3 + $0x258] sm:$0xff] %vm850_vm4, %v2787_v57  ;;  %v3833_v50 = vld [vmem:[#allocation3 + $0x248] sm:$0xff] }
 0x451   : > { %3049 = vst.msk [vmem:[#allocation3 + $0x258] sm:$0xff] %vm1043_vm5, %v2979_v20  ;;  %4193 = vmatmul.f32.gmra.mxu2 %v3833_v50 }
 0x454   : > { %v4170_v38 = vpop.f32.mrf.mxu2  ;;  %v8579_v50 = vpop.f32.mrf.mxu0 }
 0x455   : > { %v8568_v17 = vadd.f32 %v4170_v38, %v4058_v33 }
 0x456   : > { %v3235_v60 = vpop.permute.xlu0 %3234 }
 0x457   : > { %v3621_v53 = vpop.permute.xlu2 %3620  ;;  %v3427_v13 = vpop.permute.xlu1 %3426  ;;  %3305 = vst.msk [vmem:[#allocation3 + $0x260] sm:$0xff] %vm657_vm3, %v3235_v60 }
 0x458   : > { %3497 = vst.msk [vmem:[#allocation3 + $0x260] sm:$0xff] %vm850_vm4, %v3427_v13  ;;  %v3835_v6 = vld [vmem:[#allocation3 + $0x258] sm:$0xff] }
 0x459   : > { %3689 = vst.msk [vmem:[#allocation3 + $0x260] sm:$0xff] %vm1043_vm5, %v3619_v37  ;;  %4083 = vmatmul.f32.gmra.mxu3 %v3835_v6 }
 0x45c   : > { %v4060_v15 = vpop.f32.mrf.mxu3 }
 0x45d   : > { %v4061_v5 = vadd.f32 %v8546_v12, %v4060_v15 }
 0x45e   : > { %v2597_v49 = vpop.permute.xlu0 %2596 }
 0x45f   : > { %v2983_v20 = vpop.permute.xlu2 %2982  ;;  %v2789_v44 = vpop.permute.xlu1 %2788  ;;  %2666 = vst.msk [vmem:[#allocation3 + $0x270] sm:$0xff] %vm657_vm3, %v2597_v49 }
 0x460   : > { %2858 = vst.msk [vmem:[#allocation3 + $0x270] sm:$0xff] %vm850_vm4, %v2789_v44  ;;  %v3836_v57 = vld [vmem:[#allocation3 + $0x260] sm:$0xff] }
 0x461   : > { %3050 = vst.msk [vmem:[#allocation3 + $0x270] sm:$0xff] %vm1043_vm5, %v2981_v4  ;;  %4196 = vmatmul.f32.gmra.mxu2 %v3836_v57  ;;  %v8586_v4 = vpop.f32.mrf.mxu0 }
 0x464   : > { %v4173_v52 = vpop.f32.mrf.mxu2 }
 0x465   : > { %v8581_v37 = vadd.f32 %v4173_v52, %v4061_v5 }
 0x466   : > { %v3237_v38 = vpop.permute.xlu0 %3236 }
 0x467   : > { %9899 = vst [vmem:[#allocation40_spill] sm:$0xff] %v8581_v37  ;;  %v3429_v33 = vpop.permute.xlu1 %3428  ;;  %v3623_v13 = vpop.permute.xlu2 %3622 }
 0x468   : > { %3306 = vst.msk [vmem:[#allocation3 + $0x278] sm:$0xff] %vm657_vm3, %v3237_v38  ;;  %v3838_v60 = vld [vmem:[#allocation3 + $0x270] sm:$0xff] }
 0x469   : > { %3498 = vst.msk [vmem:[#allocation3 + $0x278] sm:$0xff] %vm850_vm4, %v3429_v33  ;;  %4086 = vmatmul.f32.gmra.mxu3 %v3838_v60  ;;  %v8594_v60 = vpop.f32.mrf.mxu0 }
 0x46a   : > { %3690 = vst.msk [vmem:[#allocation3 + $0x278] sm:$0xff] %vm1043_vm5, %v3621_v53 }
 0x46b   : > { %9901 = vst [vmem:[#allocation42_spill] sm:$0xff] %v8594_v60 }
 0x46c   : > { %v4063_v49 = vpop.f32.mrf.mxu3 }
 0x46d   : > { %v4064_v5 = vadd.f32 %v8546_v12, %v4063_v49 }
 0x46e   : > { %v2599_v44 = vpop.permute.xlu0 %2598 }
 0x46f   : > { %v2791_v6 = vpop.permute.xlu1 %2790  ;;  %2667 = vst.msk [vmem:[#allocation3 + $0x288] sm:$0xff] %vm657_vm3, %v2599_v44  ;;  %v2985_v57 = vpop.permute.xlu2 %2984 }
 0x470   : > { %2859 = vst.msk [vmem:[#allocation3 + $0x288] sm:$0xff] %vm850_vm4, %v2791_v6 }
 0x471   : > { %v3839_v15 = vld [vmem:[#allocation3 + $0x278] sm:$0xff]  ;;  %3051 = vst.msk [vmem:[#allocation3 + $0x288] sm:$0xff] %vm1043_vm5, %v2983_v20 }
 0x472   : > { %4199 = vmatmul.f32.gmra.mxu2 %v3839_v15 }
 0x474   : > { %v4176_v52 = vpop.f32.mrf.mxu2 }
 0x475   : > { %v8592_v33 = vadd.f32 %v4176_v52, %v4064_v5  ;;  %v8601_v52 = vpop.f32.mrf.mxu0 }
 0x476   : > { %v3239_v38 = vpop.permute.xlu0 %3238  ;;  %9902 = vst [vmem:[#allocation43_spill] sm:$0xff] %v8601_v52 }
 0x477   : > { %9900 = vst [vmem:[#allocation41_spill] sm:$0xff] %v8592_v33  ;;  %v3431_v53 = vpop.permute.xlu1 %3430  ;;  %v3625_v6 = vpop.permute.xlu2 %3624 }
 0x478   : > { %3307 = vst.msk [vmem:[#allocation3 + $0x290] sm:$0xff] %vm657_vm3, %v3239_v38  ;;  %v3841_v44 = vld [vmem:[#allocation3 + $0x288] sm:$0xff] }
 0x479   : > { %3499 = vst.msk [vmem:[#allocation3 + $0x290] sm:$0xff] %vm850_vm4, %v3431_v53  ;;  %4089 = vmatmul.f32.gmra.mxu3 %v3841_v44 }
 0x47a   : > { %3691 = vst.msk [vmem:[#allocation3 + $0x290] sm:$0xff] %vm1043_vm5, %v3623_v13 }
 0x47c   : > { %v4066_v49 = vpop.f32.mrf.mxu3 }
 0x47d   : > { %v4067_v53 = vadd.f32 %v8546_v12, %v4066_v49 }
 0x47e   : > { %v2601_v15 = vpop.permute.xlu0 %2600 }
 0x47f   : > { %v2793_v20 = vpop.permute.xlu1 %2792  ;;  %2668 = vst.msk [vmem:[#allocation3 + $0x2a0] sm:$0xff] %vm657_vm3, %v2601_v15  ;;  %v2987_v33 = vpop.permute.xlu2 %2986 }
 0x480   : > { %2860 = vst.msk [vmem:[#allocation3 + $0x2a0] sm:$0xff] %vm850_vm4, %v2793_v20  ;;  %v8610_v20 = vpop.f32.mrf.mxu0 }
 0x481   : > { %v3842_v5 = vld [vmem:[#allocation3 + $0x290] sm:$0xff]  ;;  %3052 = vst.msk [vmem:[#allocation3 + $0x2a0] sm:$0xff] %vm1043_vm5, %v2985_v57 }
 0x482   : > { %4202 = vmatmul.f32.gmra.mxu2 %v3842_v5  ;;  %9904 = vst [vmem:[#allocation45_spill] sm:$0xff] %v8610_v20 }
 0x484   : > { %v4179_v38 = vpop.f32.mrf.mxu2 }
 0x485   : > { %v8605_v13 = vadd.f32 %v4179_v38, %v4067_v53 }
 0x486   : > { %v3241_v60 = vpop.permute.xlu0 %3240 }
 0x487   : > { %9903 = vst [vmem:[#allocation44_spill] sm:$0xff] %v8605_v13  ;;  %v3433_v44 = vpop.permute.xlu1 %3432  ;;  %v3627_v52 = vpop.permute.xlu2 %3626 }
 0x488   : > { %3308 = vst.msk [vmem:[#allocation3 + $0x2a8] sm:$0xff] %vm657_vm3, %v3241_v60  ;;  %v3844_v15 = vld [vmem:[#allocation3 + $0x2a0] sm:$0xff] }
 0x489   : > { %3500 = vst.msk [vmem:[#allocation3 + $0x2a8] sm:$0xff] %vm850_vm4, %v3433_v44  ;;  %4092 = vmatmul.f32.gmra.mxu3 %v3844_v15  ;;  %v4295_v44 = vpop.f32.mrf.mxu0 }
 0x48a   : > { %3692 = vst.msk [vmem:[#allocation3 + $0x2a8] sm:$0xff] %vm1043_vm5, %v3625_v6 }
 0x48c   : > { %v4069_v49 = vpop.f32.mrf.mxu3 }
 0x48d   : > { %v4070_v60 = vadd.f32 %v8546_v12, %v4069_v49 }
 0x48e   : > { %v2603_v5 = vpop.permute.xlu0 %2602 }
 0x48f   : > { %v2795_v57 = vpop.permute.xlu1 %2794  ;;  %2669 = vst.msk [vmem:[#allocation3 + $0x2b8] sm:$0xff] %vm657_vm3, %v2603_v5  ;;  %v2989_v37 = vpop.permute.xlu2 %2988 }
 0x490   : > { %2861 = vst.msk [vmem:[#allocation3 + $0x2b8] sm:$0xff] %vm850_vm4, %v2795_v57 }
 0x491   : > { %v3845_v53 = vld [vmem:[#allocation3 + $0x2a8] sm:$0xff]  ;;  %3053 = vst.msk [vmem:[#allocation3 + $0x2b8] sm:$0xff] %vm1043_vm5, %v2987_v33  ;;  %v3852_v33 = vld [vmem:[#allocation3 + $0x2e0] sm:$0xff] }
 0x492   : > { %4205 = vmatmul.f32.gmra.mxu2 %v3845_v53  ;;  %5851 = vmatmul.msk.f32.gmra.mxu0 %vm9860_vm0, %v3852_v33 }
 0x494   : > { %v4182_v38 = vpop.f32.mrf.mxu2 }
 0x495   : > { %v4183_v6 = vadd.f32 %v4182_v38, %v4070_v60 }
 0x496   : > { %v3243_v13 = vpop.permute.xlu0 %3242 }
 0x497   : > { %v3435_v15 = vpop.permute.xlu1 %3434  ;;  %v8616_v20 = vadd.f32 %v4295_v44, %v4183_v6  ;;  %3309 = vst.msk [vmem:[#allocation3 + $0x2c0] sm:$0xff] %vm657_vm3, %v3243_v13  ;;  %v3629_v13 = vpop.permute.xlu2 %3628  ;;  %v3855_v44 = vld [vmem:[#allocation3 + $0x2f8] sm:$0xff] }
 0x498   : > { %3501 = vst.msk [vmem:[#allocation3 + $0x2c0] sm:$0xff] %vm850_vm4, %v3435_v15  ;;  %v3847_v5 = vld [vmem:[#allocation3 + $0x2b8] sm:$0xff] }
 0x499   : > { %9905 = vst [vmem:[#allocation46_spill] sm:$0xff] %v8616_v20  ;;  %4095 = vmatmul.f32.gmra.mxu3 %v3847_v5 }
 0x49a   : > { %3693 = vst.msk [vmem:[#allocation3 + $0x2c0] sm:$0xff] %vm1043_vm5, %v3627_v52  ;;  %5852 = vmatmul.msk.f32.gmra.mxu0 %vm9860_vm0, %v3855_v44 }
 0x49c   : > { %v8642_v44 = vpop.f32.mrf.mxu3 }
 0x49e   : > { %v2605_v49 = vpop.permute.xlu0 %2604 }
 0x49f   : > { %v2797_v57 = vpop.permute.xlu1 %2796  ;;  %2670 = vst.msk [vmem:[#allocation3 + $0x2d0] sm:$0xff] %vm657_vm3, %v2605_v49  ;;  %v2991_v6 = vpop.permute.xlu2 %2990 }
 0x4a0   : > { %2862 = vst.msk [vmem:[#allocation3 + $0x2d0] sm:$0xff] %vm850_vm4, %v2797_v57 }
 0x4a1   : > { %v3848_v53 = vld [vmem:[#allocation3 + $0x2c0] sm:$0xff]  ;;  %3054 = vst.msk [vmem:[#allocation3 + $0x2d0] sm:$0xff] %vm1043_vm5, %v2989_v37 }
 0x4a2   : > { %4208 = vmatmul.f32.gmra.mxu2 %v3848_v53 }
 0x4a6   : > { %v3245_v38 = vpop.permute.xlu0 %3244 }
 0x4a7   : > { %v3437_v60 = vpop.permute.xlu1 %3436  ;;  %3310 = vst.msk [vmem:[#allocation3 + $0x2d8] sm:$0xff] %vm657_vm3, %v3245_v38  ;;  %v3631_v33 = vpop.permute.xlu2 %3630 }
 0x4a8   : > { %3502 = vst.msk [vmem:[#allocation3 + $0x2d8] sm:$0xff] %vm850_vm4, %v3437_v60  ;;  %v3850_v52 = vld [vmem:[#allocation3 + $0x2d0] sm:$0xff]  ;;  %v8638_v38 = vpop.f32.mrf.mxu0 }
 0x4a9   : > { %3694 = vst.msk [vmem:[#allocation3 + $0x2d8] sm:$0xff] %vm1043_vm5, %v3629_v13  ;;  %4098 = vmatmul.f32.gmra.mxu3 %v3850_v52  ;;  %v4507_v13 = vld [vmem:[%s9819_s6] sm:$0x3] }
 0x4aa   : > { %5854 = vmatpush.msk.msra.mxu3 %vm4512_vm6, %v4507_v13  ;;  %9906 = vst [vmem:[#allocation47_spill] sm:$0xff] %v8638_v38  ;;  %vm363_vm6 = vcmask 203928  }
 0x4ae   : > { %v2607_v5 = vpop.permute.xlu0 %2606 }
 0x4af   : > { %v2799_v15 = vpop.permute.xlu1 %2798  ;;  %2671 = vst.msk [vmem:[#allocation3 + $0x2e8] sm:$0xff] %vm657_vm3, %v2607_v5  ;;  %v8648_v5 = vpop.f32.mrf.mxu3 }
 0x4b0   : > { %2863 = vst.msk [vmem:[#allocation3 + $0x2e8] sm:$0xff] %vm850_vm4, %v2799_v15  ;;  %v3851_v37 = vld [vmem:[#allocation3 + $0x2d8] sm:$0xff]  ;;  %v8640_v52 = vpop.f32.mrf.mxu0 }
 0x4b1   : > { %3055 = vst.msk [vmem:[#allocation3 + $0x2e8] sm:$0xff] %vm1043_vm5, %v2991_v6  ;;  %4211 = vmatmul.f32.gmra.mxu2 %v3851_v37  ;;  %v8644_v6 = vpop.f32.mrf.mxu2 }
 0x4b2   : > { %9907 = vst [vmem:[#allocation48_spill] sm:$0xff] %v8640_v52 }
 0x4b6   : > { %v3247_v57 = vpop.permute.xlu0 %3246 }
 0x4b7   : > { %v3439_v49 = vpop.permute.xlu1 %3438  ;;  %3311 = vst.msk [vmem:[#allocation3 + $0x2f0] sm:$0xff] %vm657_vm3, %v3247_v57  ;;  %v4013_v57 = vadd.f32 %v8546_v12, %v8354_v46  ;;  %v4019_v46 = vadd.f32 %v8546_v12, %v8380_v63  ;;  %v4025_v63 = vadd.f32 %v8546_v12, %v8406_v10  ;;  %v4028_v10 = vadd.f32 %v8546_v12, %v8419_v61 }
 0x4b8   : > { %3503 = vst.msk [vmem:[#allocation3 + $0x2f0] sm:$0xff] %vm850_vm4, %v3439_v49  ;;  %v3853_v53 = vld [vmem:[#allocation3 + $0x2e8] sm:$0xff]  ;;  %v8646_v15 = vpop.f32.mrf.mxu0  ;;  %vm353_vm3 = vcmask 23552   ;;  %vm358_vm4 = vcmask 359752  }
 0x4b9   : > { %3695 = vst.msk [vmem:[#allocation3 + $0x2f0] sm:$0xff] %vm1043_vm5, %v3631_v33  ;;  %4101 = vmatmul.f32.gmra.mxu3 %v3853_v53  ;;  %v8650_v37 = vpop.f32.mrf.mxu2  ;;  %v4482_v33 = vld [vmem:[%s9818_s5 + $0x18] sm:$0xff]  ;;  %v4010_v53 = vadd.f32 %v8546_v12, %v8340_v30  ;;  %v4126_v13 = vadd.f32 %v8358_v7, %v4013_v57  ;;  %v4132_v30 = vadd.f32 %v8388_v25, %v4019_v46  ;;  %vm4814_vm5 = vcmask 1042434  }
 0x4ba   : > { %9908 = vst [vmem:[#allocation49_spill] sm:$0xff] %v8646_v15  ;;  %4498 = vmatpush.msra.mxu1 %v4482_v33  ;;  %v4022_v7 = vadd.f32 %v8546_v12, %v8393_v34  ;;  %v4141_v61 = vadd.f32 %v8427_v51, %v4028_v10 }
 0x4bb   : > { %v4123_v20 = vadd.f32 %v8343_v55, %v4010_v53  ;;  %v8673_v38 = vadd.f32 %v8187_v14, %v4126_v13  ;;  %v8699_v34 = vadd.f32 %v8217_v32, %v4132_v30 }
 0x4bc   : > { %v8657_v49 = vpop.f32.mrf.mxu3 }
 0x4bd   : > { %v4332_v14 = vsel %vm9860_vm0, %v8673_v38, 0.0 }
 0x4c0   : > { %v3854_v60 = vld [vmem:[#allocation3 + $0x2f0] sm:$0xff]  ;;  %v8664_v15 = vpop.f32.mrf.mxu0 }
 0x4c1   : > { %4214 = vmatmul.f32.gmra.mxu2 %v3854_v60  ;;  %v4016_v60 = vadd.f32 %v8546_v12, %v8367_v43  ;;  %v8679_v43 = vadd.f32 %v8171_v27, %v4123_v20  ;;  %v4481_v27 = vld [vmem:[%s9818_s5 + $0x10] sm:$0xff] }
 0x4c2   : > { %4499 = vmatpush.msra.mxu1 %v4481_v27  ;;  %v4411_v27 = vsel %vm9860_vm0, %v8699_v34, -inf }
 0x4c3   : > { %v4129_v33 = vadd.f32 %v8371_v1, %v4016_v60  ;;  %9909 = vst [vmem:[#allocation50_spill] sm:$0xff] %v8679_v43  ;;  %v4135_v1 = vadd.f32 %v8401_v9, %v4022_v7  ;;  %v4138_v9 = vadd.f32 %v8414_v42, %v4025_v63  ;;  %v4331_v20 = vsel %vm9860_vm0, %v8679_v43, 0.0 }
 0x4c4   : > { %v8666_v52 = vpop.f32.mrf.mxu2  ;;  %v4408_v53 = vsel %vm9860_vm0, %v8679_v43, -inf  ;;  %v4333_v46 = vadd.f32 %v4332_v14, %v4331_v20  ;;  %v4034_v7 = vadd.f32 %v8546_v12, %v8445_v35  ;;  %v4336_v63 = vsel %vm9860_vm0, %v8699_v34, 0.0 }
 0x4c5   : > { %v8682_v57 = vadd.f32 %v8203_v41, %v4129_v33  ;;  %v4409_v41 = vsel %vm9860_vm0, %v8673_v38, -inf  ;;  %v8715_v42 = vadd.f32 %v8229_v3, %v4135_v1  ;;  %v4031_v33 = vadd.f32 %v8546_v12, %v8432_v18 }
 0x4c6   : > { %v4413_v30 = vmax.f32 %v4408_v53, %v4409_v41  ;;  %v8727_v43 = vadd.f32 %v8247_v29, %v4138_v9  ;;  %v4147_v18 = vadd.f32 %v8455_v62, %v4034_v7  ;;  %v4037_v14 = vadd.f32 %v8546_v12, %v8460_v39 }
 0x4c7   : > { %v4334_v13 = vsel %vm9860_vm0, %v8682_v57, 0.0  ;;  %v4410_v32 = vsel %vm9860_vm0, %v8682_v57, -inf  ;;  %v4144_v3 = vadd.f32 %v8440_v22, %v4031_v33  ;;  %v4338_v35 = vsel %vm9860_vm0, %v8715_v42, 0.0 }
 0x4c8   : > { %v8710_v60 = vpop.f32.mrf.mxu0  ;;  %v4335_v51 = vadd.f32 %v4334_v13, %v4333_v46  ;;  %v4415_v1 = vmax.f32 %v4410_v32, %v4413_v30  ;;  %v4412_v10 = vsel %vm9860_vm0, %v8715_v42, -inf  ;;  %v8740_v29 = vadd.f32 %v8449_v54, %v4141_v61 }
 0x4c9   : > { %v4150_v20 = vadd.f32 %v8468_v26, %v4037_v14  ;;  %v4340_v62 = vsel %vm9860_vm0, %v8727_v43, 0.0  ;;  %v4414_v39 = vsel %vm9860_vm0, %v8727_v43, -inf  ;;  %v8750_v13 = vadd.f32 %v8471_v56, %v4144_v3 }
 0x4ca   : > { %v4337_v9 = vadd.f32 %v4336_v63, %v4335_v51  ;;  %v4417_v22 = vmax.f32 %v4411_v27, %v4415_v1  ;;  %v4040_v32 = vadd.f32 %v8546_v12, %v8474_v40  ;;  %v8755_v33 = vadd.f32 %v8485_v36, %v4147_v18 }
 0x4cb   : > { %v4342_v26 = vsel %vm9860_vm0, %v8740_v29, 0.0  ;;  %v4416_v46 = vsel %vm9860_vm0, %v8740_v29, -inf  ;;  %v4043_v56 = vadd.f32 %v8546_v12, %v8488_v2  ;;  %v8767_v40 = vadd.f32 %v8506_v16, %v4150_v20 }
 0x4cc   : > { %v8684_v55 = vpop.f32.mrf.mxu3  ;;  %v4339_v54 = vadd.f32 %v4338_v35, %v4337_v9  ;;  %v4419_v61 = vmax.f32 %v4412_v10, %v4417_v22  ;;  %v4153_v30 = vadd.f32 %v8482_v21, %v4040_v32  ;;  %v4344_v36 = vsel %vm9860_vm0, %v8750_v13, 0.0 }
 0x4cd   : > { %v4418_v3 = vsel %vm9860_vm0, %v8750_v13, -inf  ;;  %v4156_v51 = vadd.f32 %v8498_v31, %v4043_v56  ;;  %v4046_v21 = vadd.f32 %v8546_v12, %v8503_v59  ;;  %v4346_v18 = vsel %vm9860_vm0, %v8755_v33, 0.0 }
 0x4ce   : > { %v4341_v7 = vadd.f32 %v4340_v62, %v4339_v54  ;;  %v4421_v63 = vmax.f32 %v4414_v39, %v4419_v61  ;;  %v4420_v16 = vsel %vm9860_vm0, %v8755_v33, -inf  ;;  %v8783_v35 = vadd.f32 %v8521_v8, %v4153_v30  ;;  %v4480_v62 = vld [vmem:[%s9818_s5 + $0x8] sm:$0xff] }
 0x4cf   : > { %v4159_v10 = vadd.f32 %v8513_v11, %v4046_v21  ;;  %v4049_v31 = vadd.f32 %v8546_v12, %v8517_v58  ;;  %v4348_v22 = vsel %vm9860_vm0, %v8767_v40, 0.0  ;;  %v4422_v8 = vsel %vm9860_vm0, %v8767_v40, -inf  ;;  %4500 = vmatpush.msra.mxu1 %v4480_v62 }
 0x4d0   : > { %v8764_v27 = vpop.f32.mrf.mxu0  ;;  %v4343_v1 = vadd.f32 %v4342_v26, %v4341_v7  ;;  %v4423_v2 = vmax.f32 %v4416_v46, %v4421_v63  ;;  %v8798_v39 = vadd.f32 %v8539_v48, %v4156_v51  ;;  %v4052_v58 = vadd.f32 %v8546_v12, %v8529_v23 }
 0x4d1   : > { %v4162_v11 = vadd.f32 %v8525_v24, %v4049_v31  ;;  %v4350_v61 = vsel %vm9860_vm0, %v8783_v35, 0.0  ;;  %v4424_v26 = vsel %vm9860_vm0, %v8783_v35, -inf  ;;  %v8808_v46 = vadd.f32 %v8556_v28, %v4159_v10 }
 0x4d2   : > { %v4345_v9 = vadd.f32 %v4344_v36, %v4343_v1  ;;  %v4425_v59 = vmax.f32 %v4418_v3, %v4423_v2  ;;  %v4165_v48 = vadd.f32 %v8536_v19, %v4052_v58  ;;  %v4352_v24 = vsel %vm9860_vm0, %v8798_v39, 0.0  ;;  %v9911_v58 = vld [vmem:[#allocation42_spill] sm:$0xff] }
 0x4d3   : > { %v4426_v23 = vsel %vm9860_vm0, %v8798_v39, -inf  ;;  %v8816_v7 = vadd.f32 %v8564_v47, %v4162_v11  ;;  %v4354_v19 = vsel %vm9860_vm0, %v8808_v46, 0.0  ;;  %v4428_v28 = vsel %vm9860_vm0, %v8808_v46, -inf  ;;  %v9910_v11 = vld [vmem:[#allocation40_spill] sm:$0xff] }
 0x4d4   : > { %v8691_v25 = vpop.f32.mrf.mxu2  ;;  %v4347_v32 = vadd.f32 %v4346_v18, %v4345_v9  ;;  %v4427_v54 = vmax.f32 %v4420_v16, %v4425_v59  ;;  %v8827_v21 = vadd.f32 %v8573_v0, %v4165_v48  ;;  %v8837_v10 = vadd.f32 %v8579_v50, %v8554_v45 }
 0x4d5   : > { %v4356_v47 = vsel %vm9860_vm0, %v8816_v7, 0.0  ;;  %v4430_v16 = vsel %vm9860_vm0, %v8816_v7, -inf }
 0x4d6   : > { %v4349_v30 = vadd.f32 %v4348_v22, %v4347_v32  ;;  %v4429_v56 = vmax.f32 %v4422_v8, %v4427_v54  ;;  %v4358_v0 = vsel %vm9860_vm0, %v8827_v21, 0.0  ;;  %v4432_v59 = vsel %vm9860_vm0, %v8827_v21, -inf }
 0x4d7   : > { %v8845_v22 = vadd.f32 %v8586_v4, %v8568_v17  ;;  %v8849_v32 = vadd.f32 %v9911_v58, %v9910_v11  ;;  %v4360_v45 = vsel %vm9860_vm0, %v8837_v10, 0.0  ;;  %v4434_v50 = vsel %vm9860_vm0, %v8837_v10, -inf  ;;  %v9912_v4 = vld [vmem:[#allocation41_spill] sm:$0xff] }
 0x4d8   : > { %v8818_v63 = vpop.f32.mrf.mxu0  ;;  %v4351_v36 = vadd.f32 %v4350_v61, %v4349_v30  ;;  %v4431_v3 = vmax.f32 %v4424_v26, %v4429_v56  ;;  %v9913_v30 = vld [vmem:[#allocation43_spill] sm:$0xff]  ;;  %v4079_v11 = vadd.f32 %v8546_v12, %v8657_v49 }
 0x4d9   : > { %v4362_v48 = vsel %vm9860_vm0, %v8845_v22, 0.0  ;;  %v4436_v17 = vsel %vm9860_vm0, %v8845_v22, -inf  ;;  %v8861_v56 = vadd.f32 %v9913_v30, %v9912_v4 }
 0x4da   : > { %v4353_v1 = vadd.f32 %v4352_v24, %v4351_v36  ;;  %v4433_v2 = vmax.f32 %v4426_v23, %v4431_v3  ;;  %v4073_v24 = vadd.f32 %v8546_v12, %v8642_v44  ;;  %v4076_v44 = vadd.f32 %v8546_v12, %v8648_v5 }
 0x4dc   : > { %v8733_v41 = vpop.f32.mrf.mxu3  ;;  %v4355_v31 = vadd.f32 %v4354_v19, %v4353_v1  ;;  %v4435_v9 = vmax.f32 %v4428_v28, %v4433_v2  ;;  %v4364_v19 = vsel %vm9860_vm0, %v8849_v32, 0.0  ;;  %v4438_v1 = vsel %vm9860_vm0, %v8849_v32, -inf  ;;  %v9914_v2 = vld [vmem:[#allocation44_spill] sm:$0xff] }
 0x4dd   : > { %v4085_v4 = vadd.f32 %v8546_v12, %v8733_v41 }
 0x4de   : > { %v4357_v62 = vadd.f32 %v4356_v47, %v4355_v31  ;;  %v4437_v8 = vmax.f32 %v4430_v16, %v4435_v9  ;;  %v9915_v47 = vld [vmem:[#allocation45_spill] sm:$0xff]  ;;  %v4186_v31 = vadd.f32 %v8644_v6, %v4073_v24  ;;  %v4082_v6 = vadd.f32 %v8546_v12, %v8684_v55  ;;  %v9917_v55 = vld [vmem:[#allocation46_spill] sm:$0xff] }
 0x4df   : > { %v8873_v16 = vadd.f32 %v9915_v47, %v9914_v2  ;;  %v4370_v24 = vsel %vm9860_vm0, %v9917_v55, 0.0 }
 0x4e0   : > { %v4359_v54 = vadd.f32 %v4358_v0, %v4357_v62  ;;  %v4439_v61 = vmax.f32 %v4432_v59, %v4437_v8  ;;  %v8865_v23 = vpop.f32.mrf.mxu0  ;;  %v4366_v59 = vsel %vm9860_vm0, %v8861_v56, 0.0  ;;  %v4440_v62 = vsel %vm9860_vm0, %v8861_v56, -inf }
 0x4e1   : > { %v4189_v8 = vadd.f32 %v8650_v37, %v4076_v44  ;;  %v4368_v5 = vsel %vm9860_vm0, %v8873_v16, 0.0  ;;  %v4195_v49 = vadd.f32 %v8691_v25, %v4082_v6 }
 0x4e2   : > { %v4361_v36 = vadd.f32 %v4360_v45, %v4359_v54  ;;  %v4441_v3 = vmax.f32 %v4434_v50, %v4439_v61  ;;  %v4442_v50 = vsel %vm9860_vm0, %v8873_v16, -inf  ;;  %v9916_v54 = vld [vmem:[#allocation47_spill] sm:$0xff] }
 0x4e3   : > { %v8892_v61 = vadd.f32 %v9916_v54, %v4186_v31  ;;  %v9919_v31 = vld [vmem:[#allocation49_spill] sm:$0xff] }
 0x4e4   : > { %v8743_v53 = vpop.f32.mrf.mxu2  ;;  %v4363_v9 = vadd.f32 %v4362_v48, %v4361_v36  ;;  %v4443_v0 = vmax.f32 %v4436_v17, %v4441_v3  ;;  %v4192_v48 = vadd.f32 %v8666_v52, %v4079_v11  ;;  %v4444_v36 = vsel %vm9860_vm0, %v9917_v55, -inf  ;;  %v9918_v3 = vld [vmem:[#allocation48_spill] sm:$0xff] }
 0x4e5   : > { %v4198_v52 = vadd.f32 %v8743_v53, %v4085_v4  ;;  %v4372_v25 = vsel %vm9860_vm0, %v8892_v61, 0.0  ;;  %v4446_v41 = vsel %vm9860_vm0, %v8892_v61, -inf }
 0x4e6   : > { %v4365_v58 = vadd.f32 %v4364_v19, %v4363_v9  ;;  %v4445_v45 = vmax.f32 %v4438_v1, %v4443_v0  ;;  %v8903_v19 = vadd.f32 %v9918_v3, %v4189_v8  ;;  %v8911_v44 = vadd.f32 %v9919_v31, %v4192_v48 }
 0x4e7   : > { %v8916_v8 = vadd.f32 %v8664_v15, %v4195_v49  ;;  %v4479_v15 = vld [vmem:[%s9818_s5] sm:$0xff] }
 0x4e8   : > { %v4367_v37 = vadd.f32 %v4366_v59, %v4365_v58  ;;  %v4447_v17 = vmax.f32 %v4440_v62, %v4445_v45  ;;  %v4322_v0 = vpop.f32.mrf.mxu0  ;;  %v4374_v53 = vsel %vm9860_vm0, %v8903_v19, 0.0  ;;  %v4448_v11 = vsel %vm9860_vm0, %v8903_v19, -inf  ;;  %4501 = vmatpush.msra.mxu1 %v4479_v15 }
 0x4e9   : > { %v4450_v54 = vsel %vm9860_vm0, %v8911_v44, -inf }
 0x4ea   : > { %v4369_v1 = vadd.f32 %v4368_v5, %v4367_v37  ;;  %v4449_v2 = vmax.f32 %v4442_v50, %v4447_v17  ;;  %v4376_v50 = vsel %vm9860_vm0, %v8911_v44, 0.0  ;;  %v4452_v17 = vsel %vm9860_vm0, %v8916_v8, -inf }
 0x4ec   : > { %v8778_v14 = vpop.f32.mrf.mxu3  ;;  %v4371_v59 = vadd.f32 %v4370_v24, %v4369_v1  ;;  %v4451_v62 = vmax.f32 %v4444_v36, %v4449_v2 }
 0x4ed   : > { %v4088_v9 = vadd.f32 %v8546_v12, %v8778_v14  ;;  %v8926_v14 = vadd.f32 %v8710_v60, %v4198_v52  ;;  %v4378_v60 = vsel %vm9860_vm0, %v8916_v8, 0.0 }
 0x4ee   : > { %v4373_v6 = vadd.f32 %v4372_v25, %v4371_v59  ;;  %v4453_v5 = vmax.f32 %v4446_v41, %v4451_v62 }
 0x4ef   : > { %v4454_v2 = vsel %vm9860_vm0, %v8926_v14, -inf }
 0x4f0   : > { %v4455_v37 = vmax.f32 %v4448_v11, %v4453_v5 }
 0x4f5   : > { %v8790_v20 = vpop.f32.mrf.mxu2 }
 0x4f6   : > { %v4201_v58 = vadd.f32 %v8790_v20, %v4088_v9  ;;  %v6095_v9 = vmov 256.0  }
 0x4f7   : > { %6010 = vrcp.f32 %v6095_v9 }
 0x4f8   : > { %v8942_v4 = vadd.f32 %v8764_v27, %v4201_v58 }
 0x4fa   : > { %v4456_v59 = vsel %vm9860_vm0, %v8942_v4, -inf }
 0x4fc   : > { %v8820_v51 = vpop.f32.mrf.mxu3 }
 0x4fd   : > { %v4091_v45 = vadd.f32 %v8546_v12, %v8820_v51  ;;  %v4375_v51 = vadd.f32 %v4374_v53, %v4373_v6 }
 0x4ff   : > { %v4377_v3 = vadd.f32 %v4376_v50, %v4375_v51 }
 0x501   : > { %v4379_v27 = vadd.f32 %v4378_v60, %v4377_v3 }
 0x505   : > { %v8829_v18 = vpop.f32.mrf.mxu2 }
 0x506   : > { %v4204_v20 = vadd.f32 %v8829_v18, %v4091_v45  ;;  %v4461_v18 = vmax.f32 %v4450_v54, %v4455_v37 }
 0x508   : > { %v8950_v52 = vadd.f32 %v8818_v63, %v4204_v20  ;;  %v4463_v31 = vmax.f32 %v4452_v17, %v4461_v18  ;;  %v6011_v20 = vpop.eup %6010 }
 0x509   : > { %vm4405_vm7 = vweird.f32 %v6011_v20 }
 0x50a   : > { %v4468_v11 = vmax.f32 %v4454_v2, %v4463_v31  ;;  %v4458_v58 = vsel %vm9860_vm0, %v8950_v52, -inf }
 0x50c   : > { %v4093_v26 = vpop.f32.mrf.mxu3  ;;  %v4457_v5 = vmax.f32 %v4468_v11, %v4456_v59 }
 0x50d   : > { %v4094_v48 = vadd.f32 %v8546_v12, %v4093_v26  ;;  %v4380_v26 = vsel %vm9860_vm0, %v8926_v14, 0.0 }
 0x50e   : > { %v4381_v63 = vadd.f32 %v4380_v26, %v4379_v27  ;;  %v4465_v51 = vmax.f32 %v4457_v5, %v4458_v58 }
 0x515   : > { %v4206_v28 = vpop.f32.mrf.mxu2 }
 0x516   : > { %v4207_v24 = vadd.f32 %v4206_v28, %v4094_v48  ;;  %v4325_v28 = vpop.f32.mrf.mxu0 }
 0x518   : > { %v8958_v62 = vadd.f32 %v8865_v23, %v4207_v24 }
 0x51a   : > { %v4386_v50 = vsel %vm9860_vm0, %v8958_v62, 0.0  ;;  %v4460_v23 = vsel %vm9860_vm0, %v8958_v62, -inf }
 0x51c   : > { %v4096_v30 = vpop.f32.mrf.mxu3 }
 0x51d   : > { %v4097_v36 = vadd.f32 %v8546_v12, %v4096_v30  ;;  %v4382_v30 = vsel %vm9860_vm0, %v8942_v4, 0.0 }
 0x51e   : > { %v4383_v6 = vadd.f32 %v4382_v30, %v4381_v63 }
 0x525   : > { %v4209_v47 = vpop.f32.mrf.mxu2 }
 0x526   : > { %v4210_v25 = vadd.f32 %v4209_v47, %v4097_v36  ;;  %v4384_v47 = vsel %vm9860_vm0, %v8950_v52, 0.0  ;;  %v4328_v36 = vpop.f32.mrf.mxu0 }
 0x527   : > { %v4385_v48 = vadd.f32 %v4384_v47, %v4383_v6 }
 0x528   : > { %v8964_v45 = vadd.f32 %v4322_v0, %v4210_v25 }
 0x529   : > { %v4387_v17 = vadd.f32 %v4386_v50, %v4385_v48 }
 0x52a   : > { %v4388_v37 = vsel %vm9860_vm0, %v8964_v45, 0.0  ;;  %v4462_v0 = vsel %vm9860_vm0, %v8964_v45, -inf }
 0x52b   : > { %v4389_v25 = vadd.f32 %v4388_v37, %v4387_v17 }
 0x52c   : > { %v4099_v49 = vpop.f32.mrf.mxu3 }
 0x52d   : > { %v4100_v41 = vadd.f32 %v8546_v12, %v4099_v49  ;;  %v4459_v49 = vmax.f32 %v4460_v23, %v4465_v51 }
 0x52f   : > { %v4467_v2 = vmax.f32 %v4459_v49, %v4462_v0 }
 0x534   : > { %v4212_v1 = vpop.f32.mrf.mxu2 }
 0x535   : > { %v4213_v53 = vadd.f32 %v4212_v1, %v4100_v41  ;;  %v4401_v1 = vmul.f32 256.0, %v6011_v20 }
 0x537   : > { %v8970_v54 = vadd.f32 %v4325_v28, %v4213_v53  ;;  %v4402_v9 = vsub.f32 1.0, %v4401_v1 }
 0x539   : > { %v4390_v3 = vsel %vm9860_vm0, %v8970_v54, 0.0  ;;  %v4464_v18 = vsel %vm9860_vm0, %v8970_v54, -inf  ;;  %v4403_v11 = vmul.f32 %v6011_v20, %v4402_v9 }
 0x53a   : > { %v4391_v27 = vadd.f32 %v4390_v3, %v4389_v25  ;;  %v4469_v31 = vmax.f32 %v4464_v18, %v4467_v2 }
 0x53c   : > { %v4102_v15 = vpop.f32.mrf.mxu3 }
 0x53d   : > { %v4103_v60 = vadd.f32 %v8546_v12, %v4102_v15  ;;  %v4404_v15 = vadd.f32 %v6011_v20, %v4403_v11 }
 0x53f   : > { %v4406_v37 = vsel %vm4405_vm7, %v6011_v20, %v4404_v15  ;;  %vm4816_vm7 = vcmask 1043459  }
 0x544   : > { %v4215_v24 = vpop.f32.mrf.mxu2 }
 0x545   : > { %v4216_v26 = vadd.f32 %v4215_v24, %v4103_v60 }
 0x547   : > { %v8981_v41 = vadd.f32 %v4328_v36, %v4216_v26 }
 0x549   : > { %v4392_v12 = vsel %vm9860_vm0, %v8981_v41, 0.0  ;;  %v4466_v28 = vsel %vm9860_vm0, %v8981_v41, -inf }
 0x54a   : > { %v4393_v30 = vadd.f32 %v4392_v12, %v4391_v27  ;;  %v4470_v59 = vmax.f32 %v4466_v28, %v4469_v31 }
 0x54c   : > { %v4394_v53 = vrot.slane %v4393_v30, 4  ;;  %v4471_v63 = vrot.slane %v4470_v59, 4 }
 0x54e   : > { %v4395_v47 = vadd.f32 %v4394_v53, %v4393_v30  ;;  %v4472_v58 = vmax.f32 %v4470_v59, %v4471_v63 }
 0x550   : > { %v4396_v6 = vrot.slane %v4395_v47, 2  ;;  %v4473_v5 = vrot.slane %v4472_v58, 2 }
 0x552   : > { %v4397_v50 = vadd.f32 %v4396_v6, %v4395_v47  ;;  %v4474_v23 = vmax.f32 %v4472_v58, %v4473_v5  ;;  %v9920_v6 = vld [vmem:[#allocation50_spill] sm:$0xff] }
 0x554   : > { %v4398_v48 = vrot.slane %v4397_v50, 1  ;;  %v4475_v51 = vrot.slane %v4474_v23, 1 }
 0x556   : > { %v4399_v0 = vadd.f32 %v4398_v48, %v4397_v50  ;;  %v4476_v17 = vmax.f32 %v4474_v23, %v4475_v51 }
 0x558   : > { %v4407_v60 = vmul.f32 %v4406_v37, %v4399_v0 }
 0x55a   : > { %v4478_v49 = vsel %vm4477_vm8, %v4407_v60, %v4476_v17  ;;  %vm4818_vm8 = vcmask 1044484  }
 0x55b   : > { %5853 = vmatmul.msk.f32.vlgmr.msra.gmra.mxu1 %vm9860_vm0, %v4478_v49 }
 0x5d8   : > { %v4503_v24 = vpop.f32.mrf.mxu1 }
 0x5d9   : > { %v4506_v36 = vmax.f32 %v4503_v24, 0.0 }
 0x5db   : > { %5855 = vmatmul.msk.f32.vlgmr.msra.gmra.mxu3 %vm4508_vm9, %v4506_v36  ;;  %vm4820_vm9 = vcmask 1045509  }
 0x65e   : > { %v4533_v3 = vpop.f32.mrf.mxu3 }
 0x65f   : > { %v4537_v18 = vrot.slane %v4533_v3, 1 }
 0x661   : > { %v4539_v26 = vadd.f32 %v4537_v18, %v4533_v3 }
 0x663   : > { %v5856_v1 = vmul.f32 -1.442695, %v4539_v26 }
 0x665   : > { %6012 = vpow2.f32 %v5856_v1 }
 0x66b   : > { %v6013_v2 = vpop.eup %6012 }
 0x66c   : > { %v4543_v25 = vadd.f32 1.0, %v6013_v2 }
 0x66e   : > { %6014 = vrcp.f32 %v4543_v25  ;;  %v4555_v12 = vand.u32 2147483648, %v4543_v25  ;;  %v4553_v9 = vand.u32 2147483647, %v4543_v25  ;;  %vm4549_vm11 = vweird.f32 %v4543_v25 }
 0x670   : > { %v4556_v59 = vor.u32 1.1754944e-38, %v4555_v12  ;;  %vm4554_vm13 = vcmp.eq.f32.partialorder %v4553_v9, 8.507059e+37 }
 0x674   : > { %v6015_v20 = vpop.eup %6014 }
 0x675   : > { %v4545_v27 = vmul.f32 %v6015_v20, %v4543_v25  ;;  %vm4550_vm10 = vweird.f32 %v6015_v20 }
 0x676   : > { %vm4551_vm12 = vmor %vm4549_vm11, %vm4550_vm10  ;;  %vm4822_vm10 = vcmask 1046534   ;;  %vm4824_vm11 = vcmask 1047559  }
 0x677   : > { %v4546_v31 = vsub.f32 1.0, %v4545_v27 }
 0x679   : > { %v4547_v28 = vmul.f32 %v6015_v20, %v4546_v31 }
 0x67b   : > { %v4548_v30 = vadd.f32 %v6015_v20, %v4547_v28 }
 0x67d   : > { %v4552_v53 = vsel %vm4551_vm12, %v6015_v20, %v4548_v30  ;;  %vm4835_vm12 = vcmask 154648  }
 0x67e   : > { %v4557_v63 = vsel %vm4554_vm13, %v4556_v59, %v4552_v53  ;;  %vm5060_vm13 = vcmask 1043456  }
 0x67f   : > { %v8988_v11 = vperm.slane %v4557_v63, 0 }
 0x681   : > { %v8992_v47 = vmul.f32 %v8988_v11, %v8682_v57  ;;  %v8996_v58 = vmul.f32 %v8988_v11, %v8673_v38  ;;  %v9000_v5 = vmul.f32 %v8988_v11, %v9920_v6  ;;  %v9010_v38 = vmul.f32 %v8988_v11, %v8699_v34 }
 0x682   : > { %v9014_v23 = vmul.f32 %v8988_v11, %v8727_v43  ;;  %v9018_v48 = vmul.f32 %v8988_v11, %v8715_v42  ;;  %v9028_v43 = vmul.f32 %v8988_v11, %v8740_v29  ;;  %v9032_v42 = vmul.f32 %v8988_v11, %v8755_v33 }
 0x683   : > { %v4598_v15 = vsel %vm9860_vm0, %v8992_v47, 0.0  ;;  %v4595_v50 = vsel %vm9860_vm0, %v8996_v58, 0.0  ;;  %v4592_v57 = vsel %vm9860_vm0, %v9000_v5, 0.0  ;;  %v4601_v51 = vsel %vm9860_vm0, %v9010_v38, 0.0 }
 0x684   : > { %4599 = vadd.xlane.f32.xlu2 %v4598_v15  ;;  %4596 = vadd.xlane.f32.xlu1 %v4595_v50  ;;  %v4607_v37 = vsel %vm9860_vm0, %v9014_v23, 0.0  ;;  %v4604_v34 = vsel %vm9860_vm0, %v9018_v48, 0.0  ;;  %v9036_v0 = vmul.f32 %v8988_v11, %v8750_v13  ;;  %v4610_v60 = vsel %vm9860_vm0, %v9028_v43, 0.0 }
 0x685   : > { %4593 = vadd.xlane.f32.xlu0 %v4592_v57  ;;  %v4616_v17 = vsel %vm9860_vm0, %v9032_v42, 0.0  ;;  %v9046_v33 = vmul.f32 %v8988_v11, %v8767_v40  ;;  %v9050_v13 = vmul.f32 %v8988_v11, %v8798_v39  ;;  %v9054_v49 = vmul.f32 %v8988_v11, %v8783_v35 }
 0x686   : > { %v4613_v29 = vsel %vm9860_vm0, %v9036_v0, 0.0  ;;  %v9064_v39 = vmul.f32 %v8988_v11, %v8808_v46  ;;  %v9068_v35 = vmul.f32 %v8988_v11, %v8827_v21  ;;  %v9072_v3 = vmul.f32 %v8988_v11, %v8816_v7 }
 0x687   : > { %v4619_v24 = vsel %vm9860_vm0, %v9046_v33, 0.0  ;;  %v4625_v36 = vsel %vm9860_vm0, %v9050_v13, 0.0  ;;  %v4622_v40 = vsel %vm9860_vm0, %v9054_v49, 0.0  ;;  %v9082_v21 = vmul.f32 %v8988_v11, %v8837_v10 }
 0x688   : > { %v4628_v18 = vsel %vm9860_vm0, %v9064_v39, 0.0  ;;  %v4634_v26 = vsel %vm9860_vm0, %v9068_v35, 0.0  ;;  %v4631_v46 = vsel %vm9860_vm0, %v9072_v3, 0.0  ;;  %v9086_v7 = vmul.f32 %v8988_v11, %v8849_v32 }
 0x689   : > { %v9090_v1 = vmul.f32 %v8988_v11, %v8845_v22  ;;  %v4637_v2 = vsel %vm9860_vm0, %v9082_v21, 0.0  ;;  %v9100_v32 = vmul.f32 %v8988_v11, %v8861_v56  ;;  %v9104_v22 = vmul.f32 %v8988_v11, %v9917_v55 }
 0x68a   : > { %v4643_v25 = vsel %vm9860_vm0, %v9086_v7, 0.0  ;;  %v9108_v20 = vmul.f32 %v8988_v11, %v8873_v16  ;;  %v9118_v55 = vmul.f32 %v8988_v11, %v8892_v61  ;;  %v9122_v16 = vmul.f32 %v8988_v11, %v8911_v44 }
 0x68b   : > { %v4640_v10 = vsel %vm9860_vm0, %v9090_v1, 0.0  ;;  %v4646_v27 = vsel %vm9860_vm0, %v9100_v32, 0.0  ;;  %v4652_v31 = vsel %vm9860_vm0, %v9104_v22, 0.0  ;;  %v9126_v12 = vmul.f32 %v8988_v11, %v8903_v19 }
 0x68c   : > { %4602 = vadd.xlane.f32.xlu2 %v4601_v51  ;;  %4608 = vadd.xlane.f32.xlu1 %v4607_v37  ;;  %v4649_v56 = vsel %vm9860_vm0, %v9108_v20, 0.0  ;;  %v4655_v28 = vsel %vm9860_vm0, %v9118_v55, 0.0  ;;  %v4661_v9 = vsel %vm9860_vm0, %v9122_v16, 0.0  ;;  %v4844_v44 = vsel %vm9860_vm0, %v8992_v47, -inf }
 0x68d   : > { %4605 = vadd.xlane.f32.xlu0 %v4604_v34  ;;  %v4658_v61 = vsel %vm9860_vm0, %v9126_v12, 0.0  ;;  %v4838_v30 = vsel %vm9860_vm0, %v9000_v5, -inf  ;;  %v4841_v19 = vsel %vm9860_vm0, %v8996_v58, -inf  ;;  %v4853_v59 = vsel %vm9860_vm0, %v9014_v23, -inf }
 0x68e   : > { %v4847_v53 = vsel %vm9860_vm0, %v9010_v38, -inf  ;;  %v4850_v63 = vsel %vm9860_vm0, %v9018_v48, -inf  ;;  %v4862_v6 = vsel %vm9860_vm0, %v9032_v42, -inf  ;;  %v4856_v15 = vsel %vm9860_vm0, %v9028_v43, -inf }
 0x68f   : > { %v4859_v50 = vsel %vm9860_vm0, %v9036_v0, -inf  ;;  %v4871_v57 = vsel %vm9860_vm0, %v9050_v13, -inf  ;;  %v4865_v51 = vsel %vm9860_vm0, %v9046_v33, -inf  ;;  %v4868_v37 = vsel %vm9860_vm0, %v9054_v49, -inf }
 0x690   : > { %v4880_v34 = vsel %vm9860_vm0, %v9068_v35, -inf }
 0x694   : > { %4611 = vadd.xlane.f32.xlu2 %v4610_v60  ;;  %4617 = vadd.xlane.f32.xlu1 %v4616_v17  ;;  %v4874_v60 = vsel %vm9860_vm0, %v9064_v39, -inf  ;;  %v4877_v17 = vsel %vm9860_vm0, %v9072_v3, -inf }
 0x695   : > { %4614 = vadd.xlane.f32.xlu0 %v4613_v29  ;;  %v9166_v29 = vmul.f32 %v8988_v11, %v8926_v14  ;;  %v4892_v14 = vsel %vm9860_vm0, %v9100_v32, -inf }
 0x69c   : > { %4620 = vadd.xlane.f32.xlu2 %v4619_v24  ;;  %4626 = vadd.xlane.f32.xlu1 %v4625_v36  ;;  %v9170_v24 = vmul.f32 %v8988_v11, %v8916_v8  ;;  %v4667_v36 = vsel %vm9860_vm0, %v9166_v29, 0.0  ;;  %v4889_v8 = vsel %vm9860_vm0, %v9086_v7, -inf }
 0x69d   : > { %4623 = vadd.xlane.f32.xlu0 %v4622_v40  ;;  %v4883_v40 = vsel %vm9860_vm0, %v9082_v21, -inf }
 0x6a4   : > { %4629 = vadd.xlane.f32.xlu2 %v4628_v18  ;;  %4635 = vadd.xlane.f32.xlu1 %v4634_v26  ;;  %v4664_v18 = vsel %vm9860_vm0, %v9170_v24, 0.0  ;;  %v4886_v26 = vsel %vm9860_vm0, %v9090_v1, -inf }
 0x6a5   : > { %4632 = vadd.xlane.f32.xlu0 %v4631_v46  ;;  %v6096_v46 = vmov 32.0  }
 0x6a6   : > { %6016 = vrcp.f32 %v6096_v46  ;;  %v9230_v46 = vmul.f32 %v8988_v11, %v8981_v41 }
 0x6ac   : > { %4638 = vadd.xlane.f32.xlu2 %v4637_v2  ;;  %4644 = vadd.xlane.f32.xlu1 %v4643_v25 }
 0x6ad   : > { %4641 = vadd.xlane.f32.xlu0 %v4640_v10  ;;  %v9186_v10 = vmul.f32 %v8988_v11, %v8950_v52 }
 0x6b4   : > { %4647 = vadd.xlane.f32.xlu2 %v4646_v27  ;;  %4653 = vadd.xlane.f32.xlu1 %v4652_v31  ;;  %v9190_v31 = vmul.f32 %v8988_v11, %v8942_v4  ;;  %v9200_v4 = vmul.f32 %v8988_v11, %v8958_v62  ;;  %v9210_v62 = vmul.f32 %v8988_v11, %v8964_v45 }
 0x6b5   : > { %4650 = vadd.xlane.f32.xlu0 %v4649_v56  ;;  %v6017_v56 = vpop.eup %6016 }
 0x6b6   : > { %v4689_v52 = vmul.f32 32.0, %v6017_v56  ;;  %vm4693_vm14 = vweird.f32 %v6017_v56 }
 0x6bc   : > { %4656 = vadd.xlane.f32.xlu2 %v4655_v28  ;;  %4662 = vadd.xlane.f32.xlu1 %v4661_v9  ;;  %v4673_v28 = vsel %vm9860_vm0, %v9186_v10, 0.0  ;;  %v4895_v9 = vsel %vm9860_vm0, %v9108_v20, -inf }
 0x6bd   : > { %4659 = vadd.xlane.f32.xlu0 %v4658_v61  ;;  %v4670_v61 = vsel %vm9860_vm0, %v9190_v31, 0.0 }
 0x6c4   : > { %4845 = vmax.xlane.f32.xlu1 %v4844_v44  ;;  %4839 = vmax.xlane.f32.xlu2 %v4838_v30 }
 0x6c5   : > { %4842 = vmax.xlane.f32.xlu0 %v4841_v19 }
 0x6cc   : > { %4854 = vmax.xlane.f32.xlu1 %v4853_v59  ;;  %4848 = vmax.xlane.f32.xlu2 %v4847_v53  ;;  %v4690_v59 = vsub.f32 1.0, %v4689_v52  ;;  %v4676_v53 = vsel %vm9860_vm0, %v9200_v4, 0.0 }
 0x6cd   : > { %4851 = vmax.xlane.f32.xlu0 %v4850_v63  ;;  %v4898_v63 = vsel %vm9860_vm0, %v9104_v22, -inf }
 0x6d4   : > { %4863 = vmax.xlane.f32.xlu1 %v4862_v6  ;;  %4857 = vmax.xlane.f32.xlu2 %v4856_v15  ;;  %v4901_v6 = vsel %vm9860_vm0, %v9118_v55, -inf  ;;  %v4691_v15 = vmul.f32 %v6017_v56, %v4690_v59 }
 0x6d5   : > { %4860 = vmax.xlane.f32.xlu0 %v4859_v50 }
 0x6dc   : > { %4872 = vmax.xlane.f32.xlu1 %v4871_v57  ;;  %4866 = vmax.xlane.f32.xlu2 %v4865_v51 }
 0x6dd   : > { %4869 = vmax.xlane.f32.xlu0 %v4868_v37  ;;  %v9861_v37 = vlaneseq }
 0x6e4   : > { %4881 = vmax.xlane.f32.xlu1 %v4880_v34  ;;  %4875 = vmax.xlane.f32.xlu2 %v4874_v60  ;;  %v4692_v34 = vadd.f32 %v6017_v56, %v4691_v15  ;;  %v4907_v60 = vsel %vm9860_vm0, %v9122_v16, -inf }
 0x6e5   : > { %4878 = vmax.xlane.f32.xlu0 %v4877_v17  ;;  %v4679_v17 = vsel %vm9860_vm0, %v9210_v62, 0.0 }
 0x6e6   : > { %v9221_v45 = vsel %vm4693_vm14, %v6017_v56, %v4692_v34  ;;  %vm4970_vm14 = vcmask 335112  }
 0x6ec   : > { %4668 = vadd.xlane.f32.xlu1 %v4667_v36  ;;  %4884 = vmax.xlane.f32.xlu2 %v4883_v40  ;;  %v4904_v36 = vsel %vm9860_vm0, %v9126_v12, -inf  ;;  %v9219_v40 = vand.u32 127, %v9861_v37 }
 0x6ed   : > { %4665 = vadd.xlane.f32.xlu0 %v4664_v18  ;;  %v9225_v18 = vmul.f32 %v8988_v11, %v8970_v54 }
 0x6ee   : > { %v9237_v56 = vadd.s32 4294967285, %v9219_v40 }
 0x6ef   : > { %9921 = vst [vmem:[#allocation40_spill] sm:$0xff] %v9225_v18 }
 0x6f4   : > { %4893 = vmax.xlane.f32.xlu1 %v4892_v14  ;;  %4887 = vmax.xlane.f32.xlu2 %v4886_v26 }
 0x6f5   : > { %4890 = vmax.xlane.f32.xlu0 %v4889_v8 }
 0x6f7   : > { %v4600_v2 = vpop.xlane.xlu2 %4599  ;;  %v4597_v25 = vpop.xlane.xlu1 %4596 }
 0x6f8   : > { %v4594_v27 = vpop.xlane.xlu0 %4593  ;;  %v4696_v54 = vmul.f32 %v9221_v45, %v4597_v25 }
 0x6f9   : > { %v4695_v52 = vmul.f32 %v9221_v45, %v4594_v27  ;;  %v4685_v27 = vsel %vm9860_vm0, %v9230_v46, 0.0 }
 0x6fc   : > { %4674 = vadd.xlane.f32.xlu1 %v4673_v28  ;;  %4896 = vmax.xlane.f32.xlu2 %v4895_v9  ;;  %v9233_v9 = vadd.s32 4294967293, %v9219_v40 }
 0x6fd   : > { %4671 = vadd.xlane.f32.xlu0 %v4670_v61  ;;  %v4697_v61 = vmul.f32 %v9221_v45, %v4600_v2  ;;  %v4682_v2 = vsel %vm9860_vm0, %v9225_v18, 0.0 }
 0x6fe   : > { %v4762_v15 = vperm.slane %v4695_v52, %v9233_v9 }
 0x6ff   : > { %v4603_v44 = vpop.xlane.xlu2 %4602  ;;  %v4609_v30 = vpop.xlane.xlu1 %4608 }
 0x700   : > { %v4606_v19 = vpop.xlane.xlu0 %4605  ;;  %v4698_v14 = vmul.f32 %v9221_v45, %v4603_v44  ;;  %v4700_v44 = vmul.f32 %v9221_v45, %v4609_v30  ;;  %v4767_v30 = vperm.slane %v4697_v61, %v9233_v9 }
 0x701   : > { %v4699_v59 = vmul.f32 %v9221_v45, %v4606_v19  ;;  %v4919_v19 = vsel %vm9860_vm0, %v9186_v10, -inf }
 0x702   : > { %v4768_v41 = vperm.slane %v4698_v14, %v9237_v56 }
 0x704   : > { %4677 = vadd.xlane.f32.xlu1 %v4676_v53  ;;  %4899 = vmax.xlane.f32.xlu2 %v4898_v63  ;;  %v4910_v53 = vsel %vm9860_vm0, %v9170_v24, -inf  ;;  %v4769_v34 = vsel %vm4765_vm15, %v4768_v41, %v4767_v30 }
 0x705   : > { %4902 = vmax.xlane.f32.xlu0 %v4901_v6  ;;  %v4764_v6 = vperm.slane %v4696_v54, %v9237_v56 }
 0x707   : > { %v4612_v50 = vpop.xlane.xlu2 %4611  ;;  %v4618_v57 = vpop.xlane.xlu1 %4617 }
 0x708   : > { %v4615_v51 = vpop.xlane.xlu0 %4614  ;;  %v4701_v11 = vmul.f32 %v9221_v45, %v4612_v50  ;;  %v4771_v50 = vperm.slane %v4700_v44, %v9237_v56 }
 0x709   : > { %v4702_v63 = vmul.f32 %v9221_v45, %v4615_v51  ;;  %v4770_v51 = vperm.slane %v4699_v59, %v9233_v9 }
 0x70c   : > { %4908 = vmax.xlane.f32.xlu1 %v4907_v60  ;;  %4680 = vadd.xlane.f32.xlu2 %v4679_v17  ;;  %v4773_v60 = vperm.slane %v4701_v11, %v9233_v9  ;;  %v4703_v17 = vmul.f32 %v9221_v45, %v4618_v57  ;;  %v4766_v57 = vsel %vm4765_vm15, %v4764_v6, %v4762_v15  ;;  %v4913_v11 = vsel %vm9860_vm0, %v9166_v29, -inf }
 0x70d   : > { %4905 = vmax.xlane.f32.xlu0 %v4904_v36 }
 0x70f   : > { %v4621_v26 = vpop.xlane.xlu2 %4620  ;;  %v4627_v8 = vpop.xlane.xlu1 %4626 }
 0x710   : > { %v4624_v28 = vpop.xlane.xlu0 %4623  ;;  %v4704_v25 = vmul.f32 %v9221_v45, %v4621_v26  ;;  %v4774_v26 = vperm.slane %v4702_v63, %v9237_v56  ;;  %v4706_v54 = vmul.f32 %v9221_v45, %v4627_v8  ;;  %v4916_v8 = vsel %vm9860_vm0, %v9190_v31, -inf }
 0x711   : > { %v4705_v52 = vmul.f32 %v9221_v45, %v4624_v28  ;;  %v4813_v28 = vsel %vm4812_vm1, %v4769_v34, %v4766_v57  ;;  %v4776_v63 = vperm.slane %v4703_v17, %v9233_v9 }
 0x712   : > { %v4777_v61 = vperm.slane %v4704_v25, %v9237_v56  ;;  %v4775_v25 = vsel %vm4765_vm15, %v4774_v26, %v4773_v60 }
 0x713   : > { %v4779_v30 = vperm.slane %v4705_v52, %v9233_v9 }
 0x714   : > { %4911 = vmax.xlane.f32.xlu1 %v4910_v53  ;;  %4683 = vadd.xlane.f32.xlu2 %v4682_v2  ;;  %v9922_v53 = vmov 0.0   ;;  %v4772_v2 = vsel %vm4765_vm15, %v4771_v50, %v4770_v51  ;;  %v4778_v6 = vsel %vm4765_vm15, %v4777_v61, %v4776_v63 }
 0x715   : > { %4686 = vadd.xlane.f32.xlu0 %v4685_v27  ;;  %351 = vst.msk [vmem:[#allocation4] sm:$0x7] %vm350_vm2, %v9922_v53  ;;  %v4780_v27 = vperm.slane %v4706_v54, %v9237_v56  ;;  %v4815_v51 = vsel %vm4814_vm5, %v4772_v2, %v4813_v28  ;;  %v4922_v2 = vsel %vm9860_vm0, %v9200_v4, -inf }
 0x716   : > { %352 = vst.msk [vmem:[#allocation4 + $0x13] sm:$0x7] %vm350_vm2, %v9922_v53  ;;  %vm5033_vm2 = vcmask 335048  }
 0x717   : > { %v4630_v36 = vpop.xlane.xlu2 %4629  ;;  %v4636_v14 = vpop.xlane.xlu1 %4635  ;;  %354 = vst.msk [vmem:[#allocation4] sm:$0xff] %vm353_vm3, %v9922_v53  ;;  %v4781_v26 = vsel %vm4765_vm15, %v4780_v27, %v4779_v30  ;;  %v4925_v27 = vsel %vm9860_vm0, %v9210_v62, -inf }
 0x718   : > { %v4633_v44 = vpop.xlane.xlu0 %4632  ;;  %v4707_v59 = vmul.f32 %v9221_v45, %v4630_v36  ;;  %355 = vst.msk [vmem:[#allocation4 + $0x8] sm:$0xff] %vm353_vm3, %v9922_v53  ;;  %v4709_v34 = vmul.f32 %v9221_v45, %v4636_v14  ;;  %vm5053_vm3 = vcmask 359424  }
 0x719   : > { %v4708_v41 = vmul.f32 %v9221_v45, %v4633_v44  ;;  %359 = vst.msk [vmem:[#allocation4] sm:$0xff] %vm358_vm4, %v9922_v53 }
 0x71a   : > { %v4782_v15 = vperm.slane %v4707_v59, %v9233_v9  ;;  %360 = vst.msk [vmem:[#allocation4 + $0x8] sm:$0xff] %vm358_vm4, %v9922_v53  ;;  %v4928_v59 = vsel %vm9860_vm0, %v9225_v18, -inf  ;;  %vm356_vm4 = vcmask 21504  }
 0x71b   : > { %v4783_v50 = vperm.slane %v4708_v41, %v9237_v56  ;;  %364 = vst.msk [vmem:[#allocation4] sm:$0xff] %vm363_vm6, %v9922_v53  ;;  %v4785_v41 = vperm.slane %v4709_v34, %v9233_v9 }
 0x71c   : > { %4920 = vmax.xlane.f32.xlu1 %v4919_v19  ;;  %4914 = vmax.xlane.f32.xlu2 %v4913_v11  ;;  %v4817_v19 = vsel %vm4816_vm7, %v4775_v25, %v4815_v51  ;;  %365 = vst.msk [vmem:[#allocation4 + $0x8] sm:$0xff] %vm363_vm6, %v9922_v53  ;;  %vm361_vm6 = vcmask 357704  }
 0x71d   : > { %4917 = vmax.xlane.f32.xlu0 %v4916_v8  ;;  %v4819_v36 = vsel %vm4818_vm8, %v4778_v6, %v4817_v19  ;;  %v4784_v52 = vsel %vm4765_vm15, %v4783_v50, %v4782_v15  ;;  %357 = vst.msk [vmem:[#allocation4 + $0x10] sm:$0x3f] %vm356_vm4, %v9922_v53 }
 0x71e   : > { %v4821_v8 = vsel %vm4820_vm9, %v4781_v26, %v4819_v36  ;;  %v4931_v36 = vsel %vm9860_vm0, %v9230_v46, -inf  ;;  %vm366_vm0 = vcmask 201880   ;;  %362 = vst.msk [vmem:[#allocation4 + $0x10] sm:$0x3f] %vm361_vm6, %v9922_v53 }
 0x71f   : > { %v4639_v60 = vpop.xlane.xlu2 %4638  ;;  %v4645_v17 = vpop.xlane.xlu1 %4644  ;;  %v4823_v63 = vsel %vm4822_vm10, %v4784_v52, %v4821_v8  ;;  %367 = vst.msk [vmem:[#allocation4 + $0x10] sm:$0x3f] %vm366_vm0, %v9922_v53  ;;  %v5892_v53 = vld [vmem:[%s9820_s7 + $0x118] sm:$0xf] }
 0x720   : > { %v4710_v61 = vmul.f32 %v9221_v45, %v4639_v60  ;;  %v4712_v54 = vmul.f32 %v9221_v45, %v4645_v17  ;;  %v4642_v14 = vpop.xlane.xlu0 %4641 }
 0x721   : > { %v4711_v44 = vmul.f32 %v9221_v45, %v4642_v14 }
 0x722   : > { %v4786_v57 = vperm.slane %v4710_v61, %v9237_v56  ;;  %v4789_v11 = vperm.slane %v4712_v54, %v9237_v56 }
 0x723   : > { %v4788_v28 = vperm.slane %v4711_v44, %v9233_v9 }
 0x724   : > { %v4787_v25 = vsel %vm4765_vm15, %v4786_v57, %v4785_v41  ;;  %4929 = vmax.xlane.f32.xlu1 %v4928_v59  ;;  %4923 = vmax.xlane.f32.xlu2 %v4922_v2 }
 0x725   : > { %v4825_v30 = vsel %vm4824_vm11, %v4787_v25, %v4823_v63  ;;  %v4790_v6 = vsel %vm4765_vm15, %v4789_v11, %v4788_v28  ;;  %4926 = vmax.xlane.f32.xlu0 %v4925_v27 }
 0x726   : > { %4836 = vst.msk [vmem:[#allocation4 + $0x3] sm:$0xff] %vm4835_vm12, %v4825_v30 }
 0x727   : > { %v4648_v15 = vpop.xlane.xlu2 %4647  ;;  %v4654_v50 = vpop.xlane.xlu1 %4653 }
 0x728   : > { %v4713_v51 = vmul.f32 %v9221_v45, %v4648_v15  ;;  %v4651_v34 = vpop.xlane.xlu0 %4650  ;;  %v4715_v61 = vmul.f32 %v9221_v45, %v4654_v50 }
 0x729   : > { %v4714_v19 = vmul.f32 %v9221_v45, %v4651_v34 }
 0x72a   : > { %v4791_v60 = vperm.slane %v4713_v51, %v9233_v9  ;;  %v4794_v11 = vperm.slane %v4715_v61, %v9233_v9 }
 0x72b   : > { %v4792_v17 = vperm.slane %v4714_v19, %v9237_v56 }
 0x72c   : > { %4932 = vmax.xlane.f32.xlu2 %v4931_v36  ;;  %v5861_v36 = vld [vmem:[%s9820_s7 + $0x50] sm:$0xff] }
 0x72d   : > { %v4793_v26 = vsel %vm4765_vm15, %v4792_v17, %v4791_v60  ;;  %v5862_v60 = vld [vmem:[%s9820_s7 + $0x58] sm:$0xf] }
 0x72e   : > { %v4826_v54 = vsel %vm4812_vm1, %v4793_v26, %v4790_v6  ;;  %v5877_v17 = vld [vmem:[%s9820_s7 + $0xb8] sm:$0xf]  ;;  %5863 = vmatpush.msk.msrb.mxu1 %vm5060_vm13, %v5862_v60 }
 0x72f   : > { %v4657_v14 = vpop.xlane.xlu2 %4656  ;;  %v4663_v52 = vpop.xlane.xlu1 %4662  ;;  %5878 = vmatpush.msk.msrb.mxu3 %vm5060_vm13, %v5877_v17 }
 0x730   : > { %v4716_v44 = vmul.f32 %v9221_v45, %v4657_v14  ;;  %v4718_v59 = vmul.f32 %v9221_v45, %v4663_v52  ;;  %v4660_v41 = vpop.xlane.xlu0 %4659  ;;  %v5860_v52 = vld [vmem:[%s9820_s7 + $0x48] sm:$0xff]  ;;  %5075 = vmatpush.msrb.mxu1 %v5861_v36 }
 0x731   : > { %v4717_v57 = vmul.f32 %v9221_v45, %v4660_v41  ;;  %v5874_v41 = vld [vmem:[%s9820_s7 + $0xa0] sm:$0xff] }
 0x732   : > { %v4795_v8 = vperm.slane %v4716_v44, %v9237_v56  ;;  %v4798_v28 = vperm.slane %v4718_v59, %v9237_v56  ;;  %v5875_v44 = vld [vmem:[%s9820_s7 + $0xa8] sm:$0xff]  ;;  %v5859_v59 = vld [vmem:[%s9820_s7 + $0x40] sm:$0xff]  ;;  %5076 = vmatpush.msrb.mxu1 %v5860_v52 }
 0x733   : > { %v4797_v2 = vperm.slane %v4717_v57, %v9233_v9  ;;  %v5858_v57 = vld [vmem:[%s9820_s7 + $0x38] sm:$0xff] }
 0x734   : > { %v4796_v63 = vsel %vm4765_vm15, %v4795_v8, %v4794_v11  ;;  %v5873_v11 = vld [vmem:[%s9820_s7 + $0x98] sm:$0xff]  ;;  %5077 = vmatpush.msrb.mxu1 %v5859_v59  ;;  %v5857_v8 = vld [vmem:[%s9820_s7 + $0x30] sm:$0xff] }
 0x735   : > { %v4827_v25 = vsel %vm4814_vm5, %v4796_v63, %v4826_v54  ;;  %v4799_v27 = vsel %vm4765_vm15, %v4798_v28, %v4797_v2  ;;  %v5876_v54 = vld [vmem:[%s9820_s7 + $0xb0] sm:$0xff] }
 0x736   : > { %v9340_v30 = vsel %vm4816_vm7, %v4799_v27, %v4827_v25  ;;  %5125 = vmatpush.msrb.mxu3 %v5876_v54  ;;  %v5872_v28 = vld [vmem:[%s9820_s7 + $0x90] sm:$0xff]  ;;  %5078 = vmatpush.msrb.mxu1 %v5858_v57  ;;  %v9381_v25 = vadd.s32 4294967271, %v9219_v40  ;;  %v9384_v27 = vadd.s32 4294967263, %v9219_v40 }
 0x737   : > { %v4846_v6 = vpop.xlane.xlu1 %4845  ;;  %v4840_v15 = vpop.xlane.xlu2 %4839 }
 0x738   : > { %v4843_v50 = vpop.xlane.xlu0 %4842  ;;  %5126 = vmatpush.msrb.mxu3 %v5875_v44  ;;  %5079 = vmatpush.msrb.mxu1 %v5857_v8  ;;  %v4972_v36 = vperm.slane %v4846_v6, %v9381_v25  ;;  %v4967_v54 = vperm.slane %v4840_v15, %v9381_v25 }
 0x739   : > { %v4969_v52 = vperm.slane %v4843_v50, %v9384_v27 }
 0x73a   : > { %5127 = vmatpush.msrb.mxu3 %v5874_v41  ;;  %5893 = vmatpush.msk.msra.mxu1 %vm5060_vm13, %v5892_v53 }
 0x73b   : > { %v4971_v6 = vsel %vm4970_vm14, %v4969_v52, %v4967_v54 }
 0x73c   : > { %5128 = vmatpush.msrb.mxu3 %v5873_v11 }
 0x73e   : > { %5129 = vmatpush.msrb.mxu3 %v5872_v28 }
 0x73f   : > { %v4855_v51 = vpop.xlane.xlu1 %4854  ;;  %v4849_v34 = vpop.xlane.xlu2 %4848 }
 0x740   : > { %v4852_v19 = vpop.xlane.xlu0 %4851  ;;  %v4973_v17 = vperm.slane %v4849_v34, %v9384_v27  ;;  %v4976_v44 = vperm.slane %v4855_v51, %v9384_v27 }
 0x741   : > { %v4975_v59 = vperm.slane %v4852_v19, %v9381_v25 }
 0x742   : > { %v4974_v41 = vsel %vm4970_vm14, %v4973_v17, %v4972_v36 }
 0x743   : > { %v5017_v50 = vsel %vm4812_vm1, %v4974_v41, %v4971_v6  ;;  %v4977_v28 = vsel %vm4970_vm14, %v4976_v44, %v4975_v59 }
 0x744   : > { %v5018_v54 = vsel %vm4814_vm5, %v4977_v28, %v5017_v50 }
 0x747   : > { %v4864_v26 = vpop.xlane.xlu1 %4863  ;;  %v4858_v61 = vpop.xlane.xlu2 %4857 }
 0x748   : > { %v4861_v14 = vpop.xlane.xlu0 %4860  ;;  %v4978_v40 = vperm.slane %v4858_v61, %v9381_v25  ;;  %v4981_v51 = vperm.slane %v4864_v26, %v9381_v25 }
 0x749   : > { %v4979_v57 = vperm.slane %v4861_v14, %v9384_v27 }
 0x74b   : > { %v4980_v19 = vsel %vm4970_vm14, %v4979_v57, %v4978_v40 }
 0x74c   : > { %v5019_v52 = vsel %vm4816_vm7, %v4980_v19, %v5018_v54 }
 0x74f   : > { %v4873_v2 = vpop.xlane.xlu1 %4872  ;;  %v4867_v63 = vpop.xlane.xlu2 %4866 }
 0x750   : > { %v4870_v60 = vpop.xlane.xlu0 %4869  ;;  %v4982_v11 = vperm.slane %v4867_v63, %v9384_v27  ;;  %v4985_v17 = vperm.slane %v4873_v2, %v9384_v27 }
 0x751   : > { %v4984_v61 = vperm.slane %v4870_v60, %v9381_v25 }
 0x752   : > { %v4983_v14 = vsel %vm4970_vm14, %v4982_v11, %v4981_v51 }
 0x753   : > { %v5020_v44 = vsel %vm4818_vm8, %v4983_v14, %v5019_v52  ;;  %v4986_v26 = vsel %vm4970_vm14, %v4985_v17, %v4984_v61 }
 0x754   : > { %v5021_v11 = vsel %vm4820_vm9, %v4986_v26, %v5020_v44 }
 0x757   : > { %v4882_v34 = vpop.xlane.xlu1 %4881  ;;  %v4876_v8 = vpop.xlane.xlu2 %4875 }
 0x758   : > { %v4879_v15 = vpop.xlane.xlu0 %4878  ;;  %v4987_v63 = vperm.slane %v4876_v8, %v9381_v25  ;;  %v4990_v60 = vperm.slane %v4882_v34, %v9381_v25 }
 0x759   : > { %v4988_v36 = vperm.slane %v4879_v15, %v9384_v27 }
 0x75b   : > { %v4989_v59 = vsel %vm4970_vm14, %v4988_v36, %v4987_v63 }
 0x75c   : > { %v5022_v8 = vsel %vm4822_vm10, %v4989_v59, %v5021_v11 }
 0x75f   : > { %v4669_v41 = vpop.xlane.xlu1 %4668  ;;  %v4885_v2 = vpop.xlane.xlu2 %4884 }
 0x760   : > { %v4991_v40 = vperm.slane %v4885_v2, %v9384_v27  ;;  %v4666_v57 = vpop.xlane.xlu0 %4665  ;;  %v4720_v26 = vmul.f32 %v9221_v45, %v4669_v41  ;;  %v5891_v41 = vld [vmem:[%s9820_s7 + $0x110] sm:$0xff] }
 0x761   : > { %v4719_v59 = vmul.f32 %v9221_v45, %v4666_v57  ;;  %v5901_v57 = vld [vmem:[%s9820_s7 + $0x148] sm:$0xf]  ;;  %5175 = vmatpush.msra.mxu1 %v5891_v41 }
 0x762   : > { %v4992_v6 = vsel %vm4970_vm14, %v4991_v40, %v4990_v60  ;;  %5902 = vmatpush.msk.msra.mxu3 %vm5060_vm13, %v5901_v57 }
 0x763   : > { %v5023_v15 = vsel %vm4824_vm11, %v4992_v6, %v5022_v8  ;;  %v4801_v8 = vperm.slane %v4720_v26, %v9237_v56  ;;  %v4800_v6 = vperm.slane %v4719_v59, %v9233_v9 }
 0x764   : > { %5034 = vst.msk [vmem:[#allocation4 + $0x3] sm:$0xff] %vm5033_vm2, %v5023_v15 }
 0x765   : > { %v4802_v26 = vsel %vm4765_vm15, %v4801_v8, %v4800_v6 }
 0x766   : > { %v4829_v41 = vsel %vm4818_vm8, %v4802_v26, %v9340_v30 }
 0x767   : > { %v9418_v50 = vpop.xlane.xlu1 %4893  ;;  %v9420_v28 = vpop.xlane.xlu2 %4887 }
 0x768   : > { %v9422_v51 = vpop.xlane.xlu0 %4890 }
 0x76b   : > { %v5044_v34 = vld [vmem:[#allocation4 + $0x1] sm:$0xff] }
 0x76c   : > { %v5096_v19 = vld [vmem:[#allocation4 + $0x3] sm:$0xff]  ;;  %5864 = vmatmul.msk.f32.vlgmr.msrb.gmra.mxu1 %vm5053_vm3, %v5044_v34 }
 0x76d   : > { %5879 = vmatmul.msk.f32.vlgmr.msrb.gmra.mxu3 %vm5053_vm3, %v5096_v19 }
 0x76f   : > { %v4675_v17 = vpop.xlane.xlu1 %4674  ;;  %v9426_v61 = vpop.xlane.xlu2 %4896 }
 0x770   : > { %v4672_v14 = vpop.xlane.xlu0 %4671  ;;  %v4722_v60 = vmul.f32 %v9221_v45, %v4675_v17  ;;  %v5900_v17 = vld [vmem:[%s9820_s7 + $0x140] sm:$0xff]  ;;  %v4997_v26 = vperm.slane %v9426_v61, %v9384_v27 }
 0x771   : > { %v4721_v40 = vmul.f32 %v9221_v45, %v4672_v14  ;;  %5216 = vmatpush.msra.mxu3 %v5900_v17  ;;  %v5887_v17 = vld [vmem:[%s9820_s7 + $0xf0] sm:$0xff] }
 0x772   : > { %v4804_v34 = vperm.slane %v4722_v60, %v9237_v56 }
 0x773   : > { %v4803_v19 = vperm.slane %v4721_v40, %v9233_v9 }
 0x775   : > { %v4805_v53 = vsel %vm4765_vm15, %v4804_v34, %v4803_v19  ;;  %v5888_v34 = vld [vmem:[%s9820_s7 + $0xf8] sm:$0xff]  ;;  %v5897_v19 = vld [vmem:[%s9820_s7 + $0x128] sm:$0xff] }
 0x776   : > { %v4830_v6 = vsel %vm4820_vm9, %v4805_v53, %v4829_v41  ;;  %v4996_v53 = vperm.slane %v9418_v50, %v9381_v25  ;;  %v5870_v41 = vld [vmem:[%s9820_s7 + $0x80] sm:$0xff]  ;;  %v4994_v50 = vperm.slane %v9422_v51, %v9384_v27 }
 0x777   : > { %v4678_v63 = vpop.xlane.xlu1 %4677  ;;  %v9428_v36 = vpop.xlane.xlu2 %4899 }
 0x778   : > { %v9430_v54 = vpop.xlane.xlu0 %4902  ;;  %v4723_v15 = vmul.f32 %v9221_v45, %v4678_v63  ;;  %v5890_v63 = vld [vmem:[%s9820_s7 + $0x108] sm:$0xff] }
 0x779   : > { %5176 = vmatpush.msra.mxu1 %v5890_v63  ;;  %v5896_v63 = vld [vmem:[%s9820_s7 + $0x120] sm:$0xff]  ;;  %v5000_v61 = vperm.slane %v9430_v54, %v9384_v27 }
 0x77a   : > { %v4806_v59 = vperm.slane %v4723_v15, %v9233_v9  ;;  %v5889_v15 = vld [vmem:[%s9820_s7 + $0x100] sm:$0xff] }
 0x77b   : > { %5177 = vmatpush.msra.mxu1 %v5889_v15 }
 0x77d   : > { %5178 = vmatpush.msra.mxu1 %v5888_v34 }
 0x77f   : > { %v9434_v52 = vpop.xlane.xlu1 %4908  ;;  %v4681_v44 = vpop.xlane.xlu2 %4680  ;;  %5179 = vmatpush.msra.mxu1 %v5887_v17 }
 0x780   : > { %v9439_v2 = vpop.xlane.xlu0 %4905  ;;  %v4724_v11 = vmul.f32 %v9221_v45, %v4681_v44 }
 0x781   : > { %v5002_v54 = vperm.slane %v9439_v2, %v9381_v25 }
 0x782   : > { %v4807_v14 = vperm.slane %v4724_v11, %v9237_v56 }
 0x784   : > { %v4808_v11 = vsel %vm4765_vm15, %v4807_v14, %v4806_v59  ;;  %v5043_v59 = vld [vmem:[%s9820_s7 + $0x28] sm:$0xf] }
 0x785   : > { %5905 = vmatpush.msk.msrb.mxu1 %vm5060_vm13, %v5043_v59 }
 0x787   : > { %v4684_v44 = vpop.xlane.xlu2 %4683  ;;  %v4912_v57 = vpop.xlane.xlu1 %4911 }
 0x788   : > { %v4725_v60 = vmul.f32 %v9221_v45, %v4684_v44  ;;  %v4687_v40 = vpop.xlane.xlu0 %4686 }
 0x789   : > { %v4726_v37 = vmul.f32 %v9221_v45, %v4687_v40  ;;  %v5899_v45 = vld [vmem:[%s9820_s7 + $0x138] sm:$0xff]  ;;  %v5871_v40 = vld [vmem:[%s9820_s7 + $0x88] sm:$0xf] }
 0x78a   : > { %v4809_v18 = vperm.slane %v4725_v60, %v9233_v9  ;;  %v4831_v9 = vsel %vm4822_vm10, %v4808_v11, %v4830_v6  ;;  %5217 = vmatpush.msra.mxu3 %v5899_v45  ;;  %v5042_v60 = vld [vmem:[%s9820_s7 + $0x20] sm:$0xff]  ;;  %v4999_v11 = vperm.slane %v9428_v36, %v9381_v25  ;;  %v5003_v36 = vperm.slane %v9434_v52, %v9384_v27  ;;  %v5041_v6 = vld [vmem:[%s9820_s7 + $0x18] sm:$0xff] }
 0x78b   : > { %v4810_v8 = vperm.slane %v4726_v37, %v9237_v56  ;;  %v5898_v37 = vld [vmem:[%s9820_s7 + $0x130] sm:$0xff]  ;;  %5248 = vmatpush.msrb.mxu1 %v5042_v60 }
 0x78c   : > { %5218 = vmatpush.msra.mxu3 %v5898_v37  ;;  %v5001_v51 = vsel %vm4970_vm14, %v5000_v61, %v4999_v11  ;;  %v5004_v2 = vsel %vm4970_vm14, %v5003_v36, %v5002_v54  ;;  %v5868_v60 = vld [vmem:[%s9820_s7 + $0x70] sm:$0xff]  ;;  %v5867_v11 = vld [vmem:[%s9820_s7 + $0x68] sm:$0xff]  ;;  %v5038_v61 = vld [vmem:[%s9820_s7] sm:$0xff] }
 0x78d   : > { %v4811_v30 = vsel %vm4765_vm15, %v4810_v8, %v4809_v18  ;;  %v4993_v8 = vperm.slane %v9420_v28, %v9381_v25  ;;  %v4998_v28 = vsel %vm4970_vm14, %v4997_v26, %v4996_v53  ;;  %5249 = vmatpush.msrb.mxu1 %v5041_v6  ;;  %v5866_v54 = vld [vmem:[%s9820_s7 + $0x60] sm:$0xff] }
 0x78e   : > { %v4832_v56 = vsel %vm4824_vm11, %v4811_v30, %v4831_v9  ;;  %5219 = vmatpush.msra.mxu3 %v5897_v19  ;;  %v5005_v9 = vperm.slane %v4912_v57, %v9381_v25  ;;  %v5040_v57 = vld [vmem:[%s9820_s7 + $0x10] sm:$0xff] }
 0x78f   : > { %v4915_v14 = vpop.xlane.xlu2 %4914  ;;  %4837 = vst.msk [vmem:[#allocation4 + $0xb] sm:$0xff] %vm4835_vm12, %v4832_v56  ;;  %v4921_v44 = vpop.xlane.xlu1 %4920  ;;  %v4995_v52 = vsel %vm4970_vm14, %v4994_v50, %v4993_v8  ;;  %5250 = vmatpush.msrb.mxu1 %v5040_v57 }
 0x790   : > { %v4918_v18 = vpop.xlane.xlu0 %4917  ;;  %5220 = vmatpush.msra.mxu3 %v5896_v63  ;;  %v5006_v15 = vperm.slane %v4915_v14, %v9384_v27  ;;  %v5009_v30 = vperm.slane %v4921_v44, %v9384_v27  ;;  %v5024_v56 = vsel %vm4812_vm1, %v4998_v28, %v4995_v52  ;;  %v5869_v44 = vld [vmem:[%s9820_s7 + $0x78] sm:$0xff]  ;;  %v5885_v52 = vld [vmem:[%s9820_s7 + $0xe0] sm:$0xff] }
 0x791   : > { %v5008_v37 = vperm.slane %v4918_v18, %v9381_v25  ;;  %v5025_v63 = vsel %vm4814_vm5, %v5001_v51, %v5024_v56  ;;  %v5039_v18 = vld [vmem:[%s9820_s7 + $0x8] sm:$0xff] }
 0x792   : > { %5908 = vmatpush.msk.msrb.mxu3 %vm5060_vm13, %v5871_v40  ;;  %v5007_v19 = vsel %vm4970_vm14, %v5006_v15, %v5005_v9  ;;  %v5026_v26 = vsel %vm4816_vm7, %v5004_v2, %v5025_v63  ;;  %5251 = vmatpush.msrb.mxu1 %v5039_v18  ;;  %v5884_v2 = vld [vmem:[%s9820_s7 + $0xd8] sm:$0xff] }
 0x793   : > { %v5027_v40 = vsel %vm4818_vm8, %v5007_v19, %v5026_v26  ;;  %v5010_v53 = vsel %vm4970_vm14, %v5009_v30, %v5008_v37  ;;  %v5883_v30 = vld [vmem:[%s9820_s7 + $0xd0] sm:$0xff]  ;;  %v5882_v37 = vld [vmem:[%s9820_s7 + $0xc8] sm:$0xff] }
 0x794   : > { %5280 = vmatpush.msrb.mxu3 %v5870_v41  ;;  %v5028_v6 = vsel %vm4820_vm9, %v5010_v53, %v5027_v40  ;;  %5252 = vmatpush.msrb.mxu1 %v5038_v61  ;;  %v5087_v63 = vld [vmem:[#allocation4 + $0x2] sm:$0xff] }
 0x796   : > { %5281 = vmatpush.msrb.mxu3 %v5869_v44 }
 0x797   : > { %v4924_v45 = vpop.xlane.xlu2 %4923  ;;  %v4930_v59 = vpop.xlane.xlu1 %4929 }
 0x798   : > { %v4927_v34 = vpop.xlane.xlu0 %4926  ;;  %v5011_v17 = vperm.slane %v4924_v45, %v9381_v25  ;;  %5282 = vmatpush.msrb.mxu3 %v5868_v60  ;;  %v5014_v50 = vperm.slane %v4930_v59, %v9381_v25 }
 0x799   : > { %v5012_v14 = vperm.slane %v4927_v34, %v9384_v27 }
 0x79a   : > { %5283 = vmatpush.msrb.mxu3 %v5867_v11 }
 0x79b   : > { %v5013_v41 = vsel %vm4970_vm14, %v5012_v14, %v5011_v17  ;;  %v5881_v17 = vld [vmem:[%s9820_s7 + $0xc0] sm:$0xff]  ;;  %v5036_v14 = vld [vmem:[#allocation4] sm:$0xff] }
 0x79c   : > { %v5029_v15 = vsel %vm4822_vm10, %v5013_v41, %v5028_v6  ;;  %5284 = vmatpush.msrb.mxu3 %v5866_v54 }
 0x79f   : > { %v4933_v8 = vpop.xlane.xlu2 %4932 }
 0x7a0   : > { %v5015_v36 = vperm.slane %v4933_v8, %v9384_v27  ;;  %v5886_v27 = vld [vmem:[%s9820_s7 + $0xe8] sm:$0xf] }
 0x7a2   : > { %v5016_v45 = vsel %vm4970_vm14, %v5015_v36, %v5014_v50 }
 0x7a3   : > { %v5030_v28 = vsel %vm4824_vm11, %v5016_v45, %v5029_v15  ;;  %vm9925_vm11 = vcmask 261120  }
 0x7a4   : > { %5035 = vst.msk [vmem:[#allocation4 + $0xb] sm:$0xff] %vm5033_vm2, %v5030_v28  ;;  %vm9927_vm12 = vmmov %vm9925_vm11 }
 0x7a5   : > { %vm9932_vm14 = vmmov %vm9925_vm11 }
 0x7a6   : > { %vm9933_vm2 = vmmov %vm9925_vm11 }
 0x7a7   : > { %vm9937_vm4 = vmmov %vm9933_vm2 }
 0x7a8   : > { %vm9941_vm6 = vmmov %vm9933_vm2 }
 0x7ab   : > { %v5045_v25 = vld [vmem:[#allocation4 + $0x9] sm:$0xff] }
 0x7ac   : > { %v5097_v34 = vld [vmem:[#allocation4 + $0xb] sm:$0xff]  ;;  %5865 = vmatmul.msk.f32.gmra.mxu1 %vm5053_vm3, %v5045_v25 }
 0x7ad   : > { %5880 = vmatmul.msk.f32.gmra.mxu3 %vm5053_vm3, %v5097_v34  ;;  %v5146_v51 = vld [vmem:[#allocation4 + $0x5] sm:$0xff]  ;;  %v5147_v56 = vld [vmem:[#allocation4 + $0xd] sm:$0xff] }
 0x7ae   : > { %v5187_v9 = vld [vmem:[#allocation4 + $0x6] sm:$0xff]  ;;  %v5188_v19 = vld [vmem:[#allocation4 + $0xe] sm:$0xff] }
 0x7af   : > { %v5037_v57 = vld [vmem:[#allocation4 + $0x8] sm:$0xff] }
 0x7b0   : > { %v5088_v44 = vld [vmem:[#allocation4 + $0xa] sm:$0xff] }
 0x7b1   : > { %v5137_v18 = vld [vmem:[#allocation4 + $0x4] sm:$0xff]  ;;  %v5138_v26 = vld [vmem:[#allocation4 + $0xc] sm:$0xff] }
 0x7b4   : > { %5894 = vmatmul.msk.f32.vlgmr.msra.gmra.mxu1 %vm5053_vm3, %v5146_v51 }
 0x7b5   : > { %5903 = vmatmul.msk.f32.vlgmr.msra.gmra.mxu3 %vm5053_vm3, %v5187_v9  ;;  %5911 = vmatpush.msk.msra.mxu1 %vm5060_vm13, %v5886_v27  ;;  %vm9929_vm13 = vmmov %vm9925_vm11 }
 0x7b7   : > { %5314 = vmatpush.msra.mxu1 %v5885_v52 }
 0x7b9   : > { %5315 = vmatpush.msra.mxu1 %v5884_v2 }
 0x7bb   : > { %5316 = vmatpush.msra.mxu1 %v5883_v30 }
 0x7bc   : > { %5895 = vmatmul.msk.f32.gmra.mxu1 %vm5053_vm3, %v5147_v56 }
 0x7bd   : > { %5904 = vmatmul.msk.f32.gmra.mxu3 %vm5053_vm3, %v5188_v19  ;;  %5317 = vmatpush.msra.mxu1 %v5882_v37  ;;  %v9923_v19 = vlaneseq }
 0x7bf   : > { %5318 = vmatpush.msra.mxu1 %v5881_v17  ;;  %v9613_v17 = vshrl.u32 %v9923_v19, 7 }
 0x7c1   : > { %5992 = vset.pattern.permute.xlu2 %v9613_v17  ;;  %5990 = vset.pattern.permute.xlu0 %v9613_v17 }
 0x7c4   : > { %5906 = vmatmul.msk.f32.vlgmr.msrb.gmra.mxu1 %vm5053_vm3, %v5036_v14 }
 0x7c5   : > { %5909 = vmatmul.msk.f32.vlgmr.msrb.gmra.mxu3 %vm5053_vm3, %v5087_v63  ;;  %v9618_v63 = vadd.s32 8, %v9613_v17 }
 0x7c7   : > { %5991 = vset.pattern.permute.xlu1 %v9618_v63 }
 0x7cc   : > { %5907 = vmatmul.msk.f32.gmra.mxu1 %vm5053_vm3, %v5037_v57 }
 0x7cd   : > { %5910 = vmatmul.msk.f32.gmra.mxu3 %vm5053_vm3, %v5088_v44 }
 0x7d4   : > { %5912 = vmatmul.msk.f32.vlgmr.msra.gmra.mxu1 %vm5053_vm3, %v5137_v18 }
 0x7dc   : > { %5913 = vmatmul.msk.f32.gmra.mxu1 %vm5053_vm3, %v5138_v26  ;;  %vm9936_vm3 = vmmov %vm9933_vm2 }
 0x7e9   : > { %v5081_v59 = vpop.f32.mrf.mxu1 }
 0x7f0   : > { %v5131_v60 = vpop.f32.mrf.mxu3 }
 0x829   : > { %v5084_v40 = vpop.f32.mrf.mxu1 }
 0x830   : > { %v5134_v53 = vpop.f32.mrf.mxu3 }
 0x831   : > { %v5181_v11 = vpop.f32.mrf.mxu1 }
 0x838   : > { %v5222_v61 = vpop.f32.mrf.mxu3 }
 0x839   : > { %v5184_v41 = vpop.f32.mrf.mxu1 }
 0x840   : > { %v5225_v8 = vpop.f32.mrf.mxu3 }
 0x841   : > { %v5254_v50 = vpop.f32.mrf.mxu1 }
 0x842   : > { %v5255_v34 = vadd.f32 %v5254_v50, %v5081_v59 }
 0x848   : > { %v5286_v36 = vpop.f32.mrf.mxu3 }
 0x849   : > { %v5257_v54 = vpop.f32.mrf.mxu1  ;;  %v5287_v15 = vadd.f32 %v5286_v36, %v5131_v60 }
 0x84a   : > { %v5258_v45 = vadd.f32 %v5257_v54, %v5084_v40 }
 0x84b   : > { %v5292_v9 = vadd.f32 %v5287_v15, %v5255_v34 }
 0x850   : > { %v5289_v6 = vpop.f32.mrf.mxu3 }
 0x851   : > { %v5290_v28 = vadd.f32 %v5289_v6, %v5134_v53  ;;  %v5320_v25 = vpop.f32.mrf.mxu1 }
 0x852   : > { %v5321_v51 = vadd.f32 %v5320_v25, %v5181_v11 }
 0x853   : > { %v5293_v27 = vadd.f32 %v5290_v28, %v5258_v45 }
 0x854   : > { %v5326_v52 = vadd.f32 %v5321_v51, %v5222_v61 }
 0x856   : > { %v5328_v2 = vadd.f32 %v5326_v52, %v5292_v9 }
 0x858   : > { %v5914_v30 = vmul.f32 -1.442695, %v5328_v2 }
 0x859   : > { %v5323_v37 = vpop.f32.mrf.mxu1 }
 0x85a   : > { %6018 = vpow2.f32 %v5914_v30  ;;  %v5324_v56 = vadd.f32 %v5323_v37, %v5184_v41 }
 0x85c   : > { %v5327_v14 = vadd.f32 %v5324_v56, %v5225_v8 }
 0x85e   : > { %v5329_v57 = vadd.f32 %v5327_v14, %v5293_v27 }
 0x860   : > { %v6019_v44 = vpop.eup %6018  ;;  %v5915_v6 = vmul.f32 -1.442695, %v5329_v57 }
 0x861   : > { %v5336_v18 = vadd.f32 1.0, %v6019_v44 }
 0x863   : > { %6020 = vrcp.f32 %v5336_v18  ;;  %v5349_v40 = vand.u32 2147483648, %v5336_v18  ;;  %v5347_v11 = vand.u32 2147483647, %v5336_v18  ;;  %vm5343_vm15 = vweird.f32 %v5336_v18 }
 0x864   : > { %6022 = vpow2.f32 %v5915_v6  ;;  %v9926_v6 = vld [vmem:[#allocation10_spill] sm:$0xff] }
 0x865   : > { %v5350_v41 = vor.u32 1.1754944e-38, %v5349_v40  ;;  %vm5348_vm5 = vcmp.eq.f32.partialorder %v5347_v11, 8.507059e+37 }
 0x869   : > { %v6021_v26 = vpop.eup %6020 }
 0x86a   : > { %v5339_v59 = vmul.f32 %v6021_v26, %v5336_v18  ;;  %vm5344_vm0 = vweird.f32 %v6021_v26  ;;  %v6023_v45 = vpop.eup %6022 }
 0x86b   : > { %vm5345_vm1 = vmor %vm5343_vm15, %vm5344_vm0  ;;  %v5337_v28 = vadd.f32 1.0, %v6023_v45 }
 0x86c   : > { %v5340_v60 = vsub.f32 1.0, %v5339_v59  ;;  %vm9942_vm0 = vmmov %vm9933_vm2 }
 0x86d   : > { %6024 = vrcp.f32 %v5337_v28  ;;  %v5364_v37 = vand.u32 2147483648, %v5337_v28  ;;  %vm5358_vm8 = vweird.f32 %v5337_v28  ;;  %v5362_v19 = vand.u32 2147483647, %v5337_v28  ;;  %vm9943_vm15 = vmmov %vm9942_vm0 }
 0x86e   : > { %v5341_v53 = vmul.f32 %v6021_v26, %v5340_v60 }
 0x86f   : > { %v5365_v57 = vor.u32 1.1754944e-38, %v5364_v37  ;;  %vm5363_vm10 = vcmp.eq.f32.partialorder %v5362_v19, 8.507059e+37 }
 0x870   : > { %v5342_v61 = vadd.f32 %v6021_v26, %v5341_v53 }
 0x872   : > { %v5346_v8 = vsel %vm5345_vm1, %v6021_v26, %v5342_v61  ;;  %vm9947_vm1 = vmmov %vm9942_vm0 }
 0x873   : > { %v5351_v50 = vsel %vm5348_vm5, %v5350_v41, %v5346_v8  ;;  %v6025_v34 = vpop.eup %6024  ;;  %v9924_v41 = vld [vmem:[#allocation12_spill] sm:$0xff]  ;;  %vm9948_vm5 = vmmov %vm9942_vm0 }
 0x874   : > { %v5381_v36 = vperm.slane %v5351_v50, 1  ;;  %v5368_v54 = vperm.slane %v5351_v50, 0  ;;  %v5394_v15 = vperm.slane %v5351_v50, 2  ;;  %v5407_v25 = vperm.slane %v5351_v50, 3 }
 0x875   : > { %v5354_v27 = vmul.f32 %v6025_v34, %v5337_v28  ;;  %v5420_v9 = vperm.slane %v5351_v50, 4  ;;  %v5446_v52 = vperm.slane %v5351_v50, 6  ;;  %vm5359_vm7 = vweird.f32 %v6025_v34 }
 0x876   : > { %5386 = vperm.xlu2 %5992, %v5381_v36   ;;  %5379 = vperm.xlu1 %5991, %v5368_v54   ;;  %v5433_v56 = vperm.slane %v5351_v50, 5  ;;  %vm5360_vm9 = vmor %vm5358_vm8, %vm5359_vm7  ;;  %v5459_v26 = vperm.slane %v5351_v50, 7 }
 0x877   : > { %5373 = vperm.xlu0 %5990, %v5368_v54   ;;  %v5355_v51 = vsub.f32 1.0, %v5354_v27  ;;  %vm9949_vm7 = vmmov %vm9942_vm0 }
 0x878   : > { %vm9952_vm8 = vmmov %vm9942_vm0 }
 0x879   : > { %v5356_v2 = vmul.f32 %v6025_v34, %v5355_v51 }
 0x87b   : > { %v5357_v30 = vadd.f32 %v6025_v34, %v5356_v2 }
 0x87d   : > { %v5361_v14 = vsel %vm5360_vm9, %v6025_v34, %v5357_v30  ;;  %v9928_v34 = vld [vmem:[#allocation14_spill] sm:$0xff]  ;;  %v9930_v30 = vld [vmem:[#allocation9_spill] sm:$0xff]  ;;  %vm9953_vm9 = vmmov %vm9942_vm0 }
 0x87e   : > { %5399 = vperm.xlu2 %5992, %v5394_v15   ;;  %5392 = vperm.xlu1 %5991, %v5381_v36   ;;  %v9626_v44 = vsel %vm5363_vm10, %v5365_v57, %v5361_v14  ;;  %vm9955_vm10 = vmmov %vm9942_vm0 }
 0x87f   : > { %5993 = vset.pattern.permute.xlu0 %v9618_v63  ;;  %v5472_v18 = vperm.slane %v9626_v44, 0  ;;  %v5511_v59 = vperm.slane %v9626_v44, 3  ;;  %v5485_v60 = vperm.slane %v9626_v44, 1  ;;  %v5537_v40 = vperm.slane %v9626_v44, 5 }
 0x880   : > { %v5498_v53 = vperm.slane %v9626_v44, 2 }
 0x886   : > { %5412 = vperm.xlu2 %5992, %v5407_v25   ;;  %5405 = vperm.xlu1 %5991, %v5394_v15  }
 0x887   : > { %5418 = vperm.xlu0 %5993, %v5407_v25  }
 0x88e   : > { %5995 = vset.pattern.permute.xlu2 %v9618_v63  ;;  %5994 = vset.pattern.permute.xlu1 %v9613_v17 }
 0x88f   : > { %5996 = vset.pattern.permute.xlu0 %v9613_v17 }
 0x896   : > { %5431 = vperm.xlu2 %5995, %v5420_v9   ;;  %5425 = vperm.xlu1 %5994, %v5420_v9  }
 0x897   : > { %5451 = vperm.xlu0 %5996, %v5446_v52  }
 0x89e   : > { %5444 = vperm.xlu2 %5995, %v5433_v56   ;;  %5438 = vperm.xlu1 %5994, %v5433_v56   ;;  %v9931_v56 = vld [vmem:[#allocation8_spill] sm:$0xff] }
 0x89f   : > { %5999 = vset.pattern.permute.xlu0 %v9618_v63 }
 0x8a6   : > { %5998 = vset.pattern.permute.xlu2 %v9613_v17  ;;  %5997 = vset.pattern.permute.xlu1 %v9618_v63 }
 0x8a7   : > { %5483 = vperm.xlu0 %5999, %v5472_v18  }
 0x8ae   : > { %5464 = vperm.xlu2 %5998, %v5459_v26   ;;  %5457 = vperm.xlu1 %5997, %v5446_v52  }
 0x8af   : > { %6002 = vset.pattern.permute.xlu0 %v9613_v17 }
 0x8b6   : > { %5470 = vperm.xlu1 %5997, %v5459_v26   ;;  %5477 = vperm.xlu2 %5998, %v5472_v18   ;;  %v9934_v26 = vld [vmem:[#allocation17_spill] sm:$0xff] }
 0x8b7   : > { %5516 = vperm.xlu0 %6002, %v5511_v59  }
 0x8be   : > { %6000 = vset.pattern.permute.xlu1 %v9613_v17  ;;  %6001 = vset.pattern.permute.xlu2 %v9618_v63 }
 0x8bf   : > { %6005 = vset.pattern.permute.xlu0 %v9618_v63 }
 0x8c6   : > { %5490 = vperm.xlu1 %6000, %v5485_v60   ;;  %5496 = vperm.xlu2 %6001, %v5485_v60   ;;  %v9935_v60 = vld [vmem:[#allocation13_spill] sm:$0xff] }
 0x8c7   : > { %5548 = vperm.xlu0 %6005, %v5537_v40  }
 0x8ce   : > { %5503 = vperm.xlu1 %6000, %v5498_v53   ;;  %5509 = vperm.xlu2 %6001, %v5498_v53   ;;  %v5550_v53 = vperm.slane %v9626_v44, 6 }
 0x8d0   : > { %v5387_v11 = vpop.permute.xlu2 %5386 }
 0x8d1   : > { %v5578_v61 = vmul.f32 %v5387_v11, %v8992_v47  ;;  %v5524_v47 = vperm.slane %v9626_v44, 4 }
 0x8d3   : > { %v5610_v8 = vadd.f32 %v5578_v61, %v9924_v41 }
 0x8d5   : > { %v5642_v50 = vmax.f32 %v5610_v8, 0.0 }
 0x8d6   : > { %6003 = vset.pattern.permute.xlu1 %v9618_v63  ;;  %6004 = vset.pattern.permute.xlu2 %v9613_v17 }
 0x8d7   : > { %5674 = vst.msk [vmem:[%s9646_s17 + $0x10] sm:$0xff] %vm9925_vm11, %v5642_v50  ;;  %v9938_v50 = vld [vmem:[#allocation19_spill] sm:$0xff]  ;;  %vm9958_vm11 = vmmov %vm9942_vm0 }
 0x8d8   : > { %v5400_v36 = vpop.permute.xlu2 %5399 }
 0x8d9   : > { %v5580_v54 = vmul.f32 %v5400_v36, %v9018_v48 }
 0x8db   : > { %v5612_v15 = vadd.f32 %v5580_v54, %v9926_v6  ;;  %v9939_v54 = vld [vmem:[#allocation11_spill] sm:$0xff] }
 0x8dd   : > { %v5644_v45 = vmax.f32 %v5612_v15, 0.0  ;;  %v9940_v15 = vld [vmem:[#allocation15_spill] sm:$0xff] }
 0x8de   : > { %5522 = vperm.xlu1 %6003, %v5511_v59   ;;  %5529 = vperm.xlu2 %6004, %v5524_v47  }
 0x8df   : > { %5676 = vst.msk [vmem:[%s9646_s17 + $0x20] sm:$0xff] %vm9927_vm12, %v5644_v45  ;;  %v5563_v45 = vperm.slane %v9626_v44, 7  ;;  %vm9959_vm12 = vmmov %vm9942_vm0 }
 0x8e0   : > { %v5413_v28 = vpop.permute.xlu2 %5412 }
 0x8e1   : > { %v5582_v25 = vmul.f32 %v5413_v28, %v9028_v43 }
 0x8e3   : > { %v5614_v27 = vadd.f32 %v5582_v25, %v9928_v34 }
 0x8e5   : > { %v5646_v51 = vmax.f32 %v5614_v27, 0.0 }
 0x8e6   : > { %5535 = vperm.xlu1 %6003, %v5524_v47   ;;  %5542 = vperm.xlu2 %6004, %v5537_v40  }
 0x8e7   : > { %5678 = vst.msk [vmem:[%s9646_s17 + $0x30] sm:$0xff] %vm9929_vm13, %v5646_v51  ;;  %vm9963_vm13 = vmmov %vm9942_vm0 }
 0x8e8   : > { %v5380_v48 = vpop.permute.xlu1 %5379 }
 0x8e9   : > { %v5577_v9 = vmul.f32 %v5380_v48, %v8996_v58  ;;  %v5374_v52 = vpop.permute.xlu0 %5373  ;;  %v9944_v48 = vld [vmem:[#allocation22_spill] sm:$0xff] }
 0x8ea   : > { %v5576_v2 = vmul.f32 %v5374_v52, %v9000_v5  ;;  %v9945_v52 = vld [vmem:[#allocation16_spill] sm:$0xff] }
 0x8eb   : > { %v5609_v37 = vadd.f32 %v5577_v9, %v9930_v30  ;;  %v9946_v30 = vld [vmem:[#allocation20_spill] sm:$0xff] }
 0x8ec   : > { %v5608_v19 = vadd.f32 %v5576_v2, %v9931_v56 }
 0x8ed   : > { %v5641_v43 = vmax.f32 %v5609_v37, 0.0 }
 0x8ee   : > { %v5640_v14 = vmax.f32 %v5608_v19, 0.0  ;;  %6006 = vset.pattern.permute.xlu1 %v9613_v17  ;;  %6007 = vset.pattern.permute.xlu2 %v9618_v63 }
 0x8ef   : > { %5673 = vst.msk [vmem:[%s9646_s17 + $0x8] sm:$0xff] %vm9932_vm14, %v5641_v43  ;;  %vm9964_vm14 = vmmov %vm9942_vm0 }
 0x8f0   : > { %5672 = vst.msk [vmem:[%s9646_s17] sm:$0xff] %vm9933_vm2, %v5640_v14  ;;  %v5432_v58 = vpop.permute.xlu2 %5431  ;;  %v5393_v57 = vpop.permute.xlu1 %5392  ;;  %vm9965_vm2 = vmmov %vm9942_vm0 }
 0x8f1   : > { %v5585_v5 = vmul.f32 %v5432_v58, %v9046_v33  ;;  %v5579_v18 = vmul.f32 %v5393_v57, %v9010_v38  ;;  %v9950_v58 = vld [vmem:[#allocation18_spill] sm:$0xff] }
 0x8f3   : > { %v5617_v59 = vadd.f32 %v5585_v5, %v9934_v26  ;;  %v5611_v40 = vadd.f32 %v5579_v18, %v9935_v60  ;;  %v9951_v5 = vld [vmem:[#allocation24_spill] sm:$0xff] }
 0x8f5   : > { %v5649_v17 = vmax.f32 %v5617_v59, 0.0  ;;  %v5643_v11 = vmax.f32 %v5611_v40, 0.0 }
 0x8f6   : > { %5555 = vperm.xlu1 %6006, %v5550_v53   ;;  %5561 = vperm.xlu2 %6007, %v5550_v53   ;;  %v9954_v53 = vld [vmem:[#allocation25_spill] sm:$0xff] }
 0x8f7   : > { %5681 = vst.msk [vmem:[%s9646_s17 + $0x48] sm:$0xff] %vm9936_vm3, %v5649_v17  ;;  %vm9969_vm3 = vmmov %vm9942_vm0 }
 0x8f8   : > { %5675 = vst.msk [vmem:[%s9646_s17 + $0x18] sm:$0xff] %vm9937_vm4, %v5643_v11  ;;  %v5445_v63 = vpop.permute.xlu2 %5444  ;;  %v5406_v33 = vpop.permute.xlu1 %5405  ;;  %vm9970_vm4 = vmmov %vm9942_vm0 }
 0x8f9   : > { %v5587_v38 = vmul.f32 %v5445_v63, %v9050_v13  ;;  %v5581_v61 = vmul.f32 %v5406_v33, %v9014_v23  ;;  %v5419_v41 = vpop.permute.xlu0 %5418 }
 0x8fa   : > { %v5583_v8 = vmul.f32 %v5419_v41, %v9036_v0  ;;  %v9957_v41 = vld [vmem:[#allocation27_spill] sm:$0xff] }
 0x8fb   : > { %v5619_v36 = vadd.f32 %v5587_v38, %v9938_v50  ;;  %v5613_v6 = vadd.f32 %v5581_v61, %v9939_v54  ;;  %v9956_v38 = vld [vmem:[#allocation21_spill] sm:$0xff] }
 0x8fc   : > { %v5615_v47 = vadd.f32 %v5583_v8, %v9940_v15 }
 0x8fd   : > { %v5651_v28 = vmax.f32 %v5619_v36, 0.0  ;;  %v5645_v25 = vmax.f32 %v5613_v6, 0.0 }
 0x8fe   : > { %v5647_v34 = vmax.f32 %v5615_v47, 0.0  ;;  %5568 = vperm.xlu1 %6006, %v5563_v45   ;;  %5574 = vperm.xlu2 %6007, %v5563_v45   ;;  %v9960_v47 = vld [vmem:[#allocation23_spill] sm:$0xff] }
 0x8ff   : > { %5683 = vst.msk [vmem:[%s9646_s17 + $0x58] sm:$0xff] %vm9941_vm6, %v5651_v28  ;;  %v9961_v28 = vld [vmem:[#allocation29_spill] sm:$0xff]  ;;  %vm9971_vm6 = vmmov %vm9942_vm0 }
 0x900   : > { %5677 = vst.msk [vmem:[%s9646_s17 + $0x28] sm:$0xff] %vm9942_vm0, %v5645_v25 }
 0x901   : > { %5679 = vst.msk [vmem:[%s9646_s17 + $0x38] sm:$0xff] %vm9943_vm15, %v5647_v34  ;;  %v9962_v34 = vld [vmem:[#allocation30_spill] sm:$0xff]  ;;  %vm9974_vm15 = vmmov %vm9942_vm0 }
 0x908   : > { %v5465_v23 = vpop.permute.xlu2 %5464  ;;  %v5426_v0 = vpop.permute.xlu1 %5425 }
 0x909   : > { %v5590_v13 = vmul.f32 %v5465_v23, %v9068_v35  ;;  %v5584_v44 = vmul.f32 %v5426_v0, %v9032_v42  ;;  %v5452_v27 = vpop.permute.xlu0 %5451 }
 0x90a   : > { %v5588_v51 = vmul.f32 %v5452_v27, %v9064_v39 }
 0x90b   : > { %v5622_v9 = vadd.f32 %v5590_v13, %v9944_v48  ;;  %v5616_v2 = vadd.f32 %v5584_v44, %v9945_v52 }
 0x90c   : > { %v5620_v37 = vadd.f32 %v5588_v51, %v9946_v30 }
 0x90d   : > { %v5654_v56 = vmax.f32 %v5622_v9, 0.0  ;;  %v5648_v19 = vmax.f32 %v5616_v2, 0.0  ;;  %v9966_v9 = vld [vmem:[#allocation26_spill] sm:$0xff]  ;;  %v9967_v2 = vld [vmem:[#allocation32_spill] sm:$0xff] }
 0x90e   : > { %v5652_v43 = vmax.f32 %v5620_v37, 0.0  ;;  %v9968_v37 = vld [vmem:[#allocation35_spill] sm:$0xff] }
 0x90f   : > { %5686 = vst.msk [vmem:[%s9646_s17 + $0x70] sm:$0xff] %vm9947_vm1, %v5654_v56  ;;  %vm9977_vm1 = vmmov %vm9942_vm0 }
 0x910   : > { %5680 = vst.msk [vmem:[%s9646_s17 + $0x40] sm:$0xff] %vm9948_vm5, %v5648_v19  ;;  %v5439_v42 = vpop.permute.xlu1 %5438  ;;  %v5478_v35 = vpop.permute.xlu2 %5477  ;;  %vm9978_vm5 = vmmov %vm9942_vm0 }
 0x911   : > { %5684 = vst.msk [vmem:[%s9646_s17 + $0x60] sm:$0xff] %vm9949_vm7, %v5652_v43  ;;  %v5586_v39 = vmul.f32 %v5439_v42, %v9054_v49  ;;  %v5592_v14 = vmul.f32 %v5478_v35, %v9090_v1  ;;  %vm9981_vm7 = vmmov %vm9942_vm0 }
 0x913   : > { %v5618_v57 = vadd.f32 %v5586_v39, %v9950_v58  ;;  %v5624_v18 = vadd.f32 %v5592_v14, %v9951_v5  ;;  %v9972_v39 = vld [vmem:[#allocation28_spill] sm:$0xff]  ;;  %v9973_v58 = vld [vmem:[#allocation34_spill] sm:$0xff] }
 0x915   : > { %v5650_v26 = vmax.f32 %v5618_v57, 0.0  ;;  %v5656_v59 = vmax.f32 %v5624_v18, 0.0 }
 0x917   : > { %5682 = vst.msk [vmem:[%s9646_s17 + $0x50] sm:$0xff] %vm9952_vm8, %v5650_v26  ;;  %vm9982_vm8 = vmmov %vm9942_vm0 }
 0x918   : > { %5688 = vst.msk [vmem:[%s9646_s17 + $0x80] sm:$0xff] %vm9953_vm9, %v5656_v59  ;;  %vm9984_vm9 = vmmov %vm9942_vm0 }
 0x919   : > { %v5484_v60 = vpop.permute.xlu0 %5483 }
 0x91a   : > { %v5593_v40 = vmul.f32 %v5484_v60, %v9086_v7 }
 0x91c   : > { %v5625_v17 = vadd.f32 %v5593_v40, %v9954_v53  ;;  %v9975_v40 = vld [vmem:[#allocation31_spill] sm:$0xff]  ;;  %v9976_v53 = vld [vmem:[#allocation37_spill] sm:$0xff] }
 0x91e   : > { %v5657_v49 = vmax.f32 %v5625_v17, 0.0 }
 0x920   : > { %5689 = vst.msk [vmem:[%s9646_s17 + $0x88] sm:$0xff] %vm9955_vm10, %v5657_v49  ;;  %v5458_v1 = vpop.permute.xlu1 %5457  ;;  %v5497_v11 = vpop.permute.xlu2 %5496  ;;  %vm9987_vm10 = vmmov %vm9942_vm0 }
 0x921   : > { %v5589_v63 = vmul.f32 %v5458_v1, %v9072_v3  ;;  %v5595_v33 = vmul.f32 %v5497_v11, %v9108_v20 }
 0x923   : > { %v5621_v61 = vadd.f32 %v5589_v63, %v9956_v38  ;;  %v5627_v8 = vadd.f32 %v5595_v33, %v9957_v41 }
 0x925   : > { %v5653_v50 = vmax.f32 %v5621_v61, 0.0  ;;  %v5659_v36 = vmax.f32 %v5627_v8, 0.0  ;;  %v9980_v61 = vld [vmem:[#allocation39_spill] sm:$0xff] }
 0x927   : > { %5685 = vst.msk [vmem:[%s9646_s17 + $0x68] sm:$0xff] %vm9958_vm11, %v5653_v50 }
 0x928   : > { %5691 = vst.msk [vmem:[%s9646_s17 + $0x98] sm:$0xff] %vm9959_vm12, %v5659_v36  ;;  %v5471_v7 = vpop.permute.xlu1 %5470  ;;  %v5510_v54 = vpop.permute.xlu2 %5509 }
 0x929   : > { %v5591_v6 = vmul.f32 %v5471_v7, %v9082_v21  ;;  %v5517_v3 = vpop.permute.xlu0 %5516  ;;  %v5597_v20 = vmul.f32 %v5510_v54, %v9118_v55  ;;  %v9983_v54 = vld [vmem:[#allocation36_spill] sm:$0xff] }
 0x92a   : > { %v5598_v15 = vmul.f32 %v5517_v3, %v9126_v12  ;;  %v9985_v3 = vld [vmem:[#allocation40_spill] sm:$0xff] }
 0x92b   : > { %v5623_v45 = vadd.f32 %v5591_v6, %v9960_v47  ;;  %v5629_v25 = vadd.f32 %v5597_v20, %v9961_v28 }
 0x92c   : > { %v5630_v23 = vadd.f32 %v5598_v15, %v9962_v34  ;;  %v9986_v15 = vld [vmem:[#allocation38_spill] sm:$0xff] }
 0x92d   : > { %v5655_v0 = vmax.f32 %v5623_v45, 0.0  ;;  %v5661_v13 = vmax.f32 %v5629_v25, 0.0 }
 0x92e   : > { %v5662_v44 = vmax.f32 %v5630_v23, 0.0 }
 0x92f   : > { %5687 = vst.msk [vmem:[%s9646_s17 + $0x78] sm:$0xff] %vm9963_vm13, %v5655_v0 }
 0x930   : > { %5694 = vst.msk [vmem:[%s9646_s17 + $0xb0] sm:$0xff] %vm9964_vm14, %v5662_v44 }
 0x931   : > { %5693 = vst.msk [vmem:[%s9646_s17 + $0xa8] sm:$0xff] %vm9965_vm2, %v5661_v13 }
 0x938   : > { %v5491_v21 = vpop.permute.xlu1 %5490  ;;  %v5530_v55 = vpop.permute.xlu2 %5529 }
 0x939   : > { %v5594_v12 = vmul.f32 %v5491_v21, %v9100_v32  ;;  %v5549_v27 = vpop.permute.xlu0 %5548  ;;  %v5600_v51 = vmul.f32 %v5530_v55, %v9170_v24 }
 0x93a   : > { %v5603_v48 = vmul.f32 %v5549_v27, %v9186_v10 }
 0x93b   : > { %v5626_v52 = vadd.f32 %v5594_v12, %v9966_v9  ;;  %v5632_v30 = vadd.f32 %v5600_v51, %v9967_v2 }
 0x93c   : > { %v5635_v56 = vadd.f32 %v5603_v48, %v9968_v37 }
 0x93d   : > { %v5658_v19 = vmax.f32 %v5626_v52, 0.0  ;;  %v5664_v43 = vmax.f32 %v5632_v30, 0.0 }
 0x93e   : > { %v5667_v42 = vmax.f32 %v5635_v56, 0.0 }
 0x93f   : > { %5690 = vst.msk [vmem:[%s9646_s17 + $0x90] sm:$0xff] %vm9969_vm3, %v5658_v19 }
 0x940   : > { %5699 = vst.msk [vmem:[%s9646_s17 + $0xd8] sm:$0xff] %vm9970_vm4, %v5667_v42  ;;  %v5504_v32 = vpop.permute.xlu1 %5503  ;;  %v5543_v35 = vpop.permute.xlu2 %5542 }
 0x941   : > { %5696 = vst.msk [vmem:[%s9646_s17 + $0xc0] sm:$0xff] %vm9971_vm6, %v5664_v43  ;;  %v5596_v24 = vmul.f32 %v5504_v32, %v9104_v22  ;;  %v5602_v10 = vmul.f32 %v5543_v35, %v9190_v31 }
 0x943   : > { %v5628_v14 = vadd.f32 %v5596_v24, %v9972_v39  ;;  %v5634_v57 = vadd.f32 %v5602_v10, %v9973_v58 }
 0x945   : > { %v5660_v5 = vmax.f32 %v5628_v14, 0.0  ;;  %v5666_v18 = vmax.f32 %v5634_v57, 0.0 }
 0x947   : > { %5692 = vst.msk [vmem:[%s9646_s17 + $0xa0] sm:$0xff] %vm9942_vm0, %v5660_v5 }
 0x948   : > { %5698 = vst.msk [vmem:[%s9646_s17 + $0xd0] sm:$0xff] %vm9974_vm15, %v5666_v18 }
 0x950   : > { %v5523_v26 = vpop.permute.xlu1 %5522  ;;  %v5562_v59 = vpop.permute.xlu2 %5561 }
 0x951   : > { %v5599_v60 = vmul.f32 %v5523_v26, %v9122_v16  ;;  %v5605_v22 = vmul.f32 %v5562_v59, %v9210_v62  ;;  %v9979_v62 = vld [vmem:[#allocation33_spill] sm:$0xff] }
 0x953   : > { %v5631_v31 = vadd.f32 %v5599_v60, %v9975_v40  ;;  %v5637_v17 = vadd.f32 %v5605_v22, %v9976_v53 }
 0x955   : > { %v5663_v49 = vmax.f32 %v5631_v31, 0.0  ;;  %v5669_v1 = vmax.f32 %v5637_v17, 0.0 }
 0x957   : > { %5695 = vst.msk [vmem:[%s9646_s17 + $0xb8] sm:$0xff] %vm9977_vm1, %v5663_v49 }
 0x958   : > { %5701 = vst.msk [vmem:[%s9646_s17 + $0xe8] sm:$0xff] %vm9978_vm5, %v5669_v1  ;;  %v5536_v11 = vpop.permute.xlu1 %5535  ;;  %v5575_v63 = vpop.permute.xlu2 %5574 }
 0x959   : > { %v5601_v16 = vmul.f32 %v5536_v11, %v9166_v29  ;;  %v5607_v33 = vmul.f32 %v5575_v63, %v9230_v46 }
 0x95b   : > { %v5633_v38 = vadd.f32 %v5601_v16, %v9979_v62  ;;  %v5639_v41 = vadd.f32 %v5607_v33, %v9980_v61 }
 0x95d   : > { %v5665_v8 = vmax.f32 %v5633_v38, 0.0  ;;  %v5671_v50 = vmax.f32 %v5639_v41, 0.0 }
 0x95f   : > { %5697 = vst.msk [vmem:[%s9646_s17 + $0xc8] sm:$0xff] %vm9981_vm7, %v5665_v8 }
 0x960   : > { %5703 = vst.msk [vmem:[%s9646_s17 + $0xf8] sm:$0xff] %vm9982_vm8, %v5671_v50 }
 0x968   : > { %v5556_v36 = vpop.permute.xlu1 %5555 }
 0x969   : > { %v5604_v7 = vmul.f32 %v5556_v36, %v9200_v4 }
 0x96b   : > { %v5636_v29 = vadd.f32 %v5604_v7, %v9983_v54 }
 0x96d   : > { %v5668_v46 = vmax.f32 %v5636_v29, 0.0 }
 0x96f   : > { %5700 = vst.msk [vmem:[%s9646_s17 + $0xe0] sm:$0xff] %vm9984_vm9, %v5668_v46 }
 0x970   : > { %v5569_v6 = vpop.permute.xlu1 %5568 }
 0x971   : > { %v5606_v20 = vmul.f32 %v5569_v6, %v9985_v3 }
 0x973   : > { %v5638_v47 = vadd.f32 %v5606_v20, %v9986_v15 }
 0x975   : > { %v5670_v4 = vmax.f32 %v5638_v47, 0.0 }
 0x977   : > { %5702 = vst.msk [vmem:[%s9646_s17 + $0xf0] sm:$0xff] %vm9987_vm10, %v5670_v4 }
 0x978   : > { %6054 = shalt.err (!%p6051_p3)
}
 0x979   : > { %s6097_s12 = smov 128   ;;  %s6098_s17 = smov 8  }
 0x97a   : > { %5943 = dma.vmem_to_hbm [thread:$0]  (%p6182_p5), %s5718_s25, 4096, %s5720_s26, %s5705_s9, %s6097_s12, %s6097_s12, %s6098_s17  }
 0x97b PF: > { %p5949_p4 = scmp.ge.s32.totalorder %s6089_s30, 2  ;;  %s5734_s20 = sand.u32 1, %s6077_s27  }
 0x97c   : > { %s5735_s21 = scalar_lea.sflag [#allocation6], %s5734_s20 }
 0x97d   : > { %p5946_p7 = pnand %p5949_p4, %p6186_p6 }
 0x97f   : > { %p5947_p8 = pneg %p5946_p7 }
 0x981   : > { %6072 = dma.done.wait (%p5947_p8), %s5735_s21, 4096  }
 0x982   : > { %6074 = vsyncadd (%p5947_p8), %s5735_s21, 4294963200  ;;  %p18_p9 = scmp.ge.s32.totalorder %s6169_s11, 4   ;;  %s9988_s27 = smov %s6081_s28 }
 0x983   : > { %s9989_s28 = smov %s6085_s29  ;;  %s9990_s29 = smov %s6180_s14 }
 0x984   : > { %s9991_s30 = smov %s6169_s11  ;;  %20 = sbr.rel (!%p18_p9) target bundleno = 3 (0x3), region = 96 }
 0x989   :  { %5741 = vsyncpa [#allocation6], 1 }
 0x98a   :  { %5743 = vsyncpa [#allocation6 + $0x1], 1 }

</bundles_post_ra>
